<compile_context>
chip_gen: v7x
topology: tpu7x:2x2x1
jax: 0.10.0
libtpu: 0.0.40
codegen_flags: <defaults>
</compile_context>

<pallas_src>
import math
import functools

import jax
import jax.numpy as jnp
from jax.experimental import pallas as pl
from jax.experimental.pallas import tpu as pltpu


_HIGHEST = jax.lax.Precision.HIGHEST


def _mm(a, b):
    return jnp.dot(a, b, preferred_element_type=jnp.float32, precision=_HIGHEST)


# ----------------------------------------------------------------------------
# Fused kernel: 2-layer bidirectional GRU + Linear + ReLU, single invocation.
# ----------------------------------------------------------------------------
def make_fused_gru_kernel(S, B, H, pre_len):
    HH = 2 * H

    def kernel(x0p_ref,
               w_in0_ref, b_in0_ref, w_hh0_ref, b_hhn0_ref,
               w_in1_ref, b_in1_ref, w_hh1_ref, b_hhn1_ref,
               w_fc_ref, b_fc_ref,
               out_ref, ci_sc):

        def input_proj(inp, w_ref, b_ref):
            # Hoisted out of the recurrence: one whole-sequence matmul per gate.
            # Row-block t of each result = [fwd gate(t) | bwd gate(S-1-t)].
            return [_mm(inp, w_ref[g]) + b_ref[g] for g in range(3)]

        def run_layer(gx, whh_ref, bhhn_ref):
            # Packed recurrence: state p = [h_fwd(t) | h_bwd(S-1-t)]  (B, 2H).
            bhhn = bhhn_ref[...]
            p = jnp.zeros((B, HH), jnp.float32)        # h0 = zeros (both dirs)
            p_seq = []
            for t in range(S):                         # unrolled, static indices
                rows = slice(t * B, (t + 1) * B)
                gh_r = _mm(p, whh_ref[0])
                gh_z = _mm(p, whh_ref[1])
                gh_n = _mm(p, whh_ref[2])
                r = jax.nn.sigmoid(gx[0][rows] + gh_r)   # r/z biases pre-folded
                z = jax.nn.sigmoid(gx[1][rows] + gh_z)
                n = jnp.tanh(gx[2][rows] + r * (gh_n + bhhn))
                p = (1.0 - z) * n + z * p
                p_seq.append(p)
            return p_seq

        # ------------------------------ layer 0 ------------------------------
        gx0 = input_proj(x0p_ref[...], w_in0_ref, b_in0_ref)
        p0 = run_layer(gx0, w_hh0_ref, b_hhn0_ref)

        # Layer-1 packed input, row-block t = [p0(t) | p0(S-1-t)], i.e. lanes
        #   [h0f(t) | h0b(S-1-t) | h0f(S-1-t) | h0b(t)]   (4H = 128 lanes).
        for t in range(S):
            ci_sc[t * B:(t + 1) * B, :] = jnp.concatenate(
                [p0[t], p0[S - 1 - t]], axis=1)

        # ------------------------------ layer 1 ------------------------------
        gx1 = input_proj(ci_sc[...], w_in1_ref, b_in1_ref)
        p1 = run_layer(gx1, w_hh1_ref, b_hhn1_ref)

        # ----------------- last pre_len time steps -> FC + ReLU ---------------
        w_fc = w_fc_ref[...]
        b_fc = b_fc_ref[...]
        for j in range(pre_len):
            u = S - pre_len + j                        # true time index
            y = jnp.concatenate([p1[u][:, :H], p1[S - 1 - u][:, H:]], axis=1)
            out_ref[j] = jnp.maximum(_mm(y, w_fc) + b_fc, 0.0)

    return kernel


# ----------------------------------------------------------------------------
# Host wrapper: single pallas_call, everything VMEM-resident.
# ----------------------------------------------------------------------------
@functools.partial(jax.jit, static_argnames=("pre_len",))
def gru_forward(x, packed, pre_len=1):
    """x: (B, S, input_dim) batch_first.  Returns (B, pre_len, output_dim)."""
    B, S, din = x.shape
    H = packed["w_hh0"].shape[-1] // 2
    O = packed["w_fc"].shape[-1]

    # Pack the input time-major, pairing each time step with its time reverse,
    # so the backward direction needs no in-kernel flip:
    #   row-block t of x0p = [x(t) | x(S-1-t)]
    x_tm = jnp.transpose(x, (1, 0, 2))                        # (S, B, din)
    x0p = jnp.concatenate([x_tm, x_tm[::-1]], axis=-1).reshape(S * B, 2 * din)

    vmem = pl.BlockSpec(memory_space=pltpu.MemorySpace.VMEM)
    out = pl.pallas_call(
        make_fused_gru_kernel(S, B, H, pre_len),
        out_shape=jax.ShapeDtypeStruct((pre_len, B, O), jnp.float32),
        in_specs=[vmem] * 11,
        out_specs=vmem,
        scratch_shapes=[pltpu.VMEM((S * B, 4 * H), jnp.float32)],
    )(x0p,
      packed["w_in0"], packed["b_in0"], packed["w_hh0"], packed["b_hhn0"],
      packed["w_in1"], packed["b_in1"], packed["w_hh1"], packed["b_hhn1"],
      packed["w_fc"], packed["b_fc"])
    return jnp.transpose(out, (1, 0, 2))                      # (B, pre_len, O)


# ----------------------------------------------------------------------------
# Parameters: PyTorch-layout init + one-time repacking into the kernel layout.
# ----------------------------------------------------------------------------
def init_torch_style_params(key, input_dim, H, num_layers, output_dim):
    """PyTorch-layout params: weight_ih (3H, in), weight_hh (3H, H), biases (3H,),
    gate order (r, z, n); init U(-1/sqrt(H), 1/sqrt(H)) like nn.GRU / nn.Linear."""
    params = {"layers": []}
    bound = 1.0 / math.sqrt(H)
    for layer in range(num_layers):
        in_size = input_dim if layer == 0 else 2 * H
        dirs = []
        for _ in range(2):                 # forward, backward
            key, k0, k1, k2, k3 = jax.random.split(key, 5)
            dirs.append((
                jax.random.uniform(k0, (3 * H, in_size), jnp.float32, -bound, bound),
                jax.random.uniform(k1, (3 * H, H), jnp.float32, -bound, bound),
                jax.random.uniform(k2, (3 * H,), jnp.float32, -bound, bound),
                jax.random.uniform(k3, (3 * H,), jnp.float32, -bound, bound),
            ))
        params["layers"].append(tuple(dirs))
    fb = 1.0 / math.sqrt(2 * H)
    key, kw, kb = jax.random.split(key, 3)
    params["fc_w"] = jax.random.uniform(kw, (output_dim, 2 * H), jnp.float32, -fb, fb)
    params["fc_b"] = jax.random.uniform(kb, (output_dim,), jnp.float32, -fb, fb)
    return params


def pack_params(tp, H):
    """Repack PyTorch-layout params into the lane-packed layout the fused
    kernel consumes (done once on the host)."""
    def gate(w, g):                        # rows of a (3H, .) / (3H,) param
        return w[g * H:(g + 1) * H]

    def blkdiag(a, b):
        ra, ca = a.shape
        rb, cb = b.shape
        m = jnp.zeros((ra + rb, ca + cb), jnp.float32)
        return m.at[:ra, :ca].set(a).at[ra:, ca:].set(b)

    packed = {}
    Z = jnp.zeros((H, H), jnp.float32)
    for l, (pf, pb) in enumerate(tp["layers"]):
        wih_f, whh_f, bih_f, bhh_f = pf
        wih_b, whh_b, bih_b, bhh_b = pb
        w_in, b_in, w_hh = [], [], []
        for g in range(3):                 # r, z, n
            # Recurrent weights: block-diagonal over directions, pre-transposed.
            w_hh.append(blkdiag(gate(whh_f, g).T, gate(whh_b, g).T))     # (2H, 2H)
            # Hoisted-projection biases: r/z fold bih+bhh; n folds bih only.
            if g < 2:
                b_g = jnp.concatenate([gate(bih_f, g) + gate(bhh_f, g),
                                       gate(bih_b, g) + gate(bhh_b, g)])
            else:
                b_g = jnp.concatenate([gate(bih_f, g), gate(bih_b, g)])
            b_in.append(b_g[None, :])                                     # (1, 2H)
            WfT = gate(wih_f, g).T         # (in_l, H)
            WbT = gate(wih_b, g).T
            if l == 0:
                # Kernel input row-block t = [x(t) | x(S-1-t)].
                w_in.append(blkdiag(WfT, WbT))                            # (2*in, 2H)
            else:
                # Kernel layer-1 input row-block t =
                #   [h0f(t) | h0b(S-1-t) | h0f(S-1-t) | h0b(t)]   (4H lanes)
                Af, Bf = WfT[:H], WfT[H:]   # fwd dir: weights for (fwd, bwd) half of y0
                Ab, Bb = WbT[:H], WbT[H:]   # bwd dir
                w_in.append(jnp.concatenate([
                    jnp.concatenate([Af, Z], axis=1),
                    jnp.concatenate([Z, Bb], axis=1),
                    jnp.concatenate([Z, Ab], axis=1),
                    jnp.concatenate([Bf, Z], axis=1)], axis=0))           # (4H, 2H)
        packed[f"w_in{l}"] = jnp.stack(w_in)
        packed[f"b_in{l}"] = jnp.stack(b_in)
        packed[f"w_hh{l}"] = jnp.stack(w_hh)
        packed[f"b_hhn{l}"] = jnp.concatenate(
            [gate(bhh_f, 2), gate(bhh_b, 2)])[None, :]                    # (1, 2H)
    packed["w_fc"] = tp["fc_w"].T                                         # (2H, O)
    packed["b_fc"] = tp["fc_b"][None, :]                                  # (1, O)
    return packed


# ----------------------------------------------------------------------------
# Pure-JAX reference with PyTorch GRU semantics (validation only).
# ----------------------------------------------------------------------------
def _reference_forward(x, tp, H, pre_len):
    def cell(x_t, h, w_ih, w_hh, b_ih, b_hh):
        gi = jnp.dot(x_t, w_ih.T, precision=_HIGHEST) + b_ih
        gh = jnp.dot(h, w_hh.T, precision=_HIGHEST) + b_hh
        r = jax.nn.sigmoid(gi[:, :H] + gh[:, :H])
        z = jax.nn.sigmoid(gi[:, H:2 * H] + gh[:, H:2 * H])
        n = jnp.tanh(gi[:, 2 * H:] + r * gh[:, 2 * H:])
        return (1.0 - z) * n + z * h

    B, S, _ = x.shape
    seq = x
    for pf, pb in tp["layers"]:
        h = jnp.zeros((B, H), jnp.float32)
        outs_f = []
        for t in range(S):
            h = cell(seq[:, t], h, *pf)
            outs_f.append(h)
        h = jnp.zeros((B, H), jnp.float32)
        outs_b = [None] * S
        for t in range(S - 1, -1, -1):
            h = cell(seq[:, t], h, *pb)
            outs_b[t] = h
        seq = jnp.stack(
            [jnp.concatenate([outs_f[t], outs_b[t]], axis=-1) for t in range(S)],
            axis=1)                                          # (B, S, 2H)
    last = seq[:, -pre_len:, :]
    y = jnp.dot(last, tp["fc_w"].T, precision=_HIGHEST) + tp["fc_b"]
    return jnp.maximum(y, 0.0)


if __name__ == "__main__":
    BATCH, SEQ = 2, 8
    INPUT_DIM, HIDDEN, NUM_LAYERS, OUTPUT_DIM, PRE_LEN = 1, 32, 2, 1, 1

    key = jax.random.PRNGKey(0)
    k_x, k_p = jax.random.split(key)
    x = jax.random.normal(k_x, (BATCH, SEQ, INPUT_DIM), jnp.float32)
    torch_params = init_torch_style_params(k_p, INPUT_DIM, HIDDEN, NUM_LAYERS, OUTPUT_DIM)
    packed = pack_params(torch_params, HIDDEN)

    out = gru_forward(x, packed, pre_len=PRE_LEN)
    out = jax.block_until_ready(out)
    assert out.shape == (BATCH, PRE_LEN, OUTPUT_DIM), out.shape

    ref = _reference_forward(x, torch_params, HIDDEN, PRE_LEN)
    assert jnp.allclose(out, ref, rtol=5e-3, atol=5e-3), (out, ref)
    assert bool(jnp.all(out >= 0.0))      # ReLU output
    print("KERNEL_OK")
</pallas_src>

<mosaic_0001>
module attributes {stable_mosaic.version = 11 : i64} {
  func.func @kernel(%arg0: memref<16x2xf32, #tpu.memory_space<vmem>>, %arg1: memref<3x2x64xf32, #tpu.memory_space<vmem>>, %arg2: memref<3x1x64xf32, #tpu.memory_space<vmem>>, %arg3: memref<3x64x64xf32, #tpu.memory_space<vmem>>, %arg4: memref<1x64xf32, #tpu.memory_space<vmem>>, %arg5: memref<3x128x64xf32, #tpu.memory_space<vmem>>, %arg6: memref<3x1x64xf32, #tpu.memory_space<vmem>>, %arg7: memref<3x64x64xf32, #tpu.memory_space<vmem>>, %arg8: memref<1x64xf32, #tpu.memory_space<vmem>>, %arg9: memref<64x1xf32, #tpu.memory_space<vmem>>, %arg10: memref<1x1xf32, #tpu.memory_space<vmem>>, %arg11: memref<1x2x1xf32, #tpu.memory_space<vmem>>, %arg12: memref<16x128xf32, #tpu.memory_space<vmem>>) attributes {dimension_semantics = [], scalar_prefetch = 0 : i64, scratch_operands = 1 : i64, tpu.core_type = #tpu.core_type<tc>} {
    %c0 = arith.constant 0 : index
    %c0_0 = arith.constant 0 : index
    %0 = vector.load %arg0[%c0, %c0_0] : memref<16x2xf32, #tpu.memory_space<vmem>>, vector<16x2xf32>
    %c0_1 = arith.constant 0 : index
    %c0_2 = arith.constant 0 : index
    %c0_3 = arith.constant 0 : index
    %1 = vector.load %arg1[%c0_1, %c0_2, %c0_3] : memref<3x2x64xf32, #tpu.memory_space<vmem>>, vector<1x2x64xf32>
    %2 = vector.shape_cast %1 : vector<1x2x64xf32> to vector<2x64xf32>
    %cst = arith.constant dense<0.000000e+00> : vector<16x64xf32>
    %3 = tpu.matmul %0, %2, %cst {dimension_numbers = #tpu.dot_dimension_numbers<[1], [0], [0], [1], [0, 0, 1, 1], [], []>, precision = #tpu.contract_precision<fp32>} : vector<16x2xf32>, vector<2x64xf32>, vector<16x64xf32> -> vector<16x64xf32>
    %c0_4 = arith.constant 0 : index
    %c0_5 = arith.constant 0 : index
    %c0_6 = arith.constant 0 : index
    %4 = vector.load %arg2[%c0_4, %c0_5, %c0_6] : memref<3x1x64xf32, #tpu.memory_space<vmem>>, vector<1x1x64xf32>
    %5 = vector.shape_cast %4 : vector<1x1x64xf32> to vector<1x64xf32>
    %6 = vector.broadcast %5 : vector<1x64xf32> to vector<16x64xf32>
    %7 = arith.addf %3, %6 : vector<16x64xf32>
    %c1 = arith.constant 1 : index
    %c0_7 = arith.constant 0 : index
    %c0_8 = arith.constant 0 : index
    %8 = vector.load %arg1[%c1, %c0_7, %c0_8] : memref<3x2x64xf32, #tpu.memory_space<vmem>>, vector<1x2x64xf32>
    %9 = vector.shape_cast %8 : vector<1x2x64xf32> to vector<2x64xf32>
    %cst_9 = arith.constant dense<0.000000e+00> : vector<16x64xf32>
    %10 = tpu.matmul %0, %9, %cst_9 {dimension_numbers = #tpu.dot_dimension_numbers<[1], [0], [0], [1], [0, 0, 1, 1], [], []>, precision = #tpu.contract_precision<fp32>} : vector<16x2xf32>, vector<2x64xf32>, vector<16x64xf32> -> vector<16x64xf32>
    %c1_10 = arith.constant 1 : index
    %c0_11 = arith.constant 0 : index
    %c0_12 = arith.constant 0 : index
    %11 = vector.load %arg2[%c1_10, %c0_11, %c0_12] : memref<3x1x64xf32, #tpu.memory_space<vmem>>, vector<1x1x64xf32>
    %12 = vector.shape_cast %11 : vector<1x1x64xf32> to vector<1x64xf32>
    %13 = vector.broadcast %12 : vector<1x64xf32> to vector<16x64xf32>
    %14 = arith.addf %10, %13 : vector<16x64xf32>
    %c2 = arith.constant 2 : index
    %c0_13 = arith.constant 0 : index
    %c0_14 = arith.constant 0 : index
    %15 = vector.load %arg1[%c2, %c0_13, %c0_14] : memref<3x2x64xf32, #tpu.memory_space<vmem>>, vector<1x2x64xf32>
    %16 = vector.shape_cast %15 : vector<1x2x64xf32> to vector<2x64xf32>
    %cst_15 = arith.constant dense<0.000000e+00> : vector<16x64xf32>
    %17 = tpu.matmul %0, %16, %cst_15 {dimension_numbers = #tpu.dot_dimension_numbers<[1], [0], [0], [1], [0, 0, 1, 1], [], []>, precision = #tpu.contract_precision<fp32>} : vector<16x2xf32>, vector<2x64xf32>, vector<16x64xf32> -> vector<16x64xf32>
    %c2_16 = arith.constant 2 : index
    %c0_17 = arith.constant 0 : index
    %c0_18 = arith.constant 0 : index
    %18 = vector.load %arg2[%c2_16, %c0_17, %c0_18] : memref<3x1x64xf32, #tpu.memory_space<vmem>>, vector<1x1x64xf32>
    %19 = vector.shape_cast %18 : vector<1x1x64xf32> to vector<1x64xf32>
    %20 = vector.broadcast %19 : vector<1x64xf32> to vector<16x64xf32>
    %21 = arith.addf %17, %20 : vector<16x64xf32>
    %c0_19 = arith.constant 0 : index
    %c0_20 = arith.constant 0 : index
    %22 = vector.load %arg4[%c0_19, %c0_20] : memref<1x64xf32, #tpu.memory_space<vmem>>, vector<1x64xf32>
    %cst_21 = arith.constant 0.000000e+00 : f32
    %23 = vector.broadcast %cst_21 : f32 to vector<2x64xf32>
    %c0_22 = arith.constant 0 : index
    %c0_23 = arith.constant 0 : index
    %c0_24 = arith.constant 0 : index
    %24 = vector.load %arg3[%c0_22, %c0_23, %c0_24] : memref<3x64x64xf32, #tpu.memory_space<vmem>>, vector<1x64x64xf32>
    %25 = vector.shape_cast %24 : vector<1x64x64xf32> to vector<64x64xf32>
    %cst_25 = arith.constant dense<0.000000e+00> : vector<2x64xf32>
    %26 = tpu.matmul %23, %25, %cst_25 {dimension_numbers = #tpu.dot_dimension_numbers<[1], [0], [0], [1], [0, 0, 1, 1], [], []>, precision = #tpu.contract_precision<fp32>} : vector<2x64xf32>, vector<64x64xf32>, vector<2x64xf32> -> vector<2x64xf32>
    %c1_26 = arith.constant 1 : index
    %c0_27 = arith.constant 0 : index
    %c0_28 = arith.constant 0 : index
    %27 = vector.load %arg3[%c1_26, %c0_27, %c0_28] : memref<3x64x64xf32, #tpu.memory_space<vmem>>, vector<1x64x64xf32>
    %28 = vector.shape_cast %27 : vector<1x64x64xf32> to vector<64x64xf32>
    %cst_29 = arith.constant dense<0.000000e+00> : vector<2x64xf32>
    %29 = tpu.matmul %23, %28, %cst_29 {dimension_numbers = #tpu.dot_dimension_numbers<[1], [0], [0], [1], [0, 0, 1, 1], [], []>, precision = #tpu.contract_precision<fp32>} : vector<2x64xf32>, vector<64x64xf32>, vector<2x64xf32> -> vector<2x64xf32>
    %c2_30 = arith.constant 2 : index
    %c0_31 = arith.constant 0 : index
    %c0_32 = arith.constant 0 : index
    %30 = vector.load %arg3[%c2_30, %c0_31, %c0_32] : memref<3x64x64xf32, #tpu.memory_space<vmem>>, vector<1x64x64xf32>
    %31 = vector.shape_cast %30 : vector<1x64x64xf32> to vector<64x64xf32>
    %cst_33 = arith.constant dense<0.000000e+00> : vector<2x64xf32>
    %32 = tpu.matmul %23, %31, %cst_33 {dimension_numbers = #tpu.dot_dimension_numbers<[1], [0], [0], [1], [0, 0, 1, 1], [], []>, precision = #tpu.contract_precision<fp32>} : vector<2x64xf32>, vector<64x64xf32>, vector<2x64xf32> -> vector<2x64xf32>
    %33 = vector.extract_strided_slice %7 {offsets = [0, 0], sizes = [2, 64], strides = [1, 1]} : vector<16x64xf32> to vector<2x64xf32>
    %34 = arith.addf %33, %26 : vector<2x64xf32>
    %35 = arith.negf %34 : vector<2x64xf32>
    %36 = math.exp %35 : vector<2x64xf32>
    %cst_34 = arith.constant 1.000000e+00 : f32
    %37 = vector.broadcast %cst_34 : f32 to vector<2x64xf32>
    %38 = arith.addf %37, %36 : vector<2x64xf32>
    %39 = arith.divf %37, %38 : vector<2x64xf32>
    %40 = vector.extract_strided_slice %14 {offsets = [0, 0], sizes = [2, 64], strides = [1, 1]} : vector<16x64xf32> to vector<2x64xf32>
    %41 = arith.addf %40, %29 : vector<2x64xf32>
    %42 = arith.negf %41 : vector<2x64xf32>
    %43 = math.exp %42 : vector<2x64xf32>
    %cst_35 = arith.constant 1.000000e+00 : f32
    %44 = vector.broadcast %cst_35 : f32 to vector<2x64xf32>
    %45 = arith.addf %44, %43 : vector<2x64xf32>
    %46 = arith.divf %44, %45 : vector<2x64xf32>
    %47 = vector.extract_strided_slice %21 {offsets = [0, 0], sizes = [2, 64], strides = [1, 1]} : vector<16x64xf32> to vector<2x64xf32>
    %48 = vector.broadcast %22 : vector<1x64xf32> to vector<2x64xf32>
    %49 = arith.addf %32, %48 : vector<2x64xf32>
    %50 = arith.mulf %39, %49 : vector<2x64xf32>
    %51 = arith.addf %47, %50 : vector<2x64xf32>
    %52 = math.tanh %51 : vector<2x64xf32>
    %cst_36 = arith.constant 1.000000e+00 : f32
    %53 = vector.broadcast %cst_36 : f32 to vector<2x64xf32>
    %54 = arith.subf %53, %46 : vector<2x64xf32>
    %55 = arith.mulf %54, %52 : vector<2x64xf32>
    %56 = arith.mulf %46, %23 : vector<2x64xf32>
    %57 = arith.addf %55, %56 : vector<2x64xf32>
    %c0_37 = arith.constant 0 : index
    %c0_38 = arith.constant 0 : index
    %c0_39 = arith.constant 0 : index
    %58 = vector.load %arg3[%c0_37, %c0_38, %c0_39] : memref<3x64x64xf32, #tpu.memory_space<vmem>>, vector<1x64x64xf32>
    %59 = vector.shape_cast %58 : vector<1x64x64xf32> to vector<64x64xf32>
    %cst_40 = arith.constant dense<0.000000e+00> : vector<2x64xf32>
    %60 = tpu.matmul %57, %59, %cst_40 {dimension_numbers = #tpu.dot_dimension_numbers<[1], [0], [0], [1], [0, 0, 1, 1], [], []>, precision = #tpu.contract_precision<fp32>} : vector<2x64xf32>, vector<64x64xf32>, vector<2x64xf32> -> vector<2x64xf32>
    %c1_41 = arith.constant 1 : index
    %c0_42 = arith.constant 0 : index
    %c0_43 = arith.constant 0 : index
    %61 = vector.load %arg3[%c1_41, %c0_42, %c0_43] : memref<3x64x64xf32, #tpu.memory_space<vmem>>, vector<1x64x64xf32>
    %62 = vector.shape_cast %61 : vector<1x64x64xf32> to vector<64x64xf32>
    %cst_44 = arith.constant dense<0.000000e+00> : vector<2x64xf32>
    %63 = tpu.matmul %57, %62, %cst_44 {dimension_numbers = #tpu.dot_dimension_numbers<[1], [0], [0], [1], [0, 0, 1, 1], [], []>, precision = #tpu.contract_precision<fp32>} : vector<2x64xf32>, vector<64x64xf32>, vector<2x64xf32> -> vector<2x64xf32>
    %c2_45 = arith.constant 2 : index
    %c0_46 = arith.constant 0 : index
    %c0_47 = arith.constant 0 : index
    %64 = vector.load %arg3[%c2_45, %c0_46, %c0_47] : memref<3x64x64xf32, #tpu.memory_space<vmem>>, vector<1x64x64xf32>
    %65 = vector.shape_cast %64 : vector<1x64x64xf32> to vector<64x64xf32>
    %cst_48 = arith.constant dense<0.000000e+00> : vector<2x64xf32>
    %66 = tpu.matmul %57, %65, %cst_48 {dimension_numbers = #tpu.dot_dimension_numbers<[1], [0], [0], [1], [0, 0, 1, 1], [], []>, precision = #tpu.contract_precision<fp32>} : vector<2x64xf32>, vector<64x64xf32>, vector<2x64xf32> -> vector<2x64xf32>
    %67 = vector.extract_strided_slice %7 {offsets = [2, 0], sizes = [2, 64], strides = [1, 1]} : vector<16x64xf32> to vector<2x64xf32>
    %68 = arith.addf %67, %60 : vector<2x64xf32>
    %69 = arith.negf %68 : vector<2x64xf32>
    %70 = math.exp %69 : vector<2x64xf32>
    %cst_49 = arith.constant 1.000000e+00 : f32
    %71 = vector.broadcast %cst_49 : f32 to vector<2x64xf32>
    %72 = arith.addf %71, %70 : vector<2x64xf32>
    %73 = arith.divf %71, %72 : vector<2x64xf32>
    %74 = vector.extract_strided_slice %14 {offsets = [2, 0], sizes = [2, 64], strides = [1, 1]} : vector<16x64xf32> to vector<2x64xf32>
    %75 = arith.addf %74, %63 : vector<2x64xf32>
    %76 = arith.negf %75 : vector<2x64xf32>
    %77 = math.exp %76 : vector<2x64xf32>
    %cst_50 = arith.constant 1.000000e+00 : f32
    %78 = vector.broadcast %cst_50 : f32 to vector<2x64xf32>
    %79 = arith.addf %78, %77 : vector<2x64xf32>
    %80 = arith.divf %78, %79 : vector<2x64xf32>
    %81 = vector.extract_strided_slice %21 {offsets = [2, 0], sizes = [2, 64], strides = [1, 1]} : vector<16x64xf32> to vector<2x64xf32>
    %82 = vector.broadcast %22 : vector<1x64xf32> to vector<2x64xf32>
    %83 = arith.addf %66, %82 : vector<2x64xf32>
    %84 = arith.mulf %73, %83 : vector<2x64xf32>
    %85 = arith.addf %81, %84 : vector<2x64xf32>
    %86 = math.tanh %85 : vector<2x64xf32>
    %cst_51 = arith.constant 1.000000e+00 : f32
    %87 = vector.broadcast %cst_51 : f32 to vector<2x64xf32>
    %88 = arith.subf %87, %80 : vector<2x64xf32>
    %89 = arith.mulf %88, %86 : vector<2x64xf32>
    %90 = arith.mulf %80, %57 : vector<2x64xf32>
    %91 = arith.addf %89, %90 : vector<2x64xf32>
    %c0_52 = arith.constant 0 : index
    %c0_53 = arith.constant 0 : index
    %c0_54 = arith.constant 0 : index
    %92 = vector.load %arg3[%c0_52, %c0_53, %c0_54] : memref<3x64x64xf32, #tpu.memory_space<vmem>>, vector<1x64x64xf32>
    %93 = vector.shape_cast %92 : vector<1x64x64xf32> to vector<64x64xf32>
    %cst_55 = arith.constant dense<0.000000e+00> : vector<2x64xf32>
    %94 = tpu.matmul %91, %93, %cst_55 {dimension_numbers = #tpu.dot_dimension_numbers<[1], [0], [0], [1], [0, 0, 1, 1], [], []>, precision = #tpu.contract_precision<fp32>} : vector<2x64xf32>, vector<64x64xf32>, vector<2x64xf32> -> vector<2x64xf32>
    %c1_56 = arith.constant 1 : index
    %c0_57 = arith.constant 0 : index
    %c0_58 = arith.constant 0 : index
    %95 = vector.load %arg3[%c1_56, %c0_57, %c0_58] : memref<3x64x64xf32, #tpu.memory_space<vmem>>, vector<1x64x64xf32>
    %96 = vector.shape_cast %95 : vector<1x64x64xf32> to vector<64x64xf32>
    %cst_59 = arith.constant dense<0.000000e+00> : vector<2x64xf32>
    %97 = tpu.matmul %91, %96, %cst_59 {dimension_numbers = #tpu.dot_dimension_numbers<[1], [0], [0], [1], [0, 0, 1, 1], [], []>, precision = #tpu.contract_precision<fp32>} : vector<2x64xf32>, vector<64x64xf32>, vector<2x64xf32> -> vector<2x64xf32>
    %c2_60 = arith.constant 2 : index
    %c0_61 = arith.constant 0 : index
    %c0_62 = arith.constant 0 : index
    %98 = vector.load %arg3[%c2_60, %c0_61, %c0_62] : memref<3x64x64xf32, #tpu.memory_space<vmem>>, vector<1x64x64xf32>
    %99 = vector.shape_cast %98 : vector<1x64x64xf32> to vector<64x64xf32>
    %cst_63 = arith.constant dense<0.000000e+00> : vector<2x64xf32>
    %100 = tpu.matmul %91, %99, %cst_63 {dimension_numbers = #tpu.dot_dimension_numbers<[1], [0], [0], [1], [0, 0, 1, 1], [], []>, precision = #tpu.contract_precision<fp32>} : vector<2x64xf32>, vector<64x64xf32>, vector<2x64xf32> -> vector<2x64xf32>
    %101 = vector.extract_strided_slice %7 {offsets = [4, 0], sizes = [2, 64], strides = [1, 1]} : vector<16x64xf32> to vector<2x64xf32>
    %102 = arith.addf %101, %94 : vector<2x64xf32>
    %103 = arith.negf %102 : vector<2x64xf32>
    %104 = math.exp %103 : vector<2x64xf32>
    %cst_64 = arith.constant 1.000000e+00 : f32
    %105 = vector.broadcast %cst_64 : f32 to vector<2x64xf32>
    %106 = arith.addf %105, %104 : vector<2x64xf32>
    %107 = arith.divf %105, %106 : vector<2x64xf32>
    %108 = vector.extract_strided_slice %14 {offsets = [4, 0], sizes = [2, 64], strides = [1, 1]} : vector<16x64xf32> to vector<2x64xf32>
    %109 = arith.addf %108, %97 : vector<2x64xf32>
    %110 = arith.negf %109 : vector<2x64xf32>
    %111 = math.exp %110 : vector<2x64xf32>
    %cst_65 = arith.constant 1.000000e+00 : f32
    %112 = vector.broadcast %cst_65 : f32 to vector<2x64xf32>
    %113 = arith.addf %112, %111 : vector<2x64xf32>
    %114 = arith.divf %112, %113 : vector<2x64xf32>
    %115 = vector.extract_strided_slice %21 {offsets = [4, 0], sizes = [2, 64], strides = [1, 1]} : vector<16x64xf32> to vector<2x64xf32>
    %116 = vector.broadcast %22 : vector<1x64xf32> to vector<2x64xf32>
    %117 = arith.addf %100, %116 : vector<2x64xf32>
    %118 = arith.mulf %107, %117 : vector<2x64xf32>
    %119 = arith.addf %115, %118 : vector<2x64xf32>
    %120 = math.tanh %119 : vector<2x64xf32>
    %cst_66 = arith.constant 1.000000e+00 : f32
    %121 = vector.broadcast %cst_66 : f32 to vector<2x64xf32>
    %122 = arith.subf %121, %114 : vector<2x64xf32>
    %123 = arith.mulf %122, %120 : vector<2x64xf32>
    %124 = arith.mulf %114, %91 : vector<2x64xf32>
    %125 = arith.addf %123, %124 : vector<2x64xf32>
    %c0_67 = arith.constant 0 : index
    %c0_68 = arith.constant 0 : index
    %c0_69 = arith.constant 0 : index
    %126 = vector.load %arg3[%c0_67, %c0_68, %c0_69] : memref<3x64x64xf32, #tpu.memory_space<vmem>>, vector<1x64x64xf32>
    %127 = vector.shape_cast %126 : vector<1x64x64xf32> to vector<64x64xf32>
    %cst_70 = arith.constant dense<0.000000e+00> : vector<2x64xf32>
    %128 = tpu.matmul %125, %127, %cst_70 {dimension_numbers = #tpu.dot_dimension_numbers<[1], [0], [0], [1], [0, 0, 1, 1], [], []>, precision = #tpu.contract_precision<fp32>} : vector<2x64xf32>, vector<64x64xf32>, vector<2x64xf32> -> vector<2x64xf32>
    %c1_71 = arith.constant 1 : index
    %c0_72 = arith.constant 0 : index
    %c0_73 = arith.constant 0 : index
    %129 = vector.load %arg3[%c1_71, %c0_72, %c0_73] : memref<3x64x64xf32, #tpu.memory_space<vmem>>, vector<1x64x64xf32>
    %130 = vector.shape_cast %129 : vector<1x64x64xf32> to vector<64x64xf32>
    %cst_74 = arith.constant dense<0.000000e+00> : vector<2x64xf32>
    %131 = tpu.matmul %125, %130, %cst_74 {dimension_numbers = #tpu.dot_dimension_numbers<[1], [0], [0], [1], [0, 0, 1, 1], [], []>, precision = #tpu.contract_precision<fp32>} : vector<2x64xf32>, vector<64x64xf32>, vector<2x64xf32> -> vector<2x64xf32>
    %c2_75 = arith.constant 2 : index
    %c0_76 = arith.constant 0 : index
    %c0_77 = arith.constant 0 : index
    %132 = vector.load %arg3[%c2_75, %c0_76, %c0_77] : memref<3x64x64xf32, #tpu.memory_space<vmem>>, vector<1x64x64xf32>
    %133 = vector.shape_cast %132 : vector<1x64x64xf32> to vector<64x64xf32>
    %cst_78 = arith.constant dense<0.000000e+00> : vector<2x64xf32>
    %134 = tpu.matmul %125, %133, %cst_78 {dimension_numbers = #tpu.dot_dimension_numbers<[1], [0], [0], [1], [0, 0, 1, 1], [], []>, precision = #tpu.contract_precision<fp32>} : vector<2x64xf32>, vector<64x64xf32>, vector<2x64xf32> -> vector<2x64xf32>
    %135 = vector.extract_strided_slice %7 {offsets = [6, 0], sizes = [2, 64], strides = [1, 1]} : vector<16x64xf32> to vector<2x64xf32>
    %136 = arith.addf %135, %128 : vector<2x64xf32>
    %137 = arith.negf %136 : vector<2x64xf32>
    %138 = math.exp %137 : vector<2x64xf32>
    %cst_79 = arith.constant 1.000000e+00 : f32
    %139 = vector.broadcast %cst_79 : f32 to vector<2x64xf32>
    %140 = arith.addf %139, %138 : vector<2x64xf32>
    %141 = arith.divf %139, %140 : vector<2x64xf32>
    %142 = vector.extract_strided_slice %14 {offsets = [6, 0], sizes = [2, 64], strides = [1, 1]} : vector<16x64xf32> to vector<2x64xf32>
    %143 = arith.addf %142, %131 : vector<2x64xf32>
    %144 = arith.negf %143 : vector<2x64xf32>
    %145 = math.exp %144 : vector<2x64xf32>
    %cst_80 = arith.constant 1.000000e+00 : f32
    %146 = vector.broadcast %cst_80 : f32 to vector<2x64xf32>
    %147 = arith.addf %146, %145 : vector<2x64xf32>
    %148 = arith.divf %146, %147 : vector<2x64xf32>
    %149 = vector.extract_strided_slice %21 {offsets = [6, 0], sizes = [2, 64], strides = [1, 1]} : vector<16x64xf32> to vector<2x64xf32>
    %150 = vector.broadcast %22 : vector<1x64xf32> to vector<2x64xf32>
    %151 = arith.addf %134, %150 : vector<2x64xf32>
    %152 = arith.mulf %141, %151 : vector<2x64xf32>
    %153 = arith.addf %149, %152 : vector<2x64xf32>
    %154 = math.tanh %153 : vector<2x64xf32>
    %cst_81 = arith.constant 1.000000e+00 : f32
    %155 = vector.broadcast %cst_81 : f32 to vector<2x64xf32>
    %156 = arith.subf %155, %148 : vector<2x64xf32>
    %157 = arith.mulf %156, %154 : vector<2x64xf32>
    %158 = arith.mulf %148, %125 : vector<2x64xf32>
    %159 = arith.addf %157, %158 : vector<2x64xf32>
    %c0_82 = arith.constant 0 : index
    %c0_83 = arith.constant 0 : index
    %c0_84 = arith.constant 0 : index
    %160 = vector.load %arg3[%c0_82, %c0_83, %c0_84] : memref<3x64x64xf32, #tpu.memory_space<vmem>>, vector<1x64x64xf32>
    %161 = vector.shape_cast %160 : vector<1x64x64xf32> to vector<64x64xf32>
    %cst_85 = arith.constant dense<0.000000e+00> : vector<2x64xf32>
    %162 = tpu.matmul %159, %161, %cst_85 {dimension_numbers = #tpu.dot_dimension_numbers<[1], [0], [0], [1], [0, 0, 1, 1], [], []>, precision = #tpu.contract_precision<fp32>} : vector<2x64xf32>, vector<64x64xf32>, vector<2x64xf32> -> vector<2x64xf32>
    %c1_86 = arith.constant 1 : index
    %c0_87 = arith.constant 0 : index
    %c0_88 = arith.constant 0 : index
    %163 = vector.load %arg3[%c1_86, %c0_87, %c0_88] : memref<3x64x64xf32, #tpu.memory_space<vmem>>, vector<1x64x64xf32>
    %164 = vector.shape_cast %163 : vector<1x64x64xf32> to vector<64x64xf32>
    %cst_89 = arith.constant dense<0.000000e+00> : vector<2x64xf32>
    %165 = tpu.matmul %159, %164, %cst_89 {dimension_numbers = #tpu.dot_dimension_numbers<[1], [0], [0], [1], [0, 0, 1, 1], [], []>, precision = #tpu.contract_precision<fp32>} : vector<2x64xf32>, vector<64x64xf32>, vector<2x64xf32> -> vector<2x64xf32>
    %c2_90 = arith.constant 2 : index
    %c0_91 = arith.constant 0 : index
    %c0_92 = arith.constant 0 : index
    %166 = vector.load %arg3[%c2_90, %c0_91, %c0_92] : memref<3x64x64xf32, #tpu.memory_space<vmem>>, vector<1x64x64xf32>
    %167 = vector.shape_cast %166 : vector<1x64x64xf32> to vector<64x64xf32>
    %cst_93 = arith.constant dense<0.000000e+00> : vector<2x64xf32>
    %168 = tpu.matmul %159, %167, %cst_93 {dimension_numbers = #tpu.dot_dimension_numbers<[1], [0], [0], [1], [0, 0, 1, 1], [], []>, precision = #tpu.contract_precision<fp32>} : vector<2x64xf32>, vector<64x64xf32>, vector<2x64xf32> -> vector<2x64xf32>
    %169 = vector.extract_strided_slice %7 {offsets = [8, 0], sizes = [2, 64], strides = [1, 1]} : vector<16x64xf32> to vector<2x64xf32>
    %170 = arith.addf %169, %162 : vector<2x64xf32>
    %171 = arith.negf %170 : vector<2x64xf32>
    %172 = math.exp %171 : vector<2x64xf32>
    %cst_94 = arith.constant 1.000000e+00 : f32
    %173 = vector.broadcast %cst_94 : f32 to vector<2x64xf32>
    %174 = arith.addf %173, %172 : vector<2x64xf32>
    %175 = arith.divf %173, %174 : vector<2x64xf32>
    %176 = vector.extract_strided_slice %14 {offsets = [8, 0], sizes = [2, 64], strides = [1, 1]} : vector<16x64xf32> to vector<2x64xf32>
    %177 = arith.addf %176, %165 : vector<2x64xf32>
    %178 = arith.negf %177 : vector<2x64xf32>
    %179 = math.exp %178 : vector<2x64xf32>
    %cst_95 = arith.constant 1.000000e+00 : f32
    %180 = vector.broadcast %cst_95 : f32 to vector<2x64xf32>
    %181 = arith.addf %180, %179 : vector<2x64xf32>
    %182 = arith.divf %180, %181 : vector<2x64xf32>
    %183 = vector.extract_strided_slice %21 {offsets = [8, 0], sizes = [2, 64], strides = [1, 1]} : vector<16x64xf32> to vector<2x64xf32>
    %184 = vector.broadcast %22 : vector<1x64xf32> to vector<2x64xf32>
    %185 = arith.addf %168, %184 : vector<2x64xf32>
    %186 = arith.mulf %175, %185 : vector<2x64xf32>
    %187 = arith.addf %183, %186 : vector<2x64xf32>
    %188 = math.tanh %187 : vector<2x64xf32>
    %cst_96 = arith.constant 1.000000e+00 : f32
    %189 = vector.broadcast %cst_96 : f32 to vector<2x64xf32>
    %190 = arith.subf %189, %182 : vector<2x64xf32>
    %191 = arith.mulf %190, %188 : vector<2x64xf32>
    %192 = arith.mulf %182, %159 : vector<2x64xf32>
    %193 = arith.addf %191, %192 : vector<2x64xf32>
    %c0_97 = arith.constant 0 : index
    %c0_98 = arith.constant 0 : index
    %c0_99 = arith.constant 0 : index
    %194 = vector.load %arg3[%c0_97, %c0_98, %c0_99] : memref<3x64x64xf32, #tpu.memory_space<vmem>>, vector<1x64x64xf32>
    %195 = vector.shape_cast %194 : vector<1x64x64xf32> to vector<64x64xf32>
    %cst_100 = arith.constant dense<0.000000e+00> : vector<2x64xf32>
    %196 = tpu.matmul %193, %195, %cst_100 {dimension_numbers = #tpu.dot_dimension_numbers<[1], [0], [0], [1], [0, 0, 1, 1], [], []>, precision = #tpu.contract_precision<fp32>} : vector<2x64xf32>, vector<64x64xf32>, vector<2x64xf32> -> vector<2x64xf32>
    %c1_101 = arith.constant 1 : index
    %c0_102 = arith.constant 0 : index
    %c0_103 = arith.constant 0 : index
    %197 = vector.load %arg3[%c1_101, %c0_102, %c0_103] : memref<3x64x64xf32, #tpu.memory_space<vmem>>, vector<1x64x64xf32>
    %198 = vector.shape_cast %197 : vector<1x64x64xf32> to vector<64x64xf32>
    %cst_104 = arith.constant dense<0.000000e+00> : vector<2x64xf32>
    %199 = tpu.matmul %193, %198, %cst_104 {dimension_numbers = #tpu.dot_dimension_numbers<[1], [0], [0], [1], [0, 0, 1, 1], [], []>, precision = #tpu.contract_precision<fp32>} : vector<2x64xf32>, vector<64x64xf32>, vector<2x64xf32> -> vector<2x64xf32>
    %c2_105 = arith.constant 2 : index
    %c0_106 = arith.constant 0 : index
    %c0_107 = arith.constant 0 : index
    %200 = vector.load %arg3[%c2_105, %c0_106, %c0_107] : memref<3x64x64xf32, #tpu.memory_space<vmem>>, vector<1x64x64xf32>
    %201 = vector.shape_cast %200 : vector<1x64x64xf32> to vector<64x64xf32>
    %cst_108 = arith.constant dense<0.000000e+00> : vector<2x64xf32>
    %202 = tpu.matmul %193, %201, %cst_108 {dimension_numbers = #tpu.dot_dimension_numbers<[1], [0], [0], [1], [0, 0, 1, 1], [], []>, precision = #tpu.contract_precision<fp32>} : vector<2x64xf32>, vector<64x64xf32>, vector<2x64xf32> -> vector<2x64xf32>
    %203 = vector.extract_strided_slice %7 {offsets = [10, 0], sizes = [2, 64], strides = [1, 1]} : vector<16x64xf32> to vector<2x64xf32>
    %204 = arith.addf %203, %196 : vector<2x64xf32>
    %205 = arith.negf %204 : vector<2x64xf32>
    %206 = math.exp %205 : vector<2x64xf32>
    %cst_109 = arith.constant 1.000000e+00 : f32
    %207 = vector.broadcast %cst_109 : f32 to vector<2x64xf32>
    %208 = arith.addf %207, %206 : vector<2x64xf32>
    %209 = arith.divf %207, %208 : vector<2x64xf32>
    %210 = vector.extract_strided_slice %14 {offsets = [10, 0], sizes = [2, 64], strides = [1, 1]} : vector<16x64xf32> to vector<2x64xf32>
    %211 = arith.addf %210, %199 : vector<2x64xf32>
    %212 = arith.negf %211 : vector<2x64xf32>
    %213 = math.exp %212 : vector<2x64xf32>
    %cst_110 = arith.constant 1.000000e+00 : f32
    %214 = vector.broadcast %cst_110 : f32 to vector<2x64xf32>
    %215 = arith.addf %214, %213 : vector<2x64xf32>
    %216 = arith.divf %214, %215 : vector<2x64xf32>
    %217 = vector.extract_strided_slice %21 {offsets = [10, 0], sizes = [2, 64], strides = [1, 1]} : vector<16x64xf32> to vector<2x64xf32>
    %218 = vector.broadcast %22 : vector<1x64xf32> to vector<2x64xf32>
    %219 = arith.addf %202, %218 : vector<2x64xf32>
    %220 = arith.mulf %209, %219 : vector<2x64xf32>
    %221 = arith.addf %217, %220 : vector<2x64xf32>
    %222 = math.tanh %221 : vector<2x64xf32>
    %cst_111 = arith.constant 1.000000e+00 : f32
    %223 = vector.broadcast %cst_111 : f32 to vector<2x64xf32>
    %224 = arith.subf %223, %216 : vector<2x64xf32>
    %225 = arith.mulf %224, %222 : vector<2x64xf32>
    %226 = arith.mulf %216, %193 : vector<2x64xf32>
    %227 = arith.addf %225, %226 : vector<2x64xf32>
    %c0_112 = arith.constant 0 : index
    %c0_113 = arith.constant 0 : index
    %c0_114 = arith.constant 0 : index
    %228 = vector.load %arg3[%c0_112, %c0_113, %c0_114] : memref<3x64x64xf32, #tpu.memory_space<vmem>>, vector<1x64x64xf32>
    %229 = vector.shape_cast %228 : vector<1x64x64xf32> to vector<64x64xf32>
    %cst_115 = arith.constant dense<0.000000e+00> : vector<2x64xf32>
    %230 = tpu.matmul %227, %229, %cst_115 {dimension_numbers = #tpu.dot_dimension_numbers<[1], [0], [0], [1], [0, 0, 1, 1], [], []>, precision = #tpu.contract_precision<fp32>} : vector<2x64xf32>, vector<64x64xf32>, vector<2x64xf32> -> vector<2x64xf32>
    %c1_116 = arith.constant 1 : index
    %c0_117 = arith.constant 0 : index
    %c0_118 = arith.constant 0 : index
    %231 = vector.load %arg3[%c1_116, %c0_117, %c0_118] : memref<3x64x64xf32, #tpu.memory_space<vmem>>, vector<1x64x64xf32>
    %232 = vector.shape_cast %231 : vector<1x64x64xf32> to vector<64x64xf32>
    %cst_119 = arith.constant dense<0.000000e+00> : vector<2x64xf32>
    %233 = tpu.matmul %227, %232, %cst_119 {dimension_numbers = #tpu.dot_dimension_numbers<[1], [0], [0], [1], [0, 0, 1, 1], [], []>, precision = #tpu.contract_precision<fp32>} : vector<2x64xf32>, vector<64x64xf32>, vector<2x64xf32> -> vector<2x64xf32>
    %c2_120 = arith.constant 2 : index
    %c0_121 = arith.constant 0 : index
    %c0_122 = arith.constant 0 : index
    %234 = vector.load %arg3[%c2_120, %c0_121, %c0_122] : memref<3x64x64xf32, #tpu.memory_space<vmem>>, vector<1x64x64xf32>
    %235 = vector.shape_cast %234 : vector<1x64x64xf32> to vector<64x64xf32>
    %cst_123 = arith.constant dense<0.000000e+00> : vector<2x64xf32>
    %236 = tpu.matmul %227, %235, %cst_123 {dimension_numbers = #tpu.dot_dimension_numbers<[1], [0], [0], [1], [0, 0, 1, 1], [], []>, precision = #tpu.contract_precision<fp32>} : vector<2x64xf32>, vector<64x64xf32>, vector<2x64xf32> -> vector<2x64xf32>
    %237 = vector.extract_strided_slice %7 {offsets = [12, 0], sizes = [2, 64], strides = [1, 1]} : vector<16x64xf32> to vector<2x64xf32>
    %238 = arith.addf %237, %230 : vector<2x64xf32>
    %239 = arith.negf %238 : vector<2x64xf32>
    %240 = math.exp %239 : vector<2x64xf32>
    %cst_124 = arith.constant 1.000000e+00 : f32
    %241 = vector.broadcast %cst_124 : f32 to vector<2x64xf32>
    %242 = arith.addf %241, %240 : vector<2x64xf32>
    %243 = arith.divf %241, %242 : vector<2x64xf32>
    %244 = vector.extract_strided_slice %14 {offsets = [12, 0], sizes = [2, 64], strides = [1, 1]} : vector<16x64xf32> to vector<2x64xf32>
    %245 = arith.addf %244, %233 : vector<2x64xf32>
    %246 = arith.negf %245 : vector<2x64xf32>
    %247 = math.exp %246 : vector<2x64xf32>
    %cst_125 = arith.constant 1.000000e+00 : f32
    %248 = vector.broadcast %cst_125 : f32 to vector<2x64xf32>
    %249 = arith.addf %248, %247 : vector<2x64xf32>
    %250 = arith.divf %248, %249 : vector<2x64xf32>
    %251 = vector.extract_strided_slice %21 {offsets = [12, 0], sizes = [2, 64], strides = [1, 1]} : vector<16x64xf32> to vector<2x64xf32>
    %252 = vector.broadcast %22 : vector<1x64xf32> to vector<2x64xf32>
    %253 = arith.addf %236, %252 : vector<2x64xf32>
    %254 = arith.mulf %243, %253 : vector<2x64xf32>
    %255 = arith.addf %251, %254 : vector<2x64xf32>
    %256 = math.tanh %255 : vector<2x64xf32>
    %cst_126 = arith.constant 1.000000e+00 : f32
    %257 = vector.broadcast %cst_126 : f32 to vector<2x64xf32>
    %258 = arith.subf %257, %250 : vector<2x64xf32>
    %259 = arith.mulf %258, %256 : vector<2x64xf32>
    %260 = arith.mulf %250, %227 : vector<2x64xf32>
    %261 = arith.addf %259, %260 : vector<2x64xf32>
    %c0_127 = arith.constant 0 : index
    %c0_128 = arith.constant 0 : index
    %c0_129 = arith.constant 0 : index
    %262 = vector.load %arg3[%c0_127, %c0_128, %c0_129] : memref<3x64x64xf32, #tpu.memory_space<vmem>>, vector<1x64x64xf32>
    %263 = vector.shape_cast %262 : vector<1x64x64xf32> to vector<64x64xf32>
    %cst_130 = arith.constant dense<0.000000e+00> : vector<2x64xf32>
    %264 = tpu.matmul %261, %263, %cst_130 {dimension_numbers = #tpu.dot_dimension_numbers<[1], [0], [0], [1], [0, 0, 1, 1], [], []>, precision = #tpu.contract_precision<fp32>} : vector<2x64xf32>, vector<64x64xf32>, vector<2x64xf32> -> vector<2x64xf32>
    %c1_131 = arith.constant 1 : index
    %c0_132 = arith.constant 0 : index
    %c0_133 = arith.constant 0 : index
    %265 = vector.load %arg3[%c1_131, %c0_132, %c0_133] : memref<3x64x64xf32, #tpu.memory_space<vmem>>, vector<1x64x64xf32>
    %266 = vector.shape_cast %265 : vector<1x64x64xf32> to vector<64x64xf32>
    %cst_134 = arith.constant dense<0.000000e+00> : vector<2x64xf32>
    %267 = tpu.matmul %261, %266, %cst_134 {dimension_numbers = #tpu.dot_dimension_numbers<[1], [0], [0], [1], [0, 0, 1, 1], [], []>, precision = #tpu.contract_precision<fp32>} : vector<2x64xf32>, vector<64x64xf32>, vector<2x64xf32> -> vector<2x64xf32>
    %c2_135 = arith.constant 2 : index
    %c0_136 = arith.constant 0 : index
    %c0_137 = arith.constant 0 : index
    %268 = vector.load %arg3[%c2_135, %c0_136, %c0_137] : memref<3x64x64xf32, #tpu.memory_space<vmem>>, vector<1x64x64xf32>
    %269 = vector.shape_cast %268 : vector<1x64x64xf32> to vector<64x64xf32>
    %cst_138 = arith.constant dense<0.000000e+00> : vector<2x64xf32>
    %270 = tpu.matmul %261, %269, %cst_138 {dimension_numbers = #tpu.dot_dimension_numbers<[1], [0], [0], [1], [0, 0, 1, 1], [], []>, precision = #tpu.contract_precision<fp32>} : vector<2x64xf32>, vector<64x64xf32>, vector<2x64xf32> -> vector<2x64xf32>
    %271 = vector.extract_strided_slice %7 {offsets = [14, 0], sizes = [2, 64], strides = [1, 1]} : vector<16x64xf32> to vector<2x64xf32>
    %272 = arith.addf %271, %264 : vector<2x64xf32>
    %273 = arith.negf %272 : vector<2x64xf32>
    %274 = math.exp %273 : vector<2x64xf32>
    %cst_139 = arith.constant 1.000000e+00 : f32
    %275 = vector.broadcast %cst_139 : f32 to vector<2x64xf32>
    %276 = arith.addf %275, %274 : vector<2x64xf32>
    %277 = arith.divf %275, %276 : vector<2x64xf32>
    %278 = vector.extract_strided_slice %14 {offsets = [14, 0], sizes = [2, 64], strides = [1, 1]} : vector<16x64xf32> to vector<2x64xf32>
    %279 = arith.addf %278, %267 : vector<2x64xf32>
    %280 = arith.negf %279 : vector<2x64xf32>
    %281 = math.exp %280 : vector<2x64xf32>
    %cst_140 = arith.constant 1.000000e+00 : f32
    %282 = vector.broadcast %cst_140 : f32 to vector<2x64xf32>
    %283 = arith.addf %282, %281 : vector<2x64xf32>
    %284 = arith.divf %282, %283 : vector<2x64xf32>
    %285 = vector.extract_strided_slice %21 {offsets = [14, 0], sizes = [2, 64], strides = [1, 1]} : vector<16x64xf32> to vector<2x64xf32>
    %286 = vector.broadcast %22 : vector<1x64xf32> to vector<2x64xf32>
    %287 = arith.addf %270, %286 : vector<2x64xf32>
    %288 = arith.mulf %277, %287 : vector<2x64xf32>
    %289 = arith.addf %285, %288 : vector<2x64xf32>
    %290 = math.tanh %289 : vector<2x64xf32>
    %cst_141 = arith.constant 1.000000e+00 : f32
    %291 = vector.broadcast %cst_141 : f32 to vector<2x64xf32>
    %292 = arith.subf %291, %284 : vector<2x64xf32>
    %293 = arith.mulf %292, %290 : vector<2x64xf32>
    %294 = arith.mulf %284, %261 : vector<2x64xf32>
    %295 = arith.addf %293, %294 : vector<2x64xf32>
    %296 = tpu.concatenate %57, %295 in 1 : vector<2x64xf32>, vector<2x64xf32> -> vector<2x128xf32>
    %c0_142 = arith.constant 0 : index
    %c0_143 = arith.constant 0 : index
    %297 = vector.load %arg12[%c0_142, %c0_143] : memref<16x128xf32, #tpu.memory_space<vmem>>, vector<2x128xf32>
    tpu.vector_store %arg12[%c0_142, %c0_143], %296 {strides = array<i32>} : memref<16x128xf32, #tpu.memory_space<vmem>>, vector<2x128xf32>,
    %298 = tpu.concatenate %91, %261 in 1 : vector<2x64xf32>, vector<2x64xf32> -> vector<2x128xf32>
    %c2_144 = arith.constant 2 : index
    %c0_145 = arith.constant 0 : index
    %299 = vector.load %arg12[%c2_144, %c0_145] : memref<16x128xf32, #tpu.memory_space<vmem>>, vector<2x128xf32>
    tpu.vector_store %arg12[%c2_144, %c0_145], %298 {strides = array<i32>} : memref<16x128xf32, #tpu.memory_space<vmem>>, vector<2x128xf32>,
    %300 = tpu.concatenate %125, %227 in 1 : vector<2x64xf32>, vector<2x64xf32> -> vector<2x128xf32>
    %c4 = arith.constant 4 : index
    %c0_146 = arith.constant 0 : index
    %301 = vector.load %arg12[%c4, %c0_146] : memref<16x128xf32, #tpu.memory_space<vmem>>, vector<2x128xf32>
    tpu.vector_store %arg12[%c4, %c0_146], %300 {strides = array<i32>} : memref<16x128xf32, #tpu.memory_space<vmem>>, vector<2x128xf32>,
    %302 = tpu.concatenate %159, %193 in 1 : vector<2x64xf32>, vector<2x64xf32> -> vector<2x128xf32>
    %c6 = arith.constant 6 : index
    %c0_147 = arith.constant 0 : index
    %303 = vector.load %arg12[%c6, %c0_147] : memref<16x128xf32, #tpu.memory_space<vmem>>, vector<2x128xf32>
    tpu.vector_store %arg12[%c6, %c0_147], %302 {strides = array<i32>} : memref<16x128xf32, #tpu.memory_space<vmem>>, vector<2x128xf32>,
    %304 = tpu.concatenate %193, %159 in 1 : vector<2x64xf32>, vector<2x64xf32> -> vector<2x128xf32>
    %c8 = arith.constant 8 : index
    %c0_148 = arith.constant 0 : index
    %305 = vector.load %arg12[%c8, %c0_148] : memref<16x128xf32, #tpu.memory_space<vmem>>, vector<2x128xf32>
    tpu.vector_store %arg12[%c8, %c0_148], %304 {strides = array<i32>} : memref<16x128xf32, #tpu.memory_space<vmem>>, vector<2x128xf32>,
    %306 = tpu.concatenate %227, %125 in 1 : vector<2x64xf32>, vector<2x64xf32> -> vector<2x128xf32>
    %c10 = arith.constant 10 : index
    %c0_149 = arith.constant 0 : index
    %307 = vector.load %arg12[%c10, %c0_149] : memref<16x128xf32, #tpu.memory_space<vmem>>, vector<2x128xf32>
    tpu.vector_store %arg12[%c10, %c0_149], %306 {strides = array<i32>} : memref<16x128xf32, #tpu.memory_space<vmem>>, vector<2x128xf32>,
    %308 = tpu.concatenate %261, %91 in 1 : vector<2x64xf32>, vector<2x64xf32> -> vector<2x128xf32>
    %c12 = arith.constant 12 : index
    %c0_150 = arith.constant 0 : index
    %309 = vector.load %arg12[%c12, %c0_150] : memref<16x128xf32, #tpu.memory_space<vmem>>, vector<2x128xf32>
    tpu.vector_store %arg12[%c12, %c0_150], %308 {strides = array<i32>} : memref<16x128xf32, #tpu.memory_space<vmem>>, vector<2x128xf32>,
    %310 = tpu.concatenate %295, %57 in 1 : vector<2x64xf32>, vector<2x64xf32> -> vector<2x128xf32>
    %c14 = arith.constant 14 : index
    %c0_151 = arith.constant 0 : index
    %311 = vector.load %arg12[%c14, %c0_151] : memref<16x128xf32, #tpu.memory_space<vmem>>, vector<2x128xf32>
    tpu.vector_store %arg12[%c14, %c0_151], %310 {strides = array<i32>} : memref<16x128xf32, #tpu.memory_space<vmem>>, vector<2x128xf32>,
    %c0_152 = arith.constant 0 : index
    %c0_153 = arith.constant 0 : index
    %312 = vector.load %arg12[%c0_152, %c0_153] : memref<16x128xf32, #tpu.memory_space<vmem>>, vector<16x128xf32>
    %c0_154 = arith.constant 0 : index
    %c0_155 = arith.constant 0 : index
    %c0_156 = arith.constant 0 : index
    %313 = vector.load %arg5[%c0_154, %c0_155, %c0_156] : memref<3x128x64xf32, #tpu.memory_space<vmem>>, vector<1x128x64xf32>
    %314 = vector.shape_cast %313 : vector<1x128x64xf32> to vector<128x64xf32>
    %cst_157 = arith.constant dense<0.000000e+00> : vector<16x64xf32>
    %315 = tpu.matmul %312, %314, %cst_157 {dimension_numbers = #tpu.dot_dimension_numbers<[1], [0], [0], [1], [0, 0, 1, 1], [], []>, precision = #tpu.contract_precision<fp32>} : vector<16x128xf32>, vector<128x64xf32>, vector<16x64xf32> -> vector<16x64xf32>
    %c0_158 = arith.constant 0 : index
    %c0_159 = arith.constant 0 : index
    %c0_160 = arith.constant 0 : index
    %316 = vector.load %arg6[%c0_158, %c0_159, %c0_160] : memref<3x1x64xf32, #tpu.memory_space<vmem>>, vector<1x1x64xf32>
    %317 = vector.shape_cast %316 : vector<1x1x64xf32> to vector<1x64xf32>
    %318 = vector.broadcast %317 : vector<1x64xf32> to vector<16x64xf32>
    %319 = arith.addf %315, %318 : vector<16x64xf32>
    %c1_161 = arith.constant 1 : index
    %c0_162 = arith.constant 0 : index
    %c0_163 = arith.constant 0 : index
    %320 = vector.load %arg5[%c1_161, %c0_162, %c0_163] : memref<3x128x64xf32, #tpu.memory_space<vmem>>, vector<1x128x64xf32>
    %321 = vector.shape_cast %320 : vector<1x128x64xf32> to vector<128x64xf32>
    %cst_164 = arith.constant dense<0.000000e+00> : vector<16x64xf32>
    %322 = tpu.matmul %312, %321, %cst_164 {dimension_numbers = #tpu.dot_dimension_numbers<[1], [0], [0], [1], [0, 0, 1, 1], [], []>, precision = #tpu.contract_precision<fp32>} : vector<16x128xf32>, vector<128x64xf32>, vector<16x64xf32> -> vector<16x64xf32>
    %c1_165 = arith.constant 1 : index
    %c0_166 = arith.constant 0 : index
    %c0_167 = arith.constant 0 : index
    %323 = vector.load %arg6[%c1_165, %c0_166, %c0_167] : memref<3x1x64xf32, #tpu.memory_space<vmem>>, vector<1x1x64xf32>
    %324 = vector.shape_cast %323 : vector<1x1x64xf32> to vector<1x64xf32>
    %325 = vector.broadcast %324 : vector<1x64xf32> to vector<16x64xf32>
    %326 = arith.addf %322, %325 : vector<16x64xf32>
    %c2_168 = arith.constant 2 : index
    %c0_169 = arith.constant 0 : index
    %c0_170 = arith.constant 0 : index
    %327 = vector.load %arg5[%c2_168, %c0_169, %c0_170] : memref<3x128x64xf32, #tpu.memory_space<vmem>>, vector<1x128x64xf32>
    %328 = vector.shape_cast %327 : vector<1x128x64xf32> to vector<128x64xf32>
    %cst_171 = arith.constant dense<0.000000e+00> : vector<16x64xf32>
    %329 = tpu.matmul %312, %328, %cst_171 {dimension_numbers = #tpu.dot_dimension_numbers<[1], [0], [0], [1], [0, 0, 1, 1], [], []>, precision = #tpu.contract_precision<fp32>} : vector<16x128xf32>, vector<128x64xf32>, vector<16x64xf32> -> vector<16x64xf32>
    %c2_172 = arith.constant 2 : index
    %c0_173 = arith.constant 0 : index
    %c0_174 = arith.constant 0 : index
    %330 = vector.load %arg6[%c2_172, %c0_173, %c0_174] : memref<3x1x64xf32, #tpu.memory_space<vmem>>, vector<1x1x64xf32>
    %331 = vector.shape_cast %330 : vector<1x1x64xf32> to vector<1x64xf32>
    %332 = vector.broadcast %331 : vector<1x64xf32> to vector<16x64xf32>
    %333 = arith.addf %329, %332 : vector<16x64xf32>
    %c0_175 = arith.constant 0 : index
    %c0_176 = arith.constant 0 : index
    %334 = vector.load %arg8[%c0_175, %c0_176] : memref<1x64xf32, #tpu.memory_space<vmem>>, vector<1x64xf32>
    %cst_177 = arith.constant 0.000000e+00 : f32
    %335 = vector.broadcast %cst_177 : f32 to vector<2x64xf32>
    %c0_178 = arith.constant 0 : index
    %c0_179 = arith.constant 0 : index
    %c0_180 = arith.constant 0 : index
    %336 = vector.load %arg7[%c0_178, %c0_179, %c0_180] : memref<3x64x64xf32, #tpu.memory_space<vmem>>, vector<1x64x64xf32>
    %337 = vector.shape_cast %336 : vector<1x64x64xf32> to vector<64x64xf32>
    %cst_181 = arith.constant dense<0.000000e+00> : vector<2x64xf32>
    %338 = tpu.matmul %335, %337, %cst_181 {dimension_numbers = #tpu.dot_dimension_numbers<[1], [0], [0], [1], [0, 0, 1, 1], [], []>, precision = #tpu.contract_precision<fp32>} : vector<2x64xf32>, vector<64x64xf32>, vector<2x64xf32> -> vector<2x64xf32>
    %c1_182 = arith.constant 1 : index
    %c0_183 = arith.constant 0 : index
    %c0_184 = arith.constant 0 : index
    %339 = vector.load %arg7[%c1_182, %c0_183, %c0_184] : memref<3x64x64xf32, #tpu.memory_space<vmem>>, vector<1x64x64xf32>
    %340 = vector.shape_cast %339 : vector<1x64x64xf32> to vector<64x64xf32>
    %cst_185 = arith.constant dense<0.000000e+00> : vector<2x64xf32>
    %341 = tpu.matmul %335, %340, %cst_185 {dimension_numbers = #tpu.dot_dimension_numbers<[1], [0], [0], [1], [0, 0, 1, 1], [], []>, precision = #tpu.contract_precision<fp32>} : vector<2x64xf32>, vector<64x64xf32>, vector<2x64xf32> -> vector<2x64xf32>
    %c2_186 = arith.constant 2 : index
    %c0_187 = arith.constant 0 : index
    %c0_188 = arith.constant 0 : index
    %342 = vector.load %arg7[%c2_186, %c0_187, %c0_188] : memref<3x64x64xf32, #tpu.memory_space<vmem>>, vector<1x64x64xf32>
    %343 = vector.shape_cast %342 : vector<1x64x64xf32> to vector<64x64xf32>
    %cst_189 = arith.constant dense<0.000000e+00> : vector<2x64xf32>
    %344 = tpu.matmul %335, %343, %cst_189 {dimension_numbers = #tpu.dot_dimension_numbers<[1], [0], [0], [1], [0, 0, 1, 1], [], []>, precision = #tpu.contract_precision<fp32>} : vector<2x64xf32>, vector<64x64xf32>, vector<2x64xf32> -> vector<2x64xf32>
    %345 = vector.extract_strided_slice %319 {offsets = [0, 0], sizes = [2, 64], strides = [1, 1]} : vector<16x64xf32> to vector<2x64xf32>
    %346 = arith.addf %345, %338 : vector<2x64xf32>
    %347 = arith.negf %346 : vector<2x64xf32>
    %348 = math.exp %347 : vector<2x64xf32>
    %cst_190 = arith.constant 1.000000e+00 : f32
    %349 = vector.broadcast %cst_190 : f32 to vector<2x64xf32>
    %350 = arith.addf %349, %348 : vector<2x64xf32>
    %351 = arith.divf %349, %350 : vector<2x64xf32>
    %352 = vector.extract_strided_slice %326 {offsets = [0, 0], sizes = [2, 64], strides = [1, 1]} : vector<16x64xf32> to vector<2x64xf32>
    %353 = arith.addf %352, %341 : vector<2x64xf32>
    %354 = arith.negf %353 : vector<2x64xf32>
    %355 = math.exp %354 : vector<2x64xf32>
    %cst_191 = arith.constant 1.000000e+00 : f32
    %356 = vector.broadcast %cst_191 : f32 to vector<2x64xf32>
    %357 = arith.addf %356, %355 : vector<2x64xf32>
    %358 = arith.divf %356, %357 : vector<2x64xf32>
    %359 = vector.extract_strided_slice %333 {offsets = [0, 0], sizes = [2, 64], strides = [1, 1]} : vector<16x64xf32> to vector<2x64xf32>
    %360 = vector.broadcast %334 : vector<1x64xf32> to vector<2x64xf32>
    %361 = arith.addf %344, %360 : vector<2x64xf32>
    %362 = arith.mulf %351, %361 : vector<2x64xf32>
    %363 = arith.addf %359, %362 : vector<2x64xf32>
    %364 = math.tanh %363 : vector<2x64xf32>
    %cst_192 = arith.constant 1.000000e+00 : f32
    %365 = vector.broadcast %cst_192 : f32 to vector<2x64xf32>
    %366 = arith.subf %365, %358 : vector<2x64xf32>
    %367 = arith.mulf %366, %364 : vector<2x64xf32>
    %368 = arith.mulf %358, %335 : vector<2x64xf32>
    %369 = arith.addf %367, %368 : vector<2x64xf32>
    %c0_193 = arith.constant 0 : index
    %c0_194 = arith.constant 0 : index
    %c0_195 = arith.constant 0 : index
    %370 = vector.load %arg7[%c0_193, %c0_194, %c0_195] : memref<3x64x64xf32, #tpu.memory_space<vmem>>, vector<1x64x64xf32>
    %371 = vector.shape_cast %370 : vector<1x64x64xf32> to vector<64x64xf32>
    %cst_196 = arith.constant dense<0.000000e+00> : vector<2x64xf32>
    %372 = tpu.matmul %369, %371, %cst_196 {dimension_numbers = #tpu.dot_dimension_numbers<[1], [0], [0], [1], [0, 0, 1, 1], [], []>, precision = #tpu.contract_precision<fp32>} : vector<2x64xf32>, vector<64x64xf32>, vector<2x64xf32> -> vector<2x64xf32>
    %c1_197 = arith.constant 1 : index
    %c0_198 = arith.constant 0 : index
    %c0_199 = arith.constant 0 : index
    %373 = vector.load %arg7[%c1_197, %c0_198, %c0_199] : memref<3x64x64xf32, #tpu.memory_space<vmem>>, vector<1x64x64xf32>
    %374 = vector.shape_cast %373 : vector<1x64x64xf32> to vector<64x64xf32>
    %cst_200 = arith.constant dense<0.000000e+00> : vector<2x64xf32>
    %375 = tpu.matmul %369, %374, %cst_200 {dimension_numbers = #tpu.dot_dimension_numbers<[1], [0], [0], [1], [0, 0, 1, 1], [], []>, precision = #tpu.contract_precision<fp32>} : vector<2x64xf32>, vector<64x64xf32>, vector<2x64xf32> -> vector<2x64xf32>
    %c2_201 = arith.constant 2 : index
    %c0_202 = arith.constant 0 : index
    %c0_203 = arith.constant 0 : index
    %376 = vector.load %arg7[%c2_201, %c0_202, %c0_203] : memref<3x64x64xf32, #tpu.memory_space<vmem>>, vector<1x64x64xf32>
    %377 = vector.shape_cast %376 : vector<1x64x64xf32> to vector<64x64xf32>
    %cst_204 = arith.constant dense<0.000000e+00> : vector<2x64xf32>
    %378 = tpu.matmul %369, %377, %cst_204 {dimension_numbers = #tpu.dot_dimension_numbers<[1], [0], [0], [1], [0, 0, 1, 1], [], []>, precision = #tpu.contract_precision<fp32>} : vector<2x64xf32>, vector<64x64xf32>, vector<2x64xf32> -> vector<2x64xf32>
    %379 = vector.extract_strided_slice %319 {offsets = [2, 0], sizes = [2, 64], strides = [1, 1]} : vector<16x64xf32> to vector<2x64xf32>
    %380 = arith.addf %379, %372 : vector<2x64xf32>
    %381 = arith.negf %380 : vector<2x64xf32>
    %382 = math.exp %381 : vector<2x64xf32>
    %cst_205 = arith.constant 1.000000e+00 : f32
    %383 = vector.broadcast %cst_205 : f32 to vector<2x64xf32>
    %384 = arith.addf %383, %382 : vector<2x64xf32>
    %385 = arith.divf %383, %384 : vector<2x64xf32>
    %386 = vector.extract_strided_slice %326 {offsets = [2, 0], sizes = [2, 64], strides = [1, 1]} : vector<16x64xf32> to vector<2x64xf32>
    %387 = arith.addf %386, %375 : vector<2x64xf32>
    %388 = arith.negf %387 : vector<2x64xf32>
    %389 = math.exp %388 : vector<2x64xf32>
    %cst_206 = arith.constant 1.000000e+00 : f32
    %390 = vector.broadcast %cst_206 : f32 to vector<2x64xf32>
    %391 = arith.addf %390, %389 : vector<2x64xf32>
    %392 = arith.divf %390, %391 : vector<2x64xf32>
    %393 = vector.extract_strided_slice %333 {offsets = [2, 0], sizes = [2, 64], strides = [1, 1]} : vector<16x64xf32> to vector<2x64xf32>
    %394 = vector.broadcast %334 : vector<1x64xf32> to vector<2x64xf32>
    %395 = arith.addf %378, %394 : vector<2x64xf32>
    %396 = arith.mulf %385, %395 : vector<2x64xf32>
    %397 = arith.addf %393, %396 : vector<2x64xf32>
    %398 = math.tanh %397 : vector<2x64xf32>
    %cst_207 = arith.constant 1.000000e+00 : f32
    %399 = vector.broadcast %cst_207 : f32 to vector<2x64xf32>
    %400 = arith.subf %399, %392 : vector<2x64xf32>
    %401 = arith.mulf %400, %398 : vector<2x64xf32>
    %402 = arith.mulf %392, %369 : vector<2x64xf32>
    %403 = arith.addf %401, %402 : vector<2x64xf32>
    %c0_208 = arith.constant 0 : index
    %c0_209 = arith.constant 0 : index
    %c0_210 = arith.constant 0 : index
    %404 = vector.load %arg7[%c0_208, %c0_209, %c0_210] : memref<3x64x64xf32, #tpu.memory_space<vmem>>, vector<1x64x64xf32>
    %405 = vector.shape_cast %404 : vector<1x64x64xf32> to vector<64x64xf32>
    %cst_211 = arith.constant dense<0.000000e+00> : vector<2x64xf32>
    %406 = tpu.matmul %403, %405, %cst_211 {dimension_numbers = #tpu.dot_dimension_numbers<[1], [0], [0], [1], [0, 0, 1, 1], [], []>, precision = #tpu.contract_precision<fp32>} : vector<2x64xf32>, vector<64x64xf32>, vector<2x64xf32> -> vector<2x64xf32>
    %c1_212 = arith.constant 1 : index
    %c0_213 = arith.constant 0 : index
    %c0_214 = arith.constant 0 : index
    %407 = vector.load %arg7[%c1_212, %c0_213, %c0_214] : memref<3x64x64xf32, #tpu.memory_space<vmem>>, vector<1x64x64xf32>
    %408 = vector.shape_cast %407 : vector<1x64x64xf32> to vector<64x64xf32>
    %cst_215 = arith.constant dense<0.000000e+00> : vector<2x64xf32>
    %409 = tpu.matmul %403, %408, %cst_215 {dimension_numbers = #tpu.dot_dimension_numbers<[1], [0], [0], [1], [0, 0, 1, 1], [], []>, precision = #tpu.contract_precision<fp32>} : vector<2x64xf32>, vector<64x64xf32>, vector<2x64xf32> -> vector<2x64xf32>
    %c2_216 = arith.constant 2 : index
    %c0_217 = arith.constant 0 : index
    %c0_218 = arith.constant 0 : index
    %410 = vector.load %arg7[%c2_216, %c0_217, %c0_218] : memref<3x64x64xf32, #tpu.memory_space<vmem>>, vector<1x64x64xf32>
    %411 = vector.shape_cast %410 : vector<1x64x64xf32> to vector<64x64xf32>
    %cst_219 = arith.constant dense<0.000000e+00> : vector<2x64xf32>
    %412 = tpu.matmul %403, %411, %cst_219 {dimension_numbers = #tpu.dot_dimension_numbers<[1], [0], [0], [1], [0, 0, 1, 1], [], []>, precision = #tpu.contract_precision<fp32>} : vector<2x64xf32>, vector<64x64xf32>, vector<2x64xf32> -> vector<2x64xf32>
    %413 = vector.extract_strided_slice %319 {offsets = [4, 0], sizes = [2, 64], strides = [1, 1]} : vector<16x64xf32> to vector<2x64xf32>
    %414 = arith.addf %413, %406 : vector<2x64xf32>
    %415 = arith.negf %414 : vector<2x64xf32>
    %416 = math.exp %415 : vector<2x64xf32>
    %cst_220 = arith.constant 1.000000e+00 : f32
    %417 = vector.broadcast %cst_220 : f32 to vector<2x64xf32>
    %418 = arith.addf %417, %416 : vector<2x64xf32>
    %419 = arith.divf %417, %418 : vector<2x64xf32>
    %420 = vector.extract_strided_slice %326 {offsets = [4, 0], sizes = [2, 64], strides = [1, 1]} : vector<16x64xf32> to vector<2x64xf32>
    %421 = arith.addf %420, %409 : vector<2x64xf32>
    %422 = arith.negf %421 : vector<2x64xf32>
    %423 = math.exp %422 : vector<2x64xf32>
    %cst_221 = arith.constant 1.000000e+00 : f32
    %424 = vector.broadcast %cst_221 : f32 to vector<2x64xf32>
    %425 = arith.addf %424, %423 : vector<2x64xf32>
    %426 = arith.divf %424, %425 : vector<2x64xf32>
    %427 = vector.extract_strided_slice %333 {offsets = [4, 0], sizes = [2, 64], strides = [1, 1]} : vector<16x64xf32> to vector<2x64xf32>
    %428 = vector.broadcast %334 : vector<1x64xf32> to vector<2x64xf32>
    %429 = arith.addf %412, %428 : vector<2x64xf32>
    %430 = arith.mulf %419, %429 : vector<2x64xf32>
    %431 = arith.addf %427, %430 : vector<2x64xf32>
    %432 = math.tanh %431 : vector<2x64xf32>
    %cst_222 = arith.constant 1.000000e+00 : f32
    %433 = vector.broadcast %cst_222 : f32 to vector<2x64xf32>
    %434 = arith.subf %433, %426 : vector<2x64xf32>
    %435 = arith.mulf %434, %432 : vector<2x64xf32>
    %436 = arith.mulf %426, %403 : vector<2x64xf32>
    %437 = arith.addf %435, %436 : vector<2x64xf32>
    %c0_223 = arith.constant 0 : index
    %c0_224 = arith.constant 0 : index
    %c0_225 = arith.constant 0 : index
    %438 = vector.load %arg7[%c0_223, %c0_224, %c0_225] : memref<3x64x64xf32, #tpu.memory_space<vmem>>, vector<1x64x64xf32>
    %439 = vector.shape_cast %438 : vector<1x64x64xf32> to vector<64x64xf32>
    %cst_226 = arith.constant dense<0.000000e+00> : vector<2x64xf32>
    %440 = tpu.matmul %437, %439, %cst_226 {dimension_numbers = #tpu.dot_dimension_numbers<[1], [0], [0], [1], [0, 0, 1, 1], [], []>, precision = #tpu.contract_precision<fp32>} : vector<2x64xf32>, vector<64x64xf32>, vector<2x64xf32> -> vector<2x64xf32>
    %c1_227 = arith.constant 1 : index
    %c0_228 = arith.constant 0 : index
    %c0_229 = arith.constant 0 : index
    %441 = vector.load %arg7[%c1_227, %c0_228, %c0_229] : memref<3x64x64xf32, #tpu.memory_space<vmem>>, vector<1x64x64xf32>
    %442 = vector.shape_cast %441 : vector<1x64x64xf32> to vector<64x64xf32>
    %cst_230 = arith.constant dense<0.000000e+00> : vector<2x64xf32>
    %443 = tpu.matmul %437, %442, %cst_230 {dimension_numbers = #tpu.dot_dimension_numbers<[1], [0], [0], [1], [0, 0, 1, 1], [], []>, precision = #tpu.contract_precision<fp32>} : vector<2x64xf32>, vector<64x64xf32>, vector<2x64xf32> -> vector<2x64xf32>
    %c2_231 = arith.constant 2 : index
    %c0_232 = arith.constant 0 : index
    %c0_233 = arith.constant 0 : index
    %444 = vector.load %arg7[%c2_231, %c0_232, %c0_233] : memref<3x64x64xf32, #tpu.memory_space<vmem>>, vector<1x64x64xf32>
    %445 = vector.shape_cast %444 : vector<1x64x64xf32> to vector<64x64xf32>
    %cst_234 = arith.constant dense<0.000000e+00> : vector<2x64xf32>
    %446 = tpu.matmul %437, %445, %cst_234 {dimension_numbers = #tpu.dot_dimension_numbers<[1], [0], [0], [1], [0, 0, 1, 1], [], []>, precision = #tpu.contract_precision<fp32>} : vector<2x64xf32>, vector<64x64xf32>, vector<2x64xf32> -> vector<2x64xf32>
    %447 = vector.extract_strided_slice %319 {offsets = [6, 0], sizes = [2, 64], strides = [1, 1]} : vector<16x64xf32> to vector<2x64xf32>
    %448 = arith.addf %447, %440 : vector<2x64xf32>
    %449 = arith.negf %448 : vector<2x64xf32>
    %450 = math.exp %449 : vector<2x64xf32>
    %cst_235 = arith.constant 1.000000e+00 : f32
    %451 = vector.broadcast %cst_235 : f32 to vector<2x64xf32>
    %452 = arith.addf %451, %450 : vector<2x64xf32>
    %453 = arith.divf %451, %452 : vector<2x64xf32>
    %454 = vector.extract_strided_slice %326 {offsets = [6, 0], sizes = [2, 64], strides = [1, 1]} : vector<16x64xf32> to vector<2x64xf32>
    %455 = arith.addf %454, %443 : vector<2x64xf32>
    %456 = arith.negf %455 : vector<2x64xf32>
    %457 = math.exp %456 : vector<2x64xf32>
    %cst_236 = arith.constant 1.000000e+00 : f32
    %458 = vector.broadcast %cst_236 : f32 to vector<2x64xf32>
    %459 = arith.addf %458, %457 : vector<2x64xf32>
    %460 = arith.divf %458, %459 : vector<2x64xf32>
    %461 = vector.extract_strided_slice %333 {offsets = [6, 0], sizes = [2, 64], strides = [1, 1]} : vector<16x64xf32> to vector<2x64xf32>
    %462 = vector.broadcast %334 : vector<1x64xf32> to vector<2x64xf32>
    %463 = arith.addf %446, %462 : vector<2x64xf32>
    %464 = arith.mulf %453, %463 : vector<2x64xf32>
    %465 = arith.addf %461, %464 : vector<2x64xf32>
    %466 = math.tanh %465 : vector<2x64xf32>
    %cst_237 = arith.constant 1.000000e+00 : f32
    %467 = vector.broadcast %cst_237 : f32 to vector<2x64xf32>
    %468 = arith.subf %467, %460 : vector<2x64xf32>
    %469 = arith.mulf %468, %466 : vector<2x64xf32>
    %470 = arith.mulf %460, %437 : vector<2x64xf32>
    %471 = arith.addf %469, %470 : vector<2x64xf32>
    %c0_238 = arith.constant 0 : index
    %c0_239 = arith.constant 0 : index
    %c0_240 = arith.constant 0 : index
    %472 = vector.load %arg7[%c0_238, %c0_239, %c0_240] : memref<3x64x64xf32, #tpu.memory_space<vmem>>, vector<1x64x64xf32>
    %473 = vector.shape_cast %472 : vector<1x64x64xf32> to vector<64x64xf32>
    %cst_241 = arith.constant dense<0.000000e+00> : vector<2x64xf32>
    %474 = tpu.matmul %471, %473, %cst_241 {dimension_numbers = #tpu.dot_dimension_numbers<[1], [0], [0], [1], [0, 0, 1, 1], [], []>, precision = #tpu.contract_precision<fp32>} : vector<2x64xf32>, vector<64x64xf32>, vector<2x64xf32> -> vector<2x64xf32>
    %c1_242 = arith.constant 1 : index
    %c0_243 = arith.constant 0 : index
    %c0_244 = arith.constant 0 : index
    %475 = vector.load %arg7[%c1_242, %c0_243, %c0_244] : memref<3x64x64xf32, #tpu.memory_space<vmem>>, vector<1x64x64xf32>
    %476 = vector.shape_cast %475 : vector<1x64x64xf32> to vector<64x64xf32>
    %cst_245 = arith.constant dense<0.000000e+00> : vector<2x64xf32>
    %477 = tpu.matmul %471, %476, %cst_245 {dimension_numbers = #tpu.dot_dimension_numbers<[1], [0], [0], [1], [0, 0, 1, 1], [], []>, precision = #tpu.contract_precision<fp32>} : vector<2x64xf32>, vector<64x64xf32>, vector<2x64xf32> -> vector<2x64xf32>
    %c2_246 = arith.constant 2 : index
    %c0_247 = arith.constant 0 : index
    %c0_248 = arith.constant 0 : index
    %478 = vector.load %arg7[%c2_246, %c0_247, %c0_248] : memref<3x64x64xf32, #tpu.memory_space<vmem>>, vector<1x64x64xf32>
    %479 = vector.shape_cast %478 : vector<1x64x64xf32> to vector<64x64xf32>
    %cst_249 = arith.constant dense<0.000000e+00> : vector<2x64xf32>
    %480 = tpu.matmul %471, %479, %cst_249 {dimension_numbers = #tpu.dot_dimension_numbers<[1], [0], [0], [1], [0, 0, 1, 1], [], []>, precision = #tpu.contract_precision<fp32>} : vector<2x64xf32>, vector<64x64xf32>, vector<2x64xf32> -> vector<2x64xf32>
    %481 = vector.extract_strided_slice %319 {offsets = [8, 0], sizes = [2, 64], strides = [1, 1]} : vector<16x64xf32> to vector<2x64xf32>
    %482 = arith.addf %481, %474 : vector<2x64xf32>
    %483 = arith.negf %482 : vector<2x64xf32>
    %484 = math.exp %483 : vector<2x64xf32>
    %cst_250 = arith.constant 1.000000e+00 : f32
    %485 = vector.broadcast %cst_250 : f32 to vector<2x64xf32>
    %486 = arith.addf %485, %484 : vector<2x64xf32>
    %487 = arith.divf %485, %486 : vector<2x64xf32>
    %488 = vector.extract_strided_slice %326 {offsets = [8, 0], sizes = [2, 64], strides = [1, 1]} : vector<16x64xf32> to vector<2x64xf32>
    %489 = arith.addf %488, %477 : vector<2x64xf32>
    %490 = arith.negf %489 : vector<2x64xf32>
    %491 = math.exp %490 : vector<2x64xf32>
    %cst_251 = arith.constant 1.000000e+00 : f32
    %492 = vector.broadcast %cst_251 : f32 to vector<2x64xf32>
    %493 = arith.addf %492, %491 : vector<2x64xf32>
    %494 = arith.divf %492, %493 : vector<2x64xf32>
    %495 = vector.extract_strided_slice %333 {offsets = [8, 0], sizes = [2, 64], strides = [1, 1]} : vector<16x64xf32> to vector<2x64xf32>
    %496 = vector.broadcast %334 : vector<1x64xf32> to vector<2x64xf32>
    %497 = arith.addf %480, %496 : vector<2x64xf32>
    %498 = arith.mulf %487, %497 : vector<2x64xf32>
    %499 = arith.addf %495, %498 : vector<2x64xf32>
    %500 = math.tanh %499 : vector<2x64xf32>
    %cst_252 = arith.constant 1.000000e+00 : f32
    %501 = vector.broadcast %cst_252 : f32 to vector<2x64xf32>
    %502 = arith.subf %501, %494 : vector<2x64xf32>
    %503 = arith.mulf %502, %500 : vector<2x64xf32>
    %504 = arith.mulf %494, %471 : vector<2x64xf32>
    %505 = arith.addf %503, %504 : vector<2x64xf32>
    %c0_253 = arith.constant 0 : index
    %c0_254 = arith.constant 0 : index
    %c0_255 = arith.constant 0 : index
    %506 = vector.load %arg7[%c0_253, %c0_254, %c0_255] : memref<3x64x64xf32, #tpu.memory_space<vmem>>, vector<1x64x64xf32>
    %507 = vector.shape_cast %506 : vector<1x64x64xf32> to vector<64x64xf32>
    %cst_256 = arith.constant dense<0.000000e+00> : vector<2x64xf32>
    %508 = tpu.matmul %505, %507, %cst_256 {dimension_numbers = #tpu.dot_dimension_numbers<[1], [0], [0], [1], [0, 0, 1, 1], [], []>, precision = #tpu.contract_precision<fp32>} : vector<2x64xf32>, vector<64x64xf32>, vector<2x64xf32> -> vector<2x64xf32>
    %c1_257 = arith.constant 1 : index
    %c0_258 = arith.constant 0 : index
    %c0_259 = arith.constant 0 : index
    %509 = vector.load %arg7[%c1_257, %c0_258, %c0_259] : memref<3x64x64xf32, #tpu.memory_space<vmem>>, vector<1x64x64xf32>
    %510 = vector.shape_cast %509 : vector<1x64x64xf32> to vector<64x64xf32>
    %cst_260 = arith.constant dense<0.000000e+00> : vector<2x64xf32>
    %511 = tpu.matmul %505, %510, %cst_260 {dimension_numbers = #tpu.dot_dimension_numbers<[1], [0], [0], [1], [0, 0, 1, 1], [], []>, precision = #tpu.contract_precision<fp32>} : vector<2x64xf32>, vector<64x64xf32>, vector<2x64xf32> -> vector<2x64xf32>
    %c2_261 = arith.constant 2 : index
    %c0_262 = arith.constant 0 : index
    %c0_263 = arith.constant 0 : index
    %512 = vector.load %arg7[%c2_261, %c0_262, %c0_263] : memref<3x64x64xf32, #tpu.memory_space<vmem>>, vector<1x64x64xf32>
    %513 = vector.shape_cast %512 : vector<1x64x64xf32> to vector<64x64xf32>
    %cst_264 = arith.constant dense<0.000000e+00> : vector<2x64xf32>
    %514 = tpu.matmul %505, %513, %cst_264 {dimension_numbers = #tpu.dot_dimension_numbers<[1], [0], [0], [1], [0, 0, 1, 1], [], []>, precision = #tpu.contract_precision<fp32>} : vector<2x64xf32>, vector<64x64xf32>, vector<2x64xf32> -> vector<2x64xf32>
    %515 = vector.extract_strided_slice %319 {offsets = [10, 0], sizes = [2, 64], strides = [1, 1]} : vector<16x64xf32> to vector<2x64xf32>
    %516 = arith.addf %515, %508 : vector<2x64xf32>
    %517 = arith.negf %516 : vector<2x64xf32>
    %518 = math.exp %517 : vector<2x64xf32>
    %cst_265 = arith.constant 1.000000e+00 : f32
    %519 = vector.broadcast %cst_265 : f32 to vector<2x64xf32>
    %520 = arith.addf %519, %518 : vector<2x64xf32>
    %521 = arith.divf %519, %520 : vector<2x64xf32>
    %522 = vector.extract_strided_slice %326 {offsets = [10, 0], sizes = [2, 64], strides = [1, 1]} : vector<16x64xf32> to vector<2x64xf32>
    %523 = arith.addf %522, %511 : vector<2x64xf32>
    %524 = arith.negf %523 : vector<2x64xf32>
    %525 = math.exp %524 : vector<2x64xf32>
    %cst_266 = arith.constant 1.000000e+00 : f32
    %526 = vector.broadcast %cst_266 : f32 to vector<2x64xf32>
    %527 = arith.addf %526, %525 : vector<2x64xf32>
    %528 = arith.divf %526, %527 : vector<2x64xf32>
    %529 = vector.extract_strided_slice %333 {offsets = [10, 0], sizes = [2, 64], strides = [1, 1]} : vector<16x64xf32> to vector<2x64xf32>
    %530 = vector.broadcast %334 : vector<1x64xf32> to vector<2x64xf32>
    %531 = arith.addf %514, %530 : vector<2x64xf32>
    %532 = arith.mulf %521, %531 : vector<2x64xf32>
    %533 = arith.addf %529, %532 : vector<2x64xf32>
    %534 = math.tanh %533 : vector<2x64xf32>
    %cst_267 = arith.constant 1.000000e+00 : f32
    %535 = vector.broadcast %cst_267 : f32 to vector<2x64xf32>
    %536 = arith.subf %535, %528 : vector<2x64xf32>
    %537 = arith.mulf %536, %534 : vector<2x64xf32>
    %538 = arith.mulf %528, %505 : vector<2x64xf32>
    %539 = arith.addf %537, %538 : vector<2x64xf32>
    %c0_268 = arith.constant 0 : index
    %c0_269 = arith.constant 0 : index
    %c0_270 = arith.constant 0 : index
    %540 = vector.load %arg7[%c0_268, %c0_269, %c0_270] : memref<3x64x64xf32, #tpu.memory_space<vmem>>, vector<1x64x64xf32>
    %541 = vector.shape_cast %540 : vector<1x64x64xf32> to vector<64x64xf32>
    %cst_271 = arith.constant dense<0.000000e+00> : vector<2x64xf32>
    %542 = tpu.matmul %539, %541, %cst_271 {dimension_numbers = #tpu.dot_dimension_numbers<[1], [0], [0], [1], [0, 0, 1, 1], [], []>, precision = #tpu.contract_precision<fp32>} : vector<2x64xf32>, vector<64x64xf32>, vector<2x64xf32> -> vector<2x64xf32>
    %c1_272 = arith.constant 1 : index
    %c0_273 = arith.constant 0 : index
    %c0_274 = arith.constant 0 : index
    %543 = vector.load %arg7[%c1_272, %c0_273, %c0_274] : memref<3x64x64xf32, #tpu.memory_space<vmem>>, vector<1x64x64xf32>
    %544 = vector.shape_cast %543 : vector<1x64x64xf32> to vector<64x64xf32>
    %cst_275 = arith.constant dense<0.000000e+00> : vector<2x64xf32>
    %545 = tpu.matmul %539, %544, %cst_275 {dimension_numbers = #tpu.dot_dimension_numbers<[1], [0], [0], [1], [0, 0, 1, 1], [], []>, precision = #tpu.contract_precision<fp32>} : vector<2x64xf32>, vector<64x64xf32>, vector<2x64xf32> -> vector<2x64xf32>
    %c2_276 = arith.constant 2 : index
    %c0_277 = arith.constant 0 : index
    %c0_278 = arith.constant 0 : index
    %546 = vector.load %arg7[%c2_276, %c0_277, %c0_278] : memref<3x64x64xf32, #tpu.memory_space<vmem>>, vector<1x64x64xf32>
    %547 = vector.shape_cast %546 : vector<1x64x64xf32> to vector<64x64xf32>
    %cst_279 = arith.constant dense<0.000000e+00> : vector<2x64xf32>
    %548 = tpu.matmul %539, %547, %cst_279 {dimension_numbers = #tpu.dot_dimension_numbers<[1], [0], [0], [1], [0, 0, 1, 1], [], []>, precision = #tpu.contract_precision<fp32>} : vector<2x64xf32>, vector<64x64xf32>, vector<2x64xf32> -> vector<2x64xf32>
    %549 = vector.extract_strided_slice %319 {offsets = [12, 0], sizes = [2, 64], strides = [1, 1]} : vector<16x64xf32> to vector<2x64xf32>
    %550 = arith.addf %549, %542 : vector<2x64xf32>
    %551 = arith.negf %550 : vector<2x64xf32>
    %552 = math.exp %551 : vector<2x64xf32>
    %cst_280 = arith.constant 1.000000e+00 : f32
    %553 = vector.broadcast %cst_280 : f32 to vector<2x64xf32>
    %554 = arith.addf %553, %552 : vector<2x64xf32>
    %555 = arith.divf %553, %554 : vector<2x64xf32>
    %556 = vector.extract_strided_slice %326 {offsets = [12, 0], sizes = [2, 64], strides = [1, 1]} : vector<16x64xf32> to vector<2x64xf32>
    %557 = arith.addf %556, %545 : vector<2x64xf32>
    %558 = arith.negf %557 : vector<2x64xf32>
    %559 = math.exp %558 : vector<2x64xf32>
    %cst_281 = arith.constant 1.000000e+00 : f32
    %560 = vector.broadcast %cst_281 : f32 to vector<2x64xf32>
    %561 = arith.addf %560, %559 : vector<2x64xf32>
    %562 = arith.divf %560, %561 : vector<2x64xf32>
    %563 = vector.extract_strided_slice %333 {offsets = [12, 0], sizes = [2, 64], strides = [1, 1]} : vector<16x64xf32> to vector<2x64xf32>
    %564 = vector.broadcast %334 : vector<1x64xf32> to vector<2x64xf32>
    %565 = arith.addf %548, %564 : vector<2x64xf32>
    %566 = arith.mulf %555, %565 : vector<2x64xf32>
    %567 = arith.addf %563, %566 : vector<2x64xf32>
    %568 = math.tanh %567 : vector<2x64xf32>
    %cst_282 = arith.constant 1.000000e+00 : f32
    %569 = vector.broadcast %cst_282 : f32 to vector<2x64xf32>
    %570 = arith.subf %569, %562 : vector<2x64xf32>
    %571 = arith.mulf %570, %568 : vector<2x64xf32>
    %572 = arith.mulf %562, %539 : vector<2x64xf32>
    %573 = arith.addf %571, %572 : vector<2x64xf32>
    %c0_283 = arith.constant 0 : index
    %c0_284 = arith.constant 0 : index
    %c0_285 = arith.constant 0 : index
    %574 = vector.load %arg7[%c0_283, %c0_284, %c0_285] : memref<3x64x64xf32, #tpu.memory_space<vmem>>, vector<1x64x64xf32>
    %575 = vector.shape_cast %574 : vector<1x64x64xf32> to vector<64x64xf32>
    %cst_286 = arith.constant dense<0.000000e+00> : vector<2x64xf32>
    %576 = tpu.matmul %573, %575, %cst_286 {dimension_numbers = #tpu.dot_dimension_numbers<[1], [0], [0], [1], [0, 0, 1, 1], [], []>, precision = #tpu.contract_precision<fp32>} : vector<2x64xf32>, vector<64x64xf32>, vector<2x64xf32> -> vector<2x64xf32>
    %c1_287 = arith.constant 1 : index
    %c0_288 = arith.constant 0 : index
    %c0_289 = arith.constant 0 : index
    %577 = vector.load %arg7[%c1_287, %c0_288, %c0_289] : memref<3x64x64xf32, #tpu.memory_space<vmem>>, vector<1x64x64xf32>
    %578 = vector.shape_cast %577 : vector<1x64x64xf32> to vector<64x64xf32>
    %cst_290 = arith.constant dense<0.000000e+00> : vector<2x64xf32>
    %579 = tpu.matmul %573, %578, %cst_290 {dimension_numbers = #tpu.dot_dimension_numbers<[1], [0], [0], [1], [0, 0, 1, 1], [], []>, precision = #tpu.contract_precision<fp32>} : vector<2x64xf32>, vector<64x64xf32>, vector<2x64xf32> -> vector<2x64xf32>
    %c2_291 = arith.constant 2 : index
    %c0_292 = arith.constant 0 : index
    %c0_293 = arith.constant 0 : index
    %580 = vector.load %arg7[%c2_291, %c0_292, %c0_293] : memref<3x64x64xf32, #tpu.memory_space<vmem>>, vector<1x64x64xf32>
    %581 = vector.shape_cast %580 : vector<1x64x64xf32> to vector<64x64xf32>
    %cst_294 = arith.constant dense<0.000000e+00> : vector<2x64xf32>
    %582 = tpu.matmul %573, %581, %cst_294 {dimension_numbers = #tpu.dot_dimension_numbers<[1], [0], [0], [1], [0, 0, 1, 1], [], []>, precision = #tpu.contract_precision<fp32>} : vector<2x64xf32>, vector<64x64xf32>, vector<2x64xf32> -> vector<2x64xf32>
    %583 = vector.extract_strided_slice %319 {offsets = [14, 0], sizes = [2, 64], strides = [1, 1]} : vector<16x64xf32> to vector<2x64xf32>
    %584 = arith.addf %583, %576 : vector<2x64xf32>
    %585 = arith.negf %584 : vector<2x64xf32>
    %586 = math.exp %585 : vector<2x64xf32>
    %cst_295 = arith.constant 1.000000e+00 : f32
    %587 = vector.broadcast %cst_295 : f32 to vector<2x64xf32>
    %588 = arith.addf %587, %586 : vector<2x64xf32>
    %589 = arith.divf %587, %588 : vector<2x64xf32>
    %590 = vector.extract_strided_slice %326 {offsets = [14, 0], sizes = [2, 64], strides = [1, 1]} : vector<16x64xf32> to vector<2x64xf32>
    %591 = arith.addf %590, %579 : vector<2x64xf32>
    %592 = arith.negf %591 : vector<2x64xf32>
    %593 = math.exp %592 : vector<2x64xf32>
    %cst_296 = arith.constant 1.000000e+00 : f32
    %594 = vector.broadcast %cst_296 : f32 to vector<2x64xf32>
    %595 = arith.addf %594, %593 : vector<2x64xf32>
    %596 = arith.divf %594, %595 : vector<2x64xf32>
    %597 = vector.extract_strided_slice %333 {offsets = [14, 0], sizes = [2, 64], strides = [1, 1]} : vector<16x64xf32> to vector<2x64xf32>
    %598 = vector.broadcast %334 : vector<1x64xf32> to vector<2x64xf32>
    %599 = arith.addf %582, %598 : vector<2x64xf32>
    %600 = arith.mulf %589, %599 : vector<2x64xf32>
    %601 = arith.addf %597, %600 : vector<2x64xf32>
    %602 = math.tanh %601 : vector<2x64xf32>
    %cst_297 = arith.constant 1.000000e+00 : f32
    %603 = vector.broadcast %cst_297 : f32 to vector<2x64xf32>
    %604 = arith.subf %603, %596 : vector<2x64xf32>
    %605 = arith.mulf %604, %602 : vector<2x64xf32>
    %606 = arith.mulf %596, %573 : vector<2x64xf32>
    %607 = arith.addf %605, %606 : vector<2x64xf32>
    %c0_298 = arith.constant 0 : index
    %c0_299 = arith.constant 0 : index
    %608 = vector.load %arg9[%c0_298, %c0_299] : memref<64x1xf32, #tpu.memory_space<vmem>>, vector<64x1xf32>
    %c0_300 = arith.constant 0 : index
    %c0_301 = arith.constant 0 : index
    %609 = vector.load %arg10[%c0_300, %c0_301] : memref<1x1xf32, #tpu.memory_space<vmem>>, vector<1x1xf32>
    %610 = vector.extract_strided_slice %607 {offsets = [0, 0], sizes = [2, 32], strides = [1, 1]} : vector<2x64xf32> to vector<2x32xf32>
    %611 = vector.extract_strided_slice %369 {offsets = [0, 32], sizes = [2, 32], strides = [1, 1]} : vector<2x64xf32> to vector<2x32xf32>
    %612 = tpu.concatenate %610, %611 in 1 : vector<2x32xf32>, vector<2x32xf32> -> vector<2x64xf32>
    %cst_302 = arith.constant dense<0.000000e+00> : vector<2x1xf32>
    %613 = tpu.matmul %612, %608, %cst_302 {dimension_numbers = #tpu.dot_dimension_numbers<[1], [0], [0], [1], [0, 0, 1, 1], [], []>, precision = #tpu.contract_precision<fp32>} : vector<2x64xf32>, vector<64x1xf32>, vector<2x1xf32> -> vector<2x1xf32>
    %614 = vector.broadcast %609 : vector<1x1xf32> to vector<2x1xf32>
    %615 = arith.addf %613, %614 : vector<2x1xf32>
    %cst_303 = arith.constant 0.000000e+00 : f32
    %616 = vector.broadcast %cst_303 : f32 to vector<2x1xf32>
    %617 = arith.maximumf %615, %616 : vector<2x1xf32>
    %c0_304 = arith.constant 0 : index
    %c0_305 = arith.constant 0 : index
    %c0_306 = arith.constant 0 : index
    %618 = vector.load %arg11[%c0_304, %c0_305, %c0_306] : memref<1x2x1xf32, #tpu.memory_space<vmem>>, vector<1x2x1xf32>
    %619 = vector.shape_cast %618 : vector<1x2x1xf32> to vector<2x1xf32>
    %620 = vector.shape_cast %617 : vector<2x1xf32> to vector<1x2x1xf32>
    tpu.vector_store %arg11[%c0_304, %c0_305, %c0_306], %620 {strides = array<i32>} : memref<1x2x1xf32, #tpu.memory_space<vmem>>, vector<1x2x1xf32>,
    return
  }
}

</mosaic_0001>

<bundles_post_ra>
// kernel: gru_forward.1
= control target key start
LH: loop header
LB: loop body
LE: loop exit
PB: predicated region body
PF: predicated region fallthrough
CT: control target
= control target key end

     0   :  { %vm57_vm0 = vcmask 1041408   ;;  %vm50_vm1 = vcmask 15360   ;;  %v50580_v35 = vmov 0.0|0.0   ;;  %vm44875_vm2 = vmmov 0   ;;  %s44877_s18 = smov 64   ;;  %s50556_s1 = inlined_call_operand.vmem [shape: f32[3,2,64], index: 1, kind: input, shape index: {}]   ;;  %s50557_s0 = inlined_call_operand.vmem [shape: f32[16,2], index: 0, kind: input, shape index: {}]   ;;  %s50558_s3 = inlined_call_operand.vmem [shape: f32[3,64,64], index: 3, kind: input, shape index: {}]   ;;  %s50559_s2 = inlined_call_operand.vmem [shape: f32[3,1,64], index: 2, kind: input, shape index: {}]   ;;  %s50560_s4 = inlined_call_operand.vmem [shape: f32[1,64], index: 4, kind: input, shape index: {}]   ;;  %s50561_s5 = inlined_call_operand.vmem [shape: f32[3,128,64], index: 5, kind: input, shape index: {}]   ;;  %s50562_s7 = inlined_call_operand.vmem [shape: f32[3,64,64], index: 7, kind: input, shape index: {}]   ;;  %s50563_s6 = inlined_call_operand.vmem [shape: f32[3,1,64], index: 6, kind: input, shape index: {}]   ;;  %s50564_s8 = inlined_call_operand.vmem [shape: f32[1,64], index: 8, kind: input, shape index: {}]   ;;  %s50565_s9 = inlined_call_operand.vmem [shape: f32[64,1], index: 9, kind: input, shape index: {}]   ;;  %s50566_s10 = inlined_call_operand.<no memory space> [shape: f32[1,1], index: 10, kind: input, shape index: {}]   ;;  %s50567_s11 = inlined_call_operand.vmem [shape: f32[1,2,1], index: 11, kind: output, shape index: {}]  }
   0x1   :  { %v42_v0 = vld [vmem:[%s50556_s1] sm:$0x3]  ;;  %v30663_v2 = vld [vmem:[%s50556_s1 + $0x2] sm:$0x3]  ;;  %v41_v6 = vld [vmem:[%s50557_s0 + $0x8] sm:$0xff]  ;;  %v50568_v54 = vmov 0.0  }
   0x2   :  { %v40_v1 = vld [vmem:[%s50557_s0] sm:$0xff]  ;;  %v59_v3 = vsel %vm57_vm0, %v42_v0, 0  ;;  %v561_v5 = vsel %vm57_vm0, %v30663_v2, 0  ;;  %v55_v10 = vsel %vm50_vm1, %v41_v6, 0  ;;  %v1556_v31 = vld [vmem:[%s50558_s3 + $0x8] sm:$0xff]  ;;  %v1557_v36 = vld [vmem:[%s50558_s3 + $0x10] sm:$0xff] }
   0x3   :  { %v52_v4 = vsel %vm50_vm1, %v40_v1, 0  ;;  %v44952_v7 = vand.u32 4294901760, %v59_v3  ;;  %v44956_v9 = vand.u32 4294901760, %v561_v5  ;;  %v44958_v11 = vand.u32 4294901760, %v55_v10  ;;  %v30666_v28 = vld [vmem:[%s50556_s1 + $0x4] sm:$0x3] }
   0x4   :  { %v44954_v8 = vand.u32 4294901760, %v52_v4  ;;  %v1063_v29 = vsel %vm57_vm0, %v30666_v28, 0  ;;  %v1555_v30 = vld [vmem:[%s50558_s3] sm:$0xff]  ;;  %v1571_v34 = vand.u32 4294901760, %v1556_v31  ;;  %v1558_v37 = vld [vmem:[%s50558_s3 + $0x18] sm:$0xff]  ;;  %v1574_v42 = vand.u32 4294901760, %v1557_v36 }
   0x5   :  { %33797 = vmatprep.subr.mxu0 %v44952_v7  ;;  %v149_v13 = vsub.f32 %v59_v3, %v44952_v7  ;;  %v651_v14 = vsub.f32 %v561_v5, %v44956_v9  ;;  %v44969_v15 = vsub.f32 %v55_v10, %v44958_v11  ;;  %v45017_v32 = vand.u32 4294901760, %v1063_v29  ;;  %v1559_v44 = vld [vmem:[%s50558_s3 + $0x20] sm:$0xff]  ;;  %v1560_v45 = vld [vmem:[%s50558_s3 + $0x28] sm:$0xff]  ;;  %v1561_v47 = vld [vmem:[%s50558_s3 + $0x30] sm:$0xff] }
   0x6   :  { %v44962_v12 = vsub.f32 %v52_v4, %v44954_v8  ;;  %33834 = vmatprep.mubr.f32.mxu1 %v44954_v8  ;;  %33798 = vmatpush3.msra.mxu0 %v44952_v7  ;;  %v1568_v33 = vand.u32 4294901760, %v1555_v30  ;;  %v45033_v40 = vsub.f32 %v1556_v31, %v1571_v34  ;;  %v1577_v43 = vand.u32 4294901760, %v1558_v37  ;;  %v1562_v48 = vld [vmem:[%s50558_s3 + $0x38] sm:$0xff] }
   0x7   :  { %v150_v17 = vand.u32 4294901760, %v149_v13  ;;  %v652_v18 = vand.u32 4294901760, %v651_v14  ;;  %v44975_v19 = vand.u32 4294901760, %v44969_v15  ;;  %v45029_v38 = vsub.f32 %v1063_v29, %v45017_v32 }
   0x8   :  { %v44972_v16 = vand.u32 4294901760, %v44962_v12  ;;  %v45031_v39 = vsub.f32 %v1555_v30, %v1568_v33  ;;  %v45035_v41 = vpack.c.bf16 %v1571_v34, %v1568_v33  ;;  %v1580_v46 = vand.u32 4294901760, %v1559_v44 }
   0x9   :  { %v151_v21 = vsub.f32 %v149_v13, %v150_v17  ;;  %v653_v22 = vsub.f32 %v651_v14, %v652_v18  ;;  %v140_v23 = vsub.f32 %v44969_v15, %v44975_v19  ;;  %v45055_v49 = vand.u32 4294901760, %v45029_v38 }
   0xa   :  { %v130_v20 = vsub.f32 %v44962_v12, %v44972_v16  ;;  %v1653_v50 = vand.u32 4294901760, %v45031_v39  ;;  %v1660_v51 = vand.u32 4294901760, %v45033_v40  ;;  %v45060_v52 = vpack.c.bf16 %v1577_v43, %v1574_v42 }
   0xb   :  { %v152_v25 = vand.u32 4294901760, %v151_v21  ;;  %v654_v26 = vand.u32 4294901760, %v653_v22  ;;  %v44983_v27 = vand.u32 4294901760, %v140_v23  ;;  %v1583_v53 = vand.u32 4294901760, %v1560_v45 }
   0xc   :  { %v44981_v24 = vand.u32 4294901760, %v130_v20  ;;  %v45064_v55 = vsub.f32 %v1557_v36, %v1574_v42  ;;  %v45066_v56 = vsub.f32 %v1558_v37, %v1577_v43  ;;  %v1586_v57 = vand.u32 4294901760, %v1561_v47  ;;  %v30672_v42 = vld [vmem:[%s50558_s3 + $0x58] sm:$0xff] }
   0xd   :  { %33802 = vmatprep.subr.mxu0 %v152_v25  ;;  %33832 = vmatprep.subr.mxu1 %v654_v26  ;;  %v1589_v58 = vand.u32 4294901760, %v1562_v48  ;;  %v45069_v59 = vsub.f32 %v1559_v44, %v1580_v46  ;;  %v1155_v60 = vsub.f32 %v45029_v38, %v45055_v49  ;;  %v1654_v61 = vsub.f32 %v45031_v39, %v1653_v50 }
   0xe   :  { %33799 = vmatprep.mubr.f32.mxu0 %v44981_v24  ;;  %33833 = vmatpush3.msra.mxu1 %v654_v26  ;;  %v1661_v62 = vsub.f32 %v45033_v40, %v1660_v51  ;;  %v45079_v63 = vsub.f32 %v1560_v45, %v1583_v53  ;;  %v45082_v0 = vpack.c.bf16 %v1583_v53, %v1580_v46  ;;  %v1667_v1 = vand.u32 4294901760, %v45064_v55 }
   0xf   :  { %33800 = vmatmul.mubr.f32.vlgmr.msra.gmra.mrb[0].mxu0 %v44983_v27  ;;  %33835 = vmatmul.mubr.f32.vlgmr.msra.gmra.mrb[0].mxu1 %v44958_v11  ;;  %v1674_v2 = vand.u32 4294901760, %v45066_v56  ;;  %v45090_v3 = vpack.c.bf16 %v1589_v58, %v1586_v57  ;;  %v1681_v4 = vand.u32 4294901760, %v45069_v59  ;;  %v1156_v5 = vand.u32 4294901760, %v1155_v60  ;;  %v30676_v60 = vld [vmem:[%s50558_s3 + $0x78] sm:$0xff] }
  0x10   :  { %33803 = vmatpush3.msra.mxu0 %v152_v25  ;;  %33804 = vmatprep.mubr.f32.mxu0 %v44954_v8  ;;  %v1655_v6 = vand.u32 4294901760, %v1654_v61  ;;  %v1688_v10 = vand.u32 4294901760, %v45079_v63  ;;  %v45153_v37 = vpack.c.bf16 %v45033_v40, %v45031_v39  ;;  %v30671_v40 = vld [vmem:[%s50558_s3 + $0x50] sm:$0xff]  ;;  %v2123_v46 = vand.u32 4294901760, %v30672_v42 }
  0x11   :  { %33807 = vmatprep.subr.mxu0 %v149_v13  ;;  %33837 = vmatprep.subr.mxu1 %v651_v14  ;;  %v1682_v20 = vsub.f32 %v45069_v59, %v1681_v4  ;;  %v2120_v45 = vand.u32 4294901760, %v30671_v40  ;;  %vm1563_vm3 = vcmask 523264   ;;  %vm30106_vm4 = vcmask 261120  }
  0x12   :  { %33838 = vmatpush3.msra.mxu1 %v651_v14  ;;  %33839 = vmatprep.mubr.f32.mxu1 %v44962_v12  ;;  %v45102_v14 = vsub.f32 %v1561_v47, %v1586_v57  ;;  %v1689_v21 = vsub.f32 %v45079_v63, %v1688_v10  ;;  %v45234_v43 = vpack.c.bf16 %v1688_v10, %v1681_v4  ;;  %v30673_v47 = vld [vmem:[%s50558_s3 + $0x60] sm:$0xff]  ;;  %v30675_v57 = vld [vmem:[%s50558_s3 + $0x70] sm:$0xff]  ;;  %vm30656_vm5 = vcmask 1024  }
  0x13   :  { %33842 = vmatprep.subr.mxu1 %v44956_v9  ;;  %v45294_v10 = vpack.c.bf16 %v2123_v46, %v2120_v45 }
  0x14   :  { %v1695_v25 = vand.u32 4294901760, %v45102_v14  ;;  %v1690_v29 = vand.u32 4294901760, %v1689_v21 }
  0x16   :  { %v1696_v30 = vsub.f32 %v45102_v14, %v1695_v25 }
  0x17   :  { %33805 = vmatmul.mubr.f32.vlgmr.msra.gmra.mrb[0].mxu0 %v44958_v11  ;;  %33840 = vmatmul.mubr.f32.vlgmr.msra.gmra.mrb[0].mxu1 %v44969_v15 }
  0x18   :  { %33808 = vmatpush3.msra.mxu0 %v149_v13  ;;  %33809 = vmatprep.mubr.f32.mxu0 %v44962_v12  ;;  %v1668_v13 = vsub.f32 %v45064_v55, %v1667_v1  ;;  %v1697_v33 = vand.u32 4294901760, %v1696_v30 }
  0x19   :  { %33812 = vmatprep.subr.mxu0 %v44952_v7  ;;  %33843 = vmatpush3.msra.mxu1 %v44956_v9 }
  0x1a   :  { %33844 = vmatprep.mubr.f32.mxu1 %v44972_v16  ;;  %33847 = vmatprep.subr.mxu1 %v652_v18  ;;  %v1669_v22 = vand.u32 4294901760, %v1668_v13 }
  0x1f   :  { %33810 = vmatmul.mubr.f32.vlgmr.msra.gmra.mrb[0].mxu0 %v44969_v15  ;;  %33845 = vmatmul.mubr.f32.vlgmr.msra.gmra.mrb[0].mxu1 %v44975_v19 }
  0x20   :  { %33813 = vmatpush3.msra.mxu0 %v44952_v7  ;;  %33814 = vmatprep.mubr.f32.mxu0 %v44972_v16 }
  0x21   :  { %33817 = vmatprep.subr.mxu0 %v150_v17  ;;  %33848 = vmatpush3.msra.mxu1 %v652_v18 }
  0x22   :  { %33849 = vmatprep.mubr.f32.mxu1 %v44954_v8  ;;  %33852 = vmatprep.subr.mxu1 %v44956_v9 }
  0x27   :  { %33815 = vmatmul.mubr.f32.vlgmr.msra.gmra.mrb[0].mxu0 %v44975_v19  ;;  %33850 = vmatmul.mubr.f32.vlgmr.msra.gmra.mrb[0].mxu1 %v44958_v11 }
  0x28   :  { %33818 = vmatpush3.msra.mxu0 %v150_v17  ;;  %33819 = vmatprep.mubr.f32.mxu0 %v44954_v8  ;;  %v45104_v17 = vsub.f32 %v1562_v48, %v1589_v58  ;;  %v30674_v48 = vld [vmem:[%s50558_s3 + $0x68] sm:$0xff]  ;;  %v45266_v58 = vsub.f32 %v30671_v40, %v2120_v45 }
  0x29   :  { %33822 = vmatprep.subr.mxu0 %v44952_v7  ;;  %33853 = vmatpush3.msra.mxu1 %v44956_v9  ;;  %v2129_v53 = vand.u32 4294901760, %v30674_v48 }
  0x2a   :  { %33854 = vmatprep.mubr.f32.mxu1 %v44954_v8  ;;  %40103 = vmatprep.subr.bf16.mxu1 %v50580_v35  ;;  %v1702_v26 = vand.u32 4294901760, %v45104_v17 }
  0x2f   :  { %33820 = vmatmul.mubr.f32.vlgmr.msra.gmra.mrb[0].mxu0 %v44958_v11  ;;  %33855 = vmatmul.mubr.f32.vlgmr.msra.gmra.mrb[0].mxu1 %v44958_v11 }
  0x30   :  { %33823 = vmatpush3.msra.mxu0 %v44952_v7  ;;  %33824 = vmatprep.mubr.f32.mxu0 %v44954_v8  ;;  %v1662_v7 = vand.u32 4294901760, %v1661_v62 }
  0x31   :  { %33827 = vmatprep.subr.mxu0 %v44956_v9  ;;  %40105 = vmatpush3.bf16.msra.mxu1 %v45035_v41 }
  0x32   :  { %33903 = vmatprep.mubr.msk.f32.mxu1 %vm44875_vm2, %v50568_v54  ;;  %40106 = vmatprep.subr.bf16.mxu1 %v50580_v35  ;;  %v45110_v18 = vpack.c.bf16 %v1662_v7, %v1655_v6  ;;  %v2213_v6 = vand.u32 4294901760, %v45266_v58 }
  0x34   :  { %50758 = vst [vmem:[#allocation4_spill] sm:$0xff] %v45110_v18  ;;  %v2214_v21 = vsub.f32 %v45266_v58, %v2213_v6 }
  0x35   :  { %40108 = vmatpush3.bf16.msra.mxu1 %v45060_v52 }
  0x36   :  { %40109 = vmatprep.subr.bf16.mxu1 %v50580_v35 }
  0x37   :  { %33825 = vmatmul.mubr.f32.vlgmr.msra.gmra.mrb[0].mxu0 %v44958_v11 }
  0x38   :  { %33828 = vmatpush3.msra.mxu0 %v44956_v9  ;;  %33829 = vmatprep.mubr.f32.mxu0 %v44981_v24  ;;  %v1675_v9 = vsub.f32 %v45066_v56, %v1674_v2 }
  0x39   :  { %33857 = vmatprep.subr.mxu0 %v45017_v32  ;;  %40111 = vmatpush3.bf16.msra.mxu1 %v45082_v0 }
  0x3a   :  { %40112 = vmatprep.subr.bf16.mxu1 %v50580_v35  ;;  %v1676_v23 = vand.u32 4294901760, %v1675_v9 }
  0x3b   :  { %33830 = vmatmul.mubr.f32.vlgmr.msra.gmra.mrb[2].mxu0 %v44983_v27 }
  0x3c   :  { %33858 = vmatpush3.msra.mxu0 %v45017_v32  ;;  %33859 = vmatprep.mubr.f32.mxu0 %v44981_v24  ;;  %v1683_v24 = vand.u32 4294901760, %v1682_v20  ;;  %v45127_v28 = vpack.c.bf16 %v1676_v23, %v1669_v22 }
  0x3d   :  { %33862 = vmatprep.subr.mxu0 %v1156_v5  ;;  %40114 = vmatpush3.bf16.msra.mxu1 %v45090_v3 }
  0x3e   :  { %40115 = vmatprep.subr.bf16.mxu1 %v50580_v35  ;;  %50759 = vst [vmem:[#allocation5_spill] sm:$0xff] %v45127_v28  ;;  %v45139_v31 = vpack.c.bf16 %v1690_v29, %v1683_v24 }
  0x3f   :  { %33860 = vmatmul.mubr.f32.vlgmr.msra.gmra.mrb[4].mxu0 %v44983_v27  ;;  %v1703_v27 = vsub.f32 %v45104_v17, %v1702_v26 }
  0x40   :  { %33863 = vmatpush3.msra.mxu0 %v1156_v5  ;;  %33864 = vmatprep.mubr.f32.mxu0 %v44954_v8  ;;  %50760 = vst [vmem:[#allocation6_spill] sm:$0xff] %v45139_v31  ;;  %v2135_v5 = vand.u32 4294901760, %v30676_v60 }
  0x41   :  { %33904 = vmatmul.mubr.f32.vlgmr.msra.gmra.mrb[2].mxu1 %v50568_v54  ;;  %33867 = vmatprep.subr.mxu0 %v45029_v38  ;;  %v1704_v34 = vand.u32 4294901760, %v1703_v27  ;;  %v2215_v27 = vand.u32 4294901760, %v2214_v21 }
  0x42   :  { %40117 = vmatpush3.bf16.msra.mxu1 %v45110_v18  ;;  %33922 = vmatprep.mubr.msk.f32.mxu1 %vm44875_vm2, %v50568_v54  ;;  %v45310_v23 = vsub.f32 %v30676_v60, %v2135_v5 }
  0x43   :  { %40118 = vmatprep.subr.bf16.mxu1 %v50580_v35  ;;  %v45147_v36 = vpack.c.bf16 %v1704_v34, %v1697_v33 }
  0x44   :  { %v2248_v34 = vand.u32 4294901760, %v45310_v23 }
  0x45   :  { %50761 = vst [vmem:[#allocation7_spill] sm:$0xff] %v45147_v36 }
  0x46   :  { %40120 = vmatpush3.bf16.msra.mxu1 %v45127_v28 }
  0x47   :  { %33865 = vmatmul.mubr.f32.vlgmr.msra.gmra.mrb[4].mxu0 %v44958_v11  ;;  %40121 = vmatprep.subr.bf16.mxu1 %v50580_v35 }
  0x48   :  { %33868 = vmatpush3.msra.mxu0 %v45029_v38  ;;  %33869 = vmatprep.mubr.f32.mxu0 %v44962_v12  ;;  %v45164_v12 = vpack.c.bf16 %v45066_v56, %v45064_v55  ;;  %v45216_v38 = vpack.c.bf16 %v1674_v2, %v1667_v1  ;;  %v45283_v2 = vsub.f32 %v30674_v48, %v2129_v53 }
  0x49   :  { %33872 = vmatprep.subr.mxu0 %v45017_v32 }
  0x4a   :  { %40123 = vmatpush3.bf16.msra.mxu1 %v45139_v31 }
  0x4b   :  { %40124 = vmatprep.subr.bf16.mxu1 %v50580_v35 }
  0x4e   :  { %40126 = vmatpush3.bf16.msra.mxu1 %v45147_v36 }
  0x4f   :  { %33870 = vmatmul.mubr.f32.vlgmr.msra.gmra.mrb[4].mxu0 %v44969_v15  ;;  %40127 = vmatprep.subr.bf16.mxu1 %v50580_v35  ;;  %v45172_v15 = vpack.c.bf16 %v45079_v63, %v45069_v59  ;;  %v45268_v59 = vsub.f32 %v30672_v42, %v2123_v46  ;;  %v2132_v63 = vand.u32 4294901760, %v30675_v57  ;;  %v2249_v42 = vsub.f32 %v45310_v23, %v2248_v34 }
  0x50   :  { %33873 = vmatpush3.msra.mxu0 %v45017_v32  ;;  %33874 = vmatprep.mubr.f32.mxu0 %v44972_v16  ;;  %v45182_v16 = vpack.c.bf16 %v45104_v17, %v45102_v14  ;;  %v2234_v14 = vand.u32 4294901760, %v45283_v2 }
  0x51   :  { %33923 = vmatmul.mubr.f32.vlgmr.msra.gmra.mrb[4].mxu1 %v50568_v54  ;;  %33877 = vmatprep.subr.mxu0 %v45055_v49  ;;  %v2220_v7 = vand.u32 4294901760, %v45268_v59  ;;  %v45301_v17 = vsub.f32 %v30675_v57, %v2132_v63  ;;  %v2250_v48 = vand.u32 4294901760, %v2249_v42 }
  0x52   :  { %40129 = vmatpush3.bf16.msra.mxu1 %v45153_v37  ;;  %33941 = vmatprep.mubr.msk.f32.mxu1 %vm44875_vm2, %v50568_v54  ;;  %v2235_v24 = vsub.f32 %v45283_v2, %v2234_v14 }
  0x53   :  { %40130 = vmatprep.subr.bf16.mxu1 %v50580_v35  ;;  %v2221_v22 = vsub.f32 %v45268_v59, %v2220_v7  ;;  %v2241_v29 = vand.u32 4294901760, %v45301_v17  ;;  %v45378_v60 = vpack.c.bf16 %v45310_v23, %v45301_v17 }
  0x55   :  { %v2222_v33 = vand.u32 4294901760, %v2221_v22  ;;  %v2242_v40 = vsub.f32 %v45301_v17, %v2241_v29  ;;  %v30683_v17 = vld [vmem:[%s50558_s3 + $0xb0] sm:$0xff] }
  0x56   :  { %40132 = vmatpush3.bf16.msra.mxu1 %v45164_v12 }
  0x57   :  { %33875 = vmatmul.mubr.f32.vlgmr.msra.gmra.mrb[4].mxu0 %v44975_v19  ;;  %40133 = vmatprep.subr.bf16.mxu1 %v50580_v35  ;;  %v45200_v19 = vpack.c.bf16 %v1660_v51, %v1653_v50  ;;  %v45254_v50 = vpack.c.bf16 %v1702_v26, %v1695_v25  ;;  %v2126_v51 = vand.u32 4294901760, %v30673_v47 }
  0x58   :  { %33878 = vmatpush3.msra.mxu0 %v45055_v49  ;;  %33879 = vmatprep.mubr.f32.mxu0 %v44954_v8 }
  0x59   :  { %33882 = vmatprep.subr.mxu0 %v45017_v32  ;;  %v45281_v1 = vsub.f32 %v30673_v47, %v2126_v51  ;;  %v45314_v25 = vpack.c.bf16 %v2129_v53, %v2126_v51  ;;  %v2243_v47 = vand.u32 4294901760, %v2242_v40  ;;  %v45358_v51 = vpack.c.bf16 %v45268_v59, %v45266_v58 }
  0x5a   :  { %40135 = vmatpush3.bf16.msra.mxu1 %v45172_v15 }
  0x5b   :  { %40136 = vmatprep.subr.bf16.mxu1 %v50580_v35  ;;  %v2227_v9 = vand.u32 4294901760, %v45281_v1  ;;  %v45364_v53 = vpack.c.bf16 %v2250_v48, %v2243_v47  ;;  %v45370_v57 = vpack.c.bf16 %v45283_v2, %v45281_v1  ;;  %v30680_v2 = vld [vmem:[%s50558_s3 + $0x98] sm:$0xff] }
  0x5d   :  { %v2228_v26 = vsub.f32 %v45281_v1, %v2227_v9  ;;  %v30679_v1 = vld [vmem:[%s50558_s3 + $0x90] sm:$0xff] }
  0x5e   :  { %40138 = vmatpush3.bf16.msra.mxu1 %v45182_v16 }
  0x5f   :  { %33880 = vmatmul.mubr.f32.vlgmr.msra.gmra.mrb[4].mxu0 %v44958_v11  ;;  %40139 = vmatprep.subr.bf16.mxu1 %v50580_v35 }
  0x60   :  { %33883 = vmatpush3.msra.mxu0 %v45017_v32  ;;  %33884 = vmatprep.mubr.f32.mxu0 %v44954_v8  ;;  %v30669_v8 = vld [vmem:[%s50558_s3 + $0x40] sm:$0xff]  ;;  %v30670_v32 = vld [vmem:[%s50558_s3 + $0x48] sm:$0xff] }
  0x61   :  { %33942 = vmatmul.mubr.f32.vlgmr.msra.gmra.mrb[6].mxu1 %v50568_v54  ;;  %40151 = vmatprep.subr.bf16.mxu0 %v50580_v35  ;;  %v2117_v39 = vand.u32 4294901760, %v30670_v32 }
  0x62   :  { %40141 = vmatpush3.bf16.msra.mxu1 %v45035_v41  ;;  %33960 = vmatprep.mubr.msk.f32.mxu1 %vm44875_vm2, %v50568_v54 }
  0x63   :  { %40142 = vmatprep.subr.bf16.mxu1 %v50580_v35  ;;  %v45246_v49 = vsub.f32 %v30670_v32, %v2117_v39  ;;  %v2229_v32 = vand.u32 4294901760, %v2228_v26 }
  0x65   :  { %v2206_v56 = vand.u32 4294901760, %v45246_v49 }
  0x66   :  { %40144 = vmatpush3.bf16.msra.mxu1 %v45060_v52 }
  0x67   :  { %33885 = vmatmul.mubr.f32.vlgmr.msra.gmra.mrb[4].mxu0 %v44958_v11  ;;  %40145 = vmatprep.subr.bf16.mxu1 %v50580_v35  ;;  %v2114_v11 = vand.u32 4294901760, %v30669_v8  ;;  %v2207_v4 = vsub.f32 %v45246_v49, %v2206_v56 }
  0x68   :  { %40153 = vmatpush3.bf16.msra.mxu0 %v45200_v19  ;;  %33979 = vmatprep.mubr.msk.f32.mxu0 %vm44875_vm2, %v50568_v54 }
  0x69   :  { %40154 = vmatprep.subr.bf16.mxu0 %v50580_v35  ;;  %v45237_v44 = vsub.f32 %v30669_v8, %v2114_v11  ;;  %v45275_v61 = vpack.c.bf16 %v2117_v39, %v2114_v11  ;;  %v2208_v20 = vand.u32 4294901760, %v2207_v4  ;;  %v45330_v8 = vpack.c.bf16 %v2135_v5, %v2132_v63 }
  0x6a   :  { %40147 = vmatpush3.bf16.msra.mxu1 %v45082_v0  ;;  %v45335_v11 = vpack.c.bf16 %v2222_v33, %v2215_v27  ;;  %v2236_v39 = vand.u32 4294901760, %v2235_v24  ;;  %v45402_v63 = vpack.c.bf16 %v2220_v7, %v2213_v6  ;;  %v2686_v7 = vand.u32 4294901760, %v30679_v1 }
  0x6b   :  { %40148 = vmatprep.subr.bf16.mxu1 %v50580_v35  ;;  %v2199_v55 = vand.u32 4294901760, %v45237_v44  ;;  %v45347_v45 = vpack.c.bf16 %v45246_v49, %v45237_v44  ;;  %v30677_v49 = vld [vmem:[%s50558_s3 + $0x80] sm:$0xff]  ;;  %v2698_v33 = vand.u32 4294901760, %v30683_v17 }
  0x6c   :  { %40156 = vmatpush3.bf16.msra.mxu0 %v45216_v38  ;;  %v45351_v46 = vpack.c.bf16 %v2236_v39, %v2229_v32  ;;  %v2680_v58 = vand.u32 4294901760, %v30677_v49  ;;  %v45467_v23 = vsub.f32 %v30679_v1, %v2686_v7 }
  0x6d   :  { %40157 = vmatprep.subr.bf16.mxu0 %v50580_v35  ;;  %v2200_v62 = vsub.f32 %v45237_v44, %v2199_v55  ;;  %v45414_v44 = vpack.c.bf16 %v2234_v14, %v2227_v9  ;;  %v30681_v9 = vld [vmem:[%s50558_s3 + $0xa0] sm:$0xff]  ;;  %v30682_v14 = vld [vmem:[%s50558_s3 + $0xa8] sm:$0xff] }
  0x6e   :  { %40150 = vmatpush3.bf16.msra.mxu1 %v45090_v3  ;;  %v45442_v4 = vsub.f32 %v30677_v49, %v2680_v58  ;;  %v2695_v27 = vand.u32 4294901760, %v30682_v14  ;;  %v2779_v40 = vand.u32 4294901760, %v45467_v23 }
  0x6f   :  { %40163 = vmatprep.subr.bf16.mxu1 %v50580_v35  ;;  %v2201_v13 = vand.u32 4294901760, %v2200_v62  ;;  %v45391_v62 = vpack.c.bf16 %v2206_v56, %v2199_v55  ;;  %v30678_v55 = vld [vmem:[%s50558_s3 + $0x88] sm:$0xff]  ;;  %v45428_v56 = vpack.c.bf16 %v2248_v34, %v2241_v29  ;;  %v2692_v29 = vand.u32 4294901760, %v30681_v9 }
  0x70   :  { %40159 = vmatpush3.bf16.msra.mxu0 %v45234_v43  ;;  %v2683_v59 = vand.u32 4294901760, %v30678_v55  ;;  %v2765_v21 = vand.u32 4294901760, %v45442_v4  ;;  %v45492_v49 = vsub.f32 %v30682_v14, %v2695_v27  ;;  %v2780_v1 = vsub.f32 %v45467_v23, %v2779_v40 }
  0x71   :  { %33961 = vmatmul.mubr.f32.vlgmr.msra.gmra.mrb[8].mxu1 %v50568_v54  ;;  %40160 = vmatprep.subr.bf16.mxu0 %v50580_v35  ;;  %v45325_v30 = vpack.c.bf16 %v2208_v20, %v2201_v13  ;;  %v2689_v13 = vand.u32 4294901760, %v30680_v2  ;;  %v30684_v20 = vld [vmem:[%s50558_s3 + $0xb8] sm:$0xff]  ;;  %v45488_v47 = vpack.c.bf16 %v2695_v27, %v2692_v29  ;;  %v45490_v48 = vsub.f32 %v30681_v9, %v2692_v29 }
  0x72   :  { %40165 = vmatpush3.bf16.msra.mxu1 %v45035_v41  ;;  %33998 = vmatprep.mubr.msk.f32.mxu1 %vm44875_vm2, %v50568_v54  ;;  %v45444_v5 = vsub.f32 %v30678_v55, %v2683_v59  ;;  %v45447_v6 = vpack.c.bf16 %v2683_v59, %v2680_v58  ;;  %v2701_v34 = vand.u32 4294901760, %v30684_v20  ;;  %v2766_v32 = vsub.f32 %v45442_v4, %v2765_v21 }
  0x73   :  { %40166 = vmatprep.subr.bf16.mxu1 %v50580_v35  ;;  %v45469_v26 = vsub.f32 %v30680_v2, %v2689_v13  ;;  %v45472_v24 = vpack.c.bf16 %v2689_v13, %v2686_v7  ;;  %v2793_v7 = vand.u32 4294901760, %v45490_v48  ;;  %v2800_v13 = vand.u32 4294901760, %v45492_v49 }
  0x74   :  { %40162 = vmatpush3.bf16.msra.mxu0 %v45254_v50  ;;  %v2772_v22 = vand.u32 4294901760, %v45444_v5  ;;  %v45496_v55 = vpack.c.bf16 %v2701_v34, %v2698_v33  ;;  %v2767_v58 = vand.u32 4294901760, %v2766_v32  ;;  %v45508_v9 = vsub.f32 %v30683_v17, %v2698_v33 }
  0x75   :  { %40175 = vmatprep.subr.bf16.mxu0 %v50580_v35  ;;  %v2786_v42 = vand.u32 4294901760, %v45469_v26  ;;  %v45510_v14 = vsub.f32 %v30684_v20, %v2701_v34  ;;  %v2781_v27 = vand.u32 4294901760, %v2780_v1  ;;  %v2794_v17 = vsub.f32 %v45490_v48, %v2793_v7 }
  0x76   :  { %40168 = vmatpush3.bf16.msra.mxu1 %v45060_v52  ;;  %v2773_v39 = vsub.f32 %v45444_v5, %v2772_v22  ;;  %v2801_v20 = vsub.f32 %v45492_v49, %v2800_v13  ;;  %v2807_v33 = vand.u32 4294901760, %v45508_v9 }
  0x77   :  { %33980 = vmatmul.mubr.f32.vlgmr.msra.gmra.mrb[6].mxu0 %v50568_v54  ;;  %40169 = vmatprep.subr.bf16.mxu1 %v50580_v35  ;;  %v2787_v2 = vsub.f32 %v45469_v26, %v2786_v42  ;;  %v2814_v34 = vand.u32 4294901760, %v45510_v14 }
  0x78   :  { %40177 = vmatpush3.bf16.msra.mxu0 %v45275_v61  ;;  %34017 = vmatprep.mubr.msk.f32.mxu0 %vm44875_vm2, %v50568_v54  ;;  %v2774_v59 = vand.u32 4294901760, %v2773_v39  ;;  %v2808_v1 = vsub.f32 %v45508_v9, %v2807_v33 }
  0x79   :  { %40178 = vmatprep.subr.bf16.mxu0 %v50580_v35  ;;  %v2788_v32 = vand.u32 4294901760, %v2787_v2  ;;  %v2815_v2 = vsub.f32 %v45510_v14, %v2814_v34 }
  0x7a   :  { %40171 = vmatpush3.bf16.msra.mxu1 %v45082_v0  ;;  %v45517_v29 = vpack.c.bf16 %v2774_v59, %v2767_v58  ;;  %v2795_v58 = vand.u32 4294901760, %v2794_v17  ;;  %v2802_v59 = vand.u32 4294901760, %v2801_v20 }
  0x7b   :  { %40172 = vmatprep.subr.bf16.mxu1 %v50580_v35  ;;  %v45532_v39 = vpack.c.bf16 %v2788_v32, %v2781_v27  ;;  %v2809_v32 = vand.u32 4294901760, %v2808_v1  ;;  %v2816_v17 = vand.u32 4294901760, %v2815_v2  ;;  %v45571_v1 = vpack.c.bf16 %v45492_v49, %v45490_v48  ;;  %v30665_v48 = vld [vmem:[%s50559_s2 + $0x1] ss:$0 sm:$0xff] }
  0x7c   :  { %40180 = vmatpush3.bf16.msra.mxu0 %v45294_v10  ;;  %v45544_v27 = vpack.c.bf16 %v2802_v59, %v2795_v58  ;;  %v45556_v58 = vpack.c.bf16 %v45444_v5, %v45442_v4  ;;  %v45563_v59 = vpack.c.bf16 %v45469_v26, %v45467_v23  ;;  %v45577_v2 = vpack.c.bf16 %v45510_v14, %v45508_v9  ;;  %v30662_v23 = vld [vmem:[%s50559_s2] ss:$0 sm:$0xff] }
  0x7d   :  { %40181 = vmatprep.subr.bf16.mxu0 %v50580_v35  ;;  %50762 = vst [vmem:[#allocation8_spill] sm:$0xff] %v45532_v39  ;;  %v45550_v20 = vpack.c.bf16 %v2816_v17, %v2809_v32  ;;  %50767 = vst [vmem:[#allocation13_spill] sm:$0xff] %v45571_v1  ;;  %v45596_v9 = vpack.c.bf16 %v2772_v22, %v2765_v21  ;;  %v45605_v14 = vpack.c.bf16 %v2786_v42, %v2779_v40 }
  0x7e   :  { %40174 = vmatpush3.bf16.msra.mxu1 %v45090_v3  ;;  %50763 = vst [vmem:[#allocation9_spill] sm:$0xff] %v45544_v27  ;;  %50765 = vst [vmem:[#allocation11_spill] sm:$0xff] %v45556_v58  ;;  %v45615_v4 = vpack.c.bf16 %v2800_v13, %v2793_v7  ;;  %v45619_v5 = vpack.c.bf16 %v2814_v34, %v2807_v33 }
  0x7f   :  { %40187 = vmatprep.subr.bf16.mxu1 %v50580_v35  ;;  %50764 = vst [vmem:[#allocation10_spill] sm:$0xff] %v45550_v20  ;;  %50766 = vst [vmem:[#allocation12_spill] sm:$0xff] %v45563_v59 }
  0x80   :  { %40183 = vmatpush3.bf16.msra.mxu0 %v45314_v25  ;;  %50768 = vst [vmem:[#allocation14_spill] sm:$0xff] %v45577_v2  ;;  %50769 = vst [vmem:[#allocation15_spill] sm:$0xff] %v45596_v9 }
  0x81   :  { %33999 = vmatmul.mubr.f32.vlgmr.msra.gmra.mrb[10].mxu1 %v50568_v54  ;;  %40184 = vmatprep.subr.bf16.mxu0 %v50580_v35  ;;  %50770 = vst [vmem:[#allocation16_spill] sm:$0xff] %v45605_v14  ;;  %50771 = vst [vmem:[#allocation17_spill] sm:$0xff] %v45615_v4 }
  0x82   :  { %40189 = vmatpush3.bf16.msra.mxu1 %v45325_v30  ;;  %34036 = vmatprep.mubr.msk.f32.mxu1 %vm44875_vm2, %v50568_v54  ;;  %50772 = vst [vmem:[#allocation18_spill] sm:$0xff] %v45619_v5 }
  0x83   :  { %40190 = vmatprep.subr.bf16.mxu1 %v50580_v35 }
  0x84   :  { %40186 = vmatpush3.bf16.msra.mxu0 %v45330_v8 }
  0x85   :  { %40199 = vmatprep.subr.bf16.mxu0 %v50580_v35 }
  0x86   :  { %40192 = vmatpush3.bf16.msra.mxu1 %v45335_v11 }
  0x87   :  { %34018 = vmatmul.mubr.f32.vlgmr.msra.gmra.mrb[8].mxu0 %v50568_v54  ;;  %40193 = vmatprep.subr.bf16.mxu1 %v50580_v35 }
  0x88   :  { %40201 = vmatpush3.bf16.msra.mxu0 %v45347_v45  ;;  %34055 = vmatprep.mubr.msk.f32.mxu0 %vm44875_vm2, %v50568_v54 }
  0x89   :  { %40202 = vmatprep.subr.bf16.mxu0 %v50580_v35 }
  0x8a   :  { %40195 = vmatpush3.bf16.msra.mxu1 %v45351_v46 }
  0x8b   :  { %40196 = vmatprep.subr.bf16.mxu1 %v50580_v35 }
  0x8c   :  { %40204 = vmatpush3.bf16.msra.mxu0 %v45358_v51 }
  0x8d   :  { %40205 = vmatprep.subr.bf16.mxu0 %v50580_v35 }
  0x8e   :  { %40198 = vmatpush3.bf16.msra.mxu1 %v45364_v53 }
  0x8f   :  { %40211 = vmatprep.subr.bf16.mxu1 %v50580_v35 }
  0x90   :  { %40207 = vmatpush3.bf16.msra.mxu0 %v45370_v57 }
  0x91   :  { %34037 = vmatmul.mubr.f32.vlgmr.msra.gmra.mrb[12].mxu1 %v50568_v54  ;;  %40208 = vmatprep.subr.bf16.mxu0 %v50580_v35 }
  0x92   :  { %40213 = vmatpush3.bf16.msra.mxu1 %v45275_v61  ;;  %34074 = vmatprep.mubr.msk.f32.mxu1 %vm44875_vm2, %v50568_v54 }
  0x93   :  { %40214 = vmatprep.subr.bf16.mxu1 %v50580_v35 }
  0x94   :  { %40210 = vmatpush3.bf16.msra.mxu0 %v45378_v60 }
  0x95   :  { %40223 = vmatprep.subr.bf16.mxu0 %v50580_v35 }
  0x96   :  { %40216 = vmatpush3.bf16.msra.mxu1 %v45294_v10 }
  0x97   :  { %34056 = vmatmul.mubr.f32.vlgmr.msra.gmra.mrb[10].mxu0 %v50568_v54  ;;  %40217 = vmatprep.subr.bf16.mxu1 %v50580_v35 }
  0x98   :  { %40225 = vmatpush3.bf16.msra.mxu0 %v45391_v62  ;;  %34093 = vmatprep.mubr.msk.f32.mxu0 %vm44875_vm2, %v50568_v54 }
  0x99   :  { %40226 = vmatprep.subr.bf16.mxu0 %v50580_v35 }
  0x9a   :  { %40219 = vmatpush3.bf16.msra.mxu1 %v45314_v25 }
  0x9b   :  { %40220 = vmatprep.subr.bf16.mxu1 %v50580_v35 }
  0x9c   :  { %40228 = vmatpush3.bf16.msra.mxu0 %v45402_v63 }
  0x9d   :  { %40229 = vmatprep.subr.bf16.mxu0 %v50580_v35 }
  0x9e   :  { %40222 = vmatpush3.bf16.msra.mxu1 %v45330_v8 }
  0x9f   :  { %40235 = vmatprep.subr.bf16.mxu1 %v50580_v35 }
  0xa0   :  { %40231 = vmatpush3.bf16.msra.mxu0 %v45414_v44 }
  0xa1   :  { %34075 = vmatmul.mubr.f32.vlgmr.msra.gmra.mrb[14].mxu1 %v50568_v54  ;;  %40232 = vmatprep.subr.bf16.mxu0 %v50580_v35 }
  0xa2   :  { %40237 = vmatpush3.bf16.msra.mxu1 %v45275_v61  ;;  %34112 = vmatprep.mubr.msk.f32.mxu1 %vm44875_vm2, %v50568_v54 }
  0xa3   :  { %40238 = vmatprep.subr.bf16.mxu1 %v50580_v35 }
  0xa4   :  { %40234 = vmatpush3.bf16.msra.mxu0 %v45428_v56 }
  0xa5   :  { %40247 = vmatprep.subr.bf16.mxu0 %v50580_v35 }
  0xa6   :  { %40240 = vmatpush3.bf16.msra.mxu1 %v45294_v10 }
  0xa7   :  { %34094 = vmatmul.mubr.f32.vlgmr.msra.gmra.mrb[12].mxu0 %v50568_v54  ;;  %40241 = vmatprep.subr.bf16.mxu1 %v50580_v35 }
  0xa8   :  { %40249 = vmatpush3.bf16.msra.mxu0 %v45447_v6  ;;  %34131 = vmatprep.mubr.msk.f32.mxu0 %vm44875_vm2, %v50568_v54 }
  0xa9   :  { %40250 = vmatprep.subr.bf16.mxu0 %v50580_v35 }
  0xaa   :  { %40243 = vmatpush3.bf16.msra.mxu1 %v45314_v25 }
  0xab   :  { %40244 = vmatprep.subr.bf16.mxu1 %v50580_v35 }
  0xac   :  { %40252 = vmatpush3.bf16.msra.mxu0 %v45472_v24 }
  0xad   :  { %40253 = vmatprep.subr.bf16.mxu0 %v50580_v35 }
  0xae   :  { %40246 = vmatpush3.bf16.msra.mxu1 %v45330_v8 }
  0xaf   :  { %40319 = vmatprep.subr.bf16.mxu1 %v50580_v35 }
  0xb0   :  { %40255 = vmatpush3.bf16.msra.mxu0 %v45488_v47 }
  0xb1   :  { %34113 = vmatmul.mubr.f32.vlgmr.msra.gmra.mrb[16].mxu1 %v50568_v54  ;;  %40256 = vmatprep.subr.bf16.mxu0 %v50580_v35 }
  0xb2   :  { %40321 = vmatpush3.bf16.msra.mxu1 %v45035_v41  ;;  %34245 = vmatprep.mubr.msk.f32.mxu1 %vm44875_vm2, %v50568_v54 }
  0xb3   :  { %40322 = vmatprep.subr.bf16.mxu1 %v50580_v35 }
  0xb4   :  { %40258 = vmatpush3.bf16.msra.mxu0 %v45496_v55 }
  0xb5   :  { %40259 = vmatprep.subr.bf16.mxu0 %v50580_v35 }
  0xb6   :  { %40324 = vmatpush3.bf16.msra.mxu1 %v45060_v52 }
  0xb7   :  { %34132 = vmatmul.mubr.f32.vlgmr.msra.gmra.mrb[14].mxu0 %v50568_v54  ;;  %40325 = vmatprep.subr.bf16.mxu1 %v50580_v35 }
  0xb8   :  { %40261 = vmatpush3.bf16.msra.mxu0 %v45517_v29  ;;  %34150 = vmatprep.mubr.msk.f32.mxu0 %vm44875_vm2, %v50568_v54 }
  0xb9   :  { %40262 = vmatprep.subr.bf16.mxu0 %v50580_v35 }
  0xba   :  { %40327 = vmatpush3.bf16.msra.mxu1 %v45082_v0 }
  0xbb   :  { %40328 = vmatprep.subr.bf16.mxu1 %v50580_v35 }
  0xbc   :  { %40264 = vmatpush3.bf16.msra.mxu0 %v45532_v39 }
  0xbd   :  { %40265 = vmatprep.subr.bf16.mxu0 %v50580_v35 }
  0xbe   :  { %40330 = vmatpush3.bf16.msra.mxu1 %v45090_v3 }
  0xbf   :  { %40331 = vmatprep.subr.bf16.mxu1 %v50580_v35 }
  0xc0   :  { %40267 = vmatpush3.bf16.msra.mxu0 %v45544_v27 }
  0xc1   :  { %40268 = vmatprep.subr.bf16.mxu0 %v50580_v35 }
  0xc4   :  { %40270 = vmatpush3.bf16.msra.mxu0 %v45550_v20 }
  0xc5   :  { %40271 = vmatprep.subr.bf16.mxu0 %v50580_v35 }
  0xc7   :  { %34151 = vmatmul.mubr.f32.vlgmr.msra.gmra.mrb[14].mxu0 %v50568_v54 }
  0xc8   :  { %40273 = vmatpush3.bf16.msra.mxu0 %v45556_v58  ;;  %34169 = vmatprep.mubr.msk.f32.mxu0 %vm44875_vm2, %v50568_v54 }
  0xc9   :  { %40274 = vmatprep.subr.bf16.mxu0 %v50580_v35 }
  0xcc   :  { %40276 = vmatpush3.bf16.msra.mxu0 %v45563_v59 }
  0xcd   :  { %40277 = vmatprep.subr.bf16.mxu0 %v50580_v35 }
  0xd0   :  { %40279 = vmatpush3.bf16.msra.mxu0 %v45571_v1 }
  0xd1   :  { %40280 = vmatprep.subr.bf16.mxu0 %v50580_v35 }
  0xd4   :  { %40282 = vmatpush3.bf16.msra.mxu0 %v45577_v2 }
  0xd5   :  { %40283 = vmatprep.subr.bf16.mxu0 %v50580_v35 }
  0xd7   :  { %34170 = vmatmul.mubr.f32.vlgmr.msra.gmra.mrb[14].mxu0 %v50568_v54 }
  0xd8   :  { %40285 = vmatpush3.bf16.msra.mxu0 %v45447_v6  ;;  %34188 = vmatprep.mubr.msk.f32.mxu0 %vm44875_vm2, %v50568_v54 }
  0xd9   :  { %40286 = vmatprep.subr.bf16.mxu0 %v50580_v35 }
  0xdc   :  { %40288 = vmatpush3.bf16.msra.mxu0 %v45472_v24 }
  0xdd   :  { %40289 = vmatprep.subr.bf16.mxu0 %v50580_v35 }
  0xe0   :  { %40291 = vmatpush3.bf16.msra.mxu0 %v45488_v47 }
  0xe1   :  { %40292 = vmatprep.subr.bf16.mxu0 %v50580_v35 }
  0xe4   :  { %40294 = vmatpush3.bf16.msra.mxu0 %v45496_v55 }
  0xe5   :  { %40295 = vmatprep.subr.bf16.mxu0 %v50580_v35 }
  0xe7   :  { %34189 = vmatmul.mubr.f32.vlgmr.msra.gmra.mrb[14].mxu0 %v50568_v54 }
  0xe8   :  { %40297 = vmatpush3.bf16.msra.mxu0 %v45596_v9  ;;  %34207 = vmatprep.mubr.msk.f32.mxu0 %vm44875_vm2, %v50568_v54 }
  0xe9   :  { %40298 = vmatprep.subr.bf16.mxu0 %v50580_v35 }
  0xec   :  { %40300 = vmatpush3.bf16.msra.mxu0 %v45605_v14 }
  0xed   :  { %40301 = vmatprep.subr.bf16.mxu0 %v50580_v35 }
  0xf0   :  { %40303 = vmatpush3.bf16.msra.mxu0 %v45615_v4 }
  0xf1   :  { %40304 = vmatprep.subr.bf16.mxu0 %v50580_v35 }
  0xf4   :  { %40306 = vmatpush3.bf16.msra.mxu0 %v45619_v5 }
  0xf5   :  { %40307 = vmatprep.subr.bf16.mxu0 %v50580_v35 }
  0xf7   :  { %34208 = vmatmul.mubr.f32.vlgmr.msra.gmra.mrb[14].mxu0 %v50568_v54 }
  0xf8   :  { %40309 = vmatpush3.bf16.msra.mxu0 %v45447_v6  ;;  %34226 = vmatprep.mubr.msk.f32.mxu0 %vm44875_vm2, %v50568_v54 }
  0xf9   :  { %40310 = vmatprep.subr.bf16.mxu0 %v50580_v35 }
  0xfc   :  { %40312 = vmatpush3.bf16.msra.mxu0 %v45472_v24 }
  0xfd   :  { %40313 = vmatprep.subr.bf16.mxu0 %v50580_v35 }
 0x100   :  { %40315 = vmatpush3.bf16.msra.mxu0 %v45488_v47 }
 0x101   :  { %40316 = vmatprep.subr.bf16.mxu0 %v50580_v35 }
 0x102   :  { %v33856_v21 = vpop.f32.mrb[0].mxu1 }
 0x103   :  { %v1042_v22 = vpop.f32.mrb[1].mxu1 }
 0x104   :  { %40318 = vmatpush3.bf16.msra.mxu0 %v45496_v55 }
 0x105   :  { %40391 = vmatprep.subr.bf16.mxu0 %v50580_v35 }
 0x107   :  { %34227 = vmatmul.mubr.f32.vlgmr.msra.gmra.mrb[14].mxu0 %v50568_v54 }
 0x108   :  { %40393 = vmatpush3.bf16.msra.mxu0 %v45275_v61  ;;  %34359 = vmatprep.mubr.msk.f32.mxu0 %vm44875_vm2, %v50568_v54 }
 0x109   :  { %40394 = vmatprep.subr.bf16.mxu0 %v50580_v35 }
 0x10a   :  { %v33826_v26 = vpop.f32.mrb[0].mxu0 }
 0x10b   :  { %v45643_v40 = vadd.f32 %v33826_v26, %v30662_v23  ;;  %v540_v42 = vpop.f32.mrb[1].mxu0 }
 0x10c   :  { %40396 = vmatpush3.bf16.msra.mxu0 %v45294_v10 }
 0x10d   :  { %50773 = vst [vmem:[#allocation19_spill] sm:$0xff] %v45643_v40  ;;  %40397 = vmatprep.subr.bf16.mxu0 %v50580_v35 }
 0x10e   :  { %v33831_v49 = vpop.f32.mrb[2].mxu0 }
 0x10f   :  { %v646_v7 = vadd.f32 %v33831_v49, %v30665_v48  ;;  %v635_v13 = vpop.f32.mrb[3].mxu0 }
 0x110   :  { %v636_v33 = vadd.f32 %v30665_v48, %v635_v13  ;;  %40399 = vmatpush3.bf16.msra.mxu0 %v45314_v25 }
 0x111   :  { %v45651_v34 = vadd.f32 %v33856_v21, %v646_v7  ;;  %40400 = vmatprep.subr.bf16.mxu0 %v50580_v35  ;;  %v30668_v21 = vld [vmem:[%s50559_s2 + $0x2] ss:$0 sm:$0xff] }
 0x112   :  { %v45654_v32 = vadd.f32 %v1042_v22, %v636_v33 }
 0x113   :  { %50774 = vst [vmem:[#allocation20_spill] sm:$0xff] %v45651_v34 }
 0x114   :  { %v1646_v17 = vpop.f32.mrb[2].mxu1  ;;  %40402 = vmatpush3.bf16.msra.mxu0 %v45330_v8 }
 0x115   :  { %v33905_v26 = vpop.f32.mrb[3].mxu1  ;;  %40403 = vmatprep.subr.bf16.mxu0 %v50580_v35 }
 0x124   :  { %v1757_v54 = vpop.f32.mrb[4].mxu1 }
 0x125   :  { %v1758_v40 = vadd.f32 %v1757_v54, %v1646_v17  ;;  %v33924_v5 = vpop.f32.mrb[5].mxu1 }
 0x134   :  { %v1845_v49 = vpop.f32.mrb[6].mxu1 }
 0x135   :  { %v1846_v4 = vadd.f32 %v1845_v49, %v1758_v40  ;;  %v33943_v48 = vpop.f32.mrb[7].mxu1 }
 0x13a   :  { %v33886_v7 = vpop.f32.mrb[4].mxu0 }
 0x13b   :  { %v45661_v13 = vadd.f32 %v33886_v7, %v30668_v21  ;;  %v1544_v22 = vpop.f32.mrb[5].mxu0 }
 0x13d   :  { %50775 = vst [vmem:[#allocation21_spill] sm:$0xff] %v45661_v13 }
 0x144   :  { %v1926_v33 = vpop.f32.mrb[8].mxu1 }
 0x145   :  { %v1927_v34 = vadd.f32 %v1926_v33, %v1846_v4  ;;  %v33962_v14 = vpop.f32.mrb[9].mxu1 }
 0x14a   :  { %v2021_v26 = vpop.f32.mrb[6].mxu0 }
 0x14b   :  { %v2022_v9 = vadd.f32 %v2021_v26, %v1927_v34  ;;  %v33981_v35 = vpop.f32.mrb[7].mxu0  ;;  %v45663_v26 = vadd.f32 %v30662_v23, %v540_v42 }
 0x154   :  { %v2100_v2 = vpop.f32.mrb[10].mxu1 }
 0x155   :  { %v2101_v54 = vadd.f32 %v2100_v2, %v2022_v9  ;;  %v34000_v5 = vpop.f32.mrb[11].mxu1 }
 0x157   :  { %v2659_v2 = vadd.f32 %v45663_v26, %v2101_v54 }
 0x159   :  { %v30685_v9 = vmul.f32 -1.442695, %v2659_v2 }
 0x15a   :  { %v2192_v17 = vpop.f32.mrb[8].mxu0 }
 0x15b   :  { %v34019_v40 = vpop.f32.mrb[9].mxu0  ;;  %44710 = vpow2.f32 %v30685_v9 }
 0x164   :  { %v2303_v49 = vpop.f32.mrb[12].mxu1 }
 0x165   :  { %v2304_v48 = vadd.f32 %v2303_v49, %v2192_v17  ;;  %v34038_v1 = vpop.f32.mrb[13].mxu1  ;;  %v45673_v17 = vadd.f32 %v30668_v21, %v1544_v22 }
 0x16a   :  { %v2391_v59 = vpop.f32.mrb[10].mxu0 }
 0x16b   :  { %v2392_v58 = vadd.f32 %v2391_v59, %v2304_v48  ;;  %v34057_v20 = vpop.f32.mrb[11].mxu0  ;;  %v44711_v59 = vpop.eup %44710 }
 0x16c   :  { %v2663_v20 = vadd.f32 1.0, %v44711_v59  ;;  %v50778_v59 = vmov 0.0  }
 0x174   :  { %v2472_v7 = vpop.f32.mrb[14].mxu1 }
 0x175   :  { %v2473_v13 = vadd.f32 %v2472_v7, %v2392_v58  ;;  %v34076_v27 = vpop.f32.mrb[15].mxu1 }
 0x17a   :  { %v2567_v39 = vpop.f32.mrb[12].mxu0 }
 0x17b   :  { %v2568_v4 = vadd.f32 %v2567_v39, %v2473_v13  ;;  %v34095_v14 = vpop.f32.mrb[13].mxu0  ;;  %v45670_v39 = vld [vmem:[%s50560_s4] ss:$0 sm:$0xff] }
 0x184   :  { %v2646_v33 = vpop.f32.mrb[16].mxu1 }
 0x185   :  { %v2647_v34 = vadd.f32 %v2646_v33, %v2568_v4  ;;  %v34114_v35 = vpop.f32.mrb[17].mxu1 }
 0x187   :  { %v2666_v1 = vadd.f32 %v45654_v32, %v2647_v34 }
 0x189   :  { %v30686_v5 = vmul.f32 -1.442695, %v2666_v1 }
 0x18b   :  { %44712 = vpow2.f32 %v30686_v5  ;;  %v50777_v5 = vmov 0.0|0.0  }
 0x18c   :  { %44714 = vrcp.f32 %v2663_v20  ;;  %v50779_v20 = vld [vmem:[#allocation8_spill] sm:$0xff] }
 0x195   :  { %v44713_v27 = vpop.eup %44712 }
 0x196   :  { %v2670_v58 = vadd.f32 1.0, %v44713_v27  ;;  %v44715_v54 = vpop.eup %44714  ;;  %v50780_v27 = vld [vmem:[#allocation9_spill] sm:$0xff] }
 0x198   :  { %44716 = vrcp.f32 %v2670_v58  ;;  %v50781_v58 = vld [vmem:[#allocation10_spill] sm:$0xff] }
 0x1a2   :  { %v44717_v48 = vpop.eup %44716 }
 0x1a3   :  { %v3219_v7 = vsub.f32 1.0, %v44717_v48  ;;  %v3221_v14 = vmul.f32 0.0, %v44717_v48  ;;  %v50788_v48 = vld [vmem:[#allocation17_spill] sm:$0xff] }
 0x1da   :  { %v3212_v23 = vpop.f32.mrb[14].mxu0 }
 0x1db   :  { %v44215_v42 = vadd.f32 %v45670_v39, %v3212_v23  ;;  %v34228_v13 = vpop.f32.mrb[15].mxu0  ;;  %v50782_v23 = vld [vmem:[#allocation11_spill] sm:$0xff] }
 0x1dc   :  { %v50784_v13 = vld [vmem:[#allocation13_spill] sm:$0xff] }
 0x1dd   :  { %v3216_v40 = vmul.f32 %v44715_v54, %v44215_v42  ;;  %v50783_v42 = vld [vmem:[#allocation12_spill] sm:$0xff]  ;;  %v50785_v54 = vld [vmem:[#allocation14_spill] sm:$0xff] }
 0x1df   :  { %v3217_v49 = vadd.f32 %v45673_v17, %v3216_v40  ;;  %v50786_v40 = vld [vmem:[#allocation15_spill] sm:$0xff] }
 0x1e1   :  { %44718 = vtanh.f32 %v3217_v49  ;;  %v50787_v49 = vld [vmem:[#allocation16_spill] sm:$0xff] }
 0x1eb   :  { %v44719_v4 = vpop.eup %44718 }
 0x1ec   :  { %v3220_v33 = vmul.f32 %v44719_v4, %v3219_v7  ;;  %v50789_v7 = vld [vmem:[#allocation18_spill] sm:$0xff] }
 0x1ee   :  { %v45676_v34 = vadd.f32 %v3221_v14, %v3220_v33 }
 0x1f0   :  { %50776 = vst [vmem:[#allocation22_spill] sm:$0xff] %v45676_v34  ;;  %v3224_v35 = vsel %vm1563_vm3, %v45676_v34, 0 }
 0x1f1   :  { %v45680_v2 = vand.u32 4294901760, %v3224_v35 }
 0x1f3   :  { %v45683_v21 = vsub.f32 %v3224_v35, %v45680_v2 }
 0x1f5   :  { %v45686_v22 = vand.u32 4294901760, %v45683_v21 }
 0x1f7   :  { %v3302_v9 = vsub.f32 %v45683_v21, %v45686_v22 }
 0x1f9   :  { %v45690_v1 = vand.u32 4294901760, %v3302_v9 }
 0x1fb   :  { %34246 = vmatmul.mubr.f32.vlgmr.msra.gmra.mrb[18].mxu1 %v45690_v1  ;;  %34360 = vmatmul.mubr.f32.vlgmr.msra.gmra.mrb[16].mxu0 %v45690_v1 }
 0x1fc   :  { %40333 = vmatpush3.bf16.msra.mxu1 %v45110_v18  ;;  %40405 = vmatpush3.bf16.msra.mxu0 %v45325_v30 }
 0x1fd   :  { %40334 = vmatprep.subr.bf16.mxu1 %v50777_v5  ;;  %40406 = vmatprep.subr.bf16.mxu0 %v50777_v5 }
 0x1fe   :  { %34264 = vmatprep.mubr.msk.f32.mxu1 %vm44875_vm2, %v50778_v59  ;;  %34378 = vmatprep.mubr.msk.f32.mxu0 %vm44875_vm2, %v50778_v59 }
 0x200   :  { %40336 = vmatpush3.bf16.msra.mxu1 %v45127_v28  ;;  %40408 = vmatpush3.bf16.msra.mxu0 %v45335_v11 }
 0x201   :  { %40337 = vmatprep.subr.bf16.mxu1 %v50777_v5  ;;  %40409 = vmatprep.subr.bf16.mxu0 %v50777_v5 }
 0x204   :  { %40339 = vmatpush3.bf16.msra.mxu1 %v45139_v31  ;;  %40411 = vmatpush3.bf16.msra.mxu0 %v45351_v46 }
 0x205   :  { %40340 = vmatprep.subr.bf16.mxu1 %v50777_v5  ;;  %40412 = vmatprep.subr.bf16.mxu0 %v50777_v5 }
 0x208   :  { %40342 = vmatpush3.bf16.msra.mxu1 %v45147_v36  ;;  %40414 = vmatpush3.bf16.msra.mxu0 %v45364_v53 }
 0x209   :  { %40343 = vmatprep.subr.bf16.mxu1 %v50777_v5  ;;  %40415 = vmatprep.subr.bf16.mxu0 %v50777_v5 }
 0x20b   :  { %34265 = vmatmul.mubr.f32.vlgmr.msra.gmra.mrb[18].mxu1 %v45680_v2  ;;  %34379 = vmatmul.mubr.f32.vlgmr.msra.gmra.mrb[16].mxu0 %v45680_v2 }
 0x20c   :  { %40345 = vmatpush3.bf16.msra.mxu1 %v45153_v37  ;;  %40417 = vmatpush3.bf16.msra.mxu0 %v45347_v45 }
 0x20d   :  { %40346 = vmatprep.subr.bf16.mxu1 %v50777_v5  ;;  %40418 = vmatprep.subr.bf16.mxu0 %v50777_v5 }
 0x20e   :  { %34283 = vmatprep.mubr.msk.f32.mxu1 %vm44875_vm2, %v50778_v59  ;;  %34397 = vmatprep.mubr.msk.f32.mxu0 %vm44875_vm2, %v50778_v59 }
 0x210   :  { %40348 = vmatpush3.bf16.msra.mxu1 %v45164_v12  ;;  %40420 = vmatpush3.bf16.msra.mxu0 %v45358_v51 }
 0x211   :  { %40349 = vmatprep.subr.bf16.mxu1 %v50777_v5  ;;  %40421 = vmatprep.subr.bf16.mxu0 %v50777_v5 }
 0x214   :  { %40351 = vmatpush3.bf16.msra.mxu1 %v45172_v15  ;;  %40423 = vmatpush3.bf16.msra.mxu0 %v45370_v57 }
 0x215   :  { %40352 = vmatprep.subr.bf16.mxu1 %v50777_v5  ;;  %40424 = vmatprep.subr.bf16.mxu0 %v50777_v5 }
 0x218   :  { %40354 = vmatpush3.bf16.msra.mxu1 %v45182_v16  ;;  %40426 = vmatpush3.bf16.msra.mxu0 %v45378_v60 }
 0x219   :  { %40355 = vmatprep.subr.bf16.mxu1 %v50777_v5  ;;  %40427 = vmatprep.subr.bf16.mxu0 %v50777_v5 }
 0x21b   :  { %34284 = vmatmul.mubr.f32.vlgmr.msra.gmra.mrb[18].mxu1 %v45683_v21  ;;  %34398 = vmatmul.mubr.f32.vlgmr.msra.gmra.mrb[16].mxu0 %v45683_v21 }
 0x21c   :  { %40357 = vmatpush3.bf16.msra.mxu1 %v45035_v41  ;;  %40429 = vmatpush3.bf16.msra.mxu0 %v45275_v61 }
 0x21d   :  { %40358 = vmatprep.subr.bf16.mxu1 %v50777_v5  ;;  %40430 = vmatprep.subr.bf16.mxu0 %v50777_v5 }
 0x21e   :  { %34302 = vmatprep.mubr.msk.f32.mxu1 %vm44875_vm2, %v50778_v59  ;;  %34416 = vmatprep.mubr.msk.f32.mxu0 %vm44875_vm2, %v50778_v59 }
 0x220   :  { %40360 = vmatpush3.bf16.msra.mxu1 %v45060_v52  ;;  %40432 = vmatpush3.bf16.msra.mxu0 %v45294_v10 }
 0x221   :  { %40361 = vmatprep.subr.bf16.mxu1 %v50777_v5  ;;  %40433 = vmatprep.subr.bf16.mxu0 %v50777_v5 }
 0x224   :  { %40363 = vmatpush3.bf16.msra.mxu1 %v45082_v0  ;;  %40435 = vmatpush3.bf16.msra.mxu0 %v45314_v25 }
 0x225   :  { %40364 = vmatprep.subr.bf16.mxu1 %v50777_v5  ;;  %40436 = vmatprep.subr.bf16.mxu0 %v50777_v5 }
 0x228   :  { %40366 = vmatpush3.bf16.msra.mxu1 %v45090_v3  ;;  %40438 = vmatpush3.bf16.msra.mxu0 %v45330_v8 }
 0x229   :  { %40367 = vmatprep.subr.bf16.mxu1 %v50777_v5  ;;  %40439 = vmatprep.subr.bf16.mxu0 %v50777_v5 }
 0x22b   :  { %34303 = vmatmul.mubr.f32.vlgmr.msra.gmra.mrb[18].mxu1 %v45686_v22  ;;  %34417 = vmatmul.mubr.f32.vlgmr.msra.gmra.mrb[16].mxu0 %v45686_v22 }
 0x22c   :  { %40369 = vmatpush3.bf16.msra.mxu1 %v45200_v19  ;;  %40441 = vmatpush3.bf16.msra.mxu0 %v45391_v62 }
 0x22d   :  { %40370 = vmatprep.subr.bf16.mxu1 %v50777_v5  ;;  %40442 = vmatprep.subr.bf16.mxu0 %v50777_v5 }
 0x22e   :  { %34321 = vmatprep.mubr.msk.f32.mxu1 %vm44875_vm2, %v50778_v59  ;;  %34435 = vmatprep.mubr.msk.f32.mxu0 %vm44875_vm2, %v50778_v59 }
 0x230   :  { %40372 = vmatpush3.bf16.msra.mxu1 %v45216_v38  ;;  %40444 = vmatpush3.bf16.msra.mxu0 %v45402_v63 }
 0x231   :  { %40373 = vmatprep.subr.bf16.mxu1 %v50777_v5  ;;  %40445 = vmatprep.subr.bf16.mxu0 %v50777_v5 }
 0x234   :  { %40375 = vmatpush3.bf16.msra.mxu1 %v45234_v43  ;;  %40447 = vmatpush3.bf16.msra.mxu0 %v45414_v44 }
 0x235   :  { %40376 = vmatprep.subr.bf16.mxu1 %v50777_v5  ;;  %40448 = vmatprep.subr.bf16.mxu0 %v50777_v5 }
 0x238   :  { %40378 = vmatpush3.bf16.msra.mxu1 %v45254_v50  ;;  %40450 = vmatpush3.bf16.msra.mxu0 %v45428_v56 }
 0x239   :  { %40379 = vmatprep.subr.bf16.mxu1 %v50777_v5  ;;  %40451 = vmatprep.subr.bf16.mxu0 %v50777_v5 }
 0x23b   :  { %34322 = vmatmul.mubr.f32.vlgmr.msra.gmra.mrb[18].mxu1 %v45680_v2  ;;  %34436 = vmatmul.mubr.f32.vlgmr.msra.gmra.mrb[16].mxu0 %v45680_v2 }
 0x23c   :  { %40381 = vmatpush3.bf16.msra.mxu1 %v45035_v41  ;;  %40453 = vmatpush3.bf16.msra.mxu0 %v45275_v61 }
 0x23d   :  { %40382 = vmatprep.subr.bf16.mxu1 %v50777_v5  ;;  %40454 = vmatprep.subr.bf16.mxu0 %v50777_v5 }
 0x23e   :  { %34340 = vmatprep.mubr.msk.f32.mxu1 %vm44875_vm2, %v50778_v59  ;;  %34454 = vmatprep.mubr.msk.f32.mxu0 %vm44875_vm2, %v50778_v59 }
 0x240   :  { %40384 = vmatpush3.bf16.msra.mxu1 %v45060_v52  ;;  %40456 = vmatpush3.bf16.msra.mxu0 %v45294_v10 }
 0x241   :  { %40385 = vmatprep.subr.bf16.mxu1 %v50777_v5  ;;  %40457 = vmatprep.subr.bf16.mxu0 %v50777_v5 }
 0x244   :  { %40387 = vmatpush3.bf16.msra.mxu1 %v45082_v0  ;;  %40459 = vmatpush3.bf16.msra.mxu0 %v45314_v25 }
 0x245   :  { %40388 = vmatprep.subr.bf16.mxu1 %v50777_v5  ;;  %40460 = vmatprep.subr.bf16.mxu0 %v50777_v5 }
 0x248   :  { %40390 = vmatpush3.bf16.msra.mxu1 %v45090_v3  ;;  %40462 = vmatpush3.bf16.msra.mxu0 %v45330_v8 }
 0x249   :  { %40463 = vmatprep.subr.bf16.mxu1 %v50777_v5  ;;  %40535 = vmatprep.subr.bf16.mxu0 %v50777_v5 }
 0x24b   :  { %34341 = vmatmul.mubr.f32.vlgmr.msra.gmra.mrb[18].mxu1 %v45680_v2  ;;  %34455 = vmatmul.mubr.f32.vlgmr.msra.gmra.mrb[16].mxu0 %v45680_v2 }
 0x24c   :  { %40465 = vmatpush3.bf16.msra.mxu1 %v45447_v6  ;;  %34473 = vmatprep.mubr.msk.f32.mxu1 %vm44875_vm2, %v50778_v59 }
 0x24d   :  { %40466 = vmatprep.subr.bf16.mxu1 %v50777_v5  ;;  %40537 = vmatpush3.bf16.msra.mxu0 %v45035_v41 }
 0x24e   :  { %40538 = vmatprep.subr.bf16.mxu0 %v50777_v5  ;;  %34587 = vmatprep.mubr.msk.f32.mxu0 %vm44875_vm2, %v50778_v59 }
 0x250   :  { %40468 = vmatpush3.bf16.msra.mxu1 %v45472_v24 }
 0x251   :  { %40469 = vmatprep.subr.bf16.mxu1 %v50777_v5  ;;  %40540 = vmatpush3.bf16.msra.mxu0 %v45060_v52 }
 0x252   :  { %40541 = vmatprep.subr.bf16.mxu0 %v50777_v5 }
 0x254   :  { %40471 = vmatpush3.bf16.msra.mxu1 %v45488_v47 }
 0x255   :  { %40472 = vmatprep.subr.bf16.mxu1 %v50777_v5  ;;  %40543 = vmatpush3.bf16.msra.mxu0 %v45082_v0 }
 0x256   :  { %40544 = vmatprep.subr.bf16.mxu0 %v50777_v5 }
 0x258   :  { %40474 = vmatpush3.bf16.msra.mxu1 %v45496_v55 }
 0x259   :  { %40475 = vmatprep.subr.bf16.mxu1 %v50777_v5  ;;  %40546 = vmatpush3.bf16.msra.mxu0 %v45090_v3 }
 0x25a   :  { %40547 = vmatprep.subr.bf16.mxu0 %v50777_v5 }
 0x25b   :  { %34474 = vmatmul.mubr.f32.vlgmr.msra.gmra.mrb[20].mxu1 %v45690_v1 }
 0x25c   :  { %40477 = vmatpush3.bf16.msra.mxu1 %v45517_v29  ;;  %34492 = vmatprep.mubr.msk.f32.mxu1 %vm44875_vm2, %v50778_v59 }
 0x25d   :  { %40478 = vmatprep.subr.bf16.mxu1 %v50777_v5 }
 0x260   :  { %40480 = vmatpush3.bf16.msra.mxu1 %v50779_v20 }
 0x261   :  { %40481 = vmatprep.subr.bf16.mxu1 %v50777_v5 }
 0x264   :  { %40483 = vmatpush3.bf16.msra.mxu1 %v50780_v27 }
 0x265   :  { %40484 = vmatprep.subr.bf16.mxu1 %v50777_v5 }
 0x268   :  { %40486 = vmatpush3.bf16.msra.mxu1 %v50781_v58 }
 0x269   :  { %40487 = vmatprep.subr.bf16.mxu1 %v50777_v5 }
 0x26b   :  { %34493 = vmatmul.mubr.f32.vlgmr.msra.gmra.mrb[20].mxu1 %v45680_v2 }
 0x26c   :  { %40489 = vmatpush3.bf16.msra.mxu1 %v50782_v23  ;;  %34511 = vmatprep.mubr.msk.f32.mxu1 %vm44875_vm2, %v50778_v59 }
 0x26d   :  { %40490 = vmatprep.subr.bf16.mxu1 %v50777_v5 }
 0x270   :  { %40492 = vmatpush3.bf16.msra.mxu1 %v50783_v42 }
 0x271   :  { %40493 = vmatprep.subr.bf16.mxu1 %v50777_v5 }
 0x274   :  { %40495 = vmatpush3.bf16.msra.mxu1 %v50784_v13 }
 0x275   :  { %40496 = vmatprep.subr.bf16.mxu1 %v50777_v5 }
 0x278   :  { %40498 = vmatpush3.bf16.msra.mxu1 %v50785_v54 }
 0x279   :  { %40499 = vmatprep.subr.bf16.mxu1 %v50777_v5 }
 0x27b   :  { %34512 = vmatmul.mubr.f32.vlgmr.msra.gmra.mrb[20].mxu1 %v45683_v21 }
 0x27c   :  { %40501 = vmatpush3.bf16.msra.mxu1 %v45447_v6  ;;  %34530 = vmatprep.mubr.msk.f32.mxu1 %vm44875_vm2, %v50778_v59 }
 0x27d   :  { %40502 = vmatprep.subr.bf16.mxu1 %v50777_v5 }
 0x280   :  { %40504 = vmatpush3.bf16.msra.mxu1 %v45472_v24 }
 0x281   :  { %40505 = vmatprep.subr.bf16.mxu1 %v50777_v5 }
 0x284   :  { %40507 = vmatpush3.bf16.msra.mxu1 %v45488_v47 }
 0x285   :  { %40508 = vmatprep.subr.bf16.mxu1 %v50777_v5 }
 0x288   :  { %40510 = vmatpush3.bf16.msra.mxu1 %v45496_v55 }
 0x289   :  { %40511 = vmatprep.subr.bf16.mxu1 %v50777_v5 }
 0x28b   :  { %34531 = vmatmul.mubr.f32.vlgmr.msra.gmra.mrb[20].mxu1 %v45686_v22 }
 0x28c   :  { %40513 = vmatpush3.bf16.msra.mxu1 %v50786_v40  ;;  %34549 = vmatprep.mubr.msk.f32.mxu1 %vm44875_vm2, %v50778_v59 }
 0x28d   :  { %40514 = vmatprep.subr.bf16.mxu1 %v50777_v5 }
 0x290   :  { %40516 = vmatpush3.bf16.msra.mxu1 %v50787_v49 }
 0x291   :  { %40517 = vmatprep.subr.bf16.mxu1 %v50777_v5 }
 0x294   :  { %40519 = vmatpush3.bf16.msra.mxu1 %v50788_v48 }
 0x295   :  { %40520 = vmatprep.subr.bf16.mxu1 %v50777_v5 }
 0x298   :  { %40522 = vmatpush3.bf16.msra.mxu1 %v50789_v7 }
 0x299   :  { %40523 = vmatprep.subr.bf16.mxu1 %v50777_v5 }
 0x29b   :  { %34550 = vmatmul.mubr.f32.vlgmr.msra.gmra.mrb[20].mxu1 %v45680_v2 }
 0x29c   :  { %40525 = vmatpush3.bf16.msra.mxu1 %v45447_v6  ;;  %34568 = vmatprep.mubr.msk.f32.mxu1 %vm44875_vm2, %v50778_v59 }
 0x29d   :  { %40526 = vmatprep.subr.bf16.mxu1 %v50777_v5 }
 0x2a0   :  { %40528 = vmatpush3.bf16.msra.mxu1 %v45472_v24 }
 0x2a1   :  { %40529 = vmatprep.subr.bf16.mxu1 %v50777_v5 }
 0x2a4   :  { %40531 = vmatpush3.bf16.msra.mxu1 %v45488_v47 }
 0x2a5   :  { %40532 = vmatprep.subr.bf16.mxu1 %v50777_v5 }
 0x2a8   :  { %40534 = vmatpush3.bf16.msra.mxu1 %v45496_v55 }
 0x2a9   :  { %40607 = vmatprep.subr.bf16.mxu1 %v50777_v5 }
 0x2ab   :  { %34569 = vmatmul.mubr.f32.vlgmr.msra.gmra.mrb[20].mxu1 %v45680_v2 }
 0x2ac   :  { %40609 = vmatpush3.bf16.msra.mxu1 %v45275_v61  ;;  %34701 = vmatprep.mubr.msk.f32.mxu1 %vm44875_vm2, %v50778_v59 }
 0x2ad   :  { %40610 = vmatprep.subr.bf16.mxu1 %v50777_v5 }
 0x2b0   :  { %40612 = vmatpush3.bf16.msra.mxu1 %v45294_v10 }
 0x2b1   :  { %40613 = vmatprep.subr.bf16.mxu1 %v50777_v5 }
 0x2b4   :  { %40615 = vmatpush3.bf16.msra.mxu1 %v45314_v25 }
 0x2b5   :  { %40616 = vmatprep.subr.bf16.mxu1 %v50777_v5 }
 0x2b8   :  { %40618 = vmatpush3.bf16.msra.mxu1 %v45330_v8 }
 0x2b9   :  { %40619 = vmatprep.subr.bf16.mxu1 %v50777_v5 }
 0x31e   :  { %v3759_v4 = vpop.f32.mrb[18].mxu1  ;;  %v4296_v14 = vpop.f32.mrb[16].mxu0 }
 0x31f   :  { %v34342_v33 = vpop.f32.mrb[19].mxu1  ;;  %v34456_v35 = vpop.f32.mrb[17].mxu0  ;;  %v4301_v2 = vrot.slane %v3759_v4, 6  ;;  %v4311_v9 = vrot.slane %v4296_v14, 6 }
 0x321   :  { %v4303_v21 = vadd.f32 %v45663_v26, %v4301_v2  ;;  %v4313_v1 = vadd.f32 %v45654_v32, %v4311_v9  ;;  %v4865_v9 = vrot.slane %v45676_v34, 6 }
 0x323   :  { %v30688_v22 = vmul.f32 -1.442695, %v4303_v21  ;;  %v30689_v7 = vmul.f32 -1.442695, %v4313_v1 }
 0x325   :  { %44720 = vpow2.f32 %v30688_v22 }
 0x326   :  { %44722 = vpow2.f32 %v30689_v7 }
 0x32f   :  { %v44721_v48 = vpop.eup %44720 }
 0x330   :  { %v4307_v49 = vadd.f32 1.0, %v44721_v48  ;;  %v44723_v40 = vpop.eup %44722 }
 0x331   :  { %v4317_v13 = vadd.f32 1.0, %v44723_v40 }
 0x332   :  { %44724 = vrcp.f32 %v4307_v49 }
 0x333   :  { %44726 = vrcp.f32 %v4317_v13 }
 0x33c   :  { %v44725_v4 = vpop.eup %44724 }
 0x33d   :  { %v44727_v21 = vpop.eup %44726 }
 0x33e   :  { %v4863_v22 = vsub.f32 1.0, %v44727_v21  ;;  %v4867_v48 = vmul.f32 %v44727_v21, %v4865_v9  ;;  %v50793_v21 = vld [vmem:[#allocation14_spill] sm:$0xff]  ;;  %v50795_v9 = vld [vmem:[#allocation16_spill] sm:$0xff] }
 0x37e   :  { %v4853_v54 = vpop.f32.mrb[20].mxu1 }
 0x37f   :  { %v44216_v42 = vadd.f32 %v45670_v39, %v4853_v54  ;;  %v34570_v33 = vpop.f32.mrb[21].mxu1 }
 0x381   :  { %v4858_v35 = vrot.slane %v44216_v42, 6 }
 0x383   :  { %v4860_v2 = vmul.f32 %v44725_v4, %v4858_v35 }
 0x385   :  { %v4861_v14 = vadd.f32 %v45673_v17, %v4860_v2  ;;  %v50791_v2 = vld [vmem:[#allocation12_spill] sm:$0xff] }
 0x387   :  { %44728 = vtanh.f32 %v4861_v14  ;;  %v50792_v14 = vld [vmem:[#allocation13_spill] sm:$0xff] }
 0x391   :  { %v44729_v7 = vpop.eup %44728 }
 0x392   :  { %v4864_v49 = vmul.f32 %v44729_v7, %v4863_v22  ;;  %v50794_v22 = vld [vmem:[#allocation15_spill] sm:$0xff]  ;;  %v50796_v7 = vld [vmem:[#allocation17_spill] sm:$0xff] }
 0x394   :  { %v45895_v1 = vadd.f32 %v4867_v48, %v4864_v49  ;;  %v50797_v48 = vld [vmem:[#allocation18_spill] sm:$0xff] }
 0x396   :  { %50790 = vst [vmem:[#allocation8_spill] sm:$0xff] %v45895_v1  ;;  %v4870_v40 = vrot.slane %v45895_v1, 2 }
 0x398   :  { %v4871_v54 = vsel %vm1563_vm3, %v4870_v40, 0 }
 0x399   :  { %v45899_v42 = vand.u32 4294901760, %v4871_v54 }
 0x39b   :  { %v45902_v13 = vsub.f32 %v4871_v54, %v45899_v42 }
 0x39d   :  { %v45905_v33 = vand.u32 4294901760, %v45902_v13 }
 0x39f   :  { %v4949_v35 = vsub.f32 %v45902_v13, %v45905_v33 }
 0x3a1   :  { %v45909_v4 = vand.u32 4294901760, %v4949_v35 }
 0x3a3   :  { %34588 = vmatmul.mubr.f32.vlgmr.msra.gmra.mrb[18].mxu0 %v45909_v4  ;;  %34702 = vmatmul.mubr.f32.vlgmr.msra.gmra.mrb[22].mxu1 %v45909_v4 }
 0x3a4   :  { %40549 = vmatpush3.bf16.msra.mxu0 %v45110_v18  ;;  %40621 = vmatpush3.bf16.msra.mxu1 %v45325_v30 }
 0x3a5   :  { %40550 = vmatprep.subr.bf16.mxu0 %v50777_v5  ;;  %40622 = vmatprep.subr.bf16.mxu1 %v50777_v5 }
 0x3a6   :  { %34606 = vmatprep.mubr.msk.f32.mxu0 %vm44875_vm2, %v50778_v59  ;;  %34720 = vmatprep.mubr.msk.f32.mxu1 %vm44875_vm2, %v50778_v59 }
 0x3a8   :  { %40552 = vmatpush3.bf16.msra.mxu0 %v45127_v28  ;;  %40624 = vmatpush3.bf16.msra.mxu1 %v45335_v11 }
 0x3a9   :  { %40553 = vmatprep.subr.bf16.mxu0 %v50777_v5  ;;  %40625 = vmatprep.subr.bf16.mxu1 %v50777_v5 }
 0x3ac   :  { %40555 = vmatpush3.bf16.msra.mxu0 %v45139_v31  ;;  %40627 = vmatpush3.bf16.msra.mxu1 %v45351_v46 }
 0x3ad   :  { %40556 = vmatprep.subr.bf16.mxu0 %v50777_v5  ;;  %40628 = vmatprep.subr.bf16.mxu1 %v50777_v5 }
 0x3b0   :  { %40558 = vmatpush3.bf16.msra.mxu0 %v45147_v36  ;;  %40630 = vmatpush3.bf16.msra.mxu1 %v45364_v53 }
 0x3b1   :  { %40559 = vmatprep.subr.bf16.mxu0 %v50777_v5  ;;  %40631 = vmatprep.subr.bf16.mxu1 %v50777_v5 }
 0x3b3   :  { %34607 = vmatmul.mubr.f32.vlgmr.msra.gmra.mrb[18].mxu0 %v45899_v42  ;;  %34721 = vmatmul.mubr.f32.vlgmr.msra.gmra.mrb[22].mxu1 %v45899_v42 }
 0x3b4   :  { %40561 = vmatpush3.bf16.msra.mxu0 %v45153_v37  ;;  %40633 = vmatpush3.bf16.msra.mxu1 %v45347_v45 }
 0x3b5   :  { %40562 = vmatprep.subr.bf16.mxu0 %v50777_v5  ;;  %40634 = vmatprep.subr.bf16.mxu1 %v50777_v5 }
 0x3b6   :  { %34625 = vmatprep.mubr.msk.f32.mxu0 %vm44875_vm2, %v50778_v59  ;;  %34739 = vmatprep.mubr.msk.f32.mxu1 %vm44875_vm2, %v50778_v59 }
 0x3b8   :  { %40564 = vmatpush3.bf16.msra.mxu0 %v45164_v12  ;;  %40636 = vmatpush3.bf16.msra.mxu1 %v45358_v51 }
 0x3b9   :  { %40565 = vmatprep.subr.bf16.mxu0 %v50777_v5  ;;  %40637 = vmatprep.subr.bf16.mxu1 %v50777_v5 }
 0x3bc   :  { %40567 = vmatpush3.bf16.msra.mxu0 %v45172_v15  ;;  %40639 = vmatpush3.bf16.msra.mxu1 %v45370_v57 }
 0x3bd   :  { %40568 = vmatprep.subr.bf16.mxu0 %v50777_v5  ;;  %40640 = vmatprep.subr.bf16.mxu1 %v50777_v5 }
 0x3c0   :  { %40570 = vmatpush3.bf16.msra.mxu0 %v45182_v16  ;;  %40642 = vmatpush3.bf16.msra.mxu1 %v45378_v60 }
 0x3c1   :  { %40571 = vmatprep.subr.bf16.mxu0 %v50777_v5  ;;  %40643 = vmatprep.subr.bf16.mxu1 %v50777_v5 }
 0x3c3   :  { %34626 = vmatmul.mubr.f32.vlgmr.msra.gmra.mrb[18].mxu0 %v45902_v13  ;;  %34740 = vmatmul.mubr.f32.vlgmr.msra.gmra.mrb[22].mxu1 %v45902_v13 }
 0x3c4   :  { %40573 = vmatpush3.bf16.msra.mxu0 %v45035_v41  ;;  %40645 = vmatpush3.bf16.msra.mxu1 %v45275_v61 }
 0x3c5   :  { %40574 = vmatprep.subr.bf16.mxu0 %v50777_v5  ;;  %40646 = vmatprep.subr.bf16.mxu1 %v50777_v5 }
 0x3c6   :  { %34644 = vmatprep.mubr.msk.f32.mxu0 %vm44875_vm2, %v50778_v59  ;;  %34758 = vmatprep.mubr.msk.f32.mxu1 %vm44875_vm2, %v50778_v59 }
 0x3c8   :  { %40576 = vmatpush3.bf16.msra.mxu0 %v45060_v52  ;;  %40648 = vmatpush3.bf16.msra.mxu1 %v45294_v10 }
 0x3c9   :  { %40577 = vmatprep.subr.bf16.mxu0 %v50777_v5  ;;  %40649 = vmatprep.subr.bf16.mxu1 %v50777_v5 }
 0x3cc   :  { %40579 = vmatpush3.bf16.msra.mxu0 %v45082_v0  ;;  %40651 = vmatpush3.bf16.msra.mxu1 %v45314_v25 }
 0x3cd   :  { %40580 = vmatprep.subr.bf16.mxu0 %v50777_v5  ;;  %40652 = vmatprep.subr.bf16.mxu1 %v50777_v5 }
 0x3d0   :  { %40582 = vmatpush3.bf16.msra.mxu0 %v45090_v3  ;;  %40654 = vmatpush3.bf16.msra.mxu1 %v45330_v8 }
 0x3d1   :  { %40583 = vmatprep.subr.bf16.mxu0 %v50777_v5  ;;  %40655 = vmatprep.subr.bf16.mxu1 %v50777_v5 }
 0x3d3   :  { %34645 = vmatmul.mubr.f32.vlgmr.msra.gmra.mrb[18].mxu0 %v45905_v33  ;;  %34759 = vmatmul.mubr.f32.vlgmr.msra.gmra.mrb[22].mxu1 %v45905_v33 }
 0x3d4   :  { %40585 = vmatpush3.bf16.msra.mxu0 %v45200_v19  ;;  %40657 = vmatpush3.bf16.msra.mxu1 %v45391_v62 }
 0x3d5   :  { %40586 = vmatprep.subr.bf16.mxu0 %v50777_v5  ;;  %40658 = vmatprep.subr.bf16.mxu1 %v50777_v5 }
 0x3d6   :  { %34663 = vmatprep.mubr.msk.f32.mxu0 %vm44875_vm2, %v50778_v59  ;;  %34777 = vmatprep.mubr.msk.f32.mxu1 %vm44875_vm2, %v50778_v59 }
 0x3d8   :  { %40588 = vmatpush3.bf16.msra.mxu0 %v45216_v38  ;;  %40660 = vmatpush3.bf16.msra.mxu1 %v45402_v63 }
 0x3d9   :  { %40589 = vmatprep.subr.bf16.mxu0 %v50777_v5  ;;  %40661 = vmatprep.subr.bf16.mxu1 %v50777_v5 }
 0x3dc   :  { %40591 = vmatpush3.bf16.msra.mxu0 %v45234_v43  ;;  %40663 = vmatpush3.bf16.msra.mxu1 %v45414_v44 }
 0x3dd   :  { %40592 = vmatprep.subr.bf16.mxu0 %v50777_v5  ;;  %40664 = vmatprep.subr.bf16.mxu1 %v50777_v5 }
 0x3e0   :  { %40594 = vmatpush3.bf16.msra.mxu0 %v45254_v50  ;;  %40666 = vmatpush3.bf16.msra.mxu1 %v45428_v56 }
 0x3e1   :  { %40595 = vmatprep.subr.bf16.mxu0 %v50777_v5  ;;  %40667 = vmatprep.subr.bf16.mxu1 %v50777_v5 }
 0x3e3   :  { %34664 = vmatmul.mubr.f32.vlgmr.msra.gmra.mrb[18].mxu0 %v45899_v42  ;;  %34778 = vmatmul.mubr.f32.vlgmr.msra.gmra.mrb[22].mxu1 %v45899_v42 }
 0x3e4   :  { %40597 = vmatpush3.bf16.msra.mxu0 %v45035_v41  ;;  %40669 = vmatpush3.bf16.msra.mxu1 %v45275_v61 }
 0x3e5   :  { %40598 = vmatprep.subr.bf16.mxu0 %v50777_v5  ;;  %40670 = vmatprep.subr.bf16.mxu1 %v50777_v5 }
 0x3e6   :  { %34682 = vmatprep.mubr.msk.f32.mxu0 %vm44875_vm2, %v50778_v59  ;;  %34796 = vmatprep.mubr.msk.f32.mxu1 %vm44875_vm2, %v50778_v59 }
 0x3e8   :  { %40600 = vmatpush3.bf16.msra.mxu0 %v45060_v52  ;;  %40672 = vmatpush3.bf16.msra.mxu1 %v45294_v10 }
 0x3e9   :  { %40601 = vmatprep.subr.bf16.mxu0 %v50777_v5  ;;  %40673 = vmatprep.subr.bf16.mxu1 %v50777_v5 }
 0x3ec   :  { %40603 = vmatpush3.bf16.msra.mxu0 %v45082_v0  ;;  %40675 = vmatpush3.bf16.msra.mxu1 %v45314_v25 }
 0x3ed   :  { %40604 = vmatprep.subr.bf16.mxu0 %v50777_v5  ;;  %40676 = vmatprep.subr.bf16.mxu1 %v50777_v5 }
 0x3f0   :  { %40606 = vmatpush3.bf16.msra.mxu0 %v45090_v3  ;;  %40678 = vmatpush3.bf16.msra.mxu1 %v45330_v8 }
 0x3f1   :  { %40679 = vmatprep.subr.bf16.mxu0 %v50777_v5  ;;  %40751 = vmatprep.subr.bf16.mxu1 %v50777_v5 }
 0x3f3   :  { %34683 = vmatmul.mubr.f32.vlgmr.msra.gmra.mrb[18].mxu0 %v45899_v42  ;;  %34797 = vmatmul.mubr.f32.vlgmr.msra.gmra.mrb[22].mxu1 %v45899_v42 }
 0x3f4   :  { %40681 = vmatpush3.bf16.msra.mxu0 %v45447_v6  ;;  %34815 = vmatprep.mubr.msk.f32.mxu0 %vm44875_vm2, %v50778_v59 }
 0x3f5   :  { %40682 = vmatprep.subr.bf16.mxu0 %v50777_v5  ;;  %40753 = vmatpush3.bf16.msra.mxu1 %v45035_v41 }
 0x3f6   :  { %40754 = vmatprep.subr.bf16.mxu1 %v50777_v5  ;;  %34929 = vmatprep.mubr.msk.f32.mxu1 %vm44875_vm2, %v50778_v59 }
 0x3f8   :  { %40684 = vmatpush3.bf16.msra.mxu0 %v45472_v24 }
 0x3f9   :  { %40685 = vmatprep.subr.bf16.mxu0 %v50777_v5  ;;  %40756 = vmatpush3.bf16.msra.mxu1 %v45060_v52 }
 0x3fa   :  { %40757 = vmatprep.subr.bf16.mxu1 %v50777_v5 }
 0x3fc   :  { %40687 = vmatpush3.bf16.msra.mxu0 %v45488_v47 }
 0x3fd   :  { %40688 = vmatprep.subr.bf16.mxu0 %v50777_v5  ;;  %40759 = vmatpush3.bf16.msra.mxu1 %v45082_v0 }
 0x3fe   :  { %40760 = vmatprep.subr.bf16.mxu1 %v50777_v5 }
 0x400   :  { %40690 = vmatpush3.bf16.msra.mxu0 %v45496_v55 }
 0x401   :  { %40691 = vmatprep.subr.bf16.mxu0 %v50777_v5  ;;  %40762 = vmatpush3.bf16.msra.mxu1 %v45090_v3 }
 0x402   :  { %40763 = vmatprep.subr.bf16.mxu1 %v50777_v5 }
 0x403   :  { %34816 = vmatmul.mubr.f32.vlgmr.msra.gmra.mrb[20].mxu0 %v45909_v4 }
 0x404   :  { %40693 = vmatpush3.bf16.msra.mxu0 %v45517_v29  ;;  %34834 = vmatprep.mubr.msk.f32.mxu0 %vm44875_vm2, %v50778_v59 }
 0x405   :  { %40694 = vmatprep.subr.bf16.mxu0 %v50777_v5 }
 0x408   :  { %40696 = vmatpush3.bf16.msra.mxu0 %v50779_v20 }
 0x409   :  { %40697 = vmatprep.subr.bf16.mxu0 %v50777_v5 }
 0x40c   :  { %40699 = vmatpush3.bf16.msra.mxu0 %v50780_v27 }
 0x40d   :  { %40700 = vmatprep.subr.bf16.mxu0 %v50777_v5 }
 0x410   :  { %40702 = vmatpush3.bf16.msra.mxu0 %v50781_v58 }
 0x411   :  { %40703 = vmatprep.subr.bf16.mxu0 %v50777_v5 }
 0x413   :  { %34835 = vmatmul.mubr.f32.vlgmr.msra.gmra.mrb[20].mxu0 %v45899_v42 }
 0x414   :  { %40705 = vmatpush3.bf16.msra.mxu0 %v50782_v23  ;;  %34853 = vmatprep.mubr.msk.f32.mxu0 %vm44875_vm2, %v50778_v59 }
 0x415   :  { %40706 = vmatprep.subr.bf16.mxu0 %v50777_v5 }
 0x418   :  { %40708 = vmatpush3.bf16.msra.mxu0 %v50791_v2 }
 0x419   :  { %40709 = vmatprep.subr.bf16.mxu0 %v50777_v5 }
 0x41c   :  { %40711 = vmatpush3.bf16.msra.mxu0 %v50792_v14 }
 0x41d   :  { %40712 = vmatprep.subr.bf16.mxu0 %v50777_v5 }
 0x420   :  { %40714 = vmatpush3.bf16.msra.mxu0 %v50793_v21 }
 0x421   :  { %40715 = vmatprep.subr.bf16.mxu0 %v50777_v5 }
 0x423   :  { %34854 = vmatmul.mubr.f32.vlgmr.msra.gmra.mrb[20].mxu0 %v45902_v13 }
 0x424   :  { %40717 = vmatpush3.bf16.msra.mxu0 %v45447_v6  ;;  %34872 = vmatprep.mubr.msk.f32.mxu0 %vm44875_vm2, %v50778_v59 }
 0x425   :  { %40718 = vmatprep.subr.bf16.mxu0 %v50777_v5 }
 0x428   :  { %40720 = vmatpush3.bf16.msra.mxu0 %v45472_v24 }
 0x429   :  { %40721 = vmatprep.subr.bf16.mxu0 %v50777_v5 }
 0x42c   :  { %40723 = vmatpush3.bf16.msra.mxu0 %v45488_v47 }
 0x42d   :  { %40724 = vmatprep.subr.bf16.mxu0 %v50777_v5 }
 0x430   :  { %40726 = vmatpush3.bf16.msra.mxu0 %v45496_v55 }
 0x431   :  { %40727 = vmatprep.subr.bf16.mxu0 %v50777_v5 }
 0x433   :  { %34873 = vmatmul.mubr.f32.vlgmr.msra.gmra.mrb[20].mxu0 %v45905_v33 }
 0x434   :  { %40729 = vmatpush3.bf16.msra.mxu0 %v50794_v22  ;;  %34891 = vmatprep.mubr.msk.f32.mxu0 %vm44875_vm2, %v50778_v59 }
 0x435   :  { %40730 = vmatprep.subr.bf16.mxu0 %v50777_v5 }
 0x438   :  { %40732 = vmatpush3.bf16.msra.mxu0 %v50795_v9 }
 0x439   :  { %40733 = vmatprep.subr.bf16.mxu0 %v50777_v5 }
 0x43c   :  { %40735 = vmatpush3.bf16.msra.mxu0 %v50796_v7 }
 0x43d   :  { %40736 = vmatprep.subr.bf16.mxu0 %v50777_v5 }
 0x440   :  { %40738 = vmatpush3.bf16.msra.mxu0 %v50797_v48 }
 0x441   :  { %40739 = vmatprep.subr.bf16.mxu0 %v50777_v5 }
 0x443   :  { %34892 = vmatmul.mubr.f32.vlgmr.msra.gmra.mrb[20].mxu0 %v45899_v42 }
 0x444   :  { %40741 = vmatpush3.bf16.msra.mxu0 %v45447_v6  ;;  %34910 = vmatprep.mubr.msk.f32.mxu0 %vm44875_vm2, %v50778_v59 }
 0x445   :  { %40742 = vmatprep.subr.bf16.mxu0 %v50777_v5 }
 0x448   :  { %40744 = vmatpush3.bf16.msra.mxu0 %v45472_v24 }
 0x449   :  { %40745 = vmatprep.subr.bf16.mxu0 %v50777_v5 }
 0x44c   :  { %40747 = vmatpush3.bf16.msra.mxu0 %v45488_v47 }
 0x44d   :  { %40748 = vmatprep.subr.bf16.mxu0 %v50777_v5 }
 0x450   :  { %40750 = vmatpush3.bf16.msra.mxu0 %v45496_v55 }
 0x451   :  { %40823 = vmatprep.subr.bf16.mxu0 %v50777_v5 }
 0x453   :  { %34911 = vmatmul.mubr.f32.vlgmr.msra.gmra.mrb[20].mxu0 %v45899_v42 }
 0x454   :  { %40825 = vmatpush3.bf16.msra.mxu0 %v45275_v61  ;;  %35043 = vmatprep.mubr.msk.f32.mxu0 %vm44875_vm2, %v50778_v59 }
 0x455   :  { %40826 = vmatprep.subr.bf16.mxu0 %v50777_v5 }
 0x458   :  { %40828 = vmatpush3.bf16.msra.mxu0 %v45294_v10 }
 0x459   :  { %40829 = vmatprep.subr.bf16.mxu0 %v50777_v5 }
 0x45c   :  { %40831 = vmatpush3.bf16.msra.mxu0 %v45314_v25 }
 0x45d   :  { %40832 = vmatprep.subr.bf16.mxu0 %v50777_v5 }
 0x460   :  { %40834 = vmatpush3.bf16.msra.mxu0 %v45330_v8 }
 0x461   :  { %40835 = vmatprep.subr.bf16.mxu0 %v50777_v5 }
 0x4c6   :  { %v5406_v49 = vpop.f32.mrb[18].mxu0  ;;  %v5943_v40 = vpop.f32.mrb[22].mxu1 }
 0x4c7   :  { %v34684_v54 = vpop.f32.mrb[19].mxu0  ;;  %v34798_v42 = vpop.f32.mrb[23].mxu1  ;;  %v5948_v13 = vrot.slane %v5406_v49, 4  ;;  %v5958_v4 = vrot.slane %v5943_v40, 4 }
 0x4c9   :  { %v5950_v33 = vadd.f32 %v45663_v26, %v5948_v13  ;;  %v5960_v34 = vadd.f32 %v45654_v32, %v5958_v4 }
 0x4cb   :  { %v30690_v35 = vmul.f32 -1.442695, %v5950_v33  ;;  %v30691_v48 = vmul.f32 -1.442695, %v5960_v34  ;;  %v50599_v34 = vrot.slane %v45895_v1, 6 }
 0x4cd   :  { %44730 = vpow2.f32 %v30690_v35 }
 0x4ce   :  { %44732 = vpow2.f32 %v30691_v48 }
 0x4d7   :  { %v44731_v7 = vpop.eup %44730 }
 0x4d8   :  { %v5954_v9 = vadd.f32 1.0, %v44731_v7  ;;  %v44733_v22 = vpop.eup %44732 }
 0x4d9   :  { %v5964_v14 = vadd.f32 1.0, %v44733_v22 }
 0x4da   :  { %44734 = vrcp.f32 %v5954_v9 }
 0x4db   :  { %44736 = vrcp.f32 %v5964_v14 }
 0x4e4   :  { %v44735_v49 = vpop.eup %44734 }
 0x4e5   :  { %v44737_v33 = vpop.eup %44736 }
 0x4e6   :  { %v6510_v35 = vsub.f32 1.0, %v44737_v33  ;;  %v6514_v9 = vmul.f32 %v44737_v33, %v50599_v34  ;;  %v50801_v33 = vld [vmem:[#allocation14_spill] sm:$0xff] }
 0x526   :  { %v6500_v21 = vpop.f32.mrb[20].mxu0 }
 0x527   :  { %v44217_v2 = vadd.f32 %v45670_v39, %v6500_v21  ;;  %v34912_v54 = vpop.f32.mrb[21].mxu0 }
 0x529   :  { %v6505_v42 = vrot.slane %v44217_v2, 4 }
 0x52b   :  { %v6507_v13 = vmul.f32 %v44735_v49, %v6505_v42 }
 0x52d   :  { %v6508_v40 = vadd.f32 %v45673_v17, %v6507_v13  ;;  %v50799_v13 = vld [vmem:[#allocation12_spill] sm:$0xff] }
 0x52f   :  { %44738 = vtanh.f32 %v6508_v40  ;;  %v50800_v40 = vld [vmem:[#allocation13_spill] sm:$0xff] }
 0x539   :  { %v44739_v48 = vpop.eup %44738 }
 0x53a   :  { %v6511_v7 = vmul.f32 %v44739_v48, %v6510_v35  ;;  %v50802_v35 = vld [vmem:[#allocation15_spill] sm:$0xff]  ;;  %v50803_v48 = vld [vmem:[#allocation16_spill] sm:$0xff] }
 0x53c   :  { %v46116_v22 = vadd.f32 %v6514_v9, %v6511_v7  ;;  %v50804_v7 = vld [vmem:[#allocation17_spill] sm:$0xff]  ;;  %v50805_v9 = vld [vmem:[#allocation18_spill] sm:$0xff] }
 0x53e   :  { %50798 = vst [vmem:[#allocation9_spill] sm:$0xff] %v46116_v22  ;;  %v14769_v39 = vrot.slane %v46116_v22, 2  ;;  %v6517_v2 = vrot.slane %v46116_v22, 4 }
 0x540   :  { %14770 = vrot.lane.b32.xlu1 %v14769_v39, %s44877_s18  ;;  %v6518_v14 = vsel %vm1563_vm3, %v6517_v2, 0 }
 0x541   :  { %v46122_v21 = vand.u32 4294901760, %v6518_v14 }
 0x543   :  { %v46125_v4 = vsub.f32 %v6518_v14, %v46122_v21 }
 0x545   :  { %v46128_v54 = vand.u32 4294901760, %v46125_v4 }
 0x547   :  { %v6596_v42 = vsub.f32 %v46125_v4, %v46128_v54 }
 0x549   :  { %v46132_v49 = vand.u32 4294901760, %v6596_v42 }
 0x54b   :  { %34930 = vmatmul.mubr.f32.vlgmr.msra.gmra.mrb[24].mxu1 %v46132_v49  ;;  %35044 = vmatmul.mubr.f32.vlgmr.msra.gmra.mrb[22].mxu0 %v46132_v49 }
 0x54c   :  { %40765 = vmatpush3.bf16.msra.mxu1 %v45110_v18  ;;  %40837 = vmatpush3.bf16.msra.mxu0 %v45325_v30 }
 0x54d   :  { %40766 = vmatprep.subr.bf16.mxu1 %v50777_v5  ;;  %40838 = vmatprep.subr.bf16.mxu0 %v50777_v5 }
 0x54e   :  { %34948 = vmatprep.mubr.msk.f32.mxu1 %vm44875_vm2, %v50778_v59  ;;  %35062 = vmatprep.mubr.msk.f32.mxu0 %vm44875_vm2, %v50778_v59 }
 0x550   :  { %40768 = vmatpush3.bf16.msra.mxu1 %v45127_v28  ;;  %40840 = vmatpush3.bf16.msra.mxu0 %v45335_v11 }
 0x551   :  { %40769 = vmatprep.subr.bf16.mxu1 %v50777_v5  ;;  %40841 = vmatprep.subr.bf16.mxu0 %v50777_v5 }
 0x554   :  { %40771 = vmatpush3.bf16.msra.mxu1 %v45139_v31  ;;  %40843 = vmatpush3.bf16.msra.mxu0 %v45351_v46 }
 0x555   :  { %40772 = vmatprep.subr.bf16.mxu1 %v50777_v5  ;;  %40844 = vmatprep.subr.bf16.mxu0 %v50777_v5 }
 0x558   :  { %40774 = vmatpush3.bf16.msra.mxu1 %v45147_v36  ;;  %40846 = vmatpush3.bf16.msra.mxu0 %v45364_v53 }
 0x559   :  { %40775 = vmatprep.subr.bf16.mxu1 %v50777_v5  ;;  %40847 = vmatprep.subr.bf16.mxu0 %v50777_v5 }
 0x55b   :  { %34949 = vmatmul.mubr.f32.vlgmr.msra.gmra.mrb[24].mxu1 %v46122_v21  ;;  %35063 = vmatmul.mubr.f32.vlgmr.msra.gmra.mrb[22].mxu0 %v46122_v21 }
 0x55c   :  { %40777 = vmatpush3.bf16.msra.mxu1 %v45153_v37  ;;  %40849 = vmatpush3.bf16.msra.mxu0 %v45347_v45 }
 0x55d   :  { %40778 = vmatprep.subr.bf16.mxu1 %v50777_v5  ;;  %40850 = vmatprep.subr.bf16.mxu0 %v50777_v5 }
 0x55e   :  { %34967 = vmatprep.mubr.msk.f32.mxu1 %vm44875_vm2, %v50778_v59  ;;  %35081 = vmatprep.mubr.msk.f32.mxu0 %vm44875_vm2, %v50778_v59 }
 0x560   :  { %40780 = vmatpush3.bf16.msra.mxu1 %v45164_v12  ;;  %40852 = vmatpush3.bf16.msra.mxu0 %v45358_v51 }
 0x561   :  { %40781 = vmatprep.subr.bf16.mxu1 %v50777_v5  ;;  %40853 = vmatprep.subr.bf16.mxu0 %v50777_v5 }
 0x564   :  { %40783 = vmatpush3.bf16.msra.mxu1 %v45172_v15  ;;  %40855 = vmatpush3.bf16.msra.mxu0 %v45370_v57 }
 0x565   :  { %40784 = vmatprep.subr.bf16.mxu1 %v50777_v5  ;;  %40856 = vmatprep.subr.bf16.mxu0 %v50777_v5 }
 0x568   :  { %40786 = vmatpush3.bf16.msra.mxu1 %v45182_v16  ;;  %40858 = vmatpush3.bf16.msra.mxu0 %v45378_v60 }
 0x569   :  { %40787 = vmatprep.subr.bf16.mxu1 %v50777_v5  ;;  %40859 = vmatprep.subr.bf16.mxu0 %v50777_v5 }
 0x56b   :  { %34968 = vmatmul.mubr.f32.vlgmr.msra.gmra.mrb[24].mxu1 %v46125_v4  ;;  %35082 = vmatmul.mubr.f32.vlgmr.msra.gmra.mrb[22].mxu0 %v46125_v4 }
 0x56c   :  { %40789 = vmatpush3.bf16.msra.mxu1 %v45035_v41  ;;  %40861 = vmatpush3.bf16.msra.mxu0 %v45275_v61 }
 0x56d   :  { %40790 = vmatprep.subr.bf16.mxu1 %v50777_v5  ;;  %40862 = vmatprep.subr.bf16.mxu0 %v50777_v5 }
 0x56e   :  { %34986 = vmatprep.mubr.msk.f32.mxu1 %vm44875_vm2, %v50778_v59  ;;  %35100 = vmatprep.mubr.msk.f32.mxu0 %vm44875_vm2, %v50778_v59 }
 0x570   :  { %40792 = vmatpush3.bf16.msra.mxu1 %v45060_v52  ;;  %40864 = vmatpush3.bf16.msra.mxu0 %v45294_v10 }
 0x571   :  { %40793 = vmatprep.subr.bf16.mxu1 %v50777_v5  ;;  %40865 = vmatprep.subr.bf16.mxu0 %v50777_v5 }
 0x574   :  { %40795 = vmatpush3.bf16.msra.mxu1 %v45082_v0  ;;  %40867 = vmatpush3.bf16.msra.mxu0 %v45314_v25 }
 0x575   :  { %40796 = vmatprep.subr.bf16.mxu1 %v50777_v5  ;;  %40868 = vmatprep.subr.bf16.mxu0 %v50777_v5 }
 0x578   :  { %40798 = vmatpush3.bf16.msra.mxu1 %v45090_v3  ;;  %40870 = vmatpush3.bf16.msra.mxu0 %v45330_v8 }
 0x579   :  { %40799 = vmatprep.subr.bf16.mxu1 %v50777_v5  ;;  %40871 = vmatprep.subr.bf16.mxu0 %v50777_v5 }
 0x57b   :  { %34987 = vmatmul.mubr.f32.vlgmr.msra.gmra.mrb[24].mxu1 %v46128_v54  ;;  %35101 = vmatmul.mubr.f32.vlgmr.msra.gmra.mrb[22].mxu0 %v46128_v54 }
 0x57c   :  { %40801 = vmatpush3.bf16.msra.mxu1 %v45200_v19  ;;  %40873 = vmatpush3.bf16.msra.mxu0 %v45391_v62 }
 0x57d   :  { %40802 = vmatprep.subr.bf16.mxu1 %v50777_v5  ;;  %40874 = vmatprep.subr.bf16.mxu0 %v50777_v5 }
 0x57e   :  { %35005 = vmatprep.mubr.msk.f32.mxu1 %vm44875_vm2, %v50778_v59  ;;  %35119 = vmatprep.mubr.msk.f32.mxu0 %vm44875_vm2, %v50778_v59 }
 0x580   :  { %40804 = vmatpush3.bf16.msra.mxu1 %v45216_v38  ;;  %40876 = vmatpush3.bf16.msra.mxu0 %v45402_v63 }
 0x581   :  { %40805 = vmatprep.subr.bf16.mxu1 %v50777_v5  ;;  %40877 = vmatprep.subr.bf16.mxu0 %v50777_v5 }
 0x584   :  { %40807 = vmatpush3.bf16.msra.mxu1 %v45234_v43  ;;  %40879 = vmatpush3.bf16.msra.mxu0 %v45414_v44 }
 0x585   :  { %40808 = vmatprep.subr.bf16.mxu1 %v50777_v5  ;;  %40880 = vmatprep.subr.bf16.mxu0 %v50777_v5 }
 0x588   :  { %40810 = vmatpush3.bf16.msra.mxu1 %v45254_v50  ;;  %40882 = vmatpush3.bf16.msra.mxu0 %v45428_v56 }
 0x589   :  { %40811 = vmatprep.subr.bf16.mxu1 %v50777_v5  ;;  %40883 = vmatprep.subr.bf16.mxu0 %v50777_v5 }
 0x58b   :  { %35006 = vmatmul.mubr.f32.vlgmr.msra.gmra.mrb[24].mxu1 %v46122_v21  ;;  %35120 = vmatmul.mubr.f32.vlgmr.msra.gmra.mrb[22].mxu0 %v46122_v21 }
 0x58c   :  { %40813 = vmatpush3.bf16.msra.mxu1 %v45035_v41  ;;  %40885 = vmatpush3.bf16.msra.mxu0 %v45275_v61 }
 0x58d   :  { %40814 = vmatprep.subr.bf16.mxu1 %v50777_v5  ;;  %40886 = vmatprep.subr.bf16.mxu0 %v50777_v5 }
 0x58e   :  { %35024 = vmatprep.mubr.msk.f32.mxu1 %vm44875_vm2, %v50778_v59  ;;  %35138 = vmatprep.mubr.msk.f32.mxu0 %vm44875_vm2, %v50778_v59 }
 0x590   :  { %40816 = vmatpush3.bf16.msra.mxu1 %v45060_v52  ;;  %40888 = vmatpush3.bf16.msra.mxu0 %v45294_v10 }
 0x591   :  { %40817 = vmatprep.subr.bf16.mxu1 %v50777_v5  ;;  %40889 = vmatprep.subr.bf16.mxu0 %v50777_v5 }
 0x594   :  { %40819 = vmatpush3.bf16.msra.mxu1 %v45082_v0  ;;  %40891 = vmatpush3.bf16.msra.mxu0 %v45314_v25 }
 0x595   :  { %40820 = vmatprep.subr.bf16.mxu1 %v50777_v5  ;;  %40892 = vmatprep.subr.bf16.mxu0 %v50777_v5 }
 0x598   :  { %40822 = vmatpush3.bf16.msra.mxu1 %v45090_v3  ;;  %40894 = vmatpush3.bf16.msra.mxu0 %v45330_v8 }
 0x599   :  { %40895 = vmatprep.subr.bf16.mxu1 %v50777_v5  ;;  %40967 = vmatprep.subr.bf16.mxu0 %v50777_v5 }
 0x59b   :  { %35025 = vmatmul.mubr.f32.vlgmr.msra.gmra.mrb[24].mxu1 %v46122_v21  ;;  %35139 = vmatmul.mubr.f32.vlgmr.msra.gmra.mrb[22].mxu0 %v46122_v21 }
 0x59c   :  { %40897 = vmatpush3.bf16.msra.mxu1 %v45447_v6  ;;  %35157 = vmatprep.mubr.msk.f32.mxu1 %vm44875_vm2, %v50778_v59 }
 0x59d   :  { %40898 = vmatprep.subr.bf16.mxu1 %v50777_v5  ;;  %40969 = vmatpush3.bf16.msra.mxu0 %v45035_v41 }
 0x59e   :  { %40970 = vmatprep.subr.bf16.mxu0 %v50777_v5  ;;  %35271 = vmatprep.mubr.msk.f32.mxu0 %vm44875_vm2, %v50778_v59 }
 0x5a0   :  { %40900 = vmatpush3.bf16.msra.mxu1 %v45472_v24 }
 0x5a1   :  { %40901 = vmatprep.subr.bf16.mxu1 %v50777_v5  ;;  %40972 = vmatpush3.bf16.msra.mxu0 %v45060_v52 }
 0x5a2   :  { %40973 = vmatprep.subr.bf16.mxu0 %v50777_v5 }
 0x5a4   :  { %40903 = vmatpush3.bf16.msra.mxu1 %v45488_v47 }
 0x5a5   :  { %40904 = vmatprep.subr.bf16.mxu1 %v50777_v5  ;;  %40975 = vmatpush3.bf16.msra.mxu0 %v45082_v0 }
 0x5a6   :  { %40976 = vmatprep.subr.bf16.mxu0 %v50777_v5 }
 0x5a8   :  { %40906 = vmatpush3.bf16.msra.mxu1 %v45496_v55 }
 0x5a9   :  { %40907 = vmatprep.subr.bf16.mxu1 %v50777_v5  ;;  %40978 = vmatpush3.bf16.msra.mxu0 %v45090_v3 }
 0x5aa   :  { %40991 = vmatprep.subr.bf16.mxu0 %v50777_v5 }
 0x5ab   :  { %35158 = vmatmul.mubr.f32.vlgmr.msra.gmra.mrb[26].mxu1 %v46132_v49 }
 0x5ac   :  { %40909 = vmatpush3.bf16.msra.mxu1 %v45517_v29  ;;  %35176 = vmatprep.mubr.msk.f32.mxu1 %vm44875_vm2, %v50778_v59 }
 0x5ad   :  { %40910 = vmatprep.subr.bf16.mxu1 %v50777_v5 }
 0x5b0   :  { %40912 = vmatpush3.bf16.msra.mxu1 %v50779_v20 }
 0x5b1   :  { %40913 = vmatprep.subr.bf16.mxu1 %v50777_v5 }
 0x5b4   :  { %40915 = vmatpush3.bf16.msra.mxu1 %v50780_v27 }
 0x5b5   :  { %40916 = vmatprep.subr.bf16.mxu1 %v50777_v5 }
 0x5b8   :  { %40918 = vmatpush3.bf16.msra.mxu1 %v50781_v58 }
 0x5b9   :  { %40919 = vmatprep.subr.bf16.mxu1 %v50777_v5 }
 0x5bb   :  { %35177 = vmatmul.mubr.f32.vlgmr.msra.gmra.mrb[26].mxu1 %v46122_v21 }
 0x5bc   :  { %40921 = vmatpush3.bf16.msra.mxu1 %v50782_v23  ;;  %35195 = vmatprep.mubr.msk.f32.mxu1 %vm44875_vm2, %v50778_v59 }
 0x5bd   :  { %40922 = vmatprep.subr.bf16.mxu1 %v50777_v5 }
 0x5c0   :  { %40924 = vmatpush3.bf16.msra.mxu1 %v50799_v13 }
 0x5c1   :  { %40925 = vmatprep.subr.bf16.mxu1 %v50777_v5 }
 0x5c4   :  { %40927 = vmatpush3.bf16.msra.mxu1 %v50800_v40 }
 0x5c5   :  { %40928 = vmatprep.subr.bf16.mxu1 %v50777_v5 }
 0x5c8   :  { %40930 = vmatpush3.bf16.msra.mxu1 %v50801_v33 }
 0x5c9   :  { %40931 = vmatprep.subr.bf16.mxu1 %v50777_v5 }
 0x5cb   :  { %35196 = vmatmul.mubr.f32.vlgmr.msra.gmra.mrb[26].mxu1 %v46125_v4 }
 0x5cc   :  { %40933 = vmatpush3.bf16.msra.mxu1 %v45447_v6  ;;  %35214 = vmatprep.mubr.msk.f32.mxu1 %vm44875_vm2, %v50778_v59 }
 0x5cd   :  { %40934 = vmatprep.subr.bf16.mxu1 %v50777_v5 }
 0x5d0   :  { %40936 = vmatpush3.bf16.msra.mxu1 %v45472_v24 }
 0x5d1   :  { %40937 = vmatprep.subr.bf16.mxu1 %v50777_v5 }
 0x5d4   :  { %40939 = vmatpush3.bf16.msra.mxu1 %v45488_v47 }
 0x5d5   :  { %40940 = vmatprep.subr.bf16.mxu1 %v50777_v5 }
 0x5d8   :  { %40942 = vmatpush3.bf16.msra.mxu1 %v45496_v55 }
 0x5d9   :  { %40943 = vmatprep.subr.bf16.mxu1 %v50777_v5 }
 0x5db   :  { %35215 = vmatmul.mubr.f32.vlgmr.msra.gmra.mrb[26].mxu1 %v46128_v54 }
 0x5dc   :  { %40945 = vmatpush3.bf16.msra.mxu1 %v50802_v35  ;;  %35233 = vmatprep.mubr.msk.f32.mxu1 %vm44875_vm2, %v50778_v59 }
 0x5dd   :  { %40946 = vmatprep.subr.bf16.mxu1 %v50777_v5 }
 0x5e0   :  { %40948 = vmatpush3.bf16.msra.mxu1 %v50803_v48 }
 0x5e1   :  { %40949 = vmatprep.subr.bf16.mxu1 %v50777_v5 }
 0x5e4   :  { %40951 = vmatpush3.bf16.msra.mxu1 %v50804_v7 }
 0x5e5   :  { %40952 = vmatprep.subr.bf16.mxu1 %v50777_v5 }
 0x5e8   :  { %40954 = vmatpush3.bf16.msra.mxu1 %v50805_v9 }
 0x5e9   :  { %40955 = vmatprep.subr.bf16.mxu1 %v50777_v5 }
 0x5eb   :  { %35234 = vmatmul.mubr.f32.vlgmr.msra.gmra.mrb[26].mxu1 %v46122_v21 }
 0x5ec   :  { %40957 = vmatpush3.bf16.msra.mxu1 %v45447_v6  ;;  %35252 = vmatprep.mubr.msk.f32.mxu1 %vm44875_vm2, %v50778_v59 }
 0x5ed   :  { %40958 = vmatprep.subr.bf16.mxu1 %v50777_v5 }
 0x5f0   :  { %40960 = vmatpush3.bf16.msra.mxu1 %v45472_v24 }
 0x5f1   :  { %40961 = vmatprep.subr.bf16.mxu1 %v50777_v5 }
 0x5f4   :  { %40963 = vmatpush3.bf16.msra.mxu1 %v45488_v47 }
 0x5f5   :  { %40964 = vmatprep.subr.bf16.mxu1 %v50777_v5 }
 0x5f8   :  { %40966 = vmatpush3.bf16.msra.mxu1 %v45496_v55 }
 0x5f9   :  { %40979 = vmatprep.subr.bf16.mxu1 %v50777_v5 }
 0x5fb   :  { %35253 = vmatmul.mubr.f32.vlgmr.msra.gmra.mrb[26].mxu1 %v46122_v21 }
 0x5fc   :  { %40981 = vmatpush3.bf16.msra.mxu1 %v45110_v18  ;;  %35290 = vmatprep.mubr.msk.f32.mxu1 %vm44875_vm2, %v50778_v59 }
 0x5fd   :  { %40982 = vmatprep.subr.bf16.mxu1 %v50777_v5 }
 0x600   :  { %40984 = vmatpush3.bf16.msra.mxu1 %v45127_v28 }
 0x601   :  { %40985 = vmatprep.subr.bf16.mxu1 %v50777_v5 }
 0x604   :  { %40987 = vmatpush3.bf16.msra.mxu1 %v45139_v31 }
 0x605   :  { %40988 = vmatprep.subr.bf16.mxu1 %v50777_v5 }
 0x608   :  { %40990 = vmatpush3.bf16.msra.mxu1 %v45147_v36 }
 0x609   :  { %41003 = vmatprep.subr.bf16.mxu1 %v50777_v5 }
 0x66e   :  { %v7053_v39 = vpop.f32.mrb[24].mxu1  ;;  %v7590_v2 = vpop.f32.mrb[22].mxu0 }
 0x66f   :  { %v35026_v14 = vpop.f32.mrb[25].mxu1  ;;  %v35140_v21 = vpop.f32.mrb[23].mxu0  ;;  %v7595_v4 = vrot.slane %v7053_v39, 2  ;;  %v7605_v49 = vrot.slane %v7590_v2, 2 }
 0x670   :  { %v46337_v14 = vld [vmem:[%s50560_s4] ss:$0 sm:$0xff] }
 0x671   :  { %v7597_v54 = vadd.f32 %v45663_v26, %v7595_v4  ;;  %v7607_v34 = vadd.f32 %v45654_v32, %v7605_v49 }
 0x673   :  { %v30692_v42 = vmul.f32 -1.442695, %v7597_v54  ;;  %v30693_v1 = vmul.f32 -1.442695, %v7607_v34 }
 0x675   :  { %44740 = vpow2.f32 %v30692_v42 }
 0x676   :  { %44742 = vpow2.f32 %v30693_v1  ;;  %v8159_v1 = vrot.slane %v46116_v22, 6 }
 0x67f   :  { %v44741_v31 = vpop.eup %44740 }
 0x680   :  { %v7601_v28 = vadd.f32 1.0, %v44741_v31  ;;  %v44743_v36 = vpop.eup %44742 }
 0x681   :  { %v7611_v9 = vadd.f32 1.0, %v44743_v36 }
 0x682   :  { %44744 = vrcp.f32 %v7601_v28 }
 0x683   :  { %44746 = vrcp.f32 %v7611_v9 }
 0x68c   :  { %v44745_v21 = vpop.eup %44744 }
 0x68d   :  { %v44747_v31 = vpop.eup %44746 }
 0x68e   :  { %v8157_v28 = vsub.f32 1.0, %v44747_v31  ;;  %v8161_v54 = vmul.f32 %v44747_v31, %v8159_v1 }
 0x6ce   :  { %v8147_v18 = vpop.f32.mrb[26].mxu1 }
 0x6cf   :  { %v44218_v26 = vadd.f32 %v46337_v14, %v8147_v18  ;;  %v35254_v39 = vpop.f32.mrb[27].mxu1 }
 0x6d1   :  { %v8152_v2 = vrot.slane %v44218_v26, 2 }
 0x6d3   :  { %v8154_v32 = vmul.f32 %v44745_v21, %v8152_v2  ;;  %v50806_v21 = vld [vmem:[#allocation18_spill] sm:$0xff] }
 0x6d5   :  { %v8155_v34 = vadd.f32 %v45673_v17, %v8154_v32 }
 0x6d7   :  { %44748 = vtanh.f32 %v8155_v34 }
 0x6e1   :  { %v44749_v36 = vpop.eup %44748 }
 0x6e2   :  { %v8158_v4 = vmul.f32 %v44749_v36, %v8157_v28 }
 0x6e4   :  { %v46342_v42 = vadd.f32 %v8161_v54, %v8158_v4 }
 0x6e6   :  { %v46345_v49 = vrot.slane %v46342_v42, 6 }
 0x6e8   :  { %14764 = vrot.lane.b32.xlu0 %v46345_v49, %s44877_s18  ;;  %v8165_v18 = vsel %vm1563_vm3, %v46345_v49, 0 }
 0x6e9   :  { %v46351_v17 = vand.u32 4294901760, %v8165_v18 }
 0x6eb   :  { %v46354_v9 = vsub.f32 %v8165_v18, %v46351_v17  ;;  %35291 = vmatmul.mubr.f32.vlgmr.msra.gmra.mrb[28].mxu1 %v46351_v17 }
 0x6ec   :  { %41005 = vmatpush3.bf16.msra.mxu1 %v45035_v41  ;;  %35328 = vmatprep.mubr.msk.f32.mxu1 %vm44875_vm2, %v50778_v59 }
 0x6ed   :  { %41006 = vmatprep.subr.bf16.mxu1 %v50777_v5  ;;  %v46362_v26 = vand.u32 4294901760, %v46354_v9 }
 0x6ef   :  { %v8243_v39 = vsub.f32 %v46354_v9, %v46362_v26 }
 0x6f0   :  { %41008 = vmatpush3.bf16.msra.mxu1 %v45060_v52 }
 0x6f1   :  { %41009 = vmatprep.subr.bf16.mxu1 %v50777_v5  ;;  %v46368_v2 = vand.u32 4294901760, %v8243_v39 }
 0x6f3   :  { %35272 = vmatmul.mubr.f32.vlgmr.msra.gmra.mrb[24].mxu0 %v46368_v2 }
 0x6f4   :  { %40993 = vmatpush3.bf16.msra.mxu0 %v45153_v37  ;;  %41011 = vmatpush3.bf16.msra.mxu1 %v45082_v0 }
 0x6f5   :  { %40994 = vmatprep.subr.bf16.mxu0 %v50777_v5  ;;  %41012 = vmatprep.subr.bf16.mxu1 %v50777_v5 }
 0x6f6   :  { %35309 = vmatprep.mubr.msk.f32.mxu0 %vm44875_vm2, %v50778_v59 }
 0x6f8   :  { %40996 = vmatpush3.bf16.msra.mxu0 %v45164_v12  ;;  %41014 = vmatpush3.bf16.msra.mxu1 %v45090_v3 }
 0x6f9   :  { %40997 = vmatprep.subr.bf16.mxu0 %v50777_v5  ;;  %41027 = vmatprep.subr.bf16.mxu1 %v50777_v5 }
 0x6fb   :  { %35329 = vmatmul.mubr.f32.vlgmr.msra.gmra.mrb[30].mxu1 %v46362_v26 }
 0x6fc   :  { %40999 = vmatpush3.bf16.msra.mxu0 %v45172_v15  ;;  %41029 = vmatpush3.bf16.msra.mxu1 %v45035_v41 }
 0x6fd   :  { %41000 = vmatprep.subr.bf16.mxu0 %v50777_v5  ;;  %41030 = vmatprep.subr.bf16.mxu1 %v50777_v5 }
 0x6fe   :  { %35366 = vmatprep.mubr.msk.f32.mxu1 %vm44875_vm2, %v50778_v59 }
 0x700   :  { %41002 = vmatpush3.bf16.msra.mxu0 %v45182_v16  ;;  %41032 = vmatpush3.bf16.msra.mxu1 %v45060_v52 }
 0x701   :  { %41015 = vmatprep.subr.bf16.mxu0 %v50777_v5  ;;  %41033 = vmatprep.subr.bf16.mxu1 %v50777_v5 }
 0x703   :  { %35310 = vmatmul.mubr.f32.vlgmr.msra.gmra.mrb[26].mxu0 %v46354_v9 }
 0x704   :  { %41017 = vmatpush3.bf16.msra.mxu0 %v45200_v19  ;;  %41035 = vmatpush3.bf16.msra.mxu1 %v45082_v0 }
 0x705   :  { %41018 = vmatprep.subr.bf16.mxu0 %v50777_v5  ;;  %41036 = vmatprep.subr.bf16.mxu1 %v50777_v5 }
 0x706   :  { %35347 = vmatprep.mubr.msk.f32.mxu0 %vm44875_vm2, %v50778_v59 }
 0x708   :  { %41020 = vmatpush3.bf16.msra.mxu0 %v45216_v38  ;;  %41038 = vmatpush3.bf16.msra.mxu1 %v45090_v3 }
 0x709   :  { %41021 = vmatprep.subr.bf16.mxu0 %v50777_v5  ;;  %41051 = vmatprep.subr.bf16.mxu1 %v50777_v5 }
 0x70b   :  { %35367 = vmatmul.mubr.f32.vlgmr.msra.gmra.mrb[32].mxu1 %v46351_v17 }
 0x70c   :  { %41023 = vmatpush3.bf16.msra.mxu0 %v45234_v43  ;;  %41053 = vmatpush3.bf16.msra.mxu1 %v45325_v30 }
 0x70d   :  { %41024 = vmatprep.subr.bf16.mxu0 %v50777_v5  ;;  %41054 = vmatprep.subr.bf16.mxu1 %v50777_v5 }
 0x70e   :  { %35404 = vmatprep.mubr.msk.f32.mxu1 %vm44875_vm2, %v50778_v59 }
 0x710   :  { %41026 = vmatpush3.bf16.msra.mxu0 %v45254_v50  ;;  %41056 = vmatpush3.bf16.msra.mxu1 %v45335_v11 }
 0x711   :  { %41039 = vmatprep.subr.bf16.mxu0 %v50777_v5  ;;  %41057 = vmatprep.subr.bf16.mxu1 %v50777_v5 }
 0x713   :  { %35348 = vmatmul.mubr.f32.vlgmr.msra.gmra.mrb[28].mxu0 %v46351_v17 }
 0x714   :  { %41041 = vmatpush3.bf16.msra.mxu0 %v45275_v61  ;;  %41059 = vmatpush3.bf16.msra.mxu1 %v45351_v46 }
 0x715   :  { %41042 = vmatprep.subr.bf16.mxu0 %v50777_v5  ;;  %41060 = vmatprep.subr.bf16.mxu1 %v50777_v5 }
 0x716   :  { %35385 = vmatprep.mubr.msk.f32.mxu0 %vm44875_vm2, %v50778_v59 }
 0x718   :  { %41044 = vmatpush3.bf16.msra.mxu0 %v45294_v10  ;;  %41062 = vmatpush3.bf16.msra.mxu1 %v45364_v53 }
 0x719   :  { %41045 = vmatprep.subr.bf16.mxu0 %v50777_v5  ;;  %41075 = vmatprep.subr.bf16.mxu1 %v50777_v5 }
 0x71b   :  { %35405 = vmatmul.mubr.f32.vlgmr.msra.gmra.mrb[34].mxu1 %v46351_v17 }
 0x71c   :  { %41047 = vmatpush3.bf16.msra.mxu0 %v45314_v25  ;;  %41077 = vmatpush3.bf16.msra.mxu1 %v45275_v61 }
 0x71d   :  { %41048 = vmatprep.subr.bf16.mxu0 %v50777_v5  ;;  %41078 = vmatprep.subr.bf16.mxu1 %v50777_v5 }
 0x71e   :  { %35442 = vmatprep.mubr.msk.f32.mxu1 %vm44875_vm2, %v50778_v59 }
 0x720   :  { %41050 = vmatpush3.bf16.msra.mxu0 %v45330_v8  ;;  %41080 = vmatpush3.bf16.msra.mxu1 %v45294_v10 }
 0x721   :  { %41063 = vmatprep.subr.bf16.mxu0 %v50777_v5  ;;  %41081 = vmatprep.subr.bf16.mxu1 %v50777_v5 }
 0x723   :  { %35386 = vmatmul.mubr.f32.vlgmr.msra.gmra.mrb[30].mxu0 %v46368_v2 }
 0x724   :  { %41065 = vmatpush3.bf16.msra.mxu0 %v45347_v45  ;;  %41083 = vmatpush3.bf16.msra.mxu1 %v45314_v25 }
 0x725   :  { %41066 = vmatprep.subr.bf16.mxu0 %v50777_v5  ;;  %41084 = vmatprep.subr.bf16.mxu1 %v50777_v5 }
 0x726   :  { %35423 = vmatprep.mubr.msk.f32.mxu0 %vm44875_vm2, %v50778_v59 }
 0x728   :  { %41068 = vmatpush3.bf16.msra.mxu0 %v45358_v51  ;;  %41086 = vmatpush3.bf16.msra.mxu1 %v45330_v8 }
 0x729   :  { %41069 = vmatprep.subr.bf16.mxu0 %v50777_v5  ;;  %41099 = vmatprep.subr.bf16.mxu1 %v50777_v5 }
 0x72b   :  { %35443 = vmatmul.mubr.f32.vlgmr.msra.gmra.mrb[36].mxu1 %v46362_v26 }
 0x72c   :  { %41071 = vmatpush3.bf16.msra.mxu0 %v45370_v57  ;;  %41101 = vmatpush3.bf16.msra.mxu1 %v45275_v61 }
 0x72d   :  { %41072 = vmatprep.subr.bf16.mxu0 %v50777_v5  ;;  %41102 = vmatprep.subr.bf16.mxu1 %v50777_v5 }
 0x72e   :  { %35480 = vmatprep.mubr.msk.f32.mxu1 %vm44875_vm2, %v50778_v59 }
 0x730   :  { %41074 = vmatpush3.bf16.msra.mxu0 %v45378_v60  ;;  %41104 = vmatpush3.bf16.msra.mxu1 %v45294_v10 }
 0x731   :  { %41087 = vmatprep.subr.bf16.mxu0 %v50777_v5  ;;  %41105 = vmatprep.subr.bf16.mxu1 %v50777_v5 }
 0x733   :  { %35424 = vmatmul.mubr.f32.vlgmr.msra.gmra.mrb[32].mxu0 %v46354_v9 }
 0x734   :  { %41089 = vmatpush3.bf16.msra.mxu0 %v45391_v62  ;;  %41107 = vmatpush3.bf16.msra.mxu1 %v45314_v25 }
 0x735   :  { %41090 = vmatprep.subr.bf16.mxu0 %v50777_v5  ;;  %41108 = vmatprep.subr.bf16.mxu1 %v50777_v5 }
 0x736   :  { %35461 = vmatprep.mubr.msk.f32.mxu0 %vm44875_vm2, %v50778_v59 }
 0x738   :  { %41092 = vmatpush3.bf16.msra.mxu0 %v45402_v63  ;;  %41110 = vmatpush3.bf16.msra.mxu1 %v45330_v8 }
 0x739   :  { %41093 = vmatprep.subr.bf16.mxu0 %v50777_v5  ;;  %41183 = vmatprep.subr.bf16.mxu1 %v50777_v5 }
 0x73b   :  { %35481 = vmatmul.mubr.f32.vlgmr.msra.gmra.mrb[38].mxu1 %v46351_v17 }
 0x73c   :  { %41095 = vmatpush3.bf16.msra.mxu0 %v45414_v44  ;;  %41185 = vmatpush3.bf16.msra.mxu1 %v45035_v41 }
 0x73d   :  { %41096 = vmatprep.subr.bf16.mxu0 %v50777_v5  ;;  %41186 = vmatprep.subr.bf16.mxu1 %v50777_v5 }
 0x73e   :  { %35613 = vmatprep.mubr.msk.f32.mxu1 %vm44875_vm2, %v50778_v59 }
 0x740   :  { %41098 = vmatpush3.bf16.msra.mxu0 %v45428_v56  ;;  %41188 = vmatpush3.bf16.msra.mxu1 %v45060_v52 }
 0x741   :  { %41111 = vmatprep.subr.bf16.mxu0 %v50777_v5  ;;  %41189 = vmatprep.subr.bf16.mxu1 %v50777_v5 }
 0x743   :  { %35462 = vmatmul.mubr.f32.vlgmr.msra.gmra.mrb[34].mxu0 %v46351_v17 }
 0x744   :  { %41113 = vmatpush3.bf16.msra.mxu0 %v45447_v6  ;;  %35499 = vmatprep.mubr.msk.f32.mxu0 %vm44875_vm2, %v50778_v59 }
 0x745   :  { %41114 = vmatprep.subr.bf16.mxu0 %v50777_v5  ;;  %41191 = vmatpush3.bf16.msra.mxu1 %v45082_v0 }
 0x746   :  { %41192 = vmatprep.subr.bf16.mxu1 %v50777_v5 }
 0x748   :  { %41116 = vmatpush3.bf16.msra.mxu0 %v45472_v24 }
 0x749   :  { %41117 = vmatprep.subr.bf16.mxu0 %v50777_v5  ;;  %41194 = vmatpush3.bf16.msra.mxu1 %v45090_v3 }
 0x74a   :  { %41195 = vmatprep.subr.bf16.mxu1 %v50777_v5 }
 0x74c   :  { %41119 = vmatpush3.bf16.msra.mxu0 %v45488_v47 }
 0x74d   :  { %41120 = vmatprep.subr.bf16.mxu0 %v50777_v5 }
 0x750   :  { %41122 = vmatpush3.bf16.msra.mxu0 %v45496_v55 }
 0x751   :  { %41123 = vmatprep.subr.bf16.mxu0 %v50777_v5 }
 0x753   :  { %35500 = vmatmul.mubr.f32.vlgmr.msra.gmra.mrb[36].mxu0 %v46368_v2 }
 0x754   :  { %41125 = vmatpush3.bf16.msra.mxu0 %v45517_v29  ;;  %35518 = vmatprep.mubr.msk.f32.mxu0 %vm44875_vm2, %v50778_v59 }
 0x755   :  { %41126 = vmatprep.subr.bf16.mxu0 %v50777_v5 }
 0x758   :  { %41128 = vmatpush3.bf16.msra.mxu0 %v50779_v20 }
 0x759   :  { %41129 = vmatprep.subr.bf16.mxu0 %v50777_v5 }
 0x75c   :  { %41131 = vmatpush3.bf16.msra.mxu0 %v50780_v27 }
 0x75d   :  { %41132 = vmatprep.subr.bf16.mxu0 %v50777_v5 }
 0x760   :  { %41134 = vmatpush3.bf16.msra.mxu0 %v50781_v58 }
 0x761   :  { %41135 = vmatprep.subr.bf16.mxu0 %v50777_v5 }
 0x763   :  { %35519 = vmatmul.mubr.f32.vlgmr.msra.gmra.mrb[36].mxu0 %v46351_v17 }
 0x764   :  { %41137 = vmatpush3.bf16.msra.mxu0 %v50782_v23  ;;  %35537 = vmatprep.mubr.msk.f32.mxu0 %vm44875_vm2, %v50778_v59 }
 0x765   :  { %41138 = vmatprep.subr.bf16.mxu0 %v50777_v5 }
 0x768   :  { %41140 = vmatpush3.bf16.msra.mxu0 %v50799_v13 }
 0x769   :  { %41141 = vmatprep.subr.bf16.mxu0 %v50777_v5 }
 0x76c   :  { %41143 = vmatpush3.bf16.msra.mxu0 %v50800_v40 }
 0x76d   :  { %41144 = vmatprep.subr.bf16.mxu0 %v50777_v5 }
 0x770   :  { %41146 = vmatpush3.bf16.msra.mxu0 %v50801_v33 }
 0x771   :  { %41147 = vmatprep.subr.bf16.mxu0 %v50777_v5 }
 0x773   :  { %35538 = vmatmul.mubr.f32.vlgmr.msra.gmra.mrb[36].mxu0 %v46354_v9 }
 0x774   :  { %41149 = vmatpush3.bf16.msra.mxu0 %v45447_v6  ;;  %35556 = vmatprep.mubr.msk.f32.mxu0 %vm44875_vm2, %v50778_v59 }
 0x775   :  { %41150 = vmatprep.subr.bf16.mxu0 %v50777_v5 }
 0x778   :  { %41152 = vmatpush3.bf16.msra.mxu0 %v45472_v24 }
 0x779   :  { %41153 = vmatprep.subr.bf16.mxu0 %v50777_v5 }
 0x77c   :  { %41155 = vmatpush3.bf16.msra.mxu0 %v45488_v47 }
 0x77d   :  { %41156 = vmatprep.subr.bf16.mxu0 %v50777_v5 }
 0x780   :  { %41158 = vmatpush3.bf16.msra.mxu0 %v45496_v55 }
 0x781   :  { %41159 = vmatprep.subr.bf16.mxu0 %v50777_v5 }
 0x783   :  { %35557 = vmatmul.mubr.f32.vlgmr.msra.gmra.mrb[36].mxu0 %v46362_v26 }
 0x784   :  { %41161 = vmatpush3.bf16.msra.mxu0 %v50802_v35  ;;  %35575 = vmatprep.mubr.msk.f32.mxu0 %vm44875_vm2, %v50778_v59 }
 0x785   :  { %41162 = vmatprep.subr.bf16.mxu0 %v50777_v5 }
 0x788   :  { %41164 = vmatpush3.bf16.msra.mxu0 %v50803_v48 }
 0x789   :  { %41165 = vmatprep.subr.bf16.mxu0 %v50777_v5 }
 0x78c   :  { %41167 = vmatpush3.bf16.msra.mxu0 %v50804_v7 }
 0x78d   :  { %41168 = vmatprep.subr.bf16.mxu0 %v50777_v5 }
 0x790   :  { %41170 = vmatpush3.bf16.msra.mxu0 %v50806_v21 }
 0x791   :  { %41171 = vmatprep.subr.bf16.mxu0 %v50777_v5 }
 0x793   :  { %35576 = vmatmul.mubr.f32.vlgmr.msra.gmra.mrb[36].mxu0 %v46351_v17 }
 0x794   :  { %41173 = vmatpush3.bf16.msra.mxu0 %v45447_v6  ;;  %35594 = vmatprep.mubr.msk.f32.mxu0 %vm44875_vm2, %v50778_v59 }
 0x795   :  { %41174 = vmatprep.subr.bf16.mxu0 %v50777_v5 }
 0x798   :  { %41176 = vmatpush3.bf16.msra.mxu0 %v45472_v24 }
 0x799   :  { %41177 = vmatprep.subr.bf16.mxu0 %v50777_v5 }
 0x79c   :  { %41179 = vmatpush3.bf16.msra.mxu0 %v45488_v47 }
 0x79d   :  { %41180 = vmatprep.subr.bf16.mxu0 %v50777_v5 }
 0x7a0   :  { %41182 = vmatpush3.bf16.msra.mxu0 %v45496_v55 }
 0x7a1   :  { %41255 = vmatprep.subr.bf16.mxu0 %v50777_v5 }
 0x7a3   :  { %35595 = vmatmul.mubr.f32.vlgmr.msra.gmra.mrb[36].mxu0 %v46351_v17 }
 0x7a4   :  { %41257 = vmatpush3.bf16.msra.mxu0 %v45275_v61  ;;  %35727 = vmatprep.mubr.msk.f32.mxu0 %vm44875_vm2, %v50778_v59 }
 0x7a5   :  { %41258 = vmatprep.subr.bf16.mxu0 %v50777_v5 }
 0x7a8   :  { %41260 = vmatpush3.bf16.msra.mxu0 %v45294_v10 }
 0x7a9   :  { %41261 = vmatprep.subr.bf16.mxu0 %v50777_v5 }
 0x7ac   :  { %41263 = vmatpush3.bf16.msra.mxu0 %v45314_v25 }
 0x7ad   :  { %41264 = vmatprep.subr.bf16.mxu0 %v50777_v5 }
 0x7b0   :  { %41266 = vmatpush3.bf16.msra.mxu0 %v45330_v8 }
 0x7b1   :  { %41267 = vmatprep.subr.bf16.mxu0 %v50777_v5 }
 0x7be   :  { %v8357_v32 = vpop.f32.mrb[28].mxu1 }
 0x7bf   :  { %v35292_v34 = vpop.f32.mrb[29].mxu1 }
 0x7c6   :  { %v8246_v31 = vpop.f32.mrb[24].mxu0 }
 0x7c7   :  { %v8358_v28 = vadd.f32 %v8357_v32, %v8246_v31  ;;  %v35273_v1 = vpop.f32.mrb[25].mxu0 }
 0x7ce   :  { %v8526_v36 = vpop.f32.mrb[30].mxu1 }
 0x7cf   :  { %v35330_v4 = vpop.f32.mrb[31].mxu1 }
 0x7d6   :  { %v8445_v54 = vpop.f32.mrb[26].mxu0 }
 0x7d7   :  { %v8446_v18 = vadd.f32 %v8445_v54, %v8358_v28  ;;  %v35311_v17 = vpop.f32.mrb[27].mxu0 }
 0x7d9   :  { %v8527_v9 = vadd.f32 %v8526_v36, %v8446_v18 }
 0x7de   :  { %v8700_v26 = vpop.f32.mrb[32].mxu1 }
 0x7df   :  { %v35368_v39 = vpop.f32.mrb[33].mxu1 }
 0x7e6   :  { %v8621_v2 = vpop.f32.mrb[28].mxu0 }
 0x7e7   :  { %v8622_v22 = vadd.f32 %v8621_v2, %v8527_v9  ;;  %v35349_v21 = vpop.f32.mrb[29].mxu0  ;;  %v50807_v9 = vld [vmem:[#allocation19_spill] sm:$0xff] }
 0x7e9   :  { %v8701_v7 = vadd.f32 %v8700_v26, %v8622_v22 }
 0x7eb   :  { %v9241_v21 = vadd.f32 %v50807_v9, %v8701_v7 }
 0x7ed   :  { %v30694_v22 = vmul.f32 -1.442695, %v9241_v21  ;;  %v14765_v21 = vpop.permute.xlu0 %14764 }
 0x7ee   :  { %v8894_v48 = vpop.f32.mrb[34].mxu1 }
 0x7ef   :  { %v35406_v35 = vpop.f32.mrb[35].mxu1  ;;  %44750 = vpow2.f32 %v30694_v22 }
 0x7f0   :  { %v50808_v35 = vld [vmem:[#allocation20_spill] sm:$0xff] }
 0x7f6   :  { %v8783_v33 = vpop.f32.mrb[30].mxu0 }
 0x7f7   :  { %v8895_v40 = vadd.f32 %v8894_v48, %v8783_v33  ;;  %v35387_v34 = vpop.f32.mrb[31].mxu0 }
 0x7f9   :  { %v44751_v48 = vpop.eup %44750 }
 0x7fa   :  { %v9245_v2 = vadd.f32 1.0, %v44751_v48 }
 0x7fe   :  { %v9063_v13 = vpop.f32.mrb[36].mxu1 }
 0x7ff   :  { %v35444_v32 = vpop.f32.mrb[37].mxu1 }
 0x806   :  { %v8982_v31 = vpop.f32.mrb[32].mxu0 }
 0x807   :  { %v8983_v1 = vadd.f32 %v8982_v31, %v8895_v40  ;;  %v35425_v4 = vpop.f32.mrb[33].mxu0 }
 0x808   :  { %v50809_v4 = vld [vmem:[#allocation21_spill] sm:$0xff] }
 0x809   :  { %v9064_v23 = vadd.f32 %v9063_v13, %v8983_v1 }
 0x80e   :  { %v9237_v28 = vpop.f32.mrb[38].mxu1 }
 0x80f   :  { %v35482_v54 = vpop.f32.mrb[39].mxu1 }
 0x816   :  { %v9158_v36 = vpop.f32.mrb[34].mxu0 }
 0x817   :  { %v9159_v18 = vadd.f32 %v9158_v36, %v9064_v23  ;;  %v35463_v17 = vpop.f32.mrb[35].mxu0 }
 0x819   :  { %v9238_v39 = vadd.f32 %v9237_v28, %v9159_v18 }
 0x81b   :  { %v9248_v26 = vadd.f32 %v50808_v35, %v9238_v39 }
 0x81d   :  { %v30695_v33 = vmul.f32 -1.442695, %v9248_v26 }
 0x81f   :  { %44752 = vpow2.f32 %v30695_v33 }
 0x820   :  { %44754 = vrcp.f32 %v9245_v2 }
 0x829   :  { %v44753_v40 = vpop.eup %44752 }
 0x82a   :  { %v9252_v34 = vadd.f32 1.0, %v44753_v40  ;;  %v44755_v23 = vpop.eup %44754 }
 0x82c   :  { %44756 = vrcp.f32 %v9252_v34 }
 0x836   :  { %v44757_v28 = vpop.eup %44756 }
 0x837   :  { %v9795_v54 = vsub.f32 1.0, %v44757_v28  ;;  %v9798_v17 = vmul.f32 %v44757_v28, %v46345_v49 }
 0x876   :  { %v9788_v13 = vpop.f32.mrb[36].mxu0 }
 0x877   :  { %v44219_v32 = vadd.f32 %v46337_v14, %v9788_v13  ;;  %v35596_v31 = vpop.f32.mrb[37].mxu0  ;;  %v50810_v13 = vld [vmem:[#allocation4_spill] sm:$0xff] }
 0x878   :  { %v50812_v31 = vld [vmem:[#allocation6_spill] sm:$0xff] }
 0x879   :  { %v9792_v1 = vmul.f32 %v44755_v23, %v44219_v32  ;;  %v50811_v32 = vld [vmem:[#allocation5_spill] sm:$0xff]  ;;  %v50813_v23 = vld [vmem:[#allocation7_spill] sm:$0xff] }
 0x87b   :  { %v9793_v7 = vadd.f32 %v50809_v4, %v9792_v1  ;;  %v46723_v1 = vpop.permute.xlu1 %14770 }
 0x87d   :  { %44758 = vtanh.f32 %v9793_v7 }
 0x887   :  { %v44759_v36 = vpop.eup %44758 }
 0x888   :  { %v9796_v18 = vmul.f32 %v44759_v36, %v9795_v54  ;;  %v50814_v54 = vld [vmem:[#allocation11_spill] sm:$0xff]  ;;  %v50815_v36 = vld [vmem:[#allocation12_spill] sm:$0xff] }
 0x88a   :  { %v46566_v39 = vadd.f32 %v9798_v17, %v9796_v18  ;;  %v50817_v18 = vld [vmem:[#allocation14_spill] sm:$0xff]  ;;  %v50818_v17 = vld [vmem:[#allocation15_spill] sm:$0xff] }
 0x88c   :  { %v14758_v22 = vrot.slane %v46566_v39, 2  ;;  %v14767_v26 = vsel %vm1563_vm3, %v46566_v39, %v14765_v21  ;;  %v9801_v33 = vsel %vm1563_vm3, %v46566_v39, 0  ;;  %v50819_v21 = vld [vmem:[#allocation16_spill] sm:$0xff] }
 0x88d   :  { %14768 = vst [vmem:[#allocation2 + $0x8] sm:$0x3] %v14767_v26  ;;  %v46573_v48 = vand.u32 4294901760, %v9801_v33  ;;  %v50821_v26 = vld [vmem:[#allocation18_spill] sm:$0xff] }
 0x88e   :  { %14759 = vrot.lane.b32.xlu1 %v14758_v22, %s44877_s18  ;;  %v50820_v22 = vld [vmem:[#allocation17_spill] sm:$0xff] }
 0x88f   :  { %v46577_v2 = vsub.f32 %v9801_v33, %v46573_v48 }
 0x891   :  { %v46580_v49 = vand.u32 4294901760, %v46577_v2 }
 0x893   :  { %v9879_v40 = vsub.f32 %v46577_v2, %v46580_v49 }
 0x895   :  { %v46584_v34 = vand.u32 4294901760, %v9879_v40 }
 0x897   :  { %35614 = vmatmul.mubr.f32.vlgmr.msra.gmra.mrb[40].mxu1 %v46584_v34  ;;  %35728 = vmatmul.mubr.f32.vlgmr.msra.gmra.mrb[38].mxu0 %v46584_v34 }
 0x898   :  { %41197 = vmatpush3.bf16.msra.mxu1 %v50810_v13  ;;  %41269 = vmatpush3.bf16.msra.mxu0 %v45325_v30 }
 0x899   :  { %41198 = vmatprep.subr.bf16.mxu1 %v50777_v5  ;;  %41270 = vmatprep.subr.bf16.mxu0 %v50777_v5 }
 0x89a   :  { %35632 = vmatprep.mubr.msk.f32.mxu1 %vm44875_vm2, %v50778_v59  ;;  %35746 = vmatprep.mubr.msk.f32.mxu0 %vm44875_vm2, %v50778_v59 }
 0x89c   :  { %41200 = vmatpush3.bf16.msra.mxu1 %v50811_v32  ;;  %41272 = vmatpush3.bf16.msra.mxu0 %v45335_v11 }
 0x89d   :  { %41201 = vmatprep.subr.bf16.mxu1 %v50777_v5  ;;  %41273 = vmatprep.subr.bf16.mxu0 %v50777_v5 }
 0x8a0   :  { %41203 = vmatpush3.bf16.msra.mxu1 %v50812_v31  ;;  %41275 = vmatpush3.bf16.msra.mxu0 %v45351_v46 }
 0x8a1   :  { %41204 = vmatprep.subr.bf16.mxu1 %v50777_v5  ;;  %41276 = vmatprep.subr.bf16.mxu0 %v50777_v5 }
 0x8a4   :  { %41206 = vmatpush3.bf16.msra.mxu1 %v50813_v23  ;;  %41278 = vmatpush3.bf16.msra.mxu0 %v45364_v53 }
 0x8a5   :  { %41207 = vmatprep.subr.bf16.mxu1 %v50777_v5  ;;  %41279 = vmatprep.subr.bf16.mxu0 %v50777_v5 }
 0x8a7   :  { %35633 = vmatmul.mubr.f32.vlgmr.msra.gmra.mrb[40].mxu1 %v46573_v48  ;;  %35747 = vmatmul.mubr.f32.vlgmr.msra.gmra.mrb[38].mxu0 %v46573_v48 }
 0x8a8   :  { %41209 = vmatpush3.bf16.msra.mxu1 %v45153_v37  ;;  %41281 = vmatpush3.bf16.msra.mxu0 %v45347_v45 }
 0x8a9   :  { %41210 = vmatprep.subr.bf16.mxu1 %v50777_v5  ;;  %41282 = vmatprep.subr.bf16.mxu0 %v50777_v5 }
 0x8aa   :  { %35651 = vmatprep.mubr.msk.f32.mxu1 %vm44875_vm2, %v50778_v59  ;;  %35765 = vmatprep.mubr.msk.f32.mxu0 %vm44875_vm2, %v50778_v59 }
 0x8ac   :  { %41212 = vmatpush3.bf16.msra.mxu1 %v45164_v12  ;;  %41284 = vmatpush3.bf16.msra.mxu0 %v45358_v51 }
 0x8ad   :  { %41213 = vmatprep.subr.bf16.mxu1 %v50777_v5  ;;  %41285 = vmatprep.subr.bf16.mxu0 %v50777_v5 }
 0x8b0   :  { %41215 = vmatpush3.bf16.msra.mxu1 %v45172_v15  ;;  %41287 = vmatpush3.bf16.msra.mxu0 %v45370_v57 }
 0x8b1   :  { %41216 = vmatprep.subr.bf16.mxu1 %v50777_v5  ;;  %41288 = vmatprep.subr.bf16.mxu0 %v50777_v5 }
 0x8b4   :  { %41218 = vmatpush3.bf16.msra.mxu1 %v45182_v16  ;;  %41290 = vmatpush3.bf16.msra.mxu0 %v45378_v60 }
 0x8b5   :  { %41219 = vmatprep.subr.bf16.mxu1 %v50777_v5  ;;  %41291 = vmatprep.subr.bf16.mxu0 %v50777_v5 }
 0x8b7   :  { %35652 = vmatmul.mubr.f32.vlgmr.msra.gmra.mrb[40].mxu1 %v46577_v2  ;;  %35766 = vmatmul.mubr.f32.vlgmr.msra.gmra.mrb[38].mxu0 %v46577_v2 }
 0x8b8   :  { %41221 = vmatpush3.bf16.msra.mxu1 %v45035_v41  ;;  %41293 = vmatpush3.bf16.msra.mxu0 %v45275_v61 }
 0x8b9   :  { %41222 = vmatprep.subr.bf16.mxu1 %v50777_v5  ;;  %41294 = vmatprep.subr.bf16.mxu0 %v50777_v5 }
 0x8ba   :  { %35670 = vmatprep.mubr.msk.f32.mxu1 %vm44875_vm2, %v50778_v59  ;;  %35784 = vmatprep.mubr.msk.f32.mxu0 %vm44875_vm2, %v50778_v59 }
 0x8bc   :  { %41224 = vmatpush3.bf16.msra.mxu1 %v45060_v52  ;;  %41296 = vmatpush3.bf16.msra.mxu0 %v45294_v10 }
 0x8bd   :  { %41225 = vmatprep.subr.bf16.mxu1 %v50777_v5  ;;  %41297 = vmatprep.subr.bf16.mxu0 %v50777_v5 }
 0x8c0   :  { %41227 = vmatpush3.bf16.msra.mxu1 %v45082_v0  ;;  %41299 = vmatpush3.bf16.msra.mxu0 %v45314_v25 }
 0x8c1   :  { %41228 = vmatprep.subr.bf16.mxu1 %v50777_v5  ;;  %41300 = vmatprep.subr.bf16.mxu0 %v50777_v5 }
 0x8c4   :  { %41230 = vmatpush3.bf16.msra.mxu1 %v45090_v3  ;;  %41302 = vmatpush3.bf16.msra.mxu0 %v45330_v8 }
 0x8c5   :  { %41231 = vmatprep.subr.bf16.mxu1 %v50777_v5  ;;  %41303 = vmatprep.subr.bf16.mxu0 %v50777_v5 }
 0x8c7   :  { %35671 = vmatmul.mubr.f32.vlgmr.msra.gmra.mrb[40].mxu1 %v46580_v49  ;;  %35785 = vmatmul.mubr.f32.vlgmr.msra.gmra.mrb[38].mxu0 %v46580_v49 }
 0x8c8   :  { %41233 = vmatpush3.bf16.msra.mxu1 %v45200_v19  ;;  %41305 = vmatpush3.bf16.msra.mxu0 %v45391_v62 }
 0x8c9   :  { %41234 = vmatprep.subr.bf16.mxu1 %v50777_v5  ;;  %41306 = vmatprep.subr.bf16.mxu0 %v50777_v5 }
 0x8ca   :  { %35689 = vmatprep.mubr.msk.f32.mxu1 %vm44875_vm2, %v50778_v59  ;;  %35803 = vmatprep.mubr.msk.f32.mxu0 %vm44875_vm2, %v50778_v59 }
 0x8cc   :  { %41236 = vmatpush3.bf16.msra.mxu1 %v45216_v38  ;;  %41308 = vmatpush3.bf16.msra.mxu0 %v45402_v63 }
 0x8cd   :  { %41237 = vmatprep.subr.bf16.mxu1 %v50777_v5  ;;  %41309 = vmatprep.subr.bf16.mxu0 %v50777_v5 }
 0x8d0   :  { %41239 = vmatpush3.bf16.msra.mxu1 %v45234_v43  ;;  %41311 = vmatpush3.bf16.msra.mxu0 %v45414_v44 }
 0x8d1   :  { %41240 = vmatprep.subr.bf16.mxu1 %v50777_v5  ;;  %41312 = vmatprep.subr.bf16.mxu0 %v50777_v5 }
 0x8d4   :  { %41242 = vmatpush3.bf16.msra.mxu1 %v45254_v50  ;;  %41314 = vmatpush3.bf16.msra.mxu0 %v45428_v56 }
 0x8d5   :  { %41243 = vmatprep.subr.bf16.mxu1 %v50777_v5  ;;  %41315 = vmatprep.subr.bf16.mxu0 %v50777_v5 }
 0x8d7   :  { %35690 = vmatmul.mubr.f32.vlgmr.msra.gmra.mrb[40].mxu1 %v46573_v48  ;;  %35804 = vmatmul.mubr.f32.vlgmr.msra.gmra.mrb[38].mxu0 %v46573_v48 }
 0x8d8   :  { %41245 = vmatpush3.bf16.msra.mxu1 %v45035_v41  ;;  %41317 = vmatpush3.bf16.msra.mxu0 %v45275_v61 }
 0x8d9   :  { %41246 = vmatprep.subr.bf16.mxu1 %v50777_v5  ;;  %41318 = vmatprep.subr.bf16.mxu0 %v50777_v5 }
 0x8da   :  { %35708 = vmatprep.mubr.msk.f32.mxu1 %vm44875_vm2, %v50778_v59  ;;  %35822 = vmatprep.mubr.msk.f32.mxu0 %vm44875_vm2, %v50778_v59 }
 0x8dc   :  { %41248 = vmatpush3.bf16.msra.mxu1 %v45060_v52  ;;  %41320 = vmatpush3.bf16.msra.mxu0 %v45294_v10 }
 0x8dd   :  { %41249 = vmatprep.subr.bf16.mxu1 %v50777_v5  ;;  %41321 = vmatprep.subr.bf16.mxu0 %v50777_v5 }
 0x8e0   :  { %41251 = vmatpush3.bf16.msra.mxu1 %v45082_v0  ;;  %41323 = vmatpush3.bf16.msra.mxu0 %v45314_v25 }
 0x8e1   :  { %41252 = vmatprep.subr.bf16.mxu1 %v50777_v5  ;;  %41324 = vmatprep.subr.bf16.mxu0 %v50777_v5 }
 0x8e4   :  { %41254 = vmatpush3.bf16.msra.mxu1 %v45090_v3  ;;  %41326 = vmatpush3.bf16.msra.mxu0 %v45330_v8 }
 0x8e5   :  { %41327 = vmatprep.subr.bf16.mxu1 %v50777_v5  ;;  %41399 = vmatprep.subr.bf16.mxu0 %v50777_v5 }
 0x8e7   :  { %35709 = vmatmul.mubr.f32.vlgmr.msra.gmra.mrb[40].mxu1 %v46573_v48  ;;  %35823 = vmatmul.mubr.f32.vlgmr.msra.gmra.mrb[38].mxu0 %v46573_v48 }
 0x8e8   :  { %41329 = vmatpush3.bf16.msra.mxu1 %v45447_v6  ;;  %35841 = vmatprep.mubr.msk.f32.mxu1 %vm44875_vm2, %v50778_v59 }
 0x8e9   :  { %41330 = vmatprep.subr.bf16.mxu1 %v50777_v5  ;;  %41401 = vmatpush3.bf16.msra.mxu0 %v45035_v41 }
 0x8ea   :  { %41402 = vmatprep.subr.bf16.mxu0 %v50777_v5  ;;  %35955 = vmatprep.mubr.msk.f32.mxu0 %vm44875_vm2, %v50778_v59 }
 0x8ec   :  { %41332 = vmatpush3.bf16.msra.mxu1 %v45472_v24 }
 0x8ed   :  { %41333 = vmatprep.subr.bf16.mxu1 %v50777_v5  ;;  %41404 = vmatpush3.bf16.msra.mxu0 %v45060_v52 }
 0x8ee   :  { %41405 = vmatprep.subr.bf16.mxu0 %v50777_v5 }
 0x8f0   :  { %41335 = vmatpush3.bf16.msra.mxu1 %v45488_v47 }
 0x8f1   :  { %41336 = vmatprep.subr.bf16.mxu1 %v50777_v5  ;;  %41407 = vmatpush3.bf16.msra.mxu0 %v45082_v0 }
 0x8f2   :  { %41408 = vmatprep.subr.bf16.mxu0 %v50777_v5 }
 0x8f4   :  { %41338 = vmatpush3.bf16.msra.mxu1 %v45496_v55 }
 0x8f5   :  { %41339 = vmatprep.subr.bf16.mxu1 %v50777_v5  ;;  %41410 = vmatpush3.bf16.msra.mxu0 %v45090_v3 }
 0x8f6   :  { %41411 = vmatprep.subr.bf16.mxu0 %v50777_v5 }
 0x8f7   :  { %35842 = vmatmul.mubr.f32.vlgmr.msra.gmra.mrb[42].mxu1 %v46584_v34 }
 0x8f8   :  { %41341 = vmatpush3.bf16.msra.mxu1 %v45517_v29  ;;  %35860 = vmatprep.mubr.msk.f32.mxu1 %vm44875_vm2, %v50778_v59 }
 0x8f9   :  { %41342 = vmatprep.subr.bf16.mxu1 %v50777_v5 }
 0x8fc   :  { %41344 = vmatpush3.bf16.msra.mxu1 %v50779_v20 }
 0x8fd   :  { %41345 = vmatprep.subr.bf16.mxu1 %v50777_v5 }
 0x900   :  { %41347 = vmatpush3.bf16.msra.mxu1 %v50780_v27  ;;  %v14760_v7 = vpop.permute.xlu1 %14759 }
 0x901   :  { %v14762_v28 = vsel %vm1563_vm3, %v46342_v42, %v14760_v7  ;;  %41348 = vmatprep.subr.bf16.mxu1 %v50777_v5  ;;  %v50816_v42 = vld [vmem:[#allocation13_spill] sm:$0xff] }
 0x902   :  { %14763 = vst [vmem:[#allocation2] sm:$0xc0] %v14762_v28 }
 0x904   :  { %41350 = vmatpush3.bf16.msra.mxu1 %v50781_v58 }
 0x905   :  { %41351 = vmatprep.subr.bf16.mxu1 %v50777_v5 }
 0x907   :  { %35861 = vmatmul.mubr.f32.vlgmr.msra.gmra.mrb[42].mxu1 %v46573_v48 }
 0x908   :  { %41353 = vmatpush3.bf16.msra.mxu1 %v50814_v54  ;;  %35879 = vmatprep.mubr.msk.f32.mxu1 %vm44875_vm2, %v50778_v59 }
 0x909   :  { %41354 = vmatprep.subr.bf16.mxu1 %v50777_v5 }
 0x90c   :  { %41356 = vmatpush3.bf16.msra.mxu1 %v50815_v36 }
 0x90d   :  { %41357 = vmatprep.subr.bf16.mxu1 %v50777_v5 }
 0x910   :  { %41359 = vmatpush3.bf16.msra.mxu1 %v50816_v42 }
 0x911   :  { %41360 = vmatprep.subr.bf16.mxu1 %v50777_v5 }
 0x914   :  { %41362 = vmatpush3.bf16.msra.mxu1 %v50817_v18 }
 0x915   :  { %41363 = vmatprep.subr.bf16.mxu1 %v50777_v5 }
 0x917   :  { %35880 = vmatmul.mubr.f32.vlgmr.msra.gmra.mrb[42].mxu1 %v46577_v2 }
 0x918   :  { %41365 = vmatpush3.bf16.msra.mxu1 %v45447_v6  ;;  %35898 = vmatprep.mubr.msk.f32.mxu1 %vm44875_vm2, %v50778_v59 }
 0x919   :  { %41366 = vmatprep.subr.bf16.mxu1 %v50777_v5 }
 0x91c   :  { %41368 = vmatpush3.bf16.msra.mxu1 %v45472_v24 }
 0x91d   :  { %41369 = vmatprep.subr.bf16.mxu1 %v50777_v5 }
 0x920   :  { %41371 = vmatpush3.bf16.msra.mxu1 %v45488_v47 }
 0x921   :  { %41372 = vmatprep.subr.bf16.mxu1 %v50777_v5 }
 0x924   :  { %41374 = vmatpush3.bf16.msra.mxu1 %v45496_v55 }
 0x925   :  { %41375 = vmatprep.subr.bf16.mxu1 %v50777_v5 }
 0x927   :  { %35899 = vmatmul.mubr.f32.vlgmr.msra.gmra.mrb[42].mxu1 %v46580_v49 }
 0x928   :  { %41377 = vmatpush3.bf16.msra.mxu1 %v50818_v17  ;;  %35917 = vmatprep.mubr.msk.f32.mxu1 %vm44875_vm2, %v50778_v59 }
 0x929   :  { %41378 = vmatprep.subr.bf16.mxu1 %v50777_v5 }
 0x92c   :  { %41380 = vmatpush3.bf16.msra.mxu1 %v50819_v21 }
 0x92d   :  { %41381 = vmatprep.subr.bf16.mxu1 %v50777_v5 }
 0x930   :  { %41383 = vmatpush3.bf16.msra.mxu1 %v50820_v22  ;;  %v11442_v22 = vrot.slane %v46566_v39, 6 }
 0x931   :  { %41384 = vmatprep.subr.bf16.mxu1 %v50777_v5 }
 0x934   :  { %41386 = vmatpush3.bf16.msra.mxu1 %v50821_v26 }
 0x935   :  { %41387 = vmatprep.subr.bf16.mxu1 %v50777_v5 }
 0x937   :  { %35918 = vmatmul.mubr.f32.vlgmr.msra.gmra.mrb[42].mxu1 %v46573_v48 }
 0x938   :  { %41389 = vmatpush3.bf16.msra.mxu1 %v45447_v6  ;;  %35936 = vmatprep.mubr.msk.f32.mxu1 %vm44875_vm2, %v50778_v59 }
 0x939   :  { %41390 = vmatprep.subr.bf16.mxu1 %v50777_v5 }
 0x93c   :  { %41392 = vmatpush3.bf16.msra.mxu1 %v45472_v24 }
 0x93d   :  { %41393 = vmatprep.subr.bf16.mxu1 %v50777_v5 }
 0x940   :  { %41395 = vmatpush3.bf16.msra.mxu1 %v45488_v47 }
 0x941   :  { %41396 = vmatprep.subr.bf16.mxu1 %v50777_v5 }
 0x944   :  { %41398 = vmatpush3.bf16.msra.mxu1 %v45496_v55 }
 0x945   :  { %41471 = vmatprep.subr.bf16.mxu1 %v50777_v5 }
 0x947   :  { %35937 = vmatmul.mubr.f32.vlgmr.msra.gmra.mrb[42].mxu1 %v46573_v48 }
 0x948   :  { %41473 = vmatpush3.bf16.msra.mxu1 %v45275_v61  ;;  %36069 = vmatprep.mubr.msk.f32.mxu1 %vm44875_vm2, %v50778_v59 }
 0x949   :  { %41474 = vmatprep.subr.bf16.mxu1 %v50777_v5 }
 0x94c   :  { %41476 = vmatpush3.bf16.msra.mxu1 %v45294_v10 }
 0x94d   :  { %41477 = vmatprep.subr.bf16.mxu1 %v50777_v5 }
 0x950   :  { %41479 = vmatpush3.bf16.msra.mxu1 %v45314_v25 }
 0x951   :  { %41480 = vmatprep.subr.bf16.mxu1 %v50777_v5 }
 0x954   :  { %41482 = vmatpush3.bf16.msra.mxu1 %v45330_v8 }
 0x955   :  { %41483 = vmatprep.subr.bf16.mxu1 %v50777_v5 }
 0x9ba   :  { %v10336_v33 = vpop.f32.mrb[40].mxu1  ;;  %v10873_v48 = vpop.f32.mrb[38].mxu0 }
 0x9bb   :  { %v10888_v2 = vrot.slane %v10873_v48, 6  ;;  %v35710_v49 = vpop.f32.mrb[41].mxu1  ;;  %v35824_v40 = vpop.f32.mrb[39].mxu0  ;;  %v10878_v18 = vrot.slane %v10336_v33, 6 }
 0x9bd   :  { %v10890_v34 = vadd.f32 %v50808_v35, %v10888_v2  ;;  %v10880_v42 = vadd.f32 %v50807_v9, %v10878_v18 }
 0x9bf   :  { %v30697_v7 = vmul.f32 -1.442695, %v10890_v34  ;;  %v30696_v36 = vmul.f32 -1.442695, %v10880_v42 }
 0x9c1   :  { %44760 = vpow2.f32 %v30697_v7 }
 0x9cb   :  { %v44761_v28 = vpop.eup %44760 }
 0x9cc   :  { %v10894_v26 = vadd.f32 1.0, %v44761_v28 }
 0x9ce   :  { %44762 = vrcp.f32 %v10894_v26 }
 0x9cf   :  { %44764 = vpow2.f32 %v30696_v36 }
 0x9d8   :  { %v44763_v21 = vpop.eup %44762 }
 0x9d9   :  { %v11444_v17 = vmul.f32 %v44763_v21, %v11442_v22  ;;  %v44765_v54 = vpop.eup %44764  ;;  %v11440_v39 = vsub.f32 1.0, %v44763_v21  ;;  %v50822_v21 = vld [vmem:[#allocation22_spill] sm:$0xff] }
 0x9da   :  { %v10884_v48 = vadd.f32 1.0, %v44765_v54 }
 0x9dc   :  { %44766 = vrcp.f32 %v10884_v48 }
 0x9e6   :  { %v44767_v7 = vpop.eup %44766 }
 0xa1a   :  { %v11430_v49 = vpop.f32.mrb[42].mxu1 }
 0xa1b   :  { %v44220_v2 = vadd.f32 %v46337_v14, %v11430_v49  ;;  %v35938_v40 = vpop.f32.mrb[43].mxu1 }
 0xa1d   :  { %v11435_v34 = vrot.slane %v44220_v2, 6 }
 0xa1f   :  { %v11437_v28 = vmul.f32 %v44767_v7, %v11435_v34  ;;  %v50823_v34 = vld [vmem:[#allocation9_spill] sm:$0xff] }
 0xa21   :  { %v11438_v26 = vadd.f32 %v50809_v4, %v11437_v28  ;;  %v50824_v28 = vld [vmem:[#allocation11_spill] sm:$0xff] }
 0xa23   :  { %44768 = vtanh.f32 %v11438_v26  ;;  %v50825_v26 = vld [vmem:[#allocation12_spill] sm:$0xff] }
 0xa2d   :  { %v44769_v22 = vpop.eup %44768 }
 0xa2e   :  { %v11441_v33 = vmul.f32 %v44769_v22, %v11440_v39  ;;  %v50826_v39 = vld [vmem:[#allocation13_spill] sm:$0xff]  ;;  %v50827_v22 = vld [vmem:[#allocation14_spill] sm:$0xff] }
 0xa30   :  { %v46793_v35 = vadd.f32 %v11444_v17, %v11441_v33  ;;  %v14780_v17 = vrot.slane %v50822_v21, 2  ;;  %v50828_v33 = vld [vmem:[#allocation15_spill] sm:$0xff] }
 0xa32   :  { %v50619_v36 = vrot.slane %v46793_v35, 6  ;;  %v14773_v54 = vsel %vm1563_vm3, %v46793_v35, %v46723_v1  ;;  %v11447_v14 = vrot.slane %v46793_v35, 2 }
 0xa33   :  { %14774 = vst [vmem:[#allocation2 + $0x8] sm:$0xc] %v14773_v54  ;;  %v50829_v54 = vld [vmem:[#allocation16_spill] sm:$0xff] }
 0xa34   :  { %14753 = vrot.lane.b32.xlu1 %v50619_v36, %s44877_s18  ;;  %v11448_v42 = vsel %vm1563_vm3, %v11447_v14, 0  ;;  %v50830_v14 = vld [vmem:[#allocation17_spill] sm:$0xff] }
 0xa35   :  { %v46804_v18 = vand.u32 4294901760, %v11448_v42 }
 0xa37   :  { %v46808_v48 = vsub.f32 %v11448_v42, %v46804_v18  ;;  %v50831_v42 = vld [vmem:[#allocation18_spill] sm:$0xff] }
 0xa38   :  { %14781 = vrot.lane.b32.xlu1 %v14780_v17, %s44877_s18 }
 0xa39   :  { %v46812_v1 = vand.u32 4294901760, %v46808_v48 }
 0xa3b   :  { %v11526_v49 = vsub.f32 %v46808_v48, %v46812_v1 }
 0xa3d   :  { %v46816_v2 = vand.u32 4294901760, %v11526_v49 }
 0xa3f   :  { %35956 = vmatmul.mubr.f32.vlgmr.msra.gmra.mrb[40].mxu0 %v46816_v2  ;;  %36070 = vmatmul.mubr.f32.vlgmr.msra.gmra.mrb[44].mxu1 %v46816_v2 }
 0xa40   :  { %41413 = vmatpush3.bf16.msra.mxu0 %v50810_v13  ;;  %41485 = vmatpush3.bf16.msra.mxu1 %v45325_v30 }
 0xa41   :  { %41414 = vmatprep.subr.bf16.mxu0 %v50777_v5  ;;  %41486 = vmatprep.subr.bf16.mxu1 %v50777_v5 }
 0xa42   :  { %35974 = vmatprep.mubr.msk.f32.mxu0 %vm44875_vm2, %v50778_v59  ;;  %36088 = vmatprep.mubr.msk.f32.mxu1 %vm44875_vm2, %v50778_v59 }
 0xa44   :  { %41416 = vmatpush3.bf16.msra.mxu0 %v50811_v32  ;;  %41488 = vmatpush3.bf16.msra.mxu1 %v45335_v11 }
 0xa45   :  { %41417 = vmatprep.subr.bf16.mxu0 %v50777_v5  ;;  %41489 = vmatprep.subr.bf16.mxu1 %v50777_v5 }
 0xa48   :  { %41419 = vmatpush3.bf16.msra.mxu0 %v50812_v31  ;;  %41491 = vmatpush3.bf16.msra.mxu1 %v45351_v46 }
 0xa49   :  { %41420 = vmatprep.subr.bf16.mxu0 %v50777_v5  ;;  %41492 = vmatprep.subr.bf16.mxu1 %v50777_v5 }
 0xa4c   :  { %41422 = vmatpush3.bf16.msra.mxu0 %v50813_v23  ;;  %41494 = vmatpush3.bf16.msra.mxu1 %v45364_v53 }
 0xa4d   :  { %41423 = vmatprep.subr.bf16.mxu0 %v50777_v5  ;;  %41495 = vmatprep.subr.bf16.mxu1 %v50777_v5 }
 0xa4f   :  { %35975 = vmatmul.mubr.f32.vlgmr.msra.gmra.mrb[40].mxu0 %v46804_v18  ;;  %36089 = vmatmul.mubr.f32.vlgmr.msra.gmra.mrb[44].mxu1 %v46804_v18 }
 0xa50   :  { %41425 = vmatpush3.bf16.msra.mxu0 %v45153_v37  ;;  %41497 = vmatpush3.bf16.msra.mxu1 %v45347_v45 }
 0xa51   :  { %41426 = vmatprep.subr.bf16.mxu0 %v50777_v5  ;;  %41498 = vmatprep.subr.bf16.mxu1 %v50777_v5 }
 0xa52   :  { %35993 = vmatprep.mubr.msk.f32.mxu0 %vm44875_vm2, %v50778_v59  ;;  %36107 = vmatprep.mubr.msk.f32.mxu1 %vm44875_vm2, %v50778_v59 }
 0xa54   :  { %41428 = vmatpush3.bf16.msra.mxu0 %v45164_v12  ;;  %41500 = vmatpush3.bf16.msra.mxu1 %v45358_v51 }
 0xa55   :  { %41429 = vmatprep.subr.bf16.mxu0 %v50777_v5  ;;  %41501 = vmatprep.subr.bf16.mxu1 %v50777_v5 }
 0xa58   :  { %41431 = vmatpush3.bf16.msra.mxu0 %v45172_v15  ;;  %41503 = vmatpush3.bf16.msra.mxu1 %v45370_v57 }
 0xa59   :  { %41432 = vmatprep.subr.bf16.mxu0 %v50777_v5  ;;  %41504 = vmatprep.subr.bf16.mxu1 %v50777_v5 }
 0xa5c   :  { %41434 = vmatpush3.bf16.msra.mxu0 %v45182_v16  ;;  %41506 = vmatpush3.bf16.msra.mxu1 %v45378_v60 }
 0xa5d   :  { %41435 = vmatprep.subr.bf16.mxu0 %v50777_v5  ;;  %41507 = vmatprep.subr.bf16.mxu1 %v50777_v5 }
 0xa5f   :  { %35994 = vmatmul.mubr.f32.vlgmr.msra.gmra.mrb[40].mxu0 %v46808_v48  ;;  %36108 = vmatmul.mubr.f32.vlgmr.msra.gmra.mrb[44].mxu1 %v46808_v48 }
 0xa60   :  { %41437 = vmatpush3.bf16.msra.mxu0 %v45035_v41  ;;  %41509 = vmatpush3.bf16.msra.mxu1 %v45275_v61 }
 0xa61   :  { %41438 = vmatprep.subr.bf16.mxu0 %v50777_v5  ;;  %41510 = vmatprep.subr.bf16.mxu1 %v50777_v5 }
 0xa62   :  { %36012 = vmatprep.mubr.msk.f32.mxu0 %vm44875_vm2, %v50778_v59  ;;  %36126 = vmatprep.mubr.msk.f32.mxu1 %vm44875_vm2, %v50778_v59 }
 0xa64   :  { %41440 = vmatpush3.bf16.msra.mxu0 %v45060_v52  ;;  %41512 = vmatpush3.bf16.msra.mxu1 %v45294_v10 }
 0xa65   :  { %41441 = vmatprep.subr.bf16.mxu0 %v50777_v5  ;;  %41513 = vmatprep.subr.bf16.mxu1 %v50777_v5 }
 0xa68   :  { %41443 = vmatpush3.bf16.msra.mxu0 %v45082_v0  ;;  %41515 = vmatpush3.bf16.msra.mxu1 %v45314_v25 }
 0xa69   :  { %41444 = vmatprep.subr.bf16.mxu0 %v50777_v5  ;;  %41516 = vmatprep.subr.bf16.mxu1 %v50777_v5 }
 0xa6c   :  { %41446 = vmatpush3.bf16.msra.mxu0 %v45090_v3  ;;  %41518 = vmatpush3.bf16.msra.mxu1 %v45330_v8 }
 0xa6d   :  { %41447 = vmatprep.subr.bf16.mxu0 %v50777_v5  ;;  %41519 = vmatprep.subr.bf16.mxu1 %v50777_v5 }
 0xa6f   :  { %36013 = vmatmul.mubr.f32.vlgmr.msra.gmra.mrb[40].mxu0 %v46812_v1  ;;  %36127 = vmatmul.mubr.f32.vlgmr.msra.gmra.mrb[44].mxu1 %v46812_v1 }
 0xa70   :  { %41449 = vmatpush3.bf16.msra.mxu0 %v45200_v19  ;;  %41521 = vmatpush3.bf16.msra.mxu1 %v45391_v62 }
 0xa71   :  { %41450 = vmatprep.subr.bf16.mxu0 %v50777_v5  ;;  %41522 = vmatprep.subr.bf16.mxu1 %v50777_v5 }
 0xa72   :  { %36031 = vmatprep.mubr.msk.f32.mxu0 %vm44875_vm2, %v50778_v59  ;;  %36145 = vmatprep.mubr.msk.f32.mxu1 %vm44875_vm2, %v50778_v59 }
 0xa74   :  { %41452 = vmatpush3.bf16.msra.mxu0 %v45216_v38  ;;  %41524 = vmatpush3.bf16.msra.mxu1 %v45402_v63 }
 0xa75   :  { %41453 = vmatprep.subr.bf16.mxu0 %v50777_v5  ;;  %41525 = vmatprep.subr.bf16.mxu1 %v50777_v5 }
 0xa78   :  { %41455 = vmatpush3.bf16.msra.mxu0 %v45234_v43  ;;  %41527 = vmatpush3.bf16.msra.mxu1 %v45414_v44 }
 0xa79   :  { %41456 = vmatprep.subr.bf16.mxu0 %v50777_v5  ;;  %41528 = vmatprep.subr.bf16.mxu1 %v50777_v5 }
 0xa7c   :  { %41458 = vmatpush3.bf16.msra.mxu0 %v45254_v50  ;;  %41530 = vmatpush3.bf16.msra.mxu1 %v45428_v56 }
 0xa7d   :  { %41459 = vmatprep.subr.bf16.mxu0 %v50777_v5  ;;  %41531 = vmatprep.subr.bf16.mxu1 %v50777_v5 }
 0xa7f   :  { %36032 = vmatmul.mubr.f32.vlgmr.msra.gmra.mrb[40].mxu0 %v46804_v18  ;;  %36146 = vmatmul.mubr.f32.vlgmr.msra.gmra.mrb[44].mxu1 %v46804_v18 }
 0xa80   :  { %41461 = vmatpush3.bf16.msra.mxu0 %v45035_v41  ;;  %41533 = vmatpush3.bf16.msra.mxu1 %v45275_v61 }
 0xa81   :  { %41462 = vmatprep.subr.bf16.mxu0 %v50777_v5  ;;  %41534 = vmatprep.subr.bf16.mxu1 %v50777_v5 }
 0xa82   :  { %36050 = vmatprep.mubr.msk.f32.mxu0 %vm44875_vm2, %v50778_v59  ;;  %36164 = vmatprep.mubr.msk.f32.mxu1 %vm44875_vm2, %v50778_v59 }
 0xa84   :  { %41464 = vmatpush3.bf16.msra.mxu0 %v45060_v52  ;;  %41536 = vmatpush3.bf16.msra.mxu1 %v45294_v10 }
 0xa85   :  { %41465 = vmatprep.subr.bf16.mxu0 %v50777_v5  ;;  %41537 = vmatprep.subr.bf16.mxu1 %v50777_v5 }
 0xa88   :  { %41467 = vmatpush3.bf16.msra.mxu0 %v45082_v0  ;;  %41539 = vmatpush3.bf16.msra.mxu1 %v45314_v25 }
 0xa89   :  { %41468 = vmatprep.subr.bf16.mxu0 %v50777_v5  ;;  %41540 = vmatprep.subr.bf16.mxu1 %v50777_v5 }
 0xa8c   :  { %41470 = vmatpush3.bf16.msra.mxu0 %v45090_v3  ;;  %41542 = vmatpush3.bf16.msra.mxu1 %v45330_v8 }
 0xa8d   :  { %41543 = vmatprep.subr.bf16.mxu0 %v50777_v5  ;;  %41615 = vmatprep.subr.bf16.mxu1 %v50777_v5 }
 0xa8f   :  { %36051 = vmatmul.mubr.f32.vlgmr.msra.gmra.mrb[40].mxu0 %v46804_v18  ;;  %36165 = vmatmul.mubr.f32.vlgmr.msra.gmra.mrb[44].mxu1 %v46804_v18 }
 0xa90   :  { %41545 = vmatpush3.bf16.msra.mxu0 %v45447_v6  ;;  %36183 = vmatprep.mubr.msk.f32.mxu0 %vm44875_vm2, %v50778_v59 }
 0xa91   :  { %41546 = vmatprep.subr.bf16.mxu0 %v50777_v5  ;;  %41617 = vmatpush3.bf16.msra.mxu1 %v45035_v41 }
 0xa92   :  { %41618 = vmatprep.subr.bf16.mxu1 %v50777_v5  ;;  %36297 = vmatprep.mubr.msk.f32.mxu1 %vm44875_vm2, %v50778_v59 }
 0xa94   :  { %41548 = vmatpush3.bf16.msra.mxu0 %v45472_v24 }
 0xa95   :  { %41549 = vmatprep.subr.bf16.mxu0 %v50777_v5  ;;  %41620 = vmatpush3.bf16.msra.mxu1 %v45060_v52 }
 0xa96   :  { %41621 = vmatprep.subr.bf16.mxu1 %v50777_v5 }
 0xa98   :  { %41551 = vmatpush3.bf16.msra.mxu0 %v45488_v47 }
 0xa99   :  { %41552 = vmatprep.subr.bf16.mxu0 %v50777_v5  ;;  %41623 = vmatpush3.bf16.msra.mxu1 %v45082_v0 }
 0xa9a   :  { %41624 = vmatprep.subr.bf16.mxu1 %v50777_v5 }
 0xa9c   :  { %41554 = vmatpush3.bf16.msra.mxu0 %v45496_v55 }
 0xa9d   :  { %41555 = vmatprep.subr.bf16.mxu0 %v50777_v5  ;;  %41626 = vmatpush3.bf16.msra.mxu1 %v45090_v3 }
 0xa9e   :  { %41627 = vmatprep.subr.bf16.mxu1 %v50777_v5 }
 0xa9f   :  { %36184 = vmatmul.mubr.f32.vlgmr.msra.gmra.mrb[42].mxu0 %v46816_v2 }
 0xaa0   :  { %41557 = vmatpush3.bf16.msra.mxu0 %v45517_v29  ;;  %36202 = vmatprep.mubr.msk.f32.mxu0 %vm44875_vm2, %v50778_v59 }
 0xaa1   :  { %41558 = vmatprep.subr.bf16.mxu0 %v50777_v5 }
 0xaa4   :  { %41560 = vmatpush3.bf16.msra.mxu0 %v50779_v20 }
 0xaa5   :  { %41561 = vmatprep.subr.bf16.mxu0 %v50777_v5 }
 0xaa6   :  { %v14754_v40 = vpop.permute.xlu1 %14753 }
 0xaa7   :  { %v14756_v7 = vsel %vm1563_vm3, %v50823_v34, %v14754_v40 }
 0xaa8   :  { %14757 = vst [vmem:[#allocation2] sm:$0x30] %v14756_v7  ;;  %41563 = vmatpush3.bf16.msra.mxu0 %v50780_v27  ;;  %v50832_v7 = vld [vmem:[#allocation20_spill] sm:$0xff] }
 0xaa9   :  { %41564 = vmatprep.subr.bf16.mxu0 %v50777_v5 }
 0xaac   :  { %41566 = vmatpush3.bf16.msra.mxu0 %v50781_v58 }
 0xaad   :  { %41567 = vmatprep.subr.bf16.mxu0 %v50777_v5 }
 0xaaf   :  { %36203 = vmatmul.mubr.f32.vlgmr.msra.gmra.mrb[42].mxu0 %v46804_v18 }
 0xab0   :  { %41569 = vmatpush3.bf16.msra.mxu0 %v50824_v28  ;;  %36221 = vmatprep.mubr.msk.f32.mxu0 %vm44875_vm2, %v50778_v59 }
 0xab1   :  { %41570 = vmatprep.subr.bf16.mxu0 %v50777_v5 }
 0xab4   :  { %41572 = vmatpush3.bf16.msra.mxu0 %v50825_v26 }
 0xab5   :  { %41573 = vmatprep.subr.bf16.mxu0 %v50777_v5 }
 0xab8   :  { %41575 = vmatpush3.bf16.msra.mxu0 %v50826_v39 }
 0xab9   :  { %41576 = vmatprep.subr.bf16.mxu0 %v50777_v5 }
 0xabc   :  { %41578 = vmatpush3.bf16.msra.mxu0 %v50827_v22 }
 0xabd   :  { %41579 = vmatprep.subr.bf16.mxu0 %v50777_v5 }
 0xabf   :  { %36222 = vmatmul.mubr.f32.vlgmr.msra.gmra.mrb[42].mxu0 %v46808_v48 }
 0xac0   :  { %41581 = vmatpush3.bf16.msra.mxu0 %v45447_v6  ;;  %36240 = vmatprep.mubr.msk.f32.mxu0 %vm44875_vm2, %v50778_v59 }
 0xac1   :  { %41582 = vmatprep.subr.bf16.mxu0 %v50777_v5 }
 0xac4   :  { %41584 = vmatpush3.bf16.msra.mxu0 %v45472_v24 }
 0xac5   :  { %41585 = vmatprep.subr.bf16.mxu0 %v50777_v5 }
 0xac8   :  { %41587 = vmatpush3.bf16.msra.mxu0 %v45488_v47 }
 0xac9   :  { %41588 = vmatprep.subr.bf16.mxu0 %v50777_v5 }
 0xacc   :  { %41590 = vmatpush3.bf16.msra.mxu0 %v45496_v55 }
 0xacd   :  { %41591 = vmatprep.subr.bf16.mxu0 %v50777_v5 }
 0xacf   :  { %36241 = vmatmul.mubr.f32.vlgmr.msra.gmra.mrb[42].mxu0 %v46812_v1 }
 0xad0   :  { %41593 = vmatpush3.bf16.msra.mxu0 %v50828_v33  ;;  %36259 = vmatprep.mubr.msk.f32.mxu0 %vm44875_vm2, %v50778_v59 }
 0xad1   :  { %41594 = vmatprep.subr.bf16.mxu0 %v50777_v5 }
 0xad4   :  { %41596 = vmatpush3.bf16.msra.mxu0 %v50829_v54 }
 0xad5   :  { %41597 = vmatprep.subr.bf16.mxu0 %v50777_v5 }
 0xad8   :  { %41599 = vmatpush3.bf16.msra.mxu0 %v50830_v14 }
 0xad9   :  { %41600 = vmatprep.subr.bf16.mxu0 %v50777_v5 }
 0xadc   :  { %41602 = vmatpush3.bf16.msra.mxu0 %v50831_v42 }
 0xadd   :  { %41603 = vmatprep.subr.bf16.mxu0 %v50777_v5 }
 0xadf   :  { %36260 = vmatmul.mubr.f32.vlgmr.msra.gmra.mrb[42].mxu0 %v46804_v18 }
 0xae0   :  { %41605 = vmatpush3.bf16.msra.mxu0 %v45447_v6  ;;  %36278 = vmatprep.mubr.msk.f32.mxu0 %vm44875_vm2, %v50778_v59 }
 0xae1   :  { %41606 = vmatprep.subr.bf16.mxu0 %v50777_v5 }
 0xae4   :  { %41608 = vmatpush3.bf16.msra.mxu0 %v45472_v24 }
 0xae5   :  { %41609 = vmatprep.subr.bf16.mxu0 %v50777_v5 }
 0xae8   :  { %41611 = vmatpush3.bf16.msra.mxu0 %v45488_v47 }
 0xae9   :  { %41612 = vmatprep.subr.bf16.mxu0 %v50777_v5 }
 0xaec   :  { %41614 = vmatpush3.bf16.msra.mxu0 %v45496_v55 }
 0xaed   :  { %41687 = vmatprep.subr.bf16.mxu0 %v50777_v5 }
 0xaef   :  { %36279 = vmatmul.mubr.f32.vlgmr.msra.gmra.mrb[42].mxu0 %v46804_v18 }
 0xaf0   :  { %41689 = vmatpush3.bf16.msra.mxu0 %v45275_v61  ;;  %36411 = vmatprep.mubr.msk.f32.mxu0 %vm44875_vm2, %v50778_v59 }
 0xaf1   :  { %41690 = vmatprep.subr.bf16.mxu0 %v50777_v5 }
 0xaf4   :  { %41692 = vmatpush3.bf16.msra.mxu0 %v45294_v10 }
 0xaf5   :  { %41693 = vmatprep.subr.bf16.mxu0 %v50777_v5 }
 0xaf8   :  { %41695 = vmatpush3.bf16.msra.mxu0 %v45314_v25 }
 0xaf9   :  { %41696 = vmatprep.subr.bf16.mxu0 %v50777_v5 }
 0xafc   :  { %41698 = vmatpush3.bf16.msra.mxu0 %v45330_v8 }
 0xafd   :  { %41699 = vmatprep.subr.bf16.mxu0 %v50777_v5 }
 0xb62   :  { %v11983_v18 = vpop.f32.mrb[40].mxu0  ;;  %v12520_v17 = vpop.f32.mrb[44].mxu1 }
 0xb63   :  { %v36052_v48 = vpop.f32.mrb[41].mxu0  ;;  %v36166_v1 = vpop.f32.mrb[45].mxu1  ;;  %v12525_v49 = vrot.slane %v11983_v18, 4  ;;  %v12535_v34 = vrot.slane %v12520_v17, 4 }
 0xb64   :  { %v47023_v48 = vld [vmem:[%s50560_s4] ss:$0 sm:$0xff] }
 0xb65   :  { %v12527_v2 = vadd.f32 %v50807_v9, %v12525_v49  ;;  %v12537_v36 = vadd.f32 %v50832_v7, %v12535_v34 }
 0xb67   :  { %v30698_v40 = vmul.f32 -1.442695, %v12527_v2  ;;  %v30699_v21 = vmul.f32 -1.442695, %v12537_v36 }
 0xb69   :  { %44770 = vpow2.f32 %v30698_v40 }
 0xb6a   :  { %44772 = vpow2.f32 %v30699_v21 }
 0xb73   :  { %v44771_v42 = vpop.eup %44770 }
 0xb74   :  { %v12531_v14 = vadd.f32 1.0, %v44771_v42  ;;  %v44773_v54 = vpop.eup %44772 }
 0xb75   :  { %v12541_v22 = vadd.f32 1.0, %v44773_v54  ;;  %v50833_v54 = vrot.slane %v46793_v35, 6 }
 0xb76   :  { %44774 = vrcp.f32 %v12531_v14 }
 0xb77   :  { %44776 = vrcp.f32 %v12541_v22 }
 0xb80   :  { %v44775_v49 = vpop.eup %44774 }
 0xb81   :  { %v44777_v21 = vpop.eup %44776 }
 0xb82   :  { %v13087_v14 = vsub.f32 1.0, %v44777_v21  ;;  %v13091_v34 = vmul.f32 %v44777_v21, %v50833_v54 }
 0xbc2   :  { %v13077_v33 = vpop.f32.mrb[42].mxu0 }
 0xbc3   :  { %v44221_v18 = vadd.f32 %v47023_v48, %v13077_v33  ;;  %v36280_v1 = vpop.f32.mrb[43].mxu0 }
 0xbc5   :  { %v13082_v17 = vrot.slane %v44221_v18, 4 }
 0xbc7   :  { %v13084_v2 = vmul.f32 %v44775_v49, %v13082_v17 }
 0xbc9   :  { %v13085_v36 = vadd.f32 %v50809_v4, %v13084_v2  ;;  %v14797_v2 = vld [vmem:[%s50561_s5 + $0x48] sm:$0xff] }
 0xbcb   :  { %44778 = vtanh.f32 %v13085_v36 }
 0xbd5   :  { %v44779_v42 = vpop.eup %44778 }
 0xbd6   :  { %v13088_v40 = vmul.f32 %v44779_v42, %v13087_v14 }
 0xbd8   :  { %v47029_v7 = vadd.f32 %v13091_v34, %v13088_v40 }
 0xbda   :  { %v14747_v9 = vrot.slane %v47029_v7, 2  ;;  %v13094_v33 = vrot.slane %v47029_v7, 4 }
 0xbdc   :  { %14748 = vrot.lane.b32.xlu0 %v14747_v9, %s44877_s18  ;;  %v13095_v22 = vsel %vm1563_vm3, %v13094_v33, 0 }
 0xbdd   :  { %v47035_v18 = vand.u32 4294901760, %v13095_v22 }
 0xbdf   :  { %v47038_v1 = vsub.f32 %v13095_v22, %v47035_v18 }
 0xbe1   :  { %v47041_v17 = vand.u32 4294901760, %v47038_v1 }
 0xbe3   :  { %v13173_v35 = vsub.f32 %v47038_v1, %v47041_v17 }
 0xbe5   :  { %v47045_v49 = vand.u32 4294901760, %v13173_v35 }
 0xbe7   :  { %36298 = vmatmul.mubr.f32.vlgmr.msra.gmra.mrb[46].mxu1 %v47045_v49  ;;  %36412 = vmatmul.mubr.f32.vlgmr.msra.gmra.mrb[44].mxu0 %v47045_v49 }
 0xbe8   :  { %41629 = vmatpush3.bf16.msra.mxu1 %v50810_v13  ;;  %41701 = vmatpush3.bf16.msra.mxu0 %v45325_v30  ;;  %v14791_v30 = vld [vmem:[%s50561_s5 + $0x18] sm:$0xff] }
 0xbe9   :  { %41630 = vmatprep.subr.bf16.mxu1 %v50777_v5  ;;  %41702 = vmatprep.subr.bf16.mxu0 %v50777_v5 }
 0xbea   :  { %36316 = vmatprep.mubr.msk.f32.mxu1 %vm44875_vm2, %v50778_v59  ;;  %36430 = vmatprep.mubr.msk.f32.mxu0 %vm44875_vm2, %v50778_v59 }
 0xbec   :  { %41632 = vmatpush3.bf16.msra.mxu1 %v50811_v32  ;;  %41704 = vmatpush3.bf16.msra.mxu0 %v45335_v11  ;;  %v14794_v32 = vld [vmem:[%s50561_s5 + $0x30] sm:$0xff] }
 0xbed   :  { %41633 = vmatprep.subr.bf16.mxu1 %v50777_v5  ;;  %41705 = vmatprep.subr.bf16.mxu0 %v50777_v5  ;;  %v14830_v34 = vand.u32 4294901760, %v14794_v32 }
 0xbf0   :  { %41635 = vmatpush3.bf16.msra.mxu1 %v50812_v31  ;;  %41707 = vmatpush3.bf16.msra.mxu0 %v45351_v46  ;;  %v14821_v46 = vand.u32 4294901760, %v14791_v30 }
 0xbf1   :  { %41636 = vmatprep.subr.bf16.mxu1 %v50777_v5  ;;  %41708 = vmatprep.subr.bf16.mxu0 %v50777_v5 }
 0xbf4   :  { %41638 = vmatpush3.bf16.msra.mxu1 %v50813_v23  ;;  %41710 = vmatpush3.bf16.msra.mxu0 %v45364_v53 }
 0xbf5   :  { %41639 = vmatprep.subr.bf16.mxu1 %v50777_v5  ;;  %41711 = vmatprep.subr.bf16.mxu0 %v50777_v5 }
 0xbf7   :  { %36317 = vmatmul.mubr.f32.vlgmr.msra.gmra.mrb[46].mxu1 %v47035_v18  ;;  %36431 = vmatmul.mubr.f32.vlgmr.msra.gmra.mrb[44].mxu0 %v47035_v18 }
 0xbf8   :  { %41641 = vmatpush3.bf16.msra.mxu1 %v45153_v37  ;;  %41713 = vmatpush3.bf16.msra.mxu0 %v45347_v45  ;;  %v50836_v37 = vld [vmem:[#allocation15_spill] sm:$0xff] }
 0xbf9   :  { %41642 = vmatprep.subr.bf16.mxu1 %v50777_v5  ;;  %41714 = vmatprep.subr.bf16.mxu0 %v50777_v5 }
 0xbfa   :  { %36335 = vmatprep.mubr.msk.f32.mxu1 %vm44875_vm2, %v50778_v59  ;;  %36449 = vmatprep.mubr.msk.f32.mxu0 %vm44875_vm2, %v50778_v59 }
 0xbfc   :  { %41644 = vmatpush3.bf16.msra.mxu1 %v45164_v12  ;;  %41716 = vmatpush3.bf16.msra.mxu0 %v45358_v51  ;;  %v50837_v12 = vld [vmem:[#allocation16_spill] sm:$0xff]  ;;  %v14792_v51 = vld [vmem:[%s50561_s5 + $0x20] sm:$0xff] }
 0xbfd   :  { %41645 = vmatprep.subr.bf16.mxu1 %v50777_v5  ;;  %41717 = vmatprep.subr.bf16.mxu0 %v50777_v5 }
 0xc00   :  { %41647 = vmatpush3.bf16.msra.mxu1 %v45172_v15  ;;  %41719 = vmatpush3.bf16.msra.mxu0 %v45370_v57  ;;  %v50838_v15 = vld [vmem:[#allocation17_spill] sm:$0xff] }
 0xc01   :  { %41648 = vmatprep.subr.bf16.mxu1 %v50777_v5  ;;  %41720 = vmatprep.subr.bf16.mxu0 %v50777_v5 }
 0xc04   :  { %41650 = vmatpush3.bf16.msra.mxu1 %v45182_v16  ;;  %41722 = vmatpush3.bf16.msra.mxu0 %v45378_v60  ;;  %v50839_v16 = vld [vmem:[#allocation18_spill] sm:$0xff] }
 0xc05   :  { %41651 = vmatprep.subr.bf16.mxu1 %v50777_v5  ;;  %41723 = vmatprep.subr.bf16.mxu0 %v50777_v5 }
 0xc07   :  { %36336 = vmatmul.mubr.f32.vlgmr.msra.gmra.mrb[46].mxu1 %v47038_v1  ;;  %36450 = vmatmul.mubr.f32.vlgmr.msra.gmra.mrb[44].mxu0 %v47038_v1 }
 0xc08   :  { %41653 = vmatpush3.bf16.msra.mxu1 %v45035_v41  ;;  %41725 = vmatpush3.bf16.msra.mxu0 %v45275_v61 }
 0xc09   :  { %41654 = vmatprep.subr.bf16.mxu1 %v50777_v5  ;;  %41726 = vmatprep.subr.bf16.mxu0 %v50777_v5 }
 0xc0a   :  { %36354 = vmatprep.mubr.msk.f32.mxu1 %vm44875_vm2, %v50778_v59  ;;  %36468 = vmatprep.mubr.msk.f32.mxu0 %vm44875_vm2, %v50778_v59 }
 0xc0c   :  { %41656 = vmatpush3.bf16.msra.mxu1 %v45060_v52  ;;  %41728 = vmatpush3.bf16.msra.mxu0 %v45294_v10 }
 0xc0d   :  { %41657 = vmatprep.subr.bf16.mxu1 %v50777_v5  ;;  %41729 = vmatprep.subr.bf16.mxu0 %v50777_v5 }
 0xc10   :  { %41659 = vmatpush3.bf16.msra.mxu1 %v45082_v0  ;;  %41731 = vmatpush3.bf16.msra.mxu0 %v45314_v25 }
 0xc11   :  { %41660 = vmatprep.subr.bf16.mxu1 %v50777_v5  ;;  %41732 = vmatprep.subr.bf16.mxu0 %v50777_v5 }
 0xc14   :  { %41662 = vmatpush3.bf16.msra.mxu1 %v45090_v3  ;;  %41734 = vmatpush3.bf16.msra.mxu0 %v45330_v8 }
 0xc15   :  { %41663 = vmatprep.subr.bf16.mxu1 %v50777_v5  ;;  %41735 = vmatprep.subr.bf16.mxu0 %v50777_v5 }
 0xc17   :  { %36355 = vmatmul.mubr.f32.vlgmr.msra.gmra.mrb[46].mxu1 %v47041_v17  ;;  %36469 = vmatmul.mubr.f32.vlgmr.msra.gmra.mrb[44].mxu0 %v47041_v17 }
 0xc18   :  { %41665 = vmatpush3.bf16.msra.mxu1 %v45200_v19  ;;  %41737 = vmatpush3.bf16.msra.mxu0 %v45391_v62  ;;  %v14788_v19 = vld [vmem:[%s50561_s5] sm:$0xff] }
 0xc19   :  { %41666 = vmatprep.subr.bf16.mxu1 %v50777_v5  ;;  %41738 = vmatprep.subr.bf16.mxu0 %v50777_v5 }
 0xc1a   :  { %36373 = vmatprep.mubr.msk.f32.mxu1 %vm44875_vm2, %v50778_v59  ;;  %36487 = vmatprep.mubr.msk.f32.mxu0 %vm44875_vm2, %v50778_v59 }
 0xc1c   :  { %41668 = vmatpush3.bf16.msra.mxu1 %v45216_v38  ;;  %41740 = vmatpush3.bf16.msra.mxu0 %v45402_v63  ;;  %v14789_v38 = vld [vmem:[%s50561_s5 + $0x8] sm:$0xff] }
 0xc1d   :  { %41669 = vmatprep.subr.bf16.mxu1 %v50777_v5  ;;  %41741 = vmatprep.subr.bf16.mxu0 %v50777_v5  ;;  %v14793_v63 = vld [vmem:[%s50561_s5 + $0x28] sm:$0xff] }
 0xc20   :  { %41671 = vmatpush3.bf16.msra.mxu1 %v45234_v43  ;;  %41743 = vmatpush3.bf16.msra.mxu0 %v45414_v44  ;;  %v14790_v43 = vld [vmem:[%s50561_s5 + $0x10] sm:$0xff] }
 0xc21   :  { %41672 = vmatprep.subr.bf16.mxu1 %v50777_v5  ;;  %41744 = vmatprep.subr.bf16.mxu0 %v50777_v5 }
 0xc24   :  { %41674 = vmatpush3.bf16.msra.mxu1 %v45254_v50  ;;  %41746 = vmatpush3.bf16.msra.mxu0 %v45428_v56  ;;  %v47257_v56 = vsub.f32 %v14791_v30, %v14821_v46 }
 0xc25   :  { %41675 = vmatprep.subr.bf16.mxu1 %v50777_v5  ;;  %41747 = vmatprep.subr.bf16.mxu0 %v50777_v5 }
 0xc27   :  { %36374 = vmatmul.mubr.f32.vlgmr.msra.gmra.mrb[46].mxu1 %v47035_v18  ;;  %36488 = vmatmul.mubr.f32.vlgmr.msra.gmra.mrb[44].mxu0 %v47035_v18 }
 0xc28   :  { %41677 = vmatpush3.bf16.msra.mxu1 %v45035_v41  ;;  %41749 = vmatpush3.bf16.msra.mxu0 %v45275_v61 }
 0xc29   :  { %41678 = vmatprep.subr.bf16.mxu1 %v50777_v5  ;;  %41750 = vmatprep.subr.bf16.mxu0 %v50777_v5 }
 0xc2a   :  { %36392 = vmatprep.mubr.msk.f32.mxu1 %vm44875_vm2, %v50778_v59  ;;  %36506 = vmatprep.mubr.msk.f32.mxu0 %vm44875_vm2, %v50778_v59 }
 0xc2c   :  { %41680 = vmatpush3.bf16.msra.mxu1 %v45060_v52  ;;  %41752 = vmatpush3.bf16.msra.mxu0 %v45294_v10  ;;  %v50834_v52 = vld [vmem:[#allocation8_spill] sm:$0xff]  ;;  %v14812_v10 = vand.u32 4294901760, %v14788_v19 }
 0xc2d   :  { %41681 = vmatprep.subr.bf16.mxu1 %v50777_v5  ;;  %41753 = vmatprep.subr.bf16.mxu0 %v50777_v5 }
 0xc2e   :  { %v47246_v57 = vsub.f32 %v14788_v19, %v14812_v10 }
 0xc30   :  { %41683 = vmatpush3.bf16.msra.mxu1 %v45082_v0  ;;  %41755 = vmatpush3.bf16.msra.mxu0 %v45314_v25  ;;  %v14815_v25 = vand.u32 4294901760, %v14789_v38 }
 0xc31   :  { %41684 = vmatprep.subr.bf16.mxu1 %v50777_v5  ;;  %41756 = vmatprep.subr.bf16.mxu0 %v50777_v5 }
 0xc32   :  { %v47244_v53 = vpack.c.bf16 %v14815_v25, %v14812_v10  ;;  %v47248_v60 = vsub.f32 %v14789_v38, %v14815_v25 }
 0xc34   :  { %41686 = vmatpush3.bf16.msra.mxu1 %v45090_v3  ;;  %41758 = vmatpush3.bf16.msra.mxu0 %v45330_v8  ;;  %v50835_v3 = vld [vmem:[#allocation14_spill] sm:$0xff]  ;;  %v14818_v8 = vand.u32 4294901760, %v14790_v43 }
 0xc35   :  { %41759 = vmatprep.subr.bf16.mxu1 %v50777_v5 }
 0xc36   :  { %v47250_v62 = vsub.f32 %v14790_v43, %v14818_v8  ;;  %v47255_v44 = vpack.c.bf16 %v14821_v46, %v14818_v8 }
 0xc37   :  { %36393 = vmatmul.mubr.f32.vlgmr.msra.gmra.mrb[46].mxu1 %v47035_v18  ;;  %36507 = vmatmul.mubr.f32.vlgmr.msra.gmra.mrb[44].mxu0 %v47035_v18 }
 0xc38   :  { %41761 = vmatpush3.bf16.msra.mxu1 %v45447_v6  ;;  %36525 = vmatprep.mubr.msk.f32.mxu1 %vm44875_vm2, %v50778_v59 }
 0xc39   :  { %41762 = vmatprep.subr.bf16.mxu1 %v50777_v5 }
 0xc3c   :  { %41764 = vmatpush3.bf16.msra.mxu1 %v45472_v24 }
 0xc3d   :  { %41765 = vmatprep.subr.bf16.mxu1 %v50777_v5 }
 0xc40   :  { %41767 = vmatpush3.bf16.msra.mxu1 %v45488_v47 }
 0xc41   :  { %41768 = vmatprep.subr.bf16.mxu1 %v50777_v5 }
 0xc44   :  { %41770 = vmatpush3.bf16.msra.mxu1 %v45496_v55 }
 0xc45   :  { %41771 = vmatprep.subr.bf16.mxu1 %v50777_v5 }
 0xc47   :  { %36526 = vmatmul.mubr.f32.vlgmr.msra.gmra.mrb[48].mxu1 %v47045_v49 }
 0xc48   :  { %41773 = vmatpush3.bf16.msra.mxu1 %v45517_v29  ;;  %36544 = vmatprep.mubr.msk.f32.mxu1 %vm44875_vm2, %v50778_v59  ;;  %v50635_v29 = vand.u32 4294901760, %v47257_v56 }
 0xc49   :  { %41774 = vmatprep.subr.bf16.mxu1 %v50777_v5 }
 0xc4a   :  { %v14937_v31 = vsub.f32 %v47257_v56, %v50635_v29 }
 0xc4c   :  { %41776 = vmatpush3.bf16.msra.mxu1 %v50779_v20  ;;  %v14827_v20 = vand.u32 4294901760, %v14793_v63  ;;  %v14938_v42 = vand.u32 4294901760, %v14937_v31 }
 0xc4d   :  { %41777 = vmatprep.subr.bf16.mxu1 %v50777_v5 }
 0xc4e   :  { %v14749_v41 = vpop.permute.xlu0 %14748 }
 0xc4f   :  { %v14751_v0 = vsel %vm1563_vm3, %v50834_v52, %v14749_v41  ;;  %v47306_v41 = vsub.f32 %v14794_v32, %v14830_v34  ;;  %v50840_v32 = vld [vmem:[#allocation19_spill] sm:$0xff] }
 0xc50   :  { %14752 = vst [vmem:[#allocation2] sm:$0xc] %v14751_v0  ;;  %41779 = vmatpush3.bf16.msra.mxu1 %v50780_v27 }
 0xc51   :  { %41780 = vmatprep.subr.bf16.mxu1 %v50777_v5 }
 0xc54   :  { %41782 = vmatpush3.bf16.msra.mxu1 %v50781_v58 }
 0xc55   :  { %41783 = vmatprep.subr.bf16.mxu1 %v50777_v5 }
 0xc57   :  { %36545 = vmatmul.mubr.f32.vlgmr.msra.gmra.mrb[48].mxu1 %v47035_v18 }
 0xc58   :  { %41785 = vmatpush3.bf16.msra.mxu1 %v50824_v28  ;;  %36563 = vmatprep.mubr.msk.f32.mxu1 %vm44875_vm2, %v50778_v59  ;;  %v47285_v28 = vsub.f32 %v14793_v63, %v14827_v20 }
 0xc59   :  { %41786 = vmatprep.subr.bf16.mxu1 %v50777_v5 }
 0xc5a   :  { %v50633_v54 = vand.u32 4294901760, %v47285_v28 }
 0xc5c   :  { %41788 = vmatpush3.bf16.msra.mxu1 %v50825_v26  ;;  %v14795_v26 = vld [vmem:[%s50561_s5 + $0x38] sm:$0xff]  ;;  %v14951_v49 = vsub.f32 %v47285_v28, %v50633_v54 }
 0xc5d   :  { %41789 = vmatprep.subr.bf16.mxu1 %v50777_v5  ;;  %v14833_v22 = vand.u32 4294901760, %v14795_v26 }
 0xc5f   :  { %v47308_v0 = vpack.c.bf16 %v14833_v22, %v14830_v34 }
 0xc60   :  { %41791 = vmatpush3.bf16.msra.mxu1 %v50826_v39  ;;  %v14796_v39 = vld [vmem:[%s50561_s5 + $0x40] sm:$0xff] }
 0xc61   :  { %41792 = vmatprep.subr.bf16.mxu1 %v50777_v5 }
 0xc64   :  { %41794 = vmatpush3.bf16.msra.mxu1 %v50835_v3  ;;  %v47310_v3 = vsub.f32 %v14795_v26, %v14833_v22 }
 0xc65   :  { %41795 = vmatprep.subr.bf16.mxu1 %v50777_v5 }
 0xc66   :  { %v50631_v38 = vand.u32 4294901760, %v47310_v3 }
 0xc67   :  { %36564 = vmatmul.mubr.f32.vlgmr.msra.gmra.mrb[48].mxu1 %v47038_v1  ;;  %v14839_v1 = vand.u32 4294901760, %v14797_v2 }
 0xc68   :  { %41797 = vmatpush3.bf16.msra.mxu1 %v45447_v6  ;;  %36582 = vmatprep.mubr.msk.f32.mxu1 %vm44875_vm2, %v50778_v59 }
 0xc69   :  { %41798 = vmatprep.subr.bf16.mxu1 %v50777_v5  ;;  %v47315_v19 = vsub.f32 %v14797_v2, %v14839_v1  ;;  %v50841_v2 = vld [vmem:[#allocation20_spill] sm:$0xff] }
 0xc6b   :  { %v50629_v8 = vand.u32 4294901760, %v47315_v19 }
 0xc6c   :  { %41800 = vmatpush3.bf16.msra.mxu1 %v45472_v24 }
 0xc6d   :  { %41801 = vmatprep.subr.bf16.mxu1 %v50777_v5 }
 0xc70   :  { %41803 = vmatpush3.bf16.msra.mxu1 %v45488_v47 }
 0xc71   :  { %41804 = vmatprep.subr.bf16.mxu1 %v50777_v5 }
 0xc74   :  { %41806 = vmatpush3.bf16.msra.mxu1 %v45496_v55 }
 0xc75   :  { %41807 = vmatprep.subr.bf16.mxu1 %v50777_v5 }
 0xc77   :  { %36583 = vmatmul.mubr.f32.vlgmr.msra.gmra.mrb[48].mxu1 %v47041_v17 }
 0xc78   :  { %41809 = vmatpush3.bf16.msra.mxu1 %v50836_v37  ;;  %36601 = vmatprep.mubr.msk.f32.mxu1 %vm44875_vm2, %v50778_v59 }
 0xc79   :  { %41810 = vmatprep.subr.bf16.mxu1 %v50777_v5 }
 0xc7c   :  { %41812 = vmatpush3.bf16.msra.mxu1 %v50837_v12 }
 0xc7d   :  { %41813 = vmatprep.subr.bf16.mxu1 %v50777_v5 }
 0xc80   :  { %41815 = vmatpush3.bf16.msra.mxu1 %v50838_v15  ;;  %v14952_v15 = vand.u32 4294901760, %v14951_v49 }
 0xc81   :  { %41816 = vmatprep.subr.bf16.mxu1 %v50777_v5 }
 0xc84   :  { %41818 = vmatpush3.bf16.msra.mxu1 %v50839_v16  ;;  %v50632_v16 = vand.u32 4294901760, %v47306_v41 }
 0xc85   :  { %41819 = vmatprep.subr.bf16.mxu1 %v50777_v5 }
 0xc86   :  { %v14958_v30 = vsub.f32 %v47306_v41, %v50632_v16 }
 0xc87   :  { %36602 = vmatmul.mubr.f32.vlgmr.msra.gmra.mrb[48].mxu1 %v47035_v18 }
 0xc88   :  { %41821 = vmatpush3.bf16.msra.mxu1 %v45447_v6  ;;  %36620 = vmatprep.mubr.msk.f32.mxu1 %vm44875_vm2, %v50778_v59  ;;  %v50638_v6 = vand.u32 4294901760, %v47246_v57  ;;  %v14959_v46 = vand.u32 4294901760, %v14958_v30  ;;  %v47548_v59 = vld [vmem:[%s50561_s5 + $0xd8] sm:$0xff] }
 0xc89   :  { %41822 = vmatprep.subr.bf16.mxu1 %v50777_v5 }
 0xc8a   :  { %v14916_v27 = vsub.f32 %v47246_v57, %v50638_v6  ;;  %v47543_v6 = vld [vmem:[%s50561_s5 + $0xd0] sm:$0xff] }
 0xc8c   :  { %41824 = vmatpush3.bf16.msra.mxu1 %v45472_v24  ;;  %v50637_v24 = vand.u32 4294901760, %v47248_v60  ;;  %v14917_v36 = vand.u32 4294901760, %v14916_v27 }
 0xc8d   :  { %41825 = vmatprep.subr.bf16.mxu1 %v50777_v5 }
 0xc8e   :  { %v14923_v58 = vsub.f32 %v47248_v60, %v50637_v24 }
 0xc90   :  { %41827 = vmatpush3.bf16.msra.mxu1 %v45488_v47  ;;  %v50636_v47 = vand.u32 4294901760, %v47250_v62  ;;  %v14924_v21 = vand.u32 4294901760, %v14923_v58 }
 0xc91   :  { %41828 = vmatprep.subr.bf16.mxu1 %v50777_v5  ;;  %v15551_v5 = vand.u32 4294901760, %v47543_v6 }
 0xc92   :  { %v14930_v9 = vsub.f32 %v47250_v62, %v50636_v47  ;;  %v41863_v33 = vpack.c.bf16 %v14924_v21, %v14917_v36 }
 0xc94   :  { %41830 = vmatpush3.bf16.msra.mxu1 %v45496_v55  ;;  %v14824_v55 = vand.u32 4294901760, %v14792_v51  ;;  %v14931_v14 = vand.u32 4294901760, %v14930_v9  ;;  %41864 = vmatprep.subr.bf16.mxu0 %v41863_v33 }
 0xc95   :  { %41832 = vmatprep.subr.bf16.mxu1 %v47244_v53  ;;  %41866 = vmatpush3.bf16.msra.mxu0 %v41863_v33 }
 0xc96   :  { %v47274_v13 = vsub.f32 %v14792_v51, %v14824_v55  ;;  %v47283_v23 = vpack.c.bf16 %v14827_v20, %v14824_v55  ;;  %v41867_v17 = vpack.c.bf16 %v14938_v42, %v14931_v14  ;;  %v14979_v51 = vsub.f32 %v47315_v19, %v50629_v8 }
 0xc97   :  { %36621 = vmatmul.mubr.f32.vlgmr.msra.gmra.mrb[48].mxu1 %v47035_v18  ;;  %v14836_v18 = vand.u32 4294901760, %v14796_v39 }
 0xc98   :  { %41834 = vmatpush3.bf16.msra.mxu1 %v47244_v53  ;;  %v50634_v40 = vand.u32 4294901760, %v47274_v13  ;;  %41868 = vmatprep.subr.bf16.mxu0 %v41867_v17  ;;  %v14980_v20 = vand.u32 4294901760, %v14979_v51 }
 0xc99   :  { %41836 = vmatprep.subr.bf16.mxu1 %v47255_v44  ;;  %v47312_v37 = vsub.f32 %v14796_v39, %v14836_v18  ;;  %v47319_v43 = vpack.c.bf16 %v14839_v1, %v14836_v18  ;;  %41870 = vmatpush3.bf16.msra.mxu0 %v41867_v17  ;;  %v14798_v17 = vld [vmem:[%s50561_s5 + $0x50] sm:$0xff] }
 0xc9a   :  { %v14944_v35 = vsub.f32 %v47274_v13, %v50634_v40  ;;  %v14842_v49 = vand.u32 4294901760, %v14798_v17  ;;  %v30711_v40 = vld [vmem:[%s50561_s5 + $0xc0] sm:$0xff] }
 0xc9b   :  { %v50630_v10 = vand.u32 4294901760, %v47312_v37  ;;  %v15545_v47 = vand.u32 4294901760, %v30711_v40 }
 0xc9c   :  { %41838 = vmatpush3.bf16.msra.mxu1 %v47255_v44  ;;  %v14945_v12 = vand.u32 4294901760, %v14944_v35 }
 0xc9d   :  { %41840 = vmatprep.subr.bf16.mxu1 %v47283_v23 }
 0xc9e   :  { %v41871_v25 = vpack.c.bf16 %v14952_v15, %v14945_v12 }
 0xca0   :  { %41842 = vmatpush3.bf16.msra.mxu1 %v47283_v23  ;;  %41872 = vmatprep.subr.bf16.mxu0 %v41871_v25 }
 0xca1   :  { %41844 = vmatprep.subr.bf16.mxu1 %v47308_v0  ;;  %41874 = vmatpush3.bf16.msra.mxu0 %v41871_v25  ;;  %v47350_v25 = vsub.f32 %v14798_v17, %v14842_v49 }
 0xca4   :  { %41846 = vmatpush3.bf16.msra.mxu1 %v47308_v0 }
 0xca5   :  { %41848 = vmatprep.subr.bf16.mxu1 %v47319_v43 }
 0xca8   :  { %41850 = vmatpush3.bf16.msra.mxu1 %v47319_v43 }
 0xd0a   :  { %v47234_v50 = vpop.f32.mrb[46].mxu1  ;;  %v47236_v61 = vpop.f32.mrb[44].mxu0 }
 0xd0b   :  { %v36394_v11 = vpop.f32.mrb[47].mxu1  ;;  %v36508_v45 = vpop.f32.mrb[45].mxu0  ;;  %v14172_v9 = vrot.slane %v47234_v50, 2  ;;  %v14182_v39 = vrot.slane %v47236_v61, 2  ;;  %v14799_v61 = vld [vmem:[%s50561_s5 + $0x58] sm:$0xff] }
 0xd0c   :  { %v14965_v11 = vsub.f32 %v47310_v3, %v50631_v38  ;;  %v14972_v45 = vsub.f32 %v47312_v37, %v50630_v10  ;;  %v14845_v12 = vand.u32 4294901760, %v14799_v61  ;;  %v30709_v10 = vld [vmem:[%s50561_s5 + $0xb0] sm:$0xff] }
 0xd0d   :  { %v14174_v31 = vadd.f32 %v50840_v32, %v14172_v9  ;;  %v14184_v36 = vadd.f32 %v50841_v2, %v14182_v39  ;;  %v14802_v9 = vld [vmem:[%s50561_s5 + $0x70] sm:$0xff]  ;;  %v14803_v32 = vld [vmem:[%s50561_s5 + $0x78] sm:$0xff]  ;;  %v15539_v16 = vand.u32 4294901760, %v30709_v10 }
 0xd0e   :  { %v14966_v63 = vand.u32 4294901760, %v14965_v11  ;;  %v14973_v55 = vand.u32 4294901760, %v14972_v45  ;;  %v47352_v30 = vsub.f32 %v14799_v61, %v14845_v12  ;;  %v14800_v11 = vld [vmem:[%s50561_s5 + $0x60] sm:$0xff]  ;;  %v14801_v45 = vld [vmem:[%s50561_s5 + $0x68] sm:$0xff] }
 0xd0f   :  { %v30700_v26 = vmul.f32 -1.442695, %v14174_v31  ;;  %v30701_v21 = vmul.f32 -1.442695, %v14184_v36  ;;  %v14854_v36 = vand.u32 4294901760, %v14802_v9 }
 0xd10   :  { %v41875_v27 = vpack.c.bf16 %v14966_v63, %v14959_v46  ;;  %v41879_v58 = vpack.c.bf16 %v14980_v20, %v14973_v55  ;;  %v50628_v46 = vand.u32 4294901760, %v47350_v25  ;;  %v50627_v51 = vand.u32 4294901760, %v47352_v30 }
 0xd11   :  { %44780 = vpow2.f32 %v30700_v26  ;;  %v14848_v63 = vand.u32 4294901760, %v14800_v11  ;;  %v14851_v55 = vand.u32 4294901760, %v14801_v45 }
 0xd12   :  { %41876 = vmatprep.subr.bf16.mxu0 %v41875_v27  ;;  %44782 = vpow2.f32 %v30701_v21  ;;  %v14986_v20 = vsub.f32 %v47350_v25, %v50628_v46  ;;  %v14857_v21 = vand.u32 4294901760, %v14803_v32 }
 0xd13   :  { %41878 = vmatpush3.bf16.msra.mxu0 %v41875_v27  ;;  %v47369_v27 = vsub.f32 %v14800_v11, %v14848_v63 }
 0xd14   :  { %41880 = vmatprep.subr.bf16.mxu0 %v41879_v58  ;;  %v14987_v31 = vand.u32 4294901760, %v14986_v20 }
 0xd15   :  { %v50626_v39 = vand.u32 4294901760, %v47369_v27 }
 0xd17   :  { %41882 = vmatpush3.bf16.msra.mxu0 %v41879_v58  ;;  %v47371_v58 = vsub.f32 %v14801_v45, %v14851_v55 }
 0xd19   :  { %50842 = vst [vmem:[#allocation10_spill] sm:$0xff] %v47371_v58  ;;  %v50625_v2 = vand.u32 4294901760, %v47371_v58 }
 0xd1b   :  { %v44781_v14 = vpop.eup %44780 }
 0xd1c   :  { %v14178_v42 = vadd.f32 1.0, %v44781_v14  ;;  %v44783_v34 = vpop.eup %44782 }
 0xd1d   :  { %v14188_v22 = vadd.f32 1.0, %v44783_v34  ;;  %v15007_v34 = vsub.f32 %v47371_v58, %v50625_v2 }
 0xd1e   :  { %44784 = vrcp.f32 %v14178_v42  ;;  %v15000_v42 = vsub.f32 %v47369_v27, %v50626_v39  ;;  %v41907_v39 = vpack.c.bf16 %v47310_v3, %v47306_v41 }
 0xd1f   :  { %44786 = vrcp.f32 %v14188_v22  ;;  %v47387_v22 = vsub.f32 %v14802_v9, %v14854_v36 }
 0xd21   :  { %50843 = vst [vmem:[#allocation21_spill] sm:$0xff] %v47387_v22  ;;  %v50624_v17 = vand.u32 4294901760, %v47387_v22 }
 0xd23   :  { %v15014_v45 = vsub.f32 %v47387_v22, %v50624_v17  ;;  %v47498_v17 = vld [vmem:[%s50561_s5 + $0xa0] sm:$0xff] }
 0xd28   :  { %v44785_v35 = vpop.eup %44784 }
 0xd6a   :  { %v14724_v33 = vpop.f32.mrb[48].mxu1 }
 0xd6b   :  { %v44222_v18 = vadd.f32 %v47023_v48, %v14724_v33  ;;  %v36622_v1 = vpop.f32.mrb[49].mxu1  ;;  %v44787_v33 = vpop.eup %44786 }
 0xd6c   :  { %v15001_v1 = vand.u32 4294901760, %v15000_v42  ;;  %v14782_v42 = vpop.permute.xlu1 %14781 }
 0xd6d   :  { %v14729_v50 = vrot.slane %v44222_v18, 2  ;;  %v47389_v18 = vsub.f32 %v14803_v32, %v14857_v21  ;;  %v15015_v32 = vand.u32 4294901760, %v15014_v45 }
 0xd6f   :  { %v14731_v15 = vmul.f32 %v44785_v35, %v14729_v50  ;;  %50844 = vst [vmem:[#allocation4_spill] sm:$0xff] %v47389_v18  ;;  %v15008_v50 = vand.u32 4294901760, %v15007_v34  ;;  %v50623_v61 = vand.u32 4294901760, %v47389_v18  ;;  %v14734_v35 = vsub.f32 1.0, %v44787_v33 }
 0xd71   :  { %v14732_v48 = vadd.f32 %v50809_v4, %v14731_v15  ;;  %v14993_v4 = vsub.f32 %v47352_v30, %v50627_v51  ;;  %v14736_v15 = vrot.slane %v47029_v7, 6  ;;  %v15021_v20 = vsub.f32 %v47389_v18, %v50623_v61 }
 0xd72   :  { %v15533_v51 = vand.u32 4294901760, %v47498_v17 }
 0xd73   :  { %44788 = vtanh.f32 %v14732_v48  ;;  %v14994_v26 = vand.u32 4294901760, %v14993_v4  ;;  %v41887_v48 = vpack.c.bf16 %v15008_v50, %v15001_v1  ;;  %v14738_v9 = vmul.f32 %v44787_v33, %v14736_v15 }
 0xd74   :  { %v47406_v33 = vpack.c.bf16 %v14851_v55, %v14848_v63  ;;  %v30703_v63 = vld [vmem:[%s50561_s5 + $0x80] sm:$0xff]  ;;  %v30704_v55 = vld [vmem:[%s50561_s5 + $0x88] sm:$0xff] }
 0xd75   :  { %v41883_v14 = vpack.c.bf16 %v14994_v26, %v14987_v31  ;;  %v15022_v31 = vand.u32 4294901760, %v15021_v20 }
 0xd77   :  { %41884 = vmatprep.subr.bf16.mxu0 %v41883_v14  ;;  %v41891_v34 = vpack.c.bf16 %v15022_v31, %v15015_v32 }
 0xd78   :  { %41886 = vmatpush3.bf16.msra.mxu0 %v41883_v14  ;;  %v47400_v14 = vpack.c.bf16 %v14845_v12, %v14842_v49  ;;  %v41895_v49 = vpack.c.bf16 %v47248_v60, %v47246_v57  ;;  %v50845_v12 = vrot.slane %v50834_v52, 6  ;;  %v47430_v52 = vpack.c.bf16 %v47352_v30, %v47350_v25 }
 0xd79   :  { %41888 = vmatprep.subr.bf16.mxu0 %v41887_v48 }
 0xd7a   :  { %41852 = vmatprep.subr.bf16.mxu1 %v47400_v14 }
 0xd7b   :  { %41854 = vmatpush3.bf16.msra.mxu1 %v47400_v14 }
 0xd7c   :  { %41890 = vmatpush3.bf16.msra.mxu0 %v41887_v48  ;;  %41856 = vmatprep.subr.bf16.mxu1 %v47406_v33  ;;  %v47434_v48 = vpack.c.bf16 %v47371_v58, %v47369_v27 }
 0xd7d   :  { %v44789_v11 = vpop.eup %44788  ;;  %41892 = vmatprep.subr.bf16.mxu0 %v41891_v34 }
 0xd7e   :  { %v14735_v4 = vmul.f32 %v44789_v11, %v14734_v35  ;;  %v47408_v35 = vpack.c.bf16 %v14857_v21, %v14854_v36  ;;  %v15521_v36 = vand.u32 4294901760, %v30703_v63  ;;  %v15524_v21 = vand.u32 4294901760, %v30704_v55 }
 0xd7f   :  { %41858 = vmatpush3.bf16.msra.mxu1 %v47406_v33  ;;  %v47438_v11 = vpack.c.bf16 %v47389_v18, %v47387_v22 }
 0xd80   :  { %v14739_v26 = vadd.f32 %v14738_v9, %v14735_v4  ;;  %41894 = vmatpush3.bf16.msra.mxu0 %v41891_v34  ;;  %41860 = vmatprep.subr.bf16.mxu1 %v47408_v35  ;;  %v47425_v15 = vpack.c.bf16 %v15524_v21, %v15521_v36  ;;  %v47440_v45 = vsub.f32 %v30703_v63, %v15521_v36 }
 0xd81   :  { %41896 = vmatprep.subr.bf16.mxu0 %v41895_v49  ;;  %v47442_v20 = vsub.f32 %v30704_v55, %v15524_v21 }
 0xd82   :  { %v14741_v1 = vrot.slane %v14739_v26, 6  ;;  %v14784_v50 = vsel %vm1563_vm3, %v14739_v26, %v14782_v42  ;;  %50846 = vst [vmem:[#allocation5_spill] sm:$0xff] %v47425_v15  ;;  %50847 = vst [vmem:[#allocation6_spill] sm:$0xff] %v47440_v45  ;;  %v50622_v4 = vand.u32 4294901760, %v47440_v45 }
 0xd83   :  { %14785 = vst [vmem:[#allocation2 + $0x8] sm:$0xc0] %v14784_v50  ;;  %41862 = vmatpush3.bf16.msra.mxu1 %v47408_v35  ;;  %50848 = vst [vmem:[#allocation7_spill] sm:$0xff] %v47442_v20  ;;  %v50621_v9 = vand.u32 4294901760, %v47442_v20 }
 0xd84   :  { %14742 = vrot.lane.b32.xlu0 %v14741_v1, %s44877_s18  ;;  %42024 = vmatprep.subr.bf16.mxu1 %v47425_v15  ;;  %v15625_v32 = vsub.f32 %v47440_v45, %v50622_v4  ;;  %v47456_v1 = vpack.c.bf16 %v47442_v20, %v47440_v45  ;;  %v47560_v45 = vld [vmem:[%s50561_s5 + $0xe0] sm:$0xff] }
 0xd85   :  { %v15632_v31 = vsub.f32 %v47442_v20, %v50621_v9  ;;  %v15554_v20 = vand.u32 4294901760, %v47548_v59 }
 0xd86   :  { %v15626_v26 = vand.u32 4294901760, %v15625_v32 }
 0xd87   :  { %v15633_v42 = vand.u32 4294901760, %v15632_v31 }
 0xd88   :  { %14775 = vrot.lane.b32.xlu0 %v50845_v12, %s44877_s18  ;;  %v50849_v12 = vld [vmem:[#allocation22_spill] sm:$0xff] }
 0xd89   :  { %v47452_v34 = vpack.c.bf16 %v15633_v42, %v15626_v26  ;;  %v41899_v42 = vpack.c.bf16 %v47257_v56, %v47250_v62 }
 0xdf6   :  { %v14743_v50 = vpop.permute.xlu0 %14742 }
 0xdf7   :  { %v14745_v63 = vsel %vm1563_vm3, %v50849_v12, %v14743_v50 }
 0xdf8   :  { %14746 = vst [vmem:[#allocation2] sm:$0x3] %v14745_v63  ;;  %v30705_v63 = vld [vmem:[%s50561_s5 + $0x90] sm:$0xff] }
 0xdf9   :  { %v15527_v4 = vand.u32 4294901760, %v30705_v63 }
 0xdfa   :  { %v14776_v55 = vpop.permute.xlu0 %14775 }
 0xdfb   :  { %v14778_v36 = vsel %vm1563_vm3, %v47029_v7, %v14776_v55  ;;  %v30706_v55 = vld [vmem:[%s50561_s5 + $0x98] sm:$0xff] }
 0xdfc   :  { %14779 = vst [vmem:[#allocation2 + $0x8] sm:$0x30] %v14778_v36  ;;  %v15530_v61 = vand.u32 4294901760, %v30706_v55 }
 0xdfe   :  { %v47514_v8 = vpack.c.bf16 %v15530_v61, %v15527_v4  ;;  %v47587_v18 = vsub.f32 %v30706_v55, %v15530_v61 }
 0xdff   :  { %v14786_v21 = vld [vmem:[#allocation2] sm:$0xff] }
 0xe00   :  { %v47462_v9 = vand.u32 4294901760, %v14786_v21  ;;  %50851 = vst [vmem:[#allocation11_spill] sm:$0xff] %v47514_v8 }
 0xe02   :  { %36690 = vmatprep.mubr.f32.mxu0 %v47462_v9  ;;  %v47466_v32 = vsub.f32 %v14786_v21, %v47462_v9  ;;  %v41903_v21 = vpack.c.bf16 %v47285_v28, %v47274_v13 }
 0xe03   :  { %v14787_v31 = vld [vmem:[#allocation2 + $0x8] sm:$0xff] }
 0xe04   :  { %v47468_v26 = vand.u32 4294901760, %v14787_v31  ;;  %v47473_v50 = vand.u32 4294901760, %v47466_v32 }
 0xe06   :  { %36691 = vmatmul.mubr.f32.vlgmr.msra.gmra.mrb[46].mxu0 %v47468_v26  ;;  %v14895_v7 = vsub.f32 %v47466_v32, %v47473_v50  ;;  %v47479_v12 = vsub.f32 %v14787_v31, %v47468_v26 }
 0xe07   :  { %41898 = vmatpush3.bf16.msra.mxu0 %v41895_v49  ;;  %36725 = vmatprep.mubr.f32.mxu0 %v47466_v32  ;;  %v47503_v49 = vld [vmem:[%s50561_s5 + $0xa8] sm:$0xff] }
 0xe08   :  { %41900 = vmatprep.subr.bf16.mxu0 %v41899_v42  ;;  %v47488_v36 = vand.u32 4294901760, %v14895_v7  ;;  %v47493_v31 = vand.u32 4294901760, %v47479_v12  ;;  %v15536_v46 = vand.u32 4294901760, %v47503_v49 }
 0xe0a   :  { %50850 = vst [vmem:[#allocation9_spill] sm:$0xff] %v47488_v36  ;;  %36655 = vmatprep.mubr.f32.mxu1 %v47488_v36  ;;  %v14905_v7 = vsub.f32 %v47479_v12, %v47493_v31  ;;  %v47527_v38 = vpack.c.bf16 %v15536_v46, %v15533_v51  ;;  %v47607_v55 = vsub.f32 %v47503_v49, %v15536_v46 }
 0xe0b   :  { %41902 = vmatpush3.bf16.msra.mxu0 %v41899_v42  ;;  %v30710_v42 = vld [vmem:[%s50561_s5 + $0xb8] sm:$0xff]  ;;  %v47638_v49 = vsub.f32 %v30711_v40, %v15545_v47 }
 0xe0c   :  { %41904 = vmatprep.subr.bf16.mxu0 %v41903_v21  ;;  %v47508_v2 = vand.u32 4294901760, %v14905_v7  ;;  %v41911_v7 = vpack.c.bf16 %v47315_v19, %v47312_v37  ;;  %50852 = vst [vmem:[#allocation12_spill] sm:$0xff] %v47527_v38  ;;  %v15542_v54 = vand.u32 4294901760, %v30710_v42 }
 0xe0d   :  { %v15680_v40 = vand.u32 4294901760, %v47638_v49 }
 0xe0e   :  { %36656 = vmatmul.mubr.f32.vlgmr.msra.gmra.mrb[50].mxu1 %v47508_v2  ;;  %v47538_v29 = vpack.c.bf16 %v15542_v54, %v15539_v16 }
 0xe0f   :  { %41906 = vmatpush3.bf16.msra.mxu0 %v41903_v21  ;;  %42026 = vmatpush3.bf16.msra.mxu1 %v47425_v15  ;;  %v30712_v21 = vld [vmem:[%s50561_s5 + $0xc8] sm:$0xff]  ;;  %v47578_v15 = vld [vmem:[%s50561_s5 + $0xf0] sm:$0xff] }
 0xe10   :  { %36865 = vmatprep.mubr.f32.mxu1 %v47488_v36  ;;  %41908 = vmatprep.subr.bf16.mxu0 %v41907_v39  ;;  %50853 = vst [vmem:[#allocation13_spill] sm:$0xff] %v47538_v29  ;;  %v15548_v24 = vand.u32 4294901760, %v30712_v21  ;;  %v47571_v36 = vpack.c.bf16 %v15554_v20, %v15551_v5  ;;  %v50660_v58 = vand.u32 4294901760, %v47578_v15 }
 0xe11   :  { %42028 = vmatprep.subr.bf16.mxu1 %v47514_v8 }
 0xe13   :  { %41910 = vmatpush3.bf16.msra.mxu0 %v41907_v39  ;;  %42030 = vmatpush3.bf16.msra.mxu1 %v47514_v8  ;;  %v47553_v39 = vpack.c.bf16 %v15548_v24, %v15545_v47 }
 0xe14   :  { %41912 = vmatprep.subr.bf16.mxu0 %v41911_v7  ;;  %42032 = vmatprep.subr.bf16.mxu1 %v47527_v38 }
 0xe17   :  { %41914 = vmatpush3.bf16.msra.mxu0 %v41911_v7  ;;  %42034 = vmatpush3.bf16.msra.mxu1 %v47527_v38  ;;  %v47565_v7 = vld [vmem:[%s50561_s5 + $0xe8] sm:$0xff]  ;;  %v50656_v38 = vand.u32 4294901760, %v47560_v45 }
 0xe18   :  { %41916 = vmatprep.subr.bf16.mxu0 %v47430_v52  ;;  %42036 = vmatprep.subr.bf16.mxu1 %v47538_v29  ;;  %v50655_v8 = vand.u32 4294901760, %v47565_v7 }
 0xe1a   :  { %v47597_v22 = vpack.c.bf16 %v50655_v8, %v50656_v38  ;;  %v47611_v8 = vsub.f32 %v30709_v10, %v15539_v16  ;;  %v47613_v38 = vsub.f32 %v30710_v42, %v15542_v54  ;;  %v50662_v10 = vand.u32 4294901760, %v47607_v55 }
 0xe1b   :  { %41918 = vmatpush3.bf16.msra.mxu0 %v47430_v52  ;;  %42038 = vmatpush3.bf16.msra.mxu1 %v47538_v29  ;;  %v47583_v52 = vld [vmem:[%s50561_s5 + $0xf8] sm:$0xff]  ;;  %v47585_v29 = vsub.f32 %v30705_v63, %v15527_v4  ;;  %v47604_v63 = vsub.f32 %v47498_v17, %v15533_v51  ;;  %v47640_v42 = vsub.f32 %v30712_v21, %v15548_v24 }
 0xe1c   :  { %41920 = vmatprep.subr.bf16.mxu0 %v47434_v48  ;;  %42040 = vmatprep.subr.bf16.mxu1 %v47553_v39  ;;  %v50659_v4 = vand.u32 4294901760, %v47583_v52  ;;  %v50661_v17 = vand.u32 4294901760, %v47611_v8 }
 0xe1d   :  { %v50658_v61 = vand.u32 4294901760, %v47585_v29  ;;  %v50663_v54 = vand.u32 4294901760, %v47604_v63  ;;  %v50667_v21 = vand.u32 4294901760, %v47640_v42 }
 0xe1e   :  { %v47621_v51 = vpack.c.bf16 %v50659_v4, %v50660_v58  ;;  %v15660_v58 = vsub.f32 %v47607_v55, %v50662_v10  ;;  %v15667_v47 = vsub.f32 %v47611_v8, %v50661_v17 }
 0xe1f   :  { %41922 = vmatpush3.bf16.msra.mxu0 %v47434_v48  ;;  %42042 = vmatpush3.bf16.msra.mxu1 %v47553_v39  ;;  %v50657_v48 = vand.u32 4294901760, %v47587_v18  ;;  %v15639_v46 = vsub.f32 %v47585_v29, %v50658_v61  ;;  %v15653_v4 = vsub.f32 %v47604_v63, %v50663_v54 }
 0xe20   :  { %41924 = vmatprep.subr.bf16.mxu0 %v47438_v11  ;;  %42044 = vmatprep.subr.bf16.mxu1 %v47571_v36  ;;  %50854 = vst [vmem:[#allocation8_spill] sm:$0xff] %v47621_v51  ;;  %v15661_v54 = vand.u32 4294901760, %v15660_v58 }
 0xe21   :  { %v15646_v16 = vsub.f32 %v47587_v18, %v50657_v48  ;;  %v15640_v48 = vand.u32 4294901760, %v15639_v46  ;;  %v47661_v46 = vsub.f32 %v47543_v6, %v15551_v5  ;;  %v15654_v10 = vand.u32 4294901760, %v15653_v4 }
 0xe22   :  { %v15681_v5 = vsub.f32 %v47638_v49, %v15680_v40 }
 0xe23   :  { %41926 = vmatpush3.bf16.msra.mxu0 %v47438_v11  ;;  %42046 = vmatpush3.bf16.msra.mxu1 %v47571_v36  ;;  %v50664_v11 = vand.u32 4294901760, %v47613_v38  ;;  %v15647_v61 = vand.u32 4294901760, %v15646_v16  ;;  %v47664_v16 = vsub.f32 %v47548_v59, %v15554_v20  ;;  %v15688_v59 = vsub.f32 %v47640_v42, %v50667_v21 }
 0xe24   :  { %41928 = vmatprep.subr.bf16.mxu0 %v47244_v53  ;;  %42048 = vmatprep.subr.bf16.mxu1 %v47597_v22  ;;  %v15694_v6 = vand.u32 4294901760, %v47661_v46  ;;  %v42063_v20 = vpack.c.bf16 %v15661_v54, %v15654_v10 }
 0xe25   :  { %v15674_v24 = vsub.f32 %v47613_v38, %v50664_v11  ;;  %v42059_v17 = vpack.c.bf16 %v15647_v61, %v15640_v48  ;;  %v15668_v11 = vand.u32 4294901760, %v15667_v47  ;;  %v50668_v58 = vand.u32 4294901760, %v47664_v16 }
 0xe26   :  { %36726 = vmatmul.mubr.f32.vlgmr.msra.gmra.mrb[46].mxu0 %v47479_v12  ;;  %v50856_v61 = vand.u32 4294901760, %v47565_v7  ;;  %v15689_v21 = vand.u32 4294901760, %v15688_v59  ;;  %v15695_v54 = vsub.f32 %v47661_v46, %v15694_v6 }
 0xe27   :  { %41930 = vmatpush3.bf16.msra.mxu0 %v47244_v53  ;;  %36760 = vmatprep.mubr.f32.mxu0 %v47473_v50 }
 0xe28   :  { %42050 = vmatpush3.bf16.msra.mxu1 %v47597_v22  ;;  %41932 = vmatprep.subr.bf16.mxu0 %v47255_v44  ;;  %v47688_v48 = vsub.f32 %v47565_v7, %v50856_v61 }
 0xe29   :  { %42052 = vmatprep.subr.bf16.mxu1 %v47621_v51 }
 0xe2a   :  { %v50671_v10 = vand.u32 4294901760, %v47688_v48 }
 0xe2b   :  { %41934 = vmatpush3.bf16.msra.mxu0 %v47255_v44 }
 0xe2c   :  { %42054 = vmatpush3.bf16.msra.mxu1 %v47621_v51  ;;  %41936 = vmatprep.subr.bf16.mxu0 %v47283_v23  ;;  %v15675_v51 = vand.u32 4294901760, %v15674_v24  ;;  %v15682_v24 = vand.u32 4294901760, %v15681_v5 }
 0xe2d   :  { %42056 = vmatprep.subr.bf16.mxu1 %v47452_v34 }
 0xe2e   :  { %v42067_v47 = vpack.c.bf16 %v15675_v51, %v15668_v11  ;;  %v50857_v51 = vand.u32 4294901760, %v47578_v15  ;;  %v50858_v11 = vand.u32 4294901760, %v47583_v52  ;;  %v42071_v59 = vpack.c.bf16 %v15689_v21, %v15682_v24 }
 0xe2f   :  { %36866 = vmatmul.mubr.f32.vlgmr.msra.gmra.mrb[52].mxu1 %v47508_v2  ;;  %41938 = vmatpush3.bf16.msra.mxu0 %v47283_v23 }
 0xe30   :  { %42058 = vmatpush3.bf16.msra.mxu1 %v47452_v34  ;;  %36900 = vmatprep.mubr.f32.mxu1 %v47462_v9  ;;  %v50855_v34 = vand.u32 4294901760, %v47560_v45  ;;  %v47708_v5 = vsub.f32 %v47583_v52, %v50858_v11  ;;  %v50860_v11 = vand.u32 4294901760, %v47248_v60  ;;  %v50864_v60 = vand.u32 4294901760, %v47285_v28 }
 0xe31   :  { %41940 = vmatprep.subr.bf16.mxu0 %v47308_v0  ;;  %42060 = vmatprep.subr.bf16.mxu1 %v42059_v17  ;;  %v50868_v28 = vand.u32 4294901760, %v47315_v19  ;;  %v50871_v19 = vand.u32 4294901760, %v47369_v27 }
 0xe32   :  { %v47683_v4 = vsub.f32 %v47560_v45, %v50855_v34  ;;  %v15702_v45 = vsub.f32 %v47664_v16, %v50668_v58  ;;  %v15696_v34 = vand.u32 4294901760, %v15695_v54 }
 0xe33   :  { %41942 = vmatpush3.bf16.msra.mxu0 %v47308_v0 }
 0xe34   :  { %42062 = vmatpush3.bf16.msra.mxu1 %v42059_v17  ;;  %41944 = vmatprep.subr.bf16.mxu0 %v47319_v43  ;;  %v50672_v7 = vand.u32 4294901760, %v47683_v4  ;;  %v47703_v17 = vsub.f32 %v47578_v15, %v50857_v51  ;;  %v15703_v61 = vand.u32 4294901760, %v15702_v45  ;;  %v15716_v15 = vsub.f32 %v47688_v48, %v50671_v10 }
 0xe35   :  { %42064 = vmatprep.subr.bf16.mxu1 %v42063_v20  ;;  %v50669_v51 = vand.u32 4294901760, %v47708_v5  ;;  %v42111_v27 = vpack.c.bf16 %v47688_v48, %v47683_v4 }
 0xe36   :  { %v15709_v58 = vsub.f32 %v47683_v4, %v50672_v7  ;;  %v50670_v52 = vand.u32 4294901760, %v47703_v17  ;;  %v42075_v21 = vpack.c.bf16 %v15703_v61, %v15696_v34  ;;  %v15717_v24 = vand.u32 4294901760, %v15716_v15 }
 0xe37   :  { %41946 = vmatpush3.bf16.msra.mxu0 %v47319_v43  ;;  %v15730_v45 = vsub.f32 %v47708_v5, %v50669_v51  ;;  %v50861_v51 = vand.u32 4294901760, %v47250_v62  ;;  %v50865_v62 = vand.u32 4294901760, %v47306_v41  ;;  %v42095_v41 = vpack.c.bf16 %v47607_v55, %v47604_v63 }
 0xe38   :  { %42066 = vmatpush3.bf16.msra.mxu1 %v42063_v20  ;;  %41948 = vmatprep.subr.bf16.mxu0 %v47400_v14  ;;  %v15710_v20 = vand.u32 4294901760, %v15709_v58  ;;  %v15723_v54 = vsub.f32 %v47703_v17, %v50670_v52  ;;  %v50862_v52 = vand.u32 4294901760, %v47257_v56  ;;  %v50866_v56 = vand.u32 4294901760, %v47310_v3 }
 0xe39   :  { %42068 = vmatprep.subr.bf16.mxu1 %v42067_v47  ;;  %v15731_v15 = vand.u32 4294901760, %v15730_v45  ;;  %v50869_v3 = vand.u32 4294901760, %v47350_v25  ;;  %v50874_v25 = vld [vmem:[#allocation21_spill] sm:$0xff] }
 0xe3a   :  { %v42079_v58 = vpack.c.bf16 %v15717_v24, %v15710_v20  ;;  %v15724_v61 = vand.u32 4294901760, %v15723_v54  ;;  %v50870_v20 = vand.u32 4294901760, %v47352_v30  ;;  %v50872_v24 = vld [vmem:[#allocation10_spill] sm:$0xff]  ;;  %v50875_v30 = vand.u32 4294901760, %v50874_v25 }
 0xe3b   :  { %41950 = vmatpush3.bf16.msra.mxu0 %v47400_v14  ;;  %v50873_v54 = vand.u32 4294901760, %v50872_v24  ;;  %v50886_v24 = vld [vmem:[#allocation7_spill] sm:$0xff] }
 0xe3c   :  { %42070 = vmatpush3.bf16.msra.mxu1 %v42067_v47  ;;  %41952 = vmatprep.subr.bf16.mxu0 %v47406_v33  ;;  %v50859_v47 = vand.u32 4294901760, %v47246_v57  ;;  %v42083_v10 = vpack.c.bf16 %v15731_v15, %v15724_v61  ;;  %v50863_v57 = vand.u32 4294901760, %v47274_v13  ;;  %v50867_v13 = vand.u32 4294901760, %v47312_v37 }
 0xe3d   :  { %42072 = vmatprep.subr.bf16.mxu1 %v42071_v59  ;;  %v42099_v37 = vpack.c.bf16 %v47613_v38, %v47611_v8  ;;  %v41983_v45 = vpack.c.bf16 %v50873_v54, %v50871_v19  ;;  %v42107_v61 = vpack.c.bf16 %v47664_v16, %v47661_v46  ;;  %v42115_v15 = vpack.c.bf16 %v47708_v5, %v47703_v17 }
 0xe3e   :  { %v41959_v34 = vpack.c.bf16 %v50860_v11, %v50859_v47  ;;  %v42103_v47 = vpack.c.bf16 %v47640_v42, %v47638_v49  ;;  %v50876_v11 = vld [vmem:[#allocation4_spill] sm:$0xff]  ;;  %v50887_v54 = vand.u32 4294901760, %v50886_v24 }
 0xe3f   :  { %41954 = vmatpush3.bf16.msra.mxu0 %v47406_v33 }
 0xe40   :  { %42074 = vmatpush3.bf16.msra.mxu1 %v42071_v59  ;;  %41956 = vmatprep.subr.bf16.mxu0 %v47408_v35  ;;  %v41963_v59 = vpack.c.bf16 %v50862_v52, %v50861_v51  ;;  %v41971_v52 = vpack.c.bf16 %v50866_v56, %v50865_v62  ;;  %v42091_v51 = vpack.c.bf16 %v47587_v18, %v47585_v29  ;;  %v47823_v62 = vld [vmem:[%s50561_s5 + $0x118] sm:$0xff] }
 0xe41   :  { %42076 = vmatprep.subr.bf16.mxu1 %v42075_v21 }
 0xe43   :  { %41958 = vmatpush3.bf16.msra.mxu0 %v47408_v35 }
 0xe44   :  { %42078 = vmatpush3.bf16.msra.mxu1 %v42075_v21  ;;  %41960 = vmatprep.subr.bf16.mxu0 %v41959_v34  ;;  %v41967_v21 = vpack.c.bf16 %v50864_v60, %v50863_v57  ;;  %v30721_v57 = vld [vmem:[%s50561_s5 + $0x100] sm:$0xff] }
 0xe45   :  { %42080 = vmatprep.subr.bf16.mxu1 %v42079_v58 }
 0xe46   :  { %36761 = vmatmul.mubr.f32.vlgmr.msra.gmra.mrb[46].mxu0 %v47493_v31 }
 0xe47   :  { %41962 = vmatpush3.bf16.msra.mxu0 %v41959_v34  ;;  %36795 = vmatprep.mubr.f32.mxu0 %v47462_v9  ;;  %v50877_v34 = vand.u32 4294901760, %v50876_v11  ;;  %v47887_v11 = vld [vmem:[%s50561_s5 + $0x148] sm:$0xff] }
 0xe48   :  { %42082 = vmatpush3.bf16.msra.mxu1 %v42079_v58  ;;  %41964 = vmatprep.subr.bf16.mxu0 %v41963_v59 }
 0xe49   :  { %42084 = vmatprep.subr.bf16.mxu1 %v42083_v10  ;;  %v41987_v58 = vpack.c.bf16 %v50877_v34, %v50875_v30  ;;  %v47882_v30 = vld [vmem:[%s50561_s5 + $0x140] sm:$0xff] }
 0xe4a   :  { %v50674_v34 = vand.u32 4294901760, %v47882_v30 }
 0xe4b   :  { %41966 = vmatpush3.bf16.msra.mxu0 %v41963_v59  ;;  %v50878_v59 = vld [vmem:[#allocation5_spill] sm:$0xff] }
 0xe4c   :  { %42086 = vmatpush3.bf16.msra.mxu1 %v42083_v10  ;;  %41968 = vmatprep.subr.bf16.mxu0 %v41967_v21  ;;  %v41975_v10 = vpack.c.bf16 %v50868_v28, %v50867_v13 }
 0xe4d   :  { %42088 = vmatprep.subr.bf16.mxu1 %v47456_v1 }
 0xe4f   :  { %36901 = vmatmul.mubr.f32.vlgmr.msra.gmra.mrb[52].mxu1 %v47468_v26  ;;  %41970 = vmatpush3.bf16.msra.mxu0 %v41967_v21  ;;  %v47818_v21 = vld [vmem:[%s50561_s5 + $0x110] sm:$0xff] }
 0xe50   :  { %42090 = vmatpush3.bf16.msra.mxu1 %v47456_v1  ;;  %36935 = vmatprep.mubr.f32.mxu1 %v47466_v32  ;;  %v41979_v1 = vpack.c.bf16 %v50870_v20, %v50869_v3  ;;  %v16236_v56 = vand.u32 4294901760, %v47818_v21  ;;  %v50882_v3 = vld [vmem:[#allocation9_spill] sm:$0xff] }
 0xe51   :  { %41972 = vmatprep.subr.bf16.mxu0 %v41971_v52  ;;  %42092 = vmatprep.subr.bf16.mxu1 %v42091_v51 }
 0xe53   :  { %41974 = vmatpush3.bf16.msra.mxu0 %v41971_v52  ;;  %v16239_v52 = vand.u32 4294901760, %v47823_v62 }
 0xe54   :  { %42094 = vmatpush3.bf16.msra.mxu1 %v42091_v51  ;;  %41976 = vmatprep.subr.bf16.mxu0 %v41975_v10  ;;  %v47836_v51 = vld [vmem:[%s50561_s5 + $0x120] sm:$0xff] }
 0xe55   :  { %42096 = vmatprep.subr.bf16.mxu1 %v42095_v41  ;;  %v47846_v13 = vpack.c.bf16 %v16239_v52, %v16236_v56  ;;  %v16242_v28 = vand.u32 4294901760, %v47836_v51 }
 0xe57   :  { %41978 = vmatpush3.bf16.msra.mxu0 %v41975_v10 }
 0xe58   :  { %42098 = vmatpush3.bf16.msra.mxu1 %v42095_v41  ;;  %41980 = vmatprep.subr.bf16.mxu0 %v41979_v1  ;;  %v47855_v41 = vld [vmem:[%s50561_s5 + $0x130] sm:$0xff] }
 0xe59   :  { %42100 = vmatprep.subr.bf16.mxu1 %v42099_v37 }
 0xe5b   :  { %41982 = vmatpush3.bf16.msra.mxu0 %v41979_v1  ;;  %v50883_v1 = vld [vmem:[#allocation8_spill] sm:$0xff] }
 0xe5c   :  { %42102 = vmatpush3.bf16.msra.mxu1 %v42099_v37  ;;  %41984 = vmatprep.subr.bf16.mxu0 %v41983_v45  ;;  %v50884_v37 = vld [vmem:[#allocation6_spill] sm:$0xff] }
 0xe5d   :  { %42104 = vmatprep.subr.bf16.mxu1 %v42103_v47  ;;  %v50885_v19 = vand.u32 4294901760, %v50884_v37  ;;  %v47907_v37 = vld [vmem:[%s50561_s5 + $0x150] sm:$0xff] }
 0xe5f   :  { %41986 = vmatpush3.bf16.msra.mxu0 %v41983_v45  ;;  %v42151_v45 = vpack.c.bf16 %v50887_v54, %v50885_v19  ;;  %v47912_v19 = vld [vmem:[%s50561_s5 + $0x158] sm:$0xff] }
 0xe60   :  { %42106 = vmatpush3.bf16.msra.mxu1 %v42103_v47  ;;  %41988 = vmatprep.subr.bf16.mxu0 %v41987_v58  ;;  %v50678_v47 = vand.u32 4294901760, %v47855_v41  ;;  %v50675_v7 = vand.u32 4294901760, %v47912_v19 }
 0xe61   :  { %42108 = vmatprep.subr.bf16.mxu1 %v42107_v61 }
 0xe63   :  { %41990 = vmatpush3.bf16.msra.mxu0 %v41987_v58  ;;  %v50673_v58 = vand.u32 4294901760, %v47887_v11 }
 0xe64   :  { %42110 = vmatpush3.bf16.msra.mxu1 %v42107_v61  ;;  %41992 = vmatprep.subr.bf16.mxu0 %v47244_v53  ;;  %v50888_v61 = vand.u32 4294901760, %v47585_v29  ;;  %v47919_v29 = vld [vmem:[%s50561_s5 + $0x160] sm:$0xff] }
 0xe65   :  { %42112 = vmatprep.subr.bf16.mxu1 %v42111_v27 }
 0xe66   :  { %36796 = vmatmul.mubr.f32.vlgmr.msra.gmra.mrb[46].mxu0 %v47468_v26 }
 0xe67   :  { %41994 = vmatpush3.bf16.msra.mxu0 %v47244_v53  ;;  %36830 = vmatprep.mubr.f32.mxu0 %v47462_v9  ;;  %v50879_v53 = vld [vmem:[#allocation11_spill] sm:$0xff] }
 0xe68   :  { %42114 = vmatpush3.bf16.msra.mxu1 %v42111_v27  ;;  %41996 = vmatprep.subr.bf16.mxu0 %v47255_v44  ;;  %v50889_v27 = vand.u32 4294901760, %v47587_v18  ;;  %v47924_v18 = vld [vmem:[%s50561_s5 + $0x168] sm:$0xff] }
 0xe69   :  { %42116 = vmatprep.subr.bf16.mxu1 %v42115_v15 }
 0xe6b   :  { %41998 = vmatpush3.bf16.msra.mxu0 %v47255_v44  ;;  %v50880_v44 = vld [vmem:[#allocation12_spill] sm:$0xff] }
 0xe6c   :  { %42118 = vmatpush3.bf16.msra.mxu1 %v42115_v15  ;;  %42000 = vmatprep.subr.bf16.mxu0 %v47283_v23  ;;  %v42155_v15 = vpack.c.bf16 %v50889_v27, %v50888_v61  ;;  %v47935_v61 = vpack.c.bf16 %v50673_v58, %v50674_v34  ;;  %v50676_v27 = vand.u32 4294901760, %v47907_v37 }
 0xe6d   :  { %42120 = vmatprep.subr.bf16.mxu1 %v50878_v59 }
 0xe6f   :  { %36936 = vmatmul.mubr.f32.vlgmr.msra.gmra.mrb[52].mxu1 %v47479_v12  ;;  %42002 = vmatpush3.bf16.msra.mxu0 %v47283_v23  ;;  %v50881_v23 = vld [vmem:[#allocation13_spill] sm:$0xff] }
 0xe70   :  { %42122 = vmatpush3.bf16.msra.mxu1 %v50878_v59  ;;  %36970 = vmatprep.mubr.f32.mxu1 %v47473_v50 }
 0xe71   :  { %42004 = vmatprep.subr.bf16.mxu0 %v47308_v0  ;;  %42124 = vmatprep.subr.bf16.mxu1 %v50879_v53 }
 0xe73   :  { %42006 = vmatpush3.bf16.msra.mxu0 %v47308_v0  ;;  %v30722_v0 = vld [vmem:[%s50561_s5 + $0x108] sm:$0xff] }
 0xe74   :  { %42126 = vmatpush3.bf16.msra.mxu1 %v50879_v53  ;;  %42008 = vmatprep.subr.bf16.mxu0 %v47319_v43  ;;  %v16233_v60 = vand.u32 4294901760, %v30722_v0 }
 0xe75   :  { %42128 = vmatprep.subr.bf16.mxu1 %v50880_v44 }
 0xe76   :  { %v47928_v54 = vsub.f32 %v30722_v0, %v16233_v60  ;;  %v50891_v0 = vand.u32 4294901760, %v47607_v55  ;;  %v47959_v55 = vld [vmem:[%s50561_s5 + $0x170] sm:$0xff] }
 0xe77   :  { %42010 = vmatpush3.bf16.msra.mxu0 %v47319_v43  ;;  %v16230_v43 = vand.u32 4294901760, %v30721_v57 }
 0xe78   :  { %42130 = vmatpush3.bf16.msra.mxu1 %v50880_v44  ;;  %42012 = vmatprep.subr.bf16.mxu0 %v47400_v14  ;;  %v50679_v34 = vand.u32 4294901760, %v47928_v54 }
 0xe79   :  { %42132 = vmatprep.subr.bf16.mxu1 %v50881_v23  ;;  %v47926_v24 = vsub.f32 %v30721_v57, %v16230_v43  ;;  %v50890_v57 = vand.u32 4294901760, %v47604_v63  ;;  %v47954_v63 = vpack.c.bf16 %v50675_v7, %v50676_v27  ;;  %v50892_v7 = vand.u32 4294901760, %v47611_v8 }
 0xe7a   :  { %v50893_v27 = vand.u32 4294901760, %v47613_v38  ;;  %v16341_v38 = vsub.f32 %v47928_v54, %v50679_v34 }
 0xe7b   :  { %42014 = vmatpush3.bf16.msra.mxu0 %v47400_v14  ;;  %v47828_v14 = vpack.c.bf16 %v16233_v60, %v16230_v43  ;;  %v42159_v43 = vpack.c.bf16 %v50891_v0, %v50890_v57  ;;  %v16266_v60 = vand.u32 4294901760, %v47919_v29  ;;  %v50680_v58 = vand.u32 4294901760, %v47926_v24  ;;  %v47964_v57 = vld [vmem:[%s50561_s5 + $0x178] sm:$0xff] }
 0xe7c   :  { %42134 = vmatpush3.bf16.msra.mxu1 %v50881_v23  ;;  %42016 = vmatprep.subr.bf16.mxu0 %v47406_v33  ;;  %v47970_v0 = vsub.f32 %v47823_v62, %v16239_v52  ;;  %v47997_v52 = vsub.f32 %v47836_v51, %v16242_v28 }
 0xe7d   :  { %42136 = vmatprep.subr.bf16.mxu1 %v47553_v39  ;;  %v16334_v62 = vsub.f32 %v47926_v24, %v50680_v58 }
 0xe7f   :  { %42018 = vmatpush3.bf16.msra.mxu0 %v47406_v33  ;;  %v47841_v33 = vld [vmem:[%s50561_s5 + $0x128] sm:$0xff]  ;;  %v16335_v51 = vand.u32 4294901760, %v16334_v62  ;;  %v50896_v62 = vand.u32 4294901760, %v47855_v41 }
 0xe80   :  { %42138 = vmatpush3.bf16.msra.mxu1 %v47553_v39  ;;  %42020 = vmatprep.subr.bf16.mxu0 %v47408_v35  ;;  %v16245_v10 = vand.u32 4294901760, %v47841_v33 }
 0xe81   :  { %42140 = vmatprep.subr.bf16.mxu1 %v47571_v36 }
 0xe82   :  { %v47870_v20 = vpack.c.bf16 %v16245_v10, %v16242_v28  ;;  %v16342_v28 = vand.u32 4294901760, %v16341_v38  ;;  %v48031_v38 = vsub.f32 %v47855_v41, %v50896_v62  ;;  %v50902_v62 = vand.u32 4294901760, %v47907_v37 }
 0xe83   :  { %42022 = vmatpush3.bf16.msra.mxu0 %v47408_v35  ;;  %v47860_v35 = vld [vmem:[%s50561_s5 + $0x138] sm:$0xff] }
 0xe84   :  { %42142 = vmatpush3.bf16.msra.mxu1 %v47571_v36  ;;  %42216 = vmatprep.subr.bf16.mxu0 %v47828_v14  ;;  %v50677_v25 = vand.u32 4294901760, %v47860_v35 }
 0xe85   :  { %42144 = vmatprep.subr.bf16.mxu1 %v47597_v22 }
 0xe86   :  { %36831 = vmatmul.mubr.f32.vlgmr.msra.gmra.mrb[46].mxu0 %v47468_v26 }
 0xe87   :  { %42218 = vmatpush3.bf16.msra.mxu0 %v47828_v14  ;;  %37075 = vmatprep.mubr.f32.mxu0 %v50882_v3  ;;  %v47902_v3 = vpack.c.bf16 %v50677_v25, %v50678_v47  ;;  %v42163_v25 = vpack.c.bf16 %v50893_v27, %v50892_v7  ;;  %v50682_v7 = vand.u32 4294901760, %v47970_v0  ;;  %v48002_v27 = vsub.f32 %v47841_v33, %v16245_v10 }
 0xe88   :  { %42146 = vmatpush3.bf16.msra.mxu1 %v47597_v22  ;;  %42220 = vmatprep.subr.bf16.mxu0 %v47846_v13  ;;  %v50895_v10 = vand.u32 4294901760, %v47664_v16  ;;  %v50899_v16 = vand.u32 4294901760, %v47887_v11 }
 0xe89   :  { %42148 = vmatprep.subr.bf16.mxu1 %v50883_v1  ;;  %v50684_v33 = vand.u32 4294901760, %v48002_v27 }
 0xe8b   :  { %42222 = vmatpush3.bf16.msra.mxu0 %v47846_v13 }
 0xe8c   :  { %42150 = vmatpush3.bf16.msra.mxu1 %v50883_v1  ;;  %42224 = vmatprep.subr.bf16.mxu0 %v47870_v20 }
 0xe8d   :  { %42152 = vmatprep.subr.bf16.mxu1 %v42151_v45 }
 0xe8f   :  { %36971 = vmatmul.mubr.f32.vlgmr.msra.gmra.mrb[52].mxu1 %v47493_v31  ;;  %42226 = vmatpush3.bf16.msra.mxu0 %v47870_v20 }
 0xe90   :  { %42154 = vmatpush3.bf16.msra.mxu1 %v42151_v45  ;;  %37005 = vmatprep.mubr.f32.mxu1 %v47462_v9  ;;  %v16269_v45 = vand.u32 4294901760, %v47924_v18 }
 0xe91   :  { %42156 = vmatprep.subr.bf16.mxu1 %v42155_v15  ;;  %42228 = vmatprep.subr.bf16.mxu0 %v47902_v3 }
 0xe92   :  { %v47980_v47 = vpack.c.bf16 %v16269_v45, %v16266_v60 }
 0xe93   :  { %42230 = vmatpush3.bf16.msra.mxu0 %v47902_v3 }
 0xe94   :  { %42158 = vmatpush3.bf16.msra.mxu1 %v42155_v15  ;;  %42232 = vmatprep.subr.bf16.mxu0 %v47935_v61  ;;  %v47967_v15 = vsub.f32 %v47818_v21, %v16236_v56  ;;  %v50686_v21 = vand.u32 4294901760, %v47959_v55  ;;  %v50683_v56 = vand.u32 4294901760, %v47964_v57 }
 0xe95   :  { %42160 = vmatprep.subr.bf16.mxu1 %v42159_v43 }
 0xe96   :  { %v50681_v8 = vand.u32 4294901760, %v47967_v15  ;;  %v48013_v58 = vpack.c.bf16 %v50683_v56, %v50686_v21  ;;  %v50898_v56 = vand.u32 4294901760, %v47882_v30 }
 0xe97   :  { %42234 = vmatpush3.bf16.msra.mxu0 %v47935_v61 }
 0xe98   :  { %42162 = vmatpush3.bf16.msra.mxu1 %v42159_v43  ;;  %42236 = vmatprep.subr.bf16.mxu0 %v47954_v63  ;;  %v50894_v43 = vand.u32 4294901760, %v47640_v42  ;;  %v16348_v49 = vsub.f32 %v47967_v15, %v50681_v8  ;;  %v16355_v42 = vsub.f32 %v47970_v0, %v50682_v7  ;;  %v42247_v7 = vpack.c.bf16 %v16342_v28, %v16335_v51 }
 0xe99   :  { %42164 = vmatprep.subr.bf16.mxu1 %v42163_v25  ;;  %v48042_v46 = vsub.f32 %v47882_v30, %v50898_v56  ;;  %v16369_v51 = vsub.f32 %v48002_v27, %v50684_v33  ;;  %v50900_v30 = vand.u32 4294901760, %v47683_v4  ;;  %v50901_v56 = vand.u32 4294901760, %v47688_v48 }
 0xe9a   :  { %v42167_v34 = vpack.c.bf16 %v50894_v43, %v15680_v40  ;;  %v50685_v40 = vand.u32 4294901760, %v47997_v52  ;;  %v50897_v43 = vand.u32 4294901760, %v47860_v35  ;;  %v16349_v41 = vand.u32 4294901760, %v16348_v49 }
 0xe9b   :  { %42238 = vmatpush3.bf16.msra.mxu0 %v47954_v63  ;;  %v50694_v49 = vand.u32 4294901760, %v48042_v46  ;;  %v50903_v4 = vand.u32 4294901760, %v47912_v19  ;;  %v50904_v33 = vand.u32 4294901760, %v47703_v17 }
 0xe9c   :  { %42166 = vmatpush3.bf16.msra.mxu1 %v42163_v25  ;;  %42240 = vmatprep.subr.bf16.mxu0 %v47980_v47  ;;  %v42171_v25 = vpack.c.bf16 %v50895_v10, %v15694_v6  ;;  %v48036_v8 = vsub.f32 %v47860_v35, %v50897_v43  ;;  %v48047_v6 = vsub.f32 %v47887_v11, %v50899_v16  ;;  %v16356_v10 = vand.u32 4294901760, %v16355_v42 }
 0xe9d   :  { %42168 = vmatprep.subr.bf16.mxu1 %v42167_v34  ;;  %v16362_v35 = vsub.f32 %v47997_v52, %v50685_v40  ;;  %v42175_v11 = vpack.c.bf16 %v50901_v56, %v50900_v30  ;;  %v48068_v43 = vsub.f32 %v47907_v37, %v50902_v62  ;;  %v48073_v48 = vsub.f32 %v47912_v19, %v50903_v4 }
 0xe9e   :  { %v16382_v28 = vand.u32 4294901760, %v48036_v8  ;;  %v50693_v42 = vand.u32 4294901760, %v48047_v6  ;;  %v42251_v16 = vpack.c.bf16 %v16356_v10, %v16349_v41  ;;  %v16370_v56 = vand.u32 4294901760, %v16369_v51 }
 0xe9f   :  { %42242 = vmatpush3.bf16.msra.mxu0 %v47980_v47  ;;  %v16363_v30 = vand.u32 4294901760, %v16362_v35  ;;  %v50905_v40 = vand.u32 4294901760, %v47708_v5  ;;  %v16390_v17 = vsub.f32 %v48042_v46, %v50694_v49  ;;  %v50907_v4 = vand.u32 4294901760, %v47964_v57 }
 0xea0   :  { %42170 = vmatpush3.bf16.msra.mxu1 %v42167_v34  ;;  %42244 = vmatprep.subr.bf16.mxu0 %v48013_v58  ;;  %v16375_v34 = vand.u32 4294901760, %v48031_v38  ;;  %v16383_v19 = vsub.f32 %v48036_v8, %v16382_v28  ;;  %v16397_v5 = vsub.f32 %v48047_v6, %v50693_v42 }
 0xea1   :  { %42172 = vmatprep.subr.bf16.mxu1 %v42171_v25  ;;  %v42179_v21 = vpack.c.bf16 %v50905_v40, %v50904_v33  ;;  %v50692_v40 = vand.u32 4294901760, %v48068_v43  ;;  %v50691_v33 = vand.u32 4294901760, %v48073_v48  ;;  %v16391_v35 = vand.u32 4294901760, %v16390_v17 }
 0xea2   :  { %v16376_v37 = vsub.f32 %v48031_v38, %v16375_v34  ;;  %v16384_v10 = vand.u32 4294901760, %v16383_v19  ;;  %v16398_v51 = vand.u32 4294901760, %v16397_v5 }
 0xea3   :  { %42246 = vmatpush3.bf16.msra.mxu0 %v48013_v58 }
 0xea4   :  { %42174 = vmatpush3.bf16.msra.mxu1 %v42171_v25  ;;  %42248 = vmatprep.subr.bf16.mxu0 %v42247_v7  ;;  %v42255_v25 = vpack.c.bf16 %v16370_v56, %v16363_v30  ;;  %v16377_v41 = vand.u32 4294901760, %v16376_v37 }
 0xea5   :  { %42176 = vmatprep.subr.bf16.mxu1 %v42175_v11 }
 0xea6   :  { %37076 = vmatmul.mubr.f32.vlgmr.msra.gmra.mrb[48].mxu0 %v47508_v2  ;;  %v48098_v2 = vsub.f32 %v47919_v29, %v16266_v60  ;;  %v16411_v29 = vsub.f32 %v48073_v48, %v50691_v33  ;;  %v42259_v30 = vpack.c.bf16 %v16384_v10, %v16377_v41 }
 0xea7   :  { %42250 = vmatpush3.bf16.msra.mxu0 %v42247_v7  ;;  %37110 = vmatprep.mubr.f32.mxu0 %v47462_v9  ;;  %v48103_v7 = vsub.f32 %v47924_v18, %v16269_v45  ;;  %v50906_v45 = vand.u32 4294901760, %v47959_v55 }
 0xea8   :  { %42178 = vmatpush3.bf16.msra.mxu1 %v42175_v11  ;;  %42252 = vmatprep.subr.bf16.mxu0 %v42251_v16  ;;  %v16404_v11 = vsub.f32 %v48068_v43, %v50692_v40  ;;  %v50690_v60 = vand.u32 4294901760, %v48098_v2  ;;  %v16412_v37 = vand.u32 4294901760, %v16411_v29  ;;  %v16914_v29 = vld [vmem:[%s50562_s7] sm:$0xff] }
 0xea9   :  { %42180 = vmatprep.subr.bf16.mxu1 %v42179_v21  ;;  %v50689_v18 = vand.u32 4294901760, %v48103_v7  ;;  %v48116_v62 = vsub.f32 %v47959_v55, %v50906_v45  ;;  %v16923_v45 = vand.u32 4294901760, %v16914_v29 }
 0xeaa   :  { %v16405_v56 = vand.u32 4294901760, %v16404_v11  ;;  %v16418_v55 = vsub.f32 %v48098_v2, %v50690_v60  ;;  %v42303_v60 = vpack.c.bf16 %v48103_v7, %v48098_v2 }
 0xeab   :  { %42254 = vmatpush3.bf16.msra.mxu0 %v42251_v16  ;;  %v48121_v16 = vsub.f32 %v47964_v57, %v50907_v4  ;;  %v16425_v57 = vsub.f32 %v48103_v7, %v50689_v18  ;;  %v50688_v19 = vand.u32 4294901760, %v48116_v62 }
 0xeac   :  { %42182 = vmatpush3.bf16.msra.mxu1 %v42179_v21  ;;  %42256 = vmatprep.subr.bf16.mxu0 %v42255_v25  ;;  %v42263_v21 = vpack.c.bf16 %v16398_v51, %v16391_v35  ;;  %v42267_v5 = vpack.c.bf16 %v16412_v37, %v16405_v56  ;;  %v48180_v56 = vsub.f32 %v16914_v29, %v16923_v45 }
 0xead   :  { %42184 = vmatprep.subr.bf16.mxu1 %v50878_v59  ;;  %v50687_v17 = vand.u32 4294901760, %v48121_v16  ;;  %v16432_v41 = vsub.f32 %v48116_v62, %v50688_v19  ;;  %v42295_v29 = vpack.c.bf16 %v48047_v6, %v48042_v46 }
 0xeaf   :  { %37006 = vmatmul.mubr.f32.vlgmr.msra.gmra.mrb[52].mxu1 %v47468_v26  ;;  %42258 = vmatpush3.bf16.msra.mxu0 %v42255_v25  ;;  %v16426_v25 = vand.u32 4294901760, %v16425_v57  ;;  %v16439_v10 = vsub.f32 %v48121_v16, %v50687_v17  ;;  %v16433_v51 = vand.u32 4294901760, %v16432_v41  ;;  %v42291_v57 = vpack.c.bf16 %v48036_v8, %v48031_v38 }
 0xeb0   :  { %42186 = vmatpush3.bf16.msra.mxu1 %v50878_v59  ;;  %37040 = vmatprep.mubr.f32.mxu1 %v47462_v9  ;;  %v16419_v59 = vand.u32 4294901760, %v16418_v55  ;;  %v42299_v17 = vpack.c.bf16 %v48073_v48, %v48068_v43  ;;  %v50922_v38 = vand.u32 4294901760, %v48047_v6  ;;  %v50926_v6 = vand.u32 4294901760, %v48073_v48 }
 0xeb1   :  { %42188 = vmatprep.subr.bf16.mxu1 %v50879_v53  ;;  %42260 = vmatprep.subr.bf16.mxu0 %v42259_v30  ;;  %v50932_v48 = vand.u32 4294901760, %v48116_v62 }
 0xeb2   :  { %v42271_v35 = vpack.c.bf16 %v16426_v25, %v16419_v59  ;;  %v50908_v25 = vmov 0.0|0.0  }
 0xeb3   :  { %42262 = vmatpush3.bf16.msra.mxu0 %v42259_v30  ;;  %v16916_v30 = vld [vmem:[%s50562_s7 + $0x10] sm:$0xff] }
 0xeb4   :  { %42190 = vmatpush3.bf16.msra.mxu1 %v50879_v53  ;;  %42264 = vmatprep.subr.bf16.mxu0 %v42263_v21  ;;  %v16440_v53 = vand.u32 4294901760, %v16439_v10 }
 0xeb5   :  { %42192 = vmatprep.subr.bf16.mxu1 %v50880_v44 }
 0xeb6   :  { %v42275_v11 = vpack.c.bf16 %v16440_v53, %v16433_v51  ;;  %v17008_v51 = vand.u32 4294901760, %v48180_v56 }
 0xeb7   :  { %42266 = vmatpush3.bf16.msra.mxu0 %v42263_v21  ;;  %v16917_v21 = vld [vmem:[%s50562_s7 + $0x18] sm:$0xff] }
 0xeb8   :  { %42194 = vmatpush3.bf16.msra.mxu1 %v50880_v44  ;;  %42268 = vmatprep.subr.bf16.mxu0 %v42267_v5  ;;  %v42279_v44 = vpack.c.bf16 %v47928_v54, %v47926_v24  ;;  %v16932_v59 = vand.u32 4294901760, %v16917_v21 }
 0xeb9   :  { %42196 = vmatprep.subr.bf16.mxu1 %v50881_v23 }
 0xebb   :  { %42270 = vmatpush3.bf16.msra.mxu0 %v42267_v5  ;;  %v16929_v5 = vand.u32 4294901760, %v16916_v30 }
 0xebc   :  { %42198 = vmatpush3.bf16.msra.mxu1 %v50881_v23  ;;  %42272 = vmatprep.subr.bf16.mxu0 %v42271_v35  ;;  %v42283_v23 = vpack.c.bf16 %v47970_v0, %v47967_v15 }
 0xebd   :  { %42200 = vmatprep.subr.bf16.mxu1 %v47553_v39 }
 0xebf   :  { %42274 = vmatpush3.bf16.msra.mxu0 %v42271_v35  ;;  %v16920_v35 = vld [vmem:[%s50562_s7 + $0x30] sm:$0xff] }
 0xec0   :  { %42202 = vmatpush3.bf16.msra.mxu1 %v47553_v39  ;;  %42276 = vmatprep.subr.bf16.mxu0 %v42275_v11  ;;  %v16915_v39 = vld [vmem:[%s50562_s7 + $0x8] sm:$0xff] }
 0xec1   :  { %42204 = vmatprep.subr.bf16.mxu1 %v47571_v36  ;;  %v16926_v4 = vand.u32 4294901760, %v16915_v39 }
 0xec3   :  { %42278 = vmatpush3.bf16.msra.mxu0 %v42275_v11  ;;  %v48182_v37 = vsub.f32 %v16915_v39, %v16926_v4  ;;  %v48185_v55 = vpack.c.bf16 %v16926_v4, %v16923_v45  ;;  %v48199_v11 = vsub.f32 %v16916_v30, %v16929_v5  ;;  %v50909_v39 = vmov 0.0  }
 0xec4   :  { %42206 = vmatpush3.bf16.msra.mxu1 %v47571_v36  ;;  %42280 = vmatprep.subr.bf16.mxu0 %v42279_v44  ;;  %v42287_v36 = vpack.c.bf16 %v48002_v27, %v47997_v52  ;;  %v16941_v45 = vand.u32 4294901760, %v16920_v35  ;;  %v17009_v30 = vsub.f32 %v48180_v56, %v17008_v51 }
 0xec5   :  { %42208 = vmatprep.subr.bf16.mxu1 %v47597_v22  ;;  %v17015_v53 = vand.u32 4294901760, %v48182_v37 }
 0xec6   :  { %37111 = vmatmul.mubr.f32.vlgmr.msra.gmra.mrb[48].mxu0 %v47468_v26  ;;  %v17010_v33 = vand.u32 4294901760, %v17009_v30 }
 0xec7   :  { %42282 = vmatpush3.bf16.msra.mxu0 %v42279_v44  ;;  %37145 = vmatprep.mubr.f32.mxu0 %v47466_v32  ;;  %v16919_v32 = vld [vmem:[%s50562_s7 + $0x28] sm:$0xff]  ;;  %v48201_v44 = vsub.f32 %v16917_v21, %v16932_v59  ;;  %v17016_v21 = vsub.f32 %v48182_v37, %v17015_v53 }
 0xec8   :  { %42210 = vmatpush3.bf16.msra.mxu1 %v47597_v22  ;;  %42284 = vmatprep.subr.bf16.mxu0 %v42283_v23  ;;  %v16918_v22 = vld [vmem:[%s50562_s7 + $0x20] sm:$0xff]  ;;  %v16938_v10 = vand.u32 4294901760, %v16919_v32 }
 0xec9   :  { %42212 = vmatprep.subr.bf16.mxu1 %v50883_v1  ;;  %v16935_v41 = vand.u32 4294901760, %v16918_v22  ;;  %v17017_v40 = vand.u32 4294901760, %v17016_v21  ;;  %v42307_v21 = vpack.c.bf16 %v48121_v16, %v48116_v62 }
 0xecb   :  { %42286 = vmatpush3.bf16.msra.mxu0 %v42283_v23  ;;  %v48204_v23 = vpack.c.bf16 %v16932_v59, %v16929_v5  ;;  %v17022_v5 = vand.u32 4294901760, %v48199_v11  ;;  %v50695_v59 = vand.u32 4294901760, %v48201_v44  ;;  %v48224_v19 = vsub.f32 %v16918_v22, %v16935_v41 }
 0xecc   :  { %42214 = vmatpush3.bf16.msra.mxu1 %v50883_v1  ;;  %42288 = vmatprep.subr.bf16.mxu0 %v42287_v36  ;;  %v16921_v1 = vld [vmem:[%s50562_s7 + $0x38] sm:$0xff]  ;;  %v48247_v30 = vpack.c.bf16 %v17017_v40, %v17010_v33 }
 0xecd   :  { %42407 = vmatprep.subr.bf16.mxu1 %v50908_v25  ;;  %v16944_v4 = vand.u32 4294901760, %v16921_v1  ;;  %v17023_v42 = vsub.f32 %v48199_v11, %v17022_v5  ;;  %v17030_v22 = vsub.f32 %v48201_v44, %v50695_v59 }
 0xece   :  { %50910 = vst [vmem:[#allocation14_spill] sm:$0xff] %v48247_v30 }
 0xecf   :  { %37041 = vmatmul.mubr.f32.vlgmr.msra.gmra.mrb[52].mxu1 %v47468_v26  ;;  %42290 = vmatpush3.bf16.msra.mxu0 %v42287_v36  ;;  %v48211_v36 = vpack.c.bf16 %v16938_v10, %v16935_v41  ;;  %v48229_v18 = vpack.c.bf16 %v16944_v4, %v16941_v45  ;;  %v17024_v49 = vand.u32 4294901760, %v17023_v42  ;;  %v17031_v59 = vand.u32 4294901760, %v17030_v22  ;;  %v48265_v42 = vld [vmem:[%s50563_s6] ss:$0 sm:$0xff] }
 0xed0   :  { %42409 = vmatpush3.bf16.msra.mxu1 %v48185_v55  ;;  %42292 = vmatprep.subr.bf16.mxu0 %v42291_v57 }
 0xed1   :  { %42410 = vmatprep.subr.bf16.mxu1 %v50908_v25  ;;  %37269 = vmatprep.mubr.msk.f32.mxu1 %vm44875_vm2, %v50909_v39  ;;  %v48267_v33 = vpack.c.bf16 %v17031_v59, %v17024_v49 }
 0xed3   :  { %42294 = vmatpush3.bf16.msra.mxu0 %v42291_v57  ;;  %v48226_v57 = vsub.f32 %v16919_v32, %v16938_v10  ;;  %v17036_v32 = vand.u32 4294901760, %v48224_v19  ;;  %v48242_v10 = vsub.f32 %v16920_v35, %v16941_v45  ;;  %50911 = vst [vmem:[#allocation15_spill] sm:$0xff] %v48267_v33 }
 0xed4   :  { %42412 = vmatpush3.bf16.msra.mxu1 %v48204_v23  ;;  %42296 = vmatprep.subr.bf16.mxu0 %v42295_v29 }
 0xed5   :  { %42413 = vmatprep.subr.bf16.mxu1 %v50908_v25  ;;  %v50696_v41 = vand.u32 4294901760, %v48226_v57  ;;  %v17037_v35 = vsub.f32 %v48224_v19, %v17036_v32 }
 0xed7   :  { %42298 = vmatpush3.bf16.msra.mxu0 %v42295_v29  ;;  %v48244_v29 = vsub.f32 %v16921_v1, %v16944_v4  ;;  %v17044_v1 = vsub.f32 %v48226_v57, %v50696_v41  ;;  %v17038_v45 = vand.u32 4294901760, %v17037_v35 }
 0xed8   :  { %42415 = vmatpush3.bf16.msra.mxu1 %v48211_v36  ;;  %42300 = vmatprep.subr.bf16.mxu0 %v42299_v17 }
 0xed9   :  { %42416 = vmatprep.subr.bf16.mxu1 %v50908_v25  ;;  %v50697_v40 = vand.u32 4294901760, %v48244_v29  ;;  %v17045_v4 = vand.u32 4294901760, %v17044_v1 }
 0xedb   :  { %42302 = vmatpush3.bf16.msra.mxu0 %v42299_v17  ;;  %v50698_v17 = vand.u32 4294901760, %v48242_v10  ;;  %v48286_v35 = vpack.c.bf16 %v17045_v4, %v17038_v45  ;;  %v50914_v45 = vand.u32 4294901760, %v47926_v24  ;;  %v50915_v4 = vand.u32 4294901760, %v47928_v54 }
 0xedc   :  { %42418 = vmatpush3.bf16.msra.mxu1 %v48229_v18  ;;  %42304 = vmatprep.subr.bf16.mxu0 %v42303_v60  ;;  %v50918_v24 = vand.u32 4294901760, %v47997_v52  ;;  %v50919_v54 = vand.u32 4294901760, %v48002_v27  ;;  %v50921_v27 = vand.u32 4294901760, %v48042_v46  ;;  %v50925_v46 = vand.u32 4294901760, %v48068_v43 }
 0xedd   :  { %42419 = vmatprep.subr.bf16.mxu1 %v50908_v25  ;;  %v17051_v22 = vsub.f32 %v48242_v10, %v50698_v17  ;;  %50912 = vst [vmem:[#allocation16_spill] sm:$0xff] %v48286_v35 }
 0xede   :  { %v42359_v8 = vpack.c.bf16 %v50922_v38, %v50921_v27 }
 0xedf   :  { %42306 = vmatpush3.bf16.msra.mxu0 %v42303_v60  ;;  %37270 = vmatmul.mubr.f32.vlgmr.msra.gmra.mrb[54].mxu1 %v50909_v39  ;;  %v17058_v60 = vsub.f32 %v48244_v29, %v50697_v40  ;;  %v17052_v1 = vand.u32 4294901760, %v17051_v22  ;;  %v42343_v22 = vpack.c.bf16 %v50915_v4, %v50914_v45  ;;  %v42351_v45 = vpack.c.bf16 %v50919_v54, %v50918_v24  ;;  %v30743_v4 = vld [vmem:[%s50562_s7 + $0x60] sm:$0xff] }
 0xee0   :  { %42421 = vmatpush3.bf16.msra.mxu1 %v48247_v30  ;;  %42308 = vmatprep.subr.bf16.mxu0 %v42307_v21 }
 0xee1   :  { %v36657_v41 = vpop.f32.mrb[50].mxu1  ;;  %42422 = vmatprep.subr.bf16.mxu1 %v50908_v25  ;;  %37288 = vmatprep.mubr.msk.f32.mxu1 %vm44875_vm2, %v50909_v39  ;;  %v17059_v40 = vand.u32 4294901760, %v17058_v60  ;;  %v50916_v60 = vand.u32 4294901760, %v47967_v15  ;;  %v42355_v15 = vpack.c.bf16 %v16382_v28, %v16375_v34  ;;  %v50923_v34 = vand.u32 4294901760, %v48226_v57 }
 0xee2   :  { %v48280_v49 = vadd.f32 %v36657_v41, %v48265_v42  ;;  %v48282_v59 = vpop.f32.mrb[51].mxu1 }
 0xee3   :  { %42310 = vmatpush3.bf16.msra.mxu0 %v42307_v21  ;;  %v48294_v41 = vpack.c.bf16 %v17059_v40, %v17052_v1  ;;  %v48321_v21 = vpack.c.bf16 %v48226_v57, %v48224_v19  ;;  %v48329_v40 = vpack.c.bf16 %v48244_v29, %v48242_v10  ;;  %v50917_v1 = vand.u32 4294901760, %v47970_v0  ;;  %v30741_v57 = vld [vmem:[%s50562_s7 + $0x50] sm:$0xff] }
 0xee4   :  { %42424 = vmatpush3.bf16.msra.mxu1 %v48267_v33  ;;  %42312 = vmatprep.subr.bf16.mxu0 %v47828_v14  ;;  %v50920_v0 = vand.u32 4294901760, %v48201_v44  ;;  %v48394_v28 = vpack.c.bf16 %v50923_v34, %v17036_v32  ;;  %v30742_v32 = vld [vmem:[%s50562_s7 + $0x58] sm:$0xff] }
 0xee5   :  { %42425 = vmatprep.subr.bf16.mxu1 %v50908_v25  ;;  %50913 = vst [vmem:[#allocation17_spill] sm:$0xff] %v48294_v41  ;;  %v42347_v17 = vpack.c.bf16 %v50917_v1, %v50916_v60  ;;  %v30746_v60 = vld [vmem:[%s50562_s7 + $0x78] sm:$0xff] }
 0xee6   :  { %37146 = vmatmul.mubr.f32.vlgmr.msra.gmra.mrb[48].mxu0 %v47479_v12  ;;  %v48302_v12 = vpack.c.bf16 %v48182_v37, %v48180_v56  ;;  %v48380_v52 = vpack.c.bf16 %v50920_v0, %v17022_v5  ;;  %50924 = vst [vmem:[#allocation18_spill] sm:$0xff] %v48394_v28  ;;  %v42363_v56 = vpack.c.bf16 %v50926_v6, %v50925_v46  ;;  %v50927_v37 = vand.u32 4294901760, %v48242_v10 }
 0xee7   :  { %42314 = vmatpush3.bf16.msra.mxu0 %v47828_v14  ;;  %37180 = vmatprep.mubr.f32.mxu0 %v47473_v50  ;;  %v48311_v50 = vpack.c.bf16 %v48201_v44, %v48199_v11  ;;  %v50931_v11 = vand.u32 4294901760, %v48103_v7  ;;  %v50933_v44 = vand.u32 4294901760, %v48121_v16  ;;  %v30740_v7 = vld [vmem:[%s50562_s7 + $0x48] sm:$0xff]  ;;  %v17490_v38 = vand.u32 4294901760, %v30746_v60 }
 0xee8   :  { %42427 = vmatpush3.bf16.msra.mxu1 %v48286_v35  ;;  %42316 = vmatprep.subr.bf16.mxu0 %v47846_v13  ;;  %v17472_v16 = vand.u32 4294901760, %v30740_v7 }
 0xee9   :  { %42428 = vmatprep.subr.bf16.mxu1 %v50908_v25  ;;  %v42371_v5 = vpack.c.bf16 %v50933_v44, %v50932_v48 }
 0xeeb   :  { %42318 = vmatpush3.bf16.msra.mxu0 %v47846_v13 }
 0xeec   :  { %42430 = vmatpush3.bf16.msra.mxu1 %v48294_v41  ;;  %42320 = vmatprep.subr.bf16.mxu0 %v47870_v20 }
 0xeed   :  { %42431 = vmatprep.subr.bf16.mxu1 %v50908_v25 }
 0xeef   :  { %37289 = vmatmul.mubr.f32.vlgmr.msra.gmra.mrb[56].mxu1 %v50909_v39  ;;  %42322 = vmatpush3.bf16.msra.mxu0 %v47870_v20 }
 0xef0   :  { %42433 = vmatpush3.bf16.msra.mxu1 %v48302_v12  ;;  %42324 = vmatprep.subr.bf16.mxu0 %v47902_v3 }
 0xef1   :  { %42434 = vmatprep.subr.bf16.mxu1 %v50908_v25  ;;  %37307 = vmatprep.mubr.msk.f32.mxu1 %vm44875_vm2, %v50909_v39 }
 0xef3   :  { %42326 = vmatpush3.bf16.msra.mxu0 %v47902_v3 }
 0xef4   :  { %42436 = vmatpush3.bf16.msra.mxu1 %v48311_v50  ;;  %42328 = vmatprep.subr.bf16.mxu0 %v47935_v61 }
 0xef5   :  { %42437 = vmatprep.subr.bf16.mxu1 %v50908_v25 }
 0xef7   :  { %42330 = vmatpush3.bf16.msra.mxu0 %v47935_v61 }
 0xef8   :  { %42439 = vmatpush3.bf16.msra.mxu1 %v48321_v21  ;;  %42332 = vmatprep.subr.bf16.mxu0 %v47954_v63 }
 0xef9   :  { %42440 = vmatprep.subr.bf16.mxu1 %v50908_v25 }
 0xefb   :  { %42334 = vmatpush3.bf16.msra.mxu0 %v47954_v63 }
 0xefc   :  { %42442 = vmatpush3.bf16.msra.mxu1 %v48329_v40  ;;  %42336 = vmatprep.subr.bf16.mxu0 %v47980_v47 }
 0xefd   :  { %42443 = vmatprep.subr.bf16.mxu1 %v50908_v25 }
 0xeff   :  { %37308 = vmatmul.mubr.f32.vlgmr.msra.gmra.mrb[58].mxu1 %v50909_v39  ;;  %42338 = vmatpush3.bf16.msra.mxu0 %v47980_v47 }
 0xf00   :  { %42445 = vmatpush3.bf16.msra.mxu1 %v48185_v55  ;;  %42340 = vmatprep.subr.bf16.mxu0 %v48013_v58 }
 0xf01   :  { %42446 = vmatprep.subr.bf16.mxu1 %v50908_v25  ;;  %37326 = vmatprep.mubr.msk.f32.mxu1 %vm44875_vm2, %v50909_v39 }
 0xf03   :  { %42342 = vmatpush3.bf16.msra.mxu0 %v48013_v58 }
 0xf04   :  { %42448 = vmatpush3.bf16.msra.mxu1 %v48204_v23  ;;  %42344 = vmatprep.subr.bf16.mxu0 %v42343_v22 }
 0xf05   :  { %42449 = vmatprep.subr.bf16.mxu1 %v50908_v25 }
 0xf06   :  { %37181 = vmatmul.mubr.f32.vlgmr.msra.gmra.mrb[48].mxu0 %v47493_v31  ;;  %v48367_v31 = vpack.c.bf16 %v17015_v53, %v17008_v51  ;;  %v50928_v51 = vand.u32 4294901760, %v48244_v29  ;;  %v50930_v53 = vand.u32 4294901760, %v48098_v2  ;;  %v30739_v2 = vld [vmem:[%s50562_s7 + $0x40] sm:$0xff]  ;;  %v17475_v29 = vand.u32 4294901760, %v30741_v57 }
 0xf07   :  { %42346 = vmatpush3.bf16.msra.mxu0 %v42343_v22  ;;  %37215 = vmatprep.mubr.f32.mxu0 %v47462_v9  ;;  %v17469_v62 = vand.u32 4294901760, %v30739_v2  ;;  %v30745_v22 = vld [vmem:[%s50562_s7 + $0x70] sm:$0xff] }
 0xf08   :  { %42451 = vmatpush3.bf16.msra.mxu1 %v48211_v36  ;;  %42348 = vmatprep.subr.bf16.mxu0 %v42347_v17  ;;  %v48406_v19 = vpack.c.bf16 %v50928_v51, %v50927_v37  ;;  %v42367_v43 = vpack.c.bf16 %v50931_v11, %v50930_v53  ;;  %v48471_v54 = vsub.f32 %v30741_v57, %v17475_v29  ;;  %v17487_v27 = vand.u32 4294901760, %v30745_v22 }
 0xf09   :  { %42452 = vmatprep.subr.bf16.mxu1 %v50908_v25  ;;  %v48452_v10 = vpack.c.bf16 %v17472_v16, %v17469_v62 }
 0xf0a   :  { %50929 = vst [vmem:[#allocation19_spill] sm:$0xff] %v48406_v19  ;;  %v50706_v46 = vand.u32 4294901760, %v48471_v54  ;;  %v48500_v51 = vpack.c.bf16 %v17490_v38, %v17487_v27 }
 0xf0b   :  { %42350 = vmatpush3.bf16.msra.mxu0 %v42347_v17  ;;  %v17478_v17 = vand.u32 4294901760, %v30742_v32 }
 0xf0c   :  { %42454 = vmatpush3.bf16.msra.mxu1 %v48229_v18  ;;  %42352 = vmatprep.subr.bf16.mxu0 %v42351_v45 }
 0xf0d   :  { %42455 = vmatprep.subr.bf16.mxu1 %v50908_v25 }
 0xf0f   :  { %37327 = vmatmul.mubr.f32.vlgmr.msra.gmra.mrb[60].mxu1 %v50909_v39  ;;  %42354 = vmatpush3.bf16.msra.mxu0 %v42351_v45  ;;  %v48473_v45 = vsub.f32 %v30742_v32, %v17478_v17 }
 0xf10   :  { %42457 = vmatpush3.bf16.msra.mxu1 %v48367_v31  ;;  %42356 = vmatprep.subr.bf16.mxu0 %v42355_v15 }
 0xf11   :  { %42458 = vmatprep.subr.bf16.mxu1 %v50908_v25  ;;  %37345 = vmatprep.mubr.msk.f32.mxu1 %vm44875_vm2, %v50909_v39  ;;  %v50705_v6 = vand.u32 4294901760, %v48473_v45 }
 0xf13   :  { %42358 = vmatpush3.bf16.msra.mxu0 %v42355_v15  ;;  %v17481_v15 = vand.u32 4294901760, %v30743_v4  ;;  %v17576_v48 = vsub.f32 %v48473_v45, %v50705_v6 }
 0xf14   :  { %42460 = vmatpush3.bf16.msra.mxu1 %v48380_v52  ;;  %42360 = vmatprep.subr.bf16.mxu0 %v42359_v8 }
 0xf15   :  { %42461 = vmatprep.subr.bf16.mxu1 %v50908_v25  ;;  %v48495_v37 = vsub.f32 %v30743_v4, %v17481_v15 }
 0xf17   :  { %42362 = vmatpush3.bf16.msra.mxu0 %v42359_v8  ;;  %v50702_v44 = vand.u32 4294901760, %v48495_v37 }
 0xf18   :  { %42463 = vmatpush3.bf16.msra.mxu1 %v48394_v28  ;;  %42364 = vmatprep.subr.bf16.mxu0 %v42363_v56 }
 0xf19   :  { %42464 = vmatprep.subr.bf16.mxu1 %v50908_v25  ;;  %v17583_v57 = vsub.f32 %v48495_v37, %v50702_v44 }
 0xf1b   :  { %42366 = vmatpush3.bf16.msra.mxu0 %v42363_v56 }
 0xf1c   :  { %42466 = vmatpush3.bf16.msra.mxu1 %v48406_v19  ;;  %42368 = vmatprep.subr.bf16.mxu0 %v42367_v43 }
 0xf1d   :  { %42467 = vmatprep.subr.bf16.mxu1 %v50908_v25 }
 0xf1f   :  { %37346 = vmatmul.mubr.f32.vlgmr.msra.gmra.mrb[62].mxu1 %v50909_v39  ;;  %42370 = vmatpush3.bf16.msra.mxu0 %v42367_v43  ;;  %v17569_v43 = vsub.f32 %v48471_v54, %v50706_v46 }
 0xf20   :  { %42469 = vmatpush3.bf16.msra.mxu1 %v48185_v55  ;;  %42372 = vmatprep.subr.bf16.mxu0 %v42371_v5 }
 0xf21   :  { %42470 = vmatprep.subr.bf16.mxu1 %v50908_v25  ;;  %37364 = vmatprep.mubr.msk.f32.mxu1 %vm44875_vm2, %v50909_v39 }
 0xf23   :  { %42374 = vmatpush3.bf16.msra.mxu0 %v42371_v5 }
 0xf24   :  { %42472 = vmatpush3.bf16.msra.mxu1 %v48204_v23  ;;  %42376 = vmatprep.subr.bf16.mxu0 %v47828_v14 }
 0xf25   :  { %42473 = vmatprep.subr.bf16.mxu1 %v50908_v25 }
 0xf26   :  { %37216 = vmatmul.mubr.f32.vlgmr.msra.gmra.mrb[48].mxu0 %v47468_v26 }
 0xf27   :  { %42378 = vmatpush3.bf16.msra.mxu0 %v47828_v14  ;;  %37250 = vmatprep.mubr.f32.mxu0 %v47462_v9  ;;  %v48446_v14 = vsub.f32 %v30739_v2, %v17469_v62  ;;  %v48448_v9 = vsub.f32 %v30740_v7, %v17472_v16  ;;  %v48513_v2 = vsub.f32 %v30745_v22, %v17487_v27  ;;  %v17570_v62 = vand.u32 4294901760, %v17569_v43 }
 0xf28   :  { %42475 = vmatpush3.bf16.msra.mxu1 %v48211_v36  ;;  %42380 = vmatprep.subr.bf16.mxu0 %v47846_v13  ;;  %v17577_v16 = vand.u32 4294901760, %v17576_v48 }
 0xf29   :  { %42476 = vmatprep.subr.bf16.mxu1 %v50908_v25  ;;  %v50710_v1 = vand.u32 4294901760, %v48446_v14  ;;  %v50707_v24 = vand.u32 4294901760, %v48448_v9 }
 0xf2b   :  { %42382 = vmatpush3.bf16.msra.mxu0 %v47846_v13  ;;  %v30744_v13 = vld [vmem:[%s50562_s7 + $0x68] sm:$0xff]  ;;  %v17555_v8 = vsub.f32 %v48446_v14, %v50710_v1  ;;  %v17562_v34 = vsub.f32 %v48448_v9, %v50707_v24 }
 0xf2c   :  { %42478 = vmatpush3.bf16.msra.mxu1 %v48229_v18  ;;  %42384 = vmatprep.subr.bf16.mxu0 %v47870_v20  ;;  %v17484_v0 = vand.u32 4294901760, %v30744_v13 }
 0xf2d   :  { %42479 = vmatprep.subr.bf16.mxu1 %v50908_v25  ;;  %v17556_v53 = vand.u32 4294901760, %v17555_v8  ;;  %v17563_v11 = vand.u32 4294901760, %v17562_v34  ;;  %v30750_v8 = vld [vmem:[%s50562_s7 + $0x98] sm:$0xff] }
 0xf2e   :  { %v48493_v56 = vpack.c.bf16 %v17484_v0, %v17481_v15  ;;  %v17584_v15 = vand.u32 4294901760, %v17583_v57  ;;  %v18044_v48 = vand.u32 4294901760, %v30750_v8 }
 0xf2f   :  { %37365 = vmatmul.mubr.f32.vlgmr.msra.gmra.mrb[64].mxu1 %v50909_v39  ;;  %42386 = vmatpush3.bf16.msra.mxu0 %v47870_v20  ;;  %v48477_v20 = vpack.c.bf16 %v17478_v17, %v17475_v29  ;;  %v48519_v7 = vpack.c.bf16 %v17563_v11, %v17556_v53  ;;  %v30748_v29 = vld [vmem:[%s50562_s7 + $0x88] sm:$0xff]  ;;  %v50700_v17 = vand.u32 4294901760, %v48513_v2 }
 0xf30   :  { %42481 = vmatpush3.bf16.msra.mxu1 %v48452_v10  ;;  %42388 = vmatprep.subr.bf16.mxu0 %v47902_v3 }
 0xf31   :  { %42482 = vmatprep.subr.bf16.mxu1 %v50908_v25  ;;  %37383 = vmatprep.mubr.msk.f32.mxu1 %vm44875_vm2, %v50909_v39  ;;  %v17597_v27 = vsub.f32 %v48513_v2, %v50700_v17 }
 0xf33   :  { %42390 = vmatpush3.bf16.msra.mxu0 %v47902_v3  ;;  %v48497_v3 = vsub.f32 %v30744_v13, %v17484_v0  ;;  %v48540_v13 = vpack.c.bf16 %v17577_v16, %v17570_v62  ;;  %v17598_v16 = vand.u32 4294901760, %v17597_v27 }
 0xf34   :  { %42484 = vmatpush3.bf16.msra.mxu1 %v48477_v20  ;;  %42392 = vmatprep.subr.bf16.mxu0 %v47935_v61 }
 0xf35   :  { %42485 = vmatprep.subr.bf16.mxu1 %v50908_v25  ;;  %v50701_v5 = vand.u32 4294901760, %v48497_v3 }
 0xf37   :  { %42394 = vmatpush3.bf16.msra.mxu0 %v47935_v61  ;;  %v48515_v61 = vsub.f32 %v30746_v60, %v17490_v38  ;;  %v17590_v32 = vsub.f32 %v48497_v3, %v50701_v5  ;;  %v18038_v60 = vand.u32 4294901760, %v30748_v29  ;;  %v30749_v38 = vld [vmem:[%s50562_s7 + $0x90] sm:$0xff] }
 0xf38   :  { %42487 = vmatpush3.bf16.msra.mxu1 %v48493_v56  ;;  %42396 = vmatprep.subr.bf16.mxu0 %v47954_v63  ;;  %v18041_v43 = vand.u32 4294901760, %v30749_v38 }
 0xf39   :  { %42488 = vmatprep.subr.bf16.mxu1 %v50908_v25  ;;  %v50699_v4 = vand.u32 4294901760, %v48515_v61  ;;  %v17591_v0 = vand.u32 4294901760, %v17590_v32  ;;  %v48561_v53 = vsub.f32 %v30748_v29, %v18038_v60  ;;  %v30751_v32 = vld [vmem:[%s50562_s7 + $0xa0] sm:$0xff]  ;;  %v30754_v29 = vld [vmem:[%s50562_s7 + $0xb8] sm:$0xff] }
 0xf3a   :  { %v48591_v27 = vpack.c.bf16 %v18044_v48, %v18041_v43 }
 0xf3b   :  { %42398 = vmatpush3.bf16.msra.mxu0 %v47954_v63  ;;  %v30747_v63 = vld [vmem:[%s50562_s7 + $0x80] sm:$0xff]  ;;  %v48568_v62 = vpack.c.bf16 %v17591_v0, %v17584_v15  ;;  %v48586_v15 = vsub.f32 %v30749_v38, %v18041_v43  ;;  %v48588_v0 = vsub.f32 %v30750_v8, %v18044_v48  ;;  %v18056_v8 = vand.u32 4294901760, %v30754_v29 }
 0xf3c   :  { %42490 = vmatpush3.bf16.msra.mxu1 %v48500_v51  ;;  %42400 = vmatprep.subr.bf16.mxu0 %v47980_v47  ;;  %v18035_v22 = vand.u32 4294901760, %v30747_v63 }
 0xf3d   :  { %42491 = vmatprep.subr.bf16.mxu1 %v50908_v25  ;;  %v50709_v17 = vand.u32 4294901760, %v48586_v15  ;;  %v50708_v5 = vand.u32 4294901760, %v48588_v0 }
 0xf3e   :  { %v48559_v34 = vsub.f32 %v30747_v63, %v18035_v22  ;;  %v48564_v11 = vpack.c.bf16 %v18038_v60, %v18035_v22  ;;  %v30753_v63 = vld [vmem:[%s50562_s7 + $0xb0] sm:$0xff]  ;;  %v50704_v60 = vand.u32 4294901760, %v48561_v53 }
 0xf3f   :  { %42402 = vmatpush3.bf16.msra.mxu0 %v47980_v47  ;;  %37384 = vmatmul.mubr.f32.vlgmr.msra.gmra.mrb[66].mxu1 %v50909_v39  ;;  %v17604_v47 = vsub.f32 %v48515_v61, %v50699_v4  ;;  %v18053_v38 = vand.u32 4294901760, %v30753_v63 }
 0xf40   :  { %42493 = vmatpush3.bf16.msra.mxu1 %v48519_v7  ;;  %42404 = vmatprep.subr.bf16.mxu0 %v48013_v58  ;;  %v50703_v22 = vand.u32 4294901760, %v48559_v34  ;;  %v18128_v48 = vsub.f32 %v48561_v53, %v50704_v60 }
 0xf41   :  { %42494 = vmatprep.subr.bf16.mxu1 %v50908_v25  ;;  %37402 = vmatprep.mubr.msk.f32.mxu1 %vm44875_vm2, %v50909_v39  ;;  %v17605_v57 = vand.u32 4294901760, %v17604_v47  ;;  %v48622_v60 = vpack.c.bf16 %v18056_v8, %v18053_v38  ;;  %v48634_v24 = vsub.f32 %v30753_v63, %v18053_v38 }
 0xf42   :  { %v18121_v43 = vsub.f32 %v48559_v34, %v50703_v22  ;;  %v48619_v22 = vpack.c.bf16 %v48448_v9, %v48446_v14  ;;  %v18129_v46 = vand.u32 4294901760, %v18128_v48  ;;  %v48642_v48 = vpack.c.bf16 %v48473_v45, %v48471_v54 }
 0xf43   :  { %42406 = vmatpush3.bf16.msra.mxu0 %v48013_v58  ;;  %v30752_v58 = vld [vmem:[%s50562_s7 + $0xa8] sm:$0xff]  ;;  %v48597_v4 = vpack.c.bf16 %v17605_v57, %v17598_v16 }
 0xf44   :  { %42496 = vmatpush3.bf16.msra.mxu1 %v48540_v13  ;;  %42551 = vmatprep.subr.bf16.mxu0 %v50908_v25  ;;  %v18050_v47 = vand.u32 4294901760, %v30752_v58  ;;  %v18122_v6 = vand.u32 4294901760, %v18121_v43  ;;  %v48636_v43 = vsub.f32 %v30754_v29, %v18056_v8  ;;  %v50714_v8 = vand.u32 4294901760, %v48634_v24 }
 0xf45   :  { %42497 = vmatprep.subr.bf16.mxu1 %v50908_v25 }
 0xf46   :  { %37251 = vmatmul.mubr.f32.vlgmr.msra.gmra.mrb[48].mxu0 %v47468_v26  ;;  %v18047_v26 = vand.u32 4294901760, %v30751_v32  ;;  %v48613_v44 = vsub.f32 %v30752_v58, %v18050_v47  ;;  %v18142_v58 = vsub.f32 %v48588_v0, %v50708_v5  ;;  %v48647_v5 = vpack.c.bf16 %v18129_v46, %v18122_v6 }
 0xf47   :  { %42553 = vmatpush3.bf16.msra.mxu0 %v48564_v11  ;;  %37497 = vmatprep.mubr.msk.f32.mxu0 %vm44875_vm2, %v50909_v39  ;;  %v50713_v1 = vand.u32 4294901760, %v48636_v43  ;;  %v48662_v46 = vpack.c.bf16 %v48497_v3, %v48495_v37 }
 0xf48   :  { %42499 = vmatpush3.bf16.msra.mxu1 %v48568_v62  ;;  %42554 = vmatprep.subr.bf16.mxu0 %v50908_v25  ;;  %v48609_v16 = vpack.c.bf16 %v18050_v47, %v18047_v26  ;;  %v48611_v57 = vsub.f32 %v30751_v32, %v18047_v26  ;;  %v18135_v32 = vsub.f32 %v48586_v15, %v50709_v17  ;;  %v50711_v47 = vand.u32 4294901760, %v48613_v44 }
 0xf49   :  { %42500 = vmatprep.subr.bf16.mxu1 %v50908_v25  ;;  %50934 = vst [vmem:[#allocation20_spill] sm:$0xff] %v48647_v5  ;;  %v18143_v63 = vand.u32 4294901760, %v18142_v58 }
 0xf4a   :  { %v50712_v26 = vand.u32 4294901760, %v48611_v57  ;;  %v18136_v17 = vand.u32 4294901760, %v18135_v32  ;;  %v18156_v38 = vsub.f32 %v48613_v44, %v50711_v47  ;;  %v18163_v47 = vsub.f32 %v48634_v24, %v50714_v8 }
 0xf4b   :  { %42556 = vmatpush3.bf16.msra.mxu0 %v48591_v27 }
 0xf4c   :  { %42502 = vmatpush3.bf16.msra.mxu1 %v48597_v4  ;;  %42557 = vmatprep.subr.bf16.mxu0 %v50908_v25  ;;  %v18149_v29 = vsub.f32 %v48611_v57, %v50712_v26  ;;  %v48666_v6 = vpack.c.bf16 %v18143_v63, %v18136_v17  ;;  %v18157_v58 = vand.u32 4294901760, %v18156_v38  ;;  %v18170_v26 = vsub.f32 %v48636_v43, %v50713_v1 }
 0xf4d   :  { %42503 = vmatprep.subr.bf16.mxu1 %v50908_v25  ;;  %v48681_v17 = vpack.c.bf16 %v48515_v61, %v48513_v2  ;;  %v14899_v63 = vadd.f32 %v48265_v42, %v48282_v59  ;;  %v18164_v19 = vand.u32 4294901760, %v18163_v47  ;;  %v48718_v59 = vpack.c.bf16 %v48588_v0, %v48586_v15 }
 0xf4e   :  { %v18150_v32 = vand.u32 4294901760, %v18149_v29  ;;  %v18171_v28 = vand.u32 4294901760, %v18170_v26  ;;  %v48743_v47 = vpack.c.bf16 %v48636_v43, %v48634_v24 }
 0xf4f   :  { %37403 = vmatmul.mubr.f32.vlgmr.msra.gmra.mrb[68].mxu1 %v50909_v39  ;;  %42559 = vmatpush3.bf16.msra.mxu0 %v48609_v16  ;;  %50937 = vst [vmem:[#allocation21_spill] sm:$0xff] %v48718_v59 }
 0xf50   :  { %42505 = vmatpush3.bf16.msra.mxu1 %v48619_v22  ;;  %42560 = vmatprep.subr.bf16.mxu0 %v50908_v25  ;;  %v48699_v42 = vpack.c.bf16 %v18171_v28, %v18164_v19  ;;  %v48728_v28 = vpack.c.bf16 %v48613_v44, %v48611_v57  ;;  %v50939_v19 = vand.u32 4294901760, %v48446_v14  ;;  %50941 = vst [vmem:[#allocation5_spill] sm:$0xff] %v48743_v47  ;;  %v50942_v14 = vand.u32 4294901760, %v48471_v54 }
 0xf51   :  { %42506 = vmatprep.subr.bf16.mxu1 %v50908_v25  ;;  %37421 = vmatprep.mubr.msk.f32.mxu1 %vm44875_vm2, %v50909_v39 }
 0xf52   :  { %50938 = vst [vmem:[#allocation4_spill] sm:$0xff] %v48728_v28 }
 0xf53   :  { %42562 = vmatpush3.bf16.msra.mxu0 %v48622_v60 }
 0xf54   :  { %42508 = vmatpush3.bf16.msra.mxu1 %v48642_v48  ;;  %42563 = vmatprep.subr.bf16.mxu0 %v50908_v25 }
 0xf55   :  { %42509 = vmatprep.subr.bf16.mxu1 %v50908_v25 }
 0xf56   :  { %37498 = vmatmul.mubr.f32.vlgmr.msra.gmra.mrb[50].mxu0 %v50909_v39 }
 0xf57   :  { %42565 = vmatpush3.bf16.msra.mxu0 %v48647_v5  ;;  %37516 = vmatprep.mubr.msk.f32.mxu0 %vm44875_vm2, %v50909_v39  ;;  %v48692_v5 = vpack.c.bf16 %v18157_v58, %v18150_v32  ;;  %v50944_v58 = vand.u32 4294901760, %v48495_v37  ;;  %v50947_v37 = vand.u32 4294901760, %v48515_v61  ;;  %v50949_v61 = vand.u32 4294901760, %v48561_v53 }
 0xf58   :  { %42511 = vmatpush3.bf16.msra.mxu1 %v48662_v46  ;;  %42566 = vmatprep.subr.bf16.mxu0 %v50908_v25 }
 0xf59   :  { %v36832_v29 = vpop.f32.mrb[46].mxu0  ;;  %42512 = vmatprep.subr.bf16.mxu1 %v50908_v25 }
 0xf5a   :  { %v48687_v38 = vadd.f32 %v36832_v29, %v48280_v49  ;;  %v15485_v1 = vpop.f32.mrb[47].mxu0  ;;  %v48709_v49 = vpack.c.bf16 %v48561_v53, %v48559_v34  ;;  %v50955_v53 = vand.u32 4294901760, %v48613_v44 }
 0xf5b   :  { %v48689_v8 = vadd.f32 %v15485_v1, %v14899_v63  ;;  %42568 = vmatpush3.bf16.msra.mxu0 %v48666_v6  ;;  %v50940_v1 = vand.u32 4294901760, %v48448_v9  ;;  %v50943_v9 = vand.u32 4294901760, %v48473_v45  ;;  %v50945_v63 = vand.u32 4294901760, %v48497_v3 }
 0xf5c   :  { %50935 = vst [vmem:[#allocation22_spill] sm:$0xff] %v48687_v38  ;;  %42514 = vmatpush3.bf16.msra.mxu1 %v48681_v17  ;;  %42569 = vmatprep.subr.bf16.mxu0 %v50908_v25  ;;  %50936 = vst [vmem:[#allocation10_spill] sm:$0xff] %v48709_v49  ;;  %v50946_v45 = vand.u32 4294901760, %v48513_v2  ;;  %v50948_v2 = vand.u32 4294901760, %v48559_v34  ;;  %v50954_v34 = vand.u32 4294901760, %v48611_v57 }
 0xf5d   :  { %42515 = vmatprep.subr.bf16.mxu1 %v50908_v25  ;;  %v48736_v26 = vpack.c.bf16 %v50940_v1, %v50939_v19  ;;  %v48751_v32 = vpack.c.bf16 %v50943_v9, %v50942_v14  ;;  %v48763_v54 = vpack.c.bf16 %v50945_v63, %v50944_v58  ;;  %v50951_v19 = vand.u32 4294901760, %v48586_v15 }
 0xf5e   :  { %v48776_v3 = vpack.c.bf16 %v50947_v37, %v50946_v45  ;;  %v48795_v29 = vpack.c.bf16 %v50949_v61, %v50948_v2  ;;  %v50952_v1 = vand.u32 4294901760, %v48588_v0  ;;  %v48818_v15 = vpack.c.bf16 %v50955_v53, %v50954_v34 }
 0xf5f   :  { %37422 = vmatmul.mubr.f32.vlgmr.msra.gmra.mrb[70].mxu1 %v50909_v39  ;;  %42571 = vmatpush3.bf16.msra.mxu0 %v48692_v5  ;;  %v50957_v0 = vand.u32 4294901760, %v48634_v24  ;;  %v50958_v9 = vand.u32 4294901760, %v48636_v43  ;;  %v30720_v24 = vld [vmem:[%s50563_s6 + $0x1] ss:$0 sm:$0xff] }
 0xf60   :  { %42517 = vmatpush3.bf16.msra.mxu1 %v48452_v10  ;;  %42572 = vmatprep.subr.bf16.mxu0 %v50908_v25  ;;  %50950 = vst [vmem:[#allocation11_spill] sm:$0xff] %v48795_v29  ;;  %v48806_v14 = vpack.c.bf16 %v50952_v1, %v50951_v19  ;;  %50956 = vst [vmem:[#allocation13_spill] sm:$0xff] %v48818_v15 }
 0xf61   :  { %42518 = vmatprep.subr.bf16.mxu1 %v50908_v25  ;;  %37440 = vmatprep.mubr.msk.f32.mxu1 %vm44875_vm2, %v50909_v39  ;;  %v48829_v58 = vpack.c.bf16 %v50958_v9, %v50957_v0 }
 0xf62   :  { %50953 = vst [vmem:[#allocation12_spill] sm:$0xff] %v48806_v14 }
 0xf63   :  { %42574 = vmatpush3.bf16.msra.mxu0 %v48699_v42  ;;  %50959 = vst [vmem:[#allocation9_spill] sm:$0xff] %v48829_v58 }
 0xf64   :  { %42520 = vmatpush3.bf16.msra.mxu1 %v48477_v20  ;;  %42575 = vmatprep.subr.bf16.mxu0 %v50908_v25 }
 0xf65   :  { %42521 = vmatprep.subr.bf16.mxu1 %v50908_v25 }
 0xf66   :  { %37517 = vmatmul.mubr.f32.vlgmr.msra.gmra.mrb[50].mxu0 %v50909_v39 }
 0xf67   :  { %42577 = vmatpush3.bf16.msra.mxu0 %v48709_v49  ;;  %37535 = vmatprep.mubr.msk.f32.mxu0 %vm44875_vm2, %v50909_v39 }
 0xf68   :  { %42523 = vmatpush3.bf16.msra.mxu1 %v48493_v56  ;;  %42578 = vmatprep.subr.bf16.mxu0 %v50908_v25 }
 0xf69   :  { %42524 = vmatprep.subr.bf16.mxu1 %v50908_v25 }
 0xf6b   :  { %42580 = vmatpush3.bf16.msra.mxu0 %v48718_v59 }
 0xf6c   :  { %42526 = vmatpush3.bf16.msra.mxu1 %v48500_v51  ;;  %42581 = vmatprep.subr.bf16.mxu0 %v50908_v25 }
 0xf6d   :  { %42527 = vmatprep.subr.bf16.mxu1 %v50908_v25 }
 0xf6f   :  { %37441 = vmatmul.mubr.f32.vlgmr.msra.gmra.mrb[72].mxu1 %v50909_v39  ;;  %42583 = vmatpush3.bf16.msra.mxu0 %v48728_v28 }
 0xf70   :  { %42529 = vmatpush3.bf16.msra.mxu1 %v48736_v26  ;;  %42584 = vmatprep.subr.bf16.mxu0 %v50908_v25 }
 0xf71   :  { %42530 = vmatprep.subr.bf16.mxu1 %v50908_v25  ;;  %37459 = vmatprep.mubr.msk.f32.mxu1 %vm44875_vm2, %v50909_v39 }
 0xf73   :  { %42586 = vmatpush3.bf16.msra.mxu0 %v48743_v47  ;;  %v30738_v47 = vld [vmem:[%s50563_s6 + $0x2] ss:$0 sm:$0xff] }
 0xf74   :  { %42532 = vmatpush3.bf16.msra.mxu1 %v48751_v32  ;;  %42587 = vmatprep.subr.bf16.mxu0 %v50908_v25 }
 0xf75   :  { %42533 = vmatprep.subr.bf16.mxu1 %v50908_v25 }
 0xf76   :  { %37536 = vmatmul.mubr.f32.vlgmr.msra.gmra.mrb[50].mxu0 %v50909_v39 }
 0xf77   :  { %42589 = vmatpush3.bf16.msra.mxu0 %v48564_v11  ;;  %37554 = vmatprep.mubr.msk.f32.mxu0 %vm44875_vm2, %v50909_v39 }
 0xf78   :  { %42535 = vmatpush3.bf16.msra.mxu1 %v48763_v54  ;;  %42590 = vmatprep.subr.bf16.mxu0 %v50908_v25 }
 0xf79   :  { %42536 = vmatprep.subr.bf16.mxu1 %v50908_v25 }
 0xf7b   :  { %42592 = vmatpush3.bf16.msra.mxu0 %v48591_v27 }
 0xf7c   :  { %42538 = vmatpush3.bf16.msra.mxu1 %v48776_v3  ;;  %42593 = vmatprep.subr.bf16.mxu0 %v50908_v25 }
 0xf7d   :  { %42539 = vmatprep.subr.bf16.mxu1 %v50908_v25 }
 0xf7f   :  { %37460 = vmatmul.mubr.f32.vlgmr.msra.gmra.mrb[74].mxu1 %v50909_v39  ;;  %42595 = vmatpush3.bf16.msra.mxu0 %v48609_v16 }
 0xf80   :  { %42541 = vmatpush3.bf16.msra.mxu1 %v48452_v10  ;;  %42596 = vmatprep.subr.bf16.mxu0 %v50908_v25 }
 0xf81   :  { %42542 = vmatprep.subr.bf16.mxu1 %v50908_v25  ;;  %37478 = vmatprep.mubr.msk.f32.mxu1 %vm44875_vm2, %v50909_v39 }
 0xf83   :  { %42598 = vmatpush3.bf16.msra.mxu0 %v48622_v60 }
 0xf84   :  { %42544 = vmatpush3.bf16.msra.mxu1 %v48477_v20  ;;  %42599 = vmatprep.subr.bf16.mxu0 %v50908_v25 }
 0xf85   :  { %42545 = vmatprep.subr.bf16.mxu1 %v50908_v25 }
 0xf86   :  { %37555 = vmatmul.mubr.f32.vlgmr.msra.gmra.mrb[50].mxu0 %v50909_v39 }
 0xf87   :  { %42601 = vmatpush3.bf16.msra.mxu0 %v48795_v29  ;;  %37573 = vmatprep.mubr.msk.f32.mxu0 %vm44875_vm2, %v50909_v39 }
 0xf88   :  { %42547 = vmatpush3.bf16.msra.mxu1 %v48493_v56  ;;  %42602 = vmatprep.subr.bf16.mxu0 %v50908_v25 }
 0xf89   :  { %42548 = vmatprep.subr.bf16.mxu1 %v50908_v25 }
 0xf8b   :  { %42604 = vmatpush3.bf16.msra.mxu0 %v48806_v14 }
 0xf8c   :  { %42550 = vmatpush3.bf16.msra.mxu1 %v48500_v51  ;;  %42605 = vmatprep.subr.bf16.mxu0 %v50908_v25 }
 0xf8d   :  { %42623 = vmatprep.subr.bf16.mxu1 %v50908_v25 }
 0xf8f   :  { %37479 = vmatmul.mubr.f32.vlgmr.msra.gmra.mrb[76].mxu1 %v50909_v39  ;;  %42607 = vmatpush3.bf16.msra.mxu0 %v48818_v15 }
 0xf90   :  { %42608 = vmatprep.subr.bf16.mxu0 %v50908_v25  ;;  %42625 = vmatpush3.bf16.msra.mxu1 %v48185_v55 }
 0xf91   :  { %42626 = vmatprep.subr.bf16.mxu1 %v50908_v25  ;;  %37611 = vmatprep.mubr.msk.f32.mxu1 %vm44875_vm2, %v50909_v39 }
 0xf93   :  { %42610 = vmatpush3.bf16.msra.mxu0 %v48829_v58 }
 0xf94   :  { %42611 = vmatprep.subr.bf16.mxu0 %v50908_v25  ;;  %42628 = vmatpush3.bf16.msra.mxu1 %v48204_v23 }
 0xf95   :  { %42629 = vmatprep.subr.bf16.mxu1 %v50908_v25 }
 0xf96   :  { %37574 = vmatmul.mubr.f32.vlgmr.msra.gmra.mrb[50].mxu0 %v50909_v39 }
 0xf97   :  { %42613 = vmatpush3.bf16.msra.mxu0 %v48564_v11  ;;  %37592 = vmatprep.mubr.msk.f32.mxu0 %vm44875_vm2, %v50909_v39 }
 0xf98   :  { %42614 = vmatprep.subr.bf16.mxu0 %v50908_v25  ;;  %42631 = vmatpush3.bf16.msra.mxu1 %v48211_v36 }
 0xf99   :  { %42632 = vmatprep.subr.bf16.mxu1 %v50908_v25 }
 0xf9b   :  { %42616 = vmatpush3.bf16.msra.mxu0 %v48591_v27 }
 0xf9c   :  { %42617 = vmatprep.subr.bf16.mxu0 %v50908_v25  ;;  %42634 = vmatpush3.bf16.msra.mxu1 %v48229_v18 }
 0xf9d   :  { %42635 = vmatprep.subr.bf16.mxu1 %v50908_v25 }
 0xf9f   :  { %42619 = vmatpush3.bf16.msra.mxu0 %v48609_v16 }
 0xfa0   :  { %42620 = vmatprep.subr.bf16.mxu0 %v50908_v25 }
 0xfa2   :  { %v37042_v44 = vpop.f32.mrb[52].mxu1 }
 0xfa3   :  { %v48856_v57 = vadd.f32 %v37042_v44, %v30720_v24  ;;  %v16194_v43 = vpop.f32.mrb[53].mxu1  ;;  %42622 = vmatpush3.bf16.msra.mxu0 %v48622_v60 }
 0xfa4   :  { %42695 = vmatprep.subr.bf16.mxu0 %v50908_v25 }
 0xfa5   :  { %50960 = vst [vmem:[#allocation8_spill] sm:$0xff] %v48856_v57 }
 0xfa6   :  { %37593 = vmatmul.mubr.f32.vlgmr.msra.gmra.mrb[50].mxu0 %v50909_v39 }
 0xfa7   :  { %42697 = vmatpush3.bf16.msra.mxu0 %v48452_v10  ;;  %37725 = vmatprep.mubr.msk.f32.mxu0 %vm44875_vm2, %v50909_v39 }
 0xfa8   :  { %42698 = vmatprep.subr.bf16.mxu0 %v50908_v25 }
 0xfab   :  { %42700 = vmatpush3.bf16.msra.mxu0 %v48477_v20 }
 0xfac   :  { %42701 = vmatprep.subr.bf16.mxu0 %v50908_v25 }
 0xfaf   :  { %42703 = vmatpush3.bf16.msra.mxu0 %v48493_v56 }
 0xfb0   :  { %42704 = vmatprep.subr.bf16.mxu0 %v50908_v25 }
 0xfb2   :  { %v17001_v63 = vpop.f32.mrb[54].mxu1 }
 0xfb3   :  { %v37271_v45 = vpop.f32.mrb[55].mxu1  ;;  %42706 = vmatpush3.bf16.msra.mxu0 %v48500_v51 }
 0xfb4   :  { %42707 = vmatprep.subr.bf16.mxu0 %v50908_v25 }
 0xfc2   :  { %v17112_v37 = vpop.f32.mrb[56].mxu1 }
 0xfc3   :  { %v17113_v2 = vadd.f32 %v17112_v37, %v17001_v63  ;;  %v37290_v61 = vpop.f32.mrb[57].mxu1 }
 0xfd2   :  { %v17200_v19 = vpop.f32.mrb[58].mxu1 }
 0xfd3   :  { %v17201_v1 = vadd.f32 %v17200_v19, %v17113_v2  ;;  %v37309_v34 = vpop.f32.mrb[59].mxu1 }
 0xfe2   :  { %v17281_v53 = vpop.f32.mrb[60].mxu1 }
 0xfe3   :  { %v17282_v0 = vadd.f32 %v17281_v53, %v17201_v1  ;;  %v37328_v9 = vpop.f32.mrb[61].mxu1 }
 0xff2   :  { %v17376_v44 = vpop.f32.mrb[62].mxu1 }
 0xff3   :  { %v17377_v57 = vadd.f32 %v17376_v44, %v17282_v0  ;;  %v37347_v38 = vpop.f32.mrb[63].mxu1 }
0x1002   :  { %v17455_v58 = vpop.f32.mrb[64].mxu1 }
0x1003   :  { %v17456_v15 = vadd.f32 %v17455_v58, %v17377_v57  ;;  %v37366_v14 = vpop.f32.mrb[65].mxu1 }
0x1005   :  { %v18014_v44 = vadd.f32 %v48689_v8, %v17456_v15 }
0x1007   :  { %v30755_v28 = vmul.f32 -1.442695, %v18014_v44 }
0x1009   :  { %44790 = vpow2.f32 %v30755_v28 }
0x1012   :  { %v17547_v45 = vpop.f32.mrb[66].mxu1 }
0x1013   :  { %v37385_v29 = vpop.f32.mrb[67].mxu1 }
0x1019   :  { %v37252_v63 = vpop.f32.mrb[48].mxu0 }
0x101a   :  { %v48874_v37 = vadd.f32 %v37252_v63, %v30738_v47  ;;  %v16903_v2 = vpop.f32.mrb[49].mxu0  ;;  %v48877_v63 = vadd.f32 %v30720_v24, %v16194_v43 }
0x101c   :  { %50961 = vst [vmem:[#allocation6_spill] sm:$0xff] %v48874_v37  ;;  %50962 = vst [vmem:[#allocation7_spill] sm:$0xff] %v48877_v63 }
0x1022   :  { %v17658_v61 = vpop.f32.mrb[68].mxu1 }
0x1023   :  { %v17659_v19 = vadd.f32 %v17658_v61, %v17547_v45  ;;  %v37404_v1 = vpop.f32.mrb[69].mxu1 }
0x1032   :  { %v17746_v34 = vpop.f32.mrb[70].mxu1 }
0x1033   :  { %v17747_v53 = vadd.f32 %v17746_v34, %v17659_v19  ;;  %v37423_v0 = vpop.f32.mrb[71].mxu1  ;;  %v44791_v19 = vpop.eup %44790 }
0x1034   :  { %v18018_v1 = vadd.f32 1.0, %v44791_v19 }
0x1042   :  { %v17827_v38 = vpop.f32.mrb[72].mxu1 }
0x1043   :  { %v17828_v9 = vadd.f32 %v17827_v38, %v17747_v53  ;;  %v37442_v58 = vpop.f32.mrb[73].mxu1  ;;  %v48883_v53 = vld [vmem:[%s50564_s8] ss:$0 sm:$0xff] }
0x1052   :  { %v17922_v14 = vpop.f32.mrb[74].mxu1 }
0x1053   :  { %v17923_v57 = vadd.f32 %v17922_v14, %v17828_v9  ;;  %v37461_v29 = vpop.f32.mrb[75].mxu1 }
0x1062   :  { %v18001_v59 = vpop.f32.mrb[76].mxu1 }
0x1063   :  { %v18002_v37 = vadd.f32 %v18001_v59, %v17923_v57  ;;  %v37480_v49 = vpop.f32.mrb[77].mxu1 }
0x1064   :  { %v48886_v49 = vadd.f32 %v30738_v47, %v16903_v2 }
0x1065   :  { %v18021_v45 = vadd.f32 %v48877_v63, %v18002_v37 }
0x1067   :  { %v30756_v61 = vmul.f32 -1.442695, %v18021_v45 }
0x1069   :  { %44792 = vpow2.f32 %v30756_v61 }
0x106a   :  { %44794 = vrcp.f32 %v18018_v1  ;;  %v50964_v1 = vld [vmem:[#allocation18_spill] sm:$0xff] }
0x1073   :  { %v44793_v34 = vpop.eup %44792 }
0x1074   :  { %v18025_v15 = vadd.f32 1.0, %v44793_v34  ;;  %v44795_v59 = vpop.eup %44794  ;;  %v50965_v34 = vld [vmem:[#allocation19_spill] sm:$0xff] }
0x1076   :  { %44796 = vrcp.f32 %v18025_v15  ;;  %v50966_v15 = vld [vmem:[#allocation20_spill] sm:$0xff] }
0x1079   :  { %v18567_v28 = vpop.f32.mrb[50].mxu0 }
0x107a   :  { %v44231_v24 = vadd.f32 %v48883_v53, %v18567_v28  ;;  %v37594_v43 = vpop.f32.mrb[51].mxu0  ;;  %v50967_v28 = vld [vmem:[#allocation10_spill] sm:$0xff] }
0x107b   :  { %v50969_v43 = vld [vmem:[#allocation4_spill] sm:$0xff] }
0x107c   :  { %v18571_v37 = vmul.f32 %v44795_v59, %v44231_v24  ;;  %v50968_v24 = vld [vmem:[#allocation21_spill] sm:$0xff] }
0x107d   :  { %v50970_v59 = vld [vmem:[#allocation5_spill] sm:$0xff] }
0x107e   :  { %v18572_v0 = vadd.f32 %v48886_v49, %v18571_v37  ;;  %v50971_v37 = vld [vmem:[#allocation11_spill] sm:$0xff] }
0x1080   :  { %44798 = vtanh.f32 %v18572_v0  ;;  %v44797_v38 = vpop.eup %44796  ;;  %v50972_v0 = vld [vmem:[#allocation12_spill] sm:$0xff] }
0x1081   :  { %v18574_v9 = vsub.f32 1.0, %v44797_v38  ;;  %v18576_v14 = vmul.f32 0.0, %v44797_v38  ;;  %v50973_v38 = vld [vmem:[#allocation13_spill] sm:$0xff] }
0x108a   :  { %v44799_v58 = vpop.eup %44798 }
0x108b   :  { %v18575_v57 = vmul.f32 %v44799_v58, %v18574_v9  ;;  %v50974_v9 = vld [vmem:[#allocation9_spill] sm:$0xff] }
0x108d   :  { %v48889_v29 = vadd.f32 %v18576_v14, %v18575_v57 }
0x108f   :  { %50963 = vst [vmem:[#allocation23_spill] sm:$0xff] %v48889_v29  ;;  %v18579_v44 = vsel %vm1563_vm3, %v48889_v29, 0 }
0x1090   :  { %v48893_v45 = vand.u32 4294901760, %v18579_v44 }
0x1092   :  { %v48896_v47 = vsub.f32 %v18579_v44, %v48893_v45 }
0x1094   :  { %v48899_v2 = vand.u32 4294901760, %v48896_v47 }
0x1096   :  { %v18657_v61 = vsub.f32 %v48896_v47, %v48899_v2 }
0x1098   :  { %v48903_v19 = vand.u32 4294901760, %v18657_v61 }
0x109a   :  { %37612 = vmatmul.mubr.f32.vlgmr.msra.gmra.mrb[78].mxu1 %v48903_v19  ;;  %37726 = vmatmul.mubr.f32.vlgmr.msra.gmra.mrb[52].mxu0 %v48903_v19 }
0x109b   :  { %42637 = vmatpush3.bf16.msra.mxu1 %v48247_v30  ;;  %42709 = vmatpush3.bf16.msra.mxu0 %v48519_v7 }
0x109c   :  { %42638 = vmatprep.subr.bf16.mxu1 %v50908_v25  ;;  %42710 = vmatprep.subr.bf16.mxu0 %v50908_v25 }
0x109d   :  { %37630 = vmatprep.mubr.msk.f32.mxu1 %vm44875_vm2, %v50909_v39  ;;  %37744 = vmatprep.mubr.msk.f32.mxu0 %vm44875_vm2, %v50909_v39 }
0x109f   :  { %42640 = vmatpush3.bf16.msra.mxu1 %v48267_v33  ;;  %42712 = vmatpush3.bf16.msra.mxu0 %v48540_v13 }
0x10a0   :  { %42641 = vmatprep.subr.bf16.mxu1 %v50908_v25  ;;  %42713 = vmatprep.subr.bf16.mxu0 %v50908_v25 }
0x10a3   :  { %42643 = vmatpush3.bf16.msra.mxu1 %v48286_v35  ;;  %42715 = vmatpush3.bf16.msra.mxu0 %v48568_v62 }
0x10a4   :  { %42644 = vmatprep.subr.bf16.mxu1 %v50908_v25  ;;  %42716 = vmatprep.subr.bf16.mxu0 %v50908_v25 }
0x10a7   :  { %42646 = vmatpush3.bf16.msra.mxu1 %v48294_v41  ;;  %42718 = vmatpush3.bf16.msra.mxu0 %v48597_v4 }
0x10a8   :  { %42647 = vmatprep.subr.bf16.mxu1 %v50908_v25  ;;  %42719 = vmatprep.subr.bf16.mxu0 %v50908_v25 }
0x10aa   :  { %37631 = vmatmul.mubr.f32.vlgmr.msra.gmra.mrb[78].mxu1 %v48893_v45  ;;  %37745 = vmatmul.mubr.f32.vlgmr.msra.gmra.mrb[52].mxu0 %v48893_v45 }
0x10ab   :  { %42649 = vmatpush3.bf16.msra.mxu1 %v48302_v12  ;;  %42721 = vmatpush3.bf16.msra.mxu0 %v48619_v22 }
0x10ac   :  { %42650 = vmatprep.subr.bf16.mxu1 %v50908_v25  ;;  %42722 = vmatprep.subr.bf16.mxu0 %v50908_v25 }
0x10ad   :  { %37649 = vmatprep.mubr.msk.f32.mxu1 %vm44875_vm2, %v50909_v39  ;;  %37763 = vmatprep.mubr.msk.f32.mxu0 %vm44875_vm2, %v50909_v39 }
0x10af   :  { %42652 = vmatpush3.bf16.msra.mxu1 %v48311_v50  ;;  %42724 = vmatpush3.bf16.msra.mxu0 %v48642_v48 }
0x10b0   :  { %42653 = vmatprep.subr.bf16.mxu1 %v50908_v25  ;;  %42725 = vmatprep.subr.bf16.mxu0 %v50908_v25 }
0x10b3   :  { %42655 = vmatpush3.bf16.msra.mxu1 %v48321_v21  ;;  %42727 = vmatpush3.bf16.msra.mxu0 %v48662_v46 }
0x10b4   :  { %42656 = vmatprep.subr.bf16.mxu1 %v50908_v25  ;;  %42728 = vmatprep.subr.bf16.mxu0 %v50908_v25 }
0x10b7   :  { %42658 = vmatpush3.bf16.msra.mxu1 %v48329_v40  ;;  %42730 = vmatpush3.bf16.msra.mxu0 %v48681_v17 }
0x10b8   :  { %42659 = vmatprep.subr.bf16.mxu1 %v50908_v25  ;;  %42731 = vmatprep.subr.bf16.mxu0 %v50908_v25 }
0x10ba   :  { %37650 = vmatmul.mubr.f32.vlgmr.msra.gmra.mrb[78].mxu1 %v48896_v47  ;;  %37764 = vmatmul.mubr.f32.vlgmr.msra.gmra.mrb[52].mxu0 %v48896_v47 }
0x10bb   :  { %42661 = vmatpush3.bf16.msra.mxu1 %v48185_v55  ;;  %42733 = vmatpush3.bf16.msra.mxu0 %v48452_v10 }
0x10bc   :  { %42662 = vmatprep.subr.bf16.mxu1 %v50908_v25  ;;  %42734 = vmatprep.subr.bf16.mxu0 %v50908_v25 }
0x10bd   :  { %37668 = vmatprep.mubr.msk.f32.mxu1 %vm44875_vm2, %v50909_v39  ;;  %37782 = vmatprep.mubr.msk.f32.mxu0 %vm44875_vm2, %v50909_v39 }
0x10bf   :  { %42664 = vmatpush3.bf16.msra.mxu1 %v48204_v23  ;;  %42736 = vmatpush3.bf16.msra.mxu0 %v48477_v20 }
0x10c0   :  { %42665 = vmatprep.subr.bf16.mxu1 %v50908_v25  ;;  %42737 = vmatprep.subr.bf16.mxu0 %v50908_v25 }
0x10c3   :  { %42667 = vmatpush3.bf16.msra.mxu1 %v48211_v36  ;;  %42739 = vmatpush3.bf16.msra.mxu0 %v48493_v56 }
0x10c4   :  { %42668 = vmatprep.subr.bf16.mxu1 %v50908_v25  ;;  %42740 = vmatprep.subr.bf16.mxu0 %v50908_v25 }
0x10c7   :  { %42670 = vmatpush3.bf16.msra.mxu1 %v48229_v18  ;;  %42742 = vmatpush3.bf16.msra.mxu0 %v48500_v51 }
0x10c8   :  { %42671 = vmatprep.subr.bf16.mxu1 %v50908_v25  ;;  %42743 = vmatprep.subr.bf16.mxu0 %v50908_v25 }
0x10ca   :  { %37669 = vmatmul.mubr.f32.vlgmr.msra.gmra.mrb[78].mxu1 %v48899_v2  ;;  %37783 = vmatmul.mubr.f32.vlgmr.msra.gmra.mrb[52].mxu0 %v48899_v2 }
0x10cb   :  { %42673 = vmatpush3.bf16.msra.mxu1 %v48367_v31  ;;  %42745 = vmatpush3.bf16.msra.mxu0 %v48736_v26 }
0x10cc   :  { %42674 = vmatprep.subr.bf16.mxu1 %v50908_v25  ;;  %42746 = vmatprep.subr.bf16.mxu0 %v50908_v25 }
0x10cd   :  { %37687 = vmatprep.mubr.msk.f32.mxu1 %vm44875_vm2, %v50909_v39  ;;  %37801 = vmatprep.mubr.msk.f32.mxu0 %vm44875_vm2, %v50909_v39 }
0x10cf   :  { %42676 = vmatpush3.bf16.msra.mxu1 %v48380_v52  ;;  %42748 = vmatpush3.bf16.msra.mxu0 %v48751_v32 }
0x10d0   :  { %42677 = vmatprep.subr.bf16.mxu1 %v50908_v25  ;;  %42749 = vmatprep.subr.bf16.mxu0 %v50908_v25 }
0x10d3   :  { %42679 = vmatpush3.bf16.msra.mxu1 %v50964_v1  ;;  %42751 = vmatpush3.bf16.msra.mxu0 %v48763_v54 }
0x10d4   :  { %42680 = vmatprep.subr.bf16.mxu1 %v50908_v25  ;;  %42752 = vmatprep.subr.bf16.mxu0 %v50908_v25 }
0x10d7   :  { %42682 = vmatpush3.bf16.msra.mxu1 %v50965_v34  ;;  %42754 = vmatpush3.bf16.msra.mxu0 %v48776_v3 }
0x10d8   :  { %42683 = vmatprep.subr.bf16.mxu1 %v50908_v25  ;;  %42755 = vmatprep.subr.bf16.mxu0 %v50908_v25 }
0x10da   :  { %37688 = vmatmul.mubr.f32.vlgmr.msra.gmra.mrb[78].mxu1 %v48893_v45  ;;  %37802 = vmatmul.mubr.f32.vlgmr.msra.gmra.mrb[52].mxu0 %v48893_v45 }
0x10db   :  { %42685 = vmatpush3.bf16.msra.mxu1 %v48185_v55  ;;  %42757 = vmatpush3.bf16.msra.mxu0 %v48452_v10 }
0x10dc   :  { %42686 = vmatprep.subr.bf16.mxu1 %v50908_v25  ;;  %42758 = vmatprep.subr.bf16.mxu0 %v50908_v25 }
0x10dd   :  { %37706 = vmatprep.mubr.msk.f32.mxu1 %vm44875_vm2, %v50909_v39  ;;  %37820 = vmatprep.mubr.msk.f32.mxu0 %vm44875_vm2, %v50909_v39 }
0x10df   :  { %42688 = vmatpush3.bf16.msra.mxu1 %v48204_v23  ;;  %42760 = vmatpush3.bf16.msra.mxu0 %v48477_v20 }
0x10e0   :  { %42689 = vmatprep.subr.bf16.mxu1 %v50908_v25  ;;  %42761 = vmatprep.subr.bf16.mxu0 %v50908_v25 }
0x10e3   :  { %42691 = vmatpush3.bf16.msra.mxu1 %v48211_v36  ;;  %42763 = vmatpush3.bf16.msra.mxu0 %v48493_v56 }
0x10e4   :  { %42692 = vmatprep.subr.bf16.mxu1 %v50908_v25  ;;  %42764 = vmatprep.subr.bf16.mxu0 %v50908_v25 }
0x10e7   :  { %42694 = vmatpush3.bf16.msra.mxu1 %v48229_v18  ;;  %42766 = vmatpush3.bf16.msra.mxu0 %v48500_v51 }
0x10e8   :  { %42767 = vmatprep.subr.bf16.mxu1 %v50908_v25  ;;  %42839 = vmatprep.subr.bf16.mxu0 %v50908_v25 }
0x10ea   :  { %37707 = vmatmul.mubr.f32.vlgmr.msra.gmra.mrb[78].mxu1 %v48893_v45  ;;  %37821 = vmatmul.mubr.f32.vlgmr.msra.gmra.mrb[52].mxu0 %v48893_v45 }
0x10eb   :  { %42769 = vmatpush3.bf16.msra.mxu1 %v48564_v11  ;;  %37839 = vmatprep.mubr.msk.f32.mxu1 %vm44875_vm2, %v50909_v39 }
0x10ec   :  { %42770 = vmatprep.subr.bf16.mxu1 %v50908_v25  ;;  %42841 = vmatpush3.bf16.msra.mxu0 %v48185_v55 }
0x10ed   :  { %42842 = vmatprep.subr.bf16.mxu0 %v50908_v25  ;;  %37953 = vmatprep.mubr.msk.f32.mxu0 %vm44875_vm2, %v50909_v39 }
0x10ef   :  { %42772 = vmatpush3.bf16.msra.mxu1 %v48591_v27 }
0x10f0   :  { %42773 = vmatprep.subr.bf16.mxu1 %v50908_v25  ;;  %42844 = vmatpush3.bf16.msra.mxu0 %v48204_v23 }
0x10f1   :  { %42845 = vmatprep.subr.bf16.mxu0 %v50908_v25 }
0x10f3   :  { %42775 = vmatpush3.bf16.msra.mxu1 %v48609_v16 }
0x10f4   :  { %42776 = vmatprep.subr.bf16.mxu1 %v50908_v25  ;;  %42847 = vmatpush3.bf16.msra.mxu0 %v48211_v36 }
0x10f5   :  { %42848 = vmatprep.subr.bf16.mxu0 %v50908_v25 }
0x10f7   :  { %42778 = vmatpush3.bf16.msra.mxu1 %v48622_v60 }
0x10f8   :  { %42779 = vmatprep.subr.bf16.mxu1 %v50908_v25  ;;  %42850 = vmatpush3.bf16.msra.mxu0 %v48229_v18 }
0x10f9   :  { %42851 = vmatprep.subr.bf16.mxu0 %v50908_v25 }
0x10fa   :  { %37840 = vmatmul.mubr.f32.vlgmr.msra.gmra.mrb[80].mxu1 %v48903_v19 }
0x10fb   :  { %42781 = vmatpush3.bf16.msra.mxu1 %v50966_v15  ;;  %37858 = vmatprep.mubr.msk.f32.mxu1 %vm44875_vm2, %v50909_v39 }
0x10fc   :  { %42782 = vmatprep.subr.bf16.mxu1 %v50908_v25 }
0x10ff   :  { %42784 = vmatpush3.bf16.msra.mxu1 %v48666_v6 }
0x1100   :  { %42785 = vmatprep.subr.bf16.mxu1 %v50908_v25 }
0x1103   :  { %42787 = vmatpush3.bf16.msra.mxu1 %v48692_v5 }
0x1104   :  { %42788 = vmatprep.subr.bf16.mxu1 %v50908_v25 }
0x1107   :  { %42790 = vmatpush3.bf16.msra.mxu1 %v48699_v42 }
0x1108   :  { %42791 = vmatprep.subr.bf16.mxu1 %v50908_v25 }
0x110a   :  { %37859 = vmatmul.mubr.f32.vlgmr.msra.gmra.mrb[80].mxu1 %v48893_v45 }
0x110b   :  { %42793 = vmatpush3.bf16.msra.mxu1 %v50967_v28  ;;  %37877 = vmatprep.mubr.msk.f32.mxu1 %vm44875_vm2, %v50909_v39 }
0x110c   :  { %42794 = vmatprep.subr.bf16.mxu1 %v50908_v25 }
0x110f   :  { %42796 = vmatpush3.bf16.msra.mxu1 %v50968_v24 }
0x1110   :  { %42797 = vmatprep.subr.bf16.mxu1 %v50908_v25 }
0x1113   :  { %42799 = vmatpush3.bf16.msra.mxu1 %v50969_v43 }
0x1114   :  { %42800 = vmatprep.subr.bf16.mxu1 %v50908_v25 }
0x1117   :  { %42802 = vmatpush3.bf16.msra.mxu1 %v50970_v59 }
0x1118   :  { %42803 = vmatprep.subr.bf16.mxu1 %v50908_v25 }
0x111a   :  { %37878 = vmatmul.mubr.f32.vlgmr.msra.gmra.mrb[80].mxu1 %v48896_v47 }
0x111b   :  { %42805 = vmatpush3.bf16.msra.mxu1 %v48564_v11  ;;  %37896 = vmatprep.mubr.msk.f32.mxu1 %vm44875_vm2, %v50909_v39 }
0x111c   :  { %42806 = vmatprep.subr.bf16.mxu1 %v50908_v25 }
0x111f   :  { %42808 = vmatpush3.bf16.msra.mxu1 %v48591_v27 }
0x1120   :  { %42809 = vmatprep.subr.bf16.mxu1 %v50908_v25 }
0x1123   :  { %42811 = vmatpush3.bf16.msra.mxu1 %v48609_v16 }
0x1124   :  { %42812 = vmatprep.subr.bf16.mxu1 %v50908_v25 }
0x1127   :  { %42814 = vmatpush3.bf16.msra.mxu1 %v48622_v60 }
0x1128   :  { %42815 = vmatprep.subr.bf16.mxu1 %v50908_v25 }
0x112a   :  { %37897 = vmatmul.mubr.f32.vlgmr.msra.gmra.mrb[80].mxu1 %v48899_v2 }
0x112b   :  { %42817 = vmatpush3.bf16.msra.mxu1 %v50971_v37  ;;  %37915 = vmatprep.mubr.msk.f32.mxu1 %vm44875_vm2, %v50909_v39 }
0x112c   :  { %42818 = vmatprep.subr.bf16.mxu1 %v50908_v25 }
0x112f   :  { %42820 = vmatpush3.bf16.msra.mxu1 %v50972_v0 }
0x1130   :  { %42821 = vmatprep.subr.bf16.mxu1 %v50908_v25 }
0x1133   :  { %42823 = vmatpush3.bf16.msra.mxu1 %v50973_v38 }
0x1134   :  { %42824 = vmatprep.subr.bf16.mxu1 %v50908_v25 }
0x1137   :  { %42826 = vmatpush3.bf16.msra.mxu1 %v50974_v9  ;;  %v20220_v9 = vrot.slane %v48889_v29, 6 }
0x1138   :  { %42827 = vmatprep.subr.bf16.mxu1 %v50908_v25 }
0x113a   :  { %37916 = vmatmul.mubr.f32.vlgmr.msra.gmra.mrb[80].mxu1 %v48893_v45 }
0x113b   :  { %42829 = vmatpush3.bf16.msra.mxu1 %v48564_v11  ;;  %37934 = vmatprep.mubr.msk.f32.mxu1 %vm44875_vm2, %v50909_v39 }
0x113c   :  { %42830 = vmatprep.subr.bf16.mxu1 %v50908_v25 }
0x113f   :  { %42832 = vmatpush3.bf16.msra.mxu1 %v48591_v27 }
0x1140   :  { %42833 = vmatprep.subr.bf16.mxu1 %v50908_v25 }
0x1143   :  { %42835 = vmatpush3.bf16.msra.mxu1 %v48609_v16 }
0x1144   :  { %42836 = vmatprep.subr.bf16.mxu1 %v50908_v25 }
0x1147   :  { %42838 = vmatpush3.bf16.msra.mxu1 %v48622_v60 }
0x1148   :  { %42911 = vmatprep.subr.bf16.mxu1 %v50908_v25 }
0x114a   :  { %37935 = vmatmul.mubr.f32.vlgmr.msra.gmra.mrb[80].mxu1 %v48893_v45 }
0x114b   :  { %42913 = vmatpush3.bf16.msra.mxu1 %v48452_v10  ;;  %38067 = vmatprep.mubr.msk.f32.mxu1 %vm44875_vm2, %v50909_v39 }
0x114c   :  { %42914 = vmatprep.subr.bf16.mxu1 %v50908_v25 }
0x114f   :  { %42916 = vmatpush3.bf16.msra.mxu1 %v48477_v20 }
0x1150   :  { %42917 = vmatprep.subr.bf16.mxu1 %v50908_v25 }
0x1153   :  { %42919 = vmatpush3.bf16.msra.mxu1 %v48493_v56 }
0x1154   :  { %42920 = vmatprep.subr.bf16.mxu1 %v50908_v25 }
0x1157   :  { %42922 = vmatpush3.bf16.msra.mxu1 %v48500_v51 }
0x1158   :  { %42923 = vmatprep.subr.bf16.mxu1 %v50908_v25 }
0x11bd   :  { %v19114_v58 = vpop.f32.mrb[78].mxu1  ;;  %v19651_v14 = vpop.f32.mrb[52].mxu0 }
0x11be   :  { %v19666_v57 = vrot.slane %v19651_v14, 6  ;;  %v37708_v44 = vpop.f32.mrb[79].mxu1  ;;  %v37822_v45 = vpop.f32.mrb[53].mxu0  ;;  %v19656_v37 = vrot.slane %v19114_v58, 6 }
0x11c0   :  { %v19668_v47 = vadd.f32 %v48877_v63, %v19666_v57  ;;  %v19658_v59 = vadd.f32 %v48689_v8, %v19656_v37 }
0x11c2   :  { %v30759_v2 = vmul.f32 -1.442695, %v19668_v47  ;;  %v30758_v43 = vmul.f32 -1.442695, %v19658_v59 }
0x11c4   :  { %44800 = vpow2.f32 %v30759_v2 }
0x11ce   :  { %v44801_v61 = vpop.eup %44800 }
0x11cf   :  { %v19672_v19 = vadd.f32 1.0, %v44801_v61 }
0x11d1   :  { %44802 = vrcp.f32 %v19672_v19 }
0x11d2   :  { %44804 = vpow2.f32 %v30758_v43 }
0x11db   :  { %v44803_v38 = vpop.eup %44802 }
0x11dc   :  { %v20222_v0 = vmul.f32 %v44803_v38, %v20220_v9  ;;  %v44805_v24 = vpop.eup %44804  ;;  %v20218_v29 = vsub.f32 1.0, %v44803_v38 }
0x11dd   :  { %v19662_v14 = vadd.f32 1.0, %v44805_v24 }
0x11df   :  { %44806 = vrcp.f32 %v19662_v14 }
0x11e9   :  { %v44807_v2 = vpop.eup %44806 }
0x121d   :  { %v20208_v44 = vpop.f32.mrb[80].mxu1 }
0x121e   :  { %v44232_v57 = vadd.f32 %v48883_v53, %v20208_v44  ;;  %v37936_v45 = vpop.f32.mrb[81].mxu1 }
0x121f   :  { %v50978_v45 = vld [vmem:[#allocation11_spill] sm:$0xff] }
0x1220   :  { %v20213_v47 = vrot.slane %v44232_v57, 6  ;;  %v50977_v57 = vld [vmem:[#allocation5_spill] sm:$0xff] }
0x1222   :  { %v20215_v61 = vmul.f32 %v44807_v2, %v20213_v47  ;;  %v50979_v47 = vld [vmem:[#allocation12_spill] sm:$0xff]  ;;  %v50980_v2 = vld [vmem:[#allocation13_spill] sm:$0xff] }
0x1224   :  { %v20216_v19 = vadd.f32 %v48886_v49, %v20215_v61  ;;  %v50981_v61 = vld [vmem:[#allocation9_spill] sm:$0xff] }
0x1226   :  { %44808 = vtanh.f32 %v20216_v19 }
0x1230   :  { %v44809_v9 = vpop.eup %44808 }
0x1231   :  { %v20219_v58 = vmul.f32 %v44809_v9, %v20218_v29  ;;  %v50975_v29 = vld [vmem:[#allocation21_spill] sm:$0xff] }
0x1233   :  { %v49108_v63 = vadd.f32 %v20222_v0, %v20219_v58  ;;  %v50976_v0 = vld [vmem:[#allocation4_spill] sm:$0xff] }
0x1235   :  { %v20225_v43 = vrot.slane %v49108_v63, 2 }
0x1237   :  { %v20226_v24 = vsel %vm1563_vm3, %v20225_v43, 0 }
0x1238   :  { %v49112_v59 = vand.u32 4294901760, %v20226_v24 }
0x123a   :  { %v49115_v37 = vsub.f32 %v20226_v24, %v49112_v59 }
0x123c   :  { %v49118_v14 = vand.u32 4294901760, %v49115_v37 }
0x123e   :  { %v20304_v44 = vsub.f32 %v49115_v37, %v49118_v14 }
0x1240   :  { %v49122_v38 = vand.u32 4294901760, %v20304_v44 }
0x1242   :  { %37954 = vmatmul.mubr.f32.vlgmr.msra.gmra.mrb[54].mxu0 %v49122_v38  ;;  %38068 = vmatmul.mubr.f32.vlgmr.msra.gmra.mrb[82].mxu1 %v49122_v38 }
0x1243   :  { %42853 = vmatpush3.bf16.msra.mxu0 %v48247_v30  ;;  %42925 = vmatpush3.bf16.msra.mxu1 %v48519_v7 }
0x1244   :  { %42854 = vmatprep.subr.bf16.mxu0 %v50908_v25  ;;  %42926 = vmatprep.subr.bf16.mxu1 %v50908_v25 }
0x1245   :  { %37972 = vmatprep.mubr.msk.f32.mxu0 %vm44875_vm2, %v50909_v39  ;;  %38086 = vmatprep.mubr.msk.f32.mxu1 %vm44875_vm2, %v50909_v39 }
0x1247   :  { %42856 = vmatpush3.bf16.msra.mxu0 %v48267_v33  ;;  %42928 = vmatpush3.bf16.msra.mxu1 %v48540_v13 }
0x1248   :  { %42857 = vmatprep.subr.bf16.mxu0 %v50908_v25  ;;  %42929 = vmatprep.subr.bf16.mxu1 %v50908_v25 }
0x124b   :  { %42859 = vmatpush3.bf16.msra.mxu0 %v48286_v35  ;;  %42931 = vmatpush3.bf16.msra.mxu1 %v48568_v62 }
0x124c   :  { %42860 = vmatprep.subr.bf16.mxu0 %v50908_v25  ;;  %42932 = vmatprep.subr.bf16.mxu1 %v50908_v25 }
0x124f   :  { %42862 = vmatpush3.bf16.msra.mxu0 %v48294_v41  ;;  %42934 = vmatpush3.bf16.msra.mxu1 %v48597_v4 }
0x1250   :  { %42863 = vmatprep.subr.bf16.mxu0 %v50908_v25  ;;  %42935 = vmatprep.subr.bf16.mxu1 %v50908_v25 }
0x1252   :  { %37973 = vmatmul.mubr.f32.vlgmr.msra.gmra.mrb[54].mxu0 %v49112_v59  ;;  %38087 = vmatmul.mubr.f32.vlgmr.msra.gmra.mrb[82].mxu1 %v49112_v59 }
0x1253   :  { %42865 = vmatpush3.bf16.msra.mxu0 %v48302_v12  ;;  %42937 = vmatpush3.bf16.msra.mxu1 %v48619_v22 }
0x1254   :  { %42866 = vmatprep.subr.bf16.mxu0 %v50908_v25  ;;  %42938 = vmatprep.subr.bf16.mxu1 %v50908_v25 }
0x1255   :  { %37991 = vmatprep.mubr.msk.f32.mxu0 %vm44875_vm2, %v50909_v39  ;;  %38105 = vmatprep.mubr.msk.f32.mxu1 %vm44875_vm2, %v50909_v39 }
0x1257   :  { %42868 = vmatpush3.bf16.msra.mxu0 %v48311_v50  ;;  %42940 = vmatpush3.bf16.msra.mxu1 %v48642_v48 }
0x1258   :  { %42869 = vmatprep.subr.bf16.mxu0 %v50908_v25  ;;  %42941 = vmatprep.subr.bf16.mxu1 %v50908_v25 }
0x125b   :  { %42871 = vmatpush3.bf16.msra.mxu0 %v48321_v21  ;;  %42943 = vmatpush3.bf16.msra.mxu1 %v48662_v46 }
0x125c   :  { %42872 = vmatprep.subr.bf16.mxu0 %v50908_v25  ;;  %42944 = vmatprep.subr.bf16.mxu1 %v50908_v25 }
0x125f   :  { %42874 = vmatpush3.bf16.msra.mxu0 %v48329_v40  ;;  %42946 = vmatpush3.bf16.msra.mxu1 %v48681_v17 }
0x1260   :  { %42875 = vmatprep.subr.bf16.mxu0 %v50908_v25  ;;  %42947 = vmatprep.subr.bf16.mxu1 %v50908_v25 }
0x1262   :  { %37992 = vmatmul.mubr.f32.vlgmr.msra.gmra.mrb[54].mxu0 %v49115_v37  ;;  %38106 = vmatmul.mubr.f32.vlgmr.msra.gmra.mrb[82].mxu1 %v49115_v37 }
0x1263   :  { %42877 = vmatpush3.bf16.msra.mxu0 %v48185_v55  ;;  %42949 = vmatpush3.bf16.msra.mxu1 %v48452_v10 }
0x1264   :  { %42878 = vmatprep.subr.bf16.mxu0 %v50908_v25  ;;  %42950 = vmatprep.subr.bf16.mxu1 %v50908_v25 }
0x1265   :  { %38010 = vmatprep.mubr.msk.f32.mxu0 %vm44875_vm2, %v50909_v39  ;;  %38124 = vmatprep.mubr.msk.f32.mxu1 %vm44875_vm2, %v50909_v39 }
0x1267   :  { %42880 = vmatpush3.bf16.msra.mxu0 %v48204_v23  ;;  %42952 = vmatpush3.bf16.msra.mxu1 %v48477_v20 }
0x1268   :  { %42881 = vmatprep.subr.bf16.mxu0 %v50908_v25  ;;  %42953 = vmatprep.subr.bf16.mxu1 %v50908_v25 }
0x126b   :  { %42883 = vmatpush3.bf16.msra.mxu0 %v48211_v36  ;;  %42955 = vmatpush3.bf16.msra.mxu1 %v48493_v56 }
0x126c   :  { %42884 = vmatprep.subr.bf16.mxu0 %v50908_v25  ;;  %42956 = vmatprep.subr.bf16.mxu1 %v50908_v25 }
0x126f   :  { %42886 = vmatpush3.bf16.msra.mxu0 %v48229_v18  ;;  %42958 = vmatpush3.bf16.msra.mxu1 %v48500_v51 }
0x1270   :  { %42887 = vmatprep.subr.bf16.mxu0 %v50908_v25  ;;  %42959 = vmatprep.subr.bf16.mxu1 %v50908_v25 }
0x1272   :  { %38011 = vmatmul.mubr.f32.vlgmr.msra.gmra.mrb[54].mxu0 %v49118_v14  ;;  %38125 = vmatmul.mubr.f32.vlgmr.msra.gmra.mrb[82].mxu1 %v49118_v14 }
0x1273   :  { %42889 = vmatpush3.bf16.msra.mxu0 %v48367_v31  ;;  %42961 = vmatpush3.bf16.msra.mxu1 %v48736_v26 }
0x1274   :  { %42890 = vmatprep.subr.bf16.mxu0 %v50908_v25  ;;  %42962 = vmatprep.subr.bf16.mxu1 %v50908_v25 }
0x1275   :  { %38029 = vmatprep.mubr.msk.f32.mxu0 %vm44875_vm2, %v50909_v39  ;;  %38143 = vmatprep.mubr.msk.f32.mxu1 %vm44875_vm2, %v50909_v39 }
0x1277   :  { %42892 = vmatpush3.bf16.msra.mxu0 %v48380_v52  ;;  %42964 = vmatpush3.bf16.msra.mxu1 %v48751_v32 }
0x1278   :  { %42893 = vmatprep.subr.bf16.mxu0 %v50908_v25  ;;  %42965 = vmatprep.subr.bf16.mxu1 %v50908_v25 }
0x127b   :  { %42895 = vmatpush3.bf16.msra.mxu0 %v50964_v1  ;;  %42967 = vmatpush3.bf16.msra.mxu1 %v48763_v54 }
0x127c   :  { %42896 = vmatprep.subr.bf16.mxu0 %v50908_v25  ;;  %42968 = vmatprep.subr.bf16.mxu1 %v50908_v25 }
0x127f   :  { %42898 = vmatpush3.bf16.msra.mxu0 %v50965_v34  ;;  %42970 = vmatpush3.bf16.msra.mxu1 %v48776_v3 }
0x1280   :  { %42899 = vmatprep.subr.bf16.mxu0 %v50908_v25  ;;  %42971 = vmatprep.subr.bf16.mxu1 %v50908_v25 }
0x1282   :  { %38030 = vmatmul.mubr.f32.vlgmr.msra.gmra.mrb[54].mxu0 %v49112_v59  ;;  %38144 = vmatmul.mubr.f32.vlgmr.msra.gmra.mrb[82].mxu1 %v49112_v59 }
0x1283   :  { %42901 = vmatpush3.bf16.msra.mxu0 %v48185_v55  ;;  %42973 = vmatpush3.bf16.msra.mxu1 %v48452_v10 }
0x1284   :  { %42902 = vmatprep.subr.bf16.mxu0 %v50908_v25  ;;  %42974 = vmatprep.subr.bf16.mxu1 %v50908_v25 }
0x1285   :  { %38048 = vmatprep.mubr.msk.f32.mxu0 %vm44875_vm2, %v50909_v39  ;;  %38162 = vmatprep.mubr.msk.f32.mxu1 %vm44875_vm2, %v50909_v39 }
0x1287   :  { %42904 = vmatpush3.bf16.msra.mxu0 %v48204_v23  ;;  %42976 = vmatpush3.bf16.msra.mxu1 %v48477_v20 }
0x1288   :  { %42905 = vmatprep.subr.bf16.mxu0 %v50908_v25  ;;  %42977 = vmatprep.subr.bf16.mxu1 %v50908_v25 }
0x128b   :  { %42907 = vmatpush3.bf16.msra.mxu0 %v48211_v36  ;;  %42979 = vmatpush3.bf16.msra.mxu1 %v48493_v56 }
0x128c   :  { %42908 = vmatprep.subr.bf16.mxu0 %v50908_v25  ;;  %42980 = vmatprep.subr.bf16.mxu1 %v50908_v25 }
0x128f   :  { %42910 = vmatpush3.bf16.msra.mxu0 %v48229_v18  ;;  %42982 = vmatpush3.bf16.msra.mxu1 %v48500_v51 }
0x1290   :  { %42983 = vmatprep.subr.bf16.mxu0 %v50908_v25  ;;  %43055 = vmatprep.subr.bf16.mxu1 %v50908_v25 }
0x1292   :  { %38049 = vmatmul.mubr.f32.vlgmr.msra.gmra.mrb[54].mxu0 %v49112_v59  ;;  %38163 = vmatmul.mubr.f32.vlgmr.msra.gmra.mrb[82].mxu1 %v49112_v59 }
0x1293   :  { %42985 = vmatpush3.bf16.msra.mxu0 %v48564_v11  ;;  %38181 = vmatprep.mubr.msk.f32.mxu0 %vm44875_vm2, %v50909_v39 }
0x1294   :  { %42986 = vmatprep.subr.bf16.mxu0 %v50908_v25  ;;  %43057 = vmatpush3.bf16.msra.mxu1 %v48185_v55 }
0x1295   :  { %43058 = vmatprep.subr.bf16.mxu1 %v50908_v25  ;;  %38295 = vmatprep.mubr.msk.f32.mxu1 %vm44875_vm2, %v50909_v39 }
0x1297   :  { %42988 = vmatpush3.bf16.msra.mxu0 %v48591_v27 }
0x1298   :  { %42989 = vmatprep.subr.bf16.mxu0 %v50908_v25  ;;  %43060 = vmatpush3.bf16.msra.mxu1 %v48204_v23 }
0x1299   :  { %43061 = vmatprep.subr.bf16.mxu1 %v50908_v25 }
0x129b   :  { %42991 = vmatpush3.bf16.msra.mxu0 %v48609_v16 }
0x129c   :  { %42992 = vmatprep.subr.bf16.mxu0 %v50908_v25  ;;  %43063 = vmatpush3.bf16.msra.mxu1 %v48211_v36 }
0x129d   :  { %43064 = vmatprep.subr.bf16.mxu1 %v50908_v25 }
0x129f   :  { %42994 = vmatpush3.bf16.msra.mxu0 %v48622_v60 }
0x12a0   :  { %42995 = vmatprep.subr.bf16.mxu0 %v50908_v25  ;;  %43066 = vmatpush3.bf16.msra.mxu1 %v48229_v18 }
0x12a1   :  { %43067 = vmatprep.subr.bf16.mxu1 %v50908_v25 }
0x12a2   :  { %38182 = vmatmul.mubr.f32.vlgmr.msra.gmra.mrb[56].mxu0 %v49122_v38 }
0x12a3   :  { %42997 = vmatpush3.bf16.msra.mxu0 %v50966_v15  ;;  %38200 = vmatprep.mubr.msk.f32.mxu0 %vm44875_vm2, %v50909_v39 }
0x12a4   :  { %42998 = vmatprep.subr.bf16.mxu0 %v50908_v25 }
0x12a7   :  { %43000 = vmatpush3.bf16.msra.mxu0 %v48666_v6 }
0x12a8   :  { %43001 = vmatprep.subr.bf16.mxu0 %v50908_v25 }
0x12ab   :  { %43003 = vmatpush3.bf16.msra.mxu0 %v48692_v5 }
0x12ac   :  { %43004 = vmatprep.subr.bf16.mxu0 %v50908_v25 }
0x12af   :  { %43006 = vmatpush3.bf16.msra.mxu0 %v48699_v42 }
0x12b0   :  { %43007 = vmatprep.subr.bf16.mxu0 %v50908_v25 }
0x12b2   :  { %38201 = vmatmul.mubr.f32.vlgmr.msra.gmra.mrb[56].mxu0 %v49112_v59 }
0x12b3   :  { %43009 = vmatpush3.bf16.msra.mxu0 %v50967_v28  ;;  %38219 = vmatprep.mubr.msk.f32.mxu0 %vm44875_vm2, %v50909_v39 }
0x12b4   :  { %43010 = vmatprep.subr.bf16.mxu0 %v50908_v25 }
0x12b7   :  { %43012 = vmatpush3.bf16.msra.mxu0 %v50975_v29 }
0x12b8   :  { %43013 = vmatprep.subr.bf16.mxu0 %v50908_v25 }
0x12bb   :  { %43015 = vmatpush3.bf16.msra.mxu0 %v50976_v0 }
0x12bc   :  { %43016 = vmatprep.subr.bf16.mxu0 %v50908_v25 }
0x12bf   :  { %43018 = vmatpush3.bf16.msra.mxu0 %v50977_v57 }
0x12c0   :  { %43019 = vmatprep.subr.bf16.mxu0 %v50908_v25 }
0x12c2   :  { %38220 = vmatmul.mubr.f32.vlgmr.msra.gmra.mrb[56].mxu0 %v49115_v37 }
0x12c3   :  { %43021 = vmatpush3.bf16.msra.mxu0 %v48564_v11  ;;  %38238 = vmatprep.mubr.msk.f32.mxu0 %vm44875_vm2, %v50909_v39 }
0x12c4   :  { %43022 = vmatprep.subr.bf16.mxu0 %v50908_v25 }
0x12c7   :  { %43024 = vmatpush3.bf16.msra.mxu0 %v48591_v27 }
0x12c8   :  { %43025 = vmatprep.subr.bf16.mxu0 %v50908_v25 }
0x12cb   :  { %43027 = vmatpush3.bf16.msra.mxu0 %v48609_v16 }
0x12cc   :  { %43028 = vmatprep.subr.bf16.mxu0 %v50908_v25 }
0x12cf   :  { %43030 = vmatpush3.bf16.msra.mxu0 %v48622_v60 }
0x12d0   :  { %43031 = vmatprep.subr.bf16.mxu0 %v50908_v25 }
0x12d2   :  { %38239 = vmatmul.mubr.f32.vlgmr.msra.gmra.mrb[56].mxu0 %v49118_v14 }
0x12d3   :  { %43033 = vmatpush3.bf16.msra.mxu0 %v50978_v45  ;;  %38257 = vmatprep.mubr.msk.f32.mxu0 %vm44875_vm2, %v50909_v39 }
0x12d4   :  { %43034 = vmatprep.subr.bf16.mxu0 %v50908_v25 }
0x12d7   :  { %43036 = vmatpush3.bf16.msra.mxu0 %v50979_v47 }
0x12d8   :  { %43037 = vmatprep.subr.bf16.mxu0 %v50908_v25 }
0x12db   :  { %43039 = vmatpush3.bf16.msra.mxu0 %v50980_v2 }
0x12dc   :  { %43040 = vmatprep.subr.bf16.mxu0 %v50908_v25 }
0x12df   :  { %43042 = vmatpush3.bf16.msra.mxu0 %v50981_v61  ;;  %v21867_v61 = vrot.slane %v49108_v63, 6 }
0x12e0   :  { %43043 = vmatprep.subr.bf16.mxu0 %v50908_v25 }
0x12e2   :  { %38258 = vmatmul.mubr.f32.vlgmr.msra.gmra.mrb[56].mxu0 %v49112_v59 }
0x12e3   :  { %43045 = vmatpush3.bf16.msra.mxu0 %v48564_v11  ;;  %38276 = vmatprep.mubr.msk.f32.mxu0 %vm44875_vm2, %v50909_v39 }
0x12e4   :  { %43046 = vmatprep.subr.bf16.mxu0 %v50908_v25 }
0x12e7   :  { %43048 = vmatpush3.bf16.msra.mxu0 %v48591_v27 }
0x12e8   :  { %43049 = vmatprep.subr.bf16.mxu0 %v50908_v25 }
0x12eb   :  { %43051 = vmatpush3.bf16.msra.mxu0 %v48609_v16 }
0x12ec   :  { %43052 = vmatprep.subr.bf16.mxu0 %v50908_v25 }
0x12ef   :  { %43054 = vmatpush3.bf16.msra.mxu0 %v48622_v60 }
0x12f0   :  { %43127 = vmatprep.subr.bf16.mxu0 %v50908_v25 }
0x12f2   :  { %38277 = vmatmul.mubr.f32.vlgmr.msra.gmra.mrb[56].mxu0 %v49112_v59  ;;  %v50982_v59 = vld [vmem:[#allocation7_spill] sm:$0xff] }
0x12f3   :  { %43129 = vmatpush3.bf16.msra.mxu0 %v48452_v10  ;;  %38409 = vmatprep.mubr.msk.f32.mxu0 %vm44875_vm2, %v50909_v39 }
0x12f4   :  { %43130 = vmatprep.subr.bf16.mxu0 %v50908_v25 }
0x12f7   :  { %43132 = vmatpush3.bf16.msra.mxu0 %v48477_v20 }
0x12f8   :  { %43133 = vmatprep.subr.bf16.mxu0 %v50908_v25 }
0x12fb   :  { %43135 = vmatpush3.bf16.msra.mxu0 %v48493_v56 }
0x12fc   :  { %43136 = vmatprep.subr.bf16.mxu0 %v50908_v25 }
0x12ff   :  { %43138 = vmatpush3.bf16.msra.mxu0 %v48500_v51 }
0x1300   :  { %43139 = vmatprep.subr.bf16.mxu0 %v50908_v25 }
0x1365   :  { %v20761_v19 = vpop.f32.mrb[54].mxu0  ;;  %v21298_v9 = vpop.f32.mrb[82].mxu1 }
0x1366   :  { %v21313_v58 = vrot.slane %v21298_v9, 4  ;;  %v38050_v43 = vpop.f32.mrb[55].mxu0  ;;  %v38164_v24 = vpop.f32.mrb[83].mxu1  ;;  %v21303_v45 = vrot.slane %v20761_v19, 4 }
0x1368   :  { %v21315_v37 = vadd.f32 %v50982_v59, %v21313_v58  ;;  %v21305_v57 = vadd.f32 %v48689_v8, %v21303_v45 }
0x136a   :  { %v30761_v14 = vmul.f32 -1.442695, %v21315_v37  ;;  %v30760_v0 = vmul.f32 -1.442695, %v21305_v57 }
0x136c   :  { %44810 = vpow2.f32 %v30761_v14 }
0x1376   :  { %v44811_v44 = vpop.eup %44810 }
0x1377   :  { %v21319_v38 = vadd.f32 1.0, %v44811_v44 }
0x1379   :  { %44812 = vrcp.f32 %v21319_v38 }
0x137a   :  { %44814 = vpow2.f32 %v30760_v0 }
0x1383   :  { %v44813_v2 = vpop.eup %44812 }
0x1384   :  { %v21869_v47 = vmul.f32 %v44813_v2, %v21867_v61  ;;  %v44815_v29 = vpop.eup %44814  ;;  %v21865_v63 = vsub.f32 1.0, %v44813_v2 }
0x1385   :  { %v21309_v9 = vadd.f32 1.0, %v44815_v29 }
0x1387   :  { %44816 = vrcp.f32 %v21309_v9 }
0x1391   :  { %v44817_v14 = vpop.eup %44816 }
0x13c5   :  { %v21855_v43 = vpop.f32.mrb[56].mxu0 }
0x13c6   :  { %v44233_v58 = vadd.f32 %v48883_v53, %v21855_v43  ;;  %v38278_v24 = vpop.f32.mrb[57].mxu0  ;;  %v50984_v43 = vld [vmem:[#allocation4_spill] sm:$0xff] }
0x13c7   :  { %v50986_v24 = vld [vmem:[#allocation11_spill] sm:$0xff] }
0x13c8   :  { %v21860_v37 = vrot.slane %v44233_v58, 4  ;;  %v50985_v58 = vld [vmem:[#allocation5_spill] sm:$0xff] }
0x13ca   :  { %v21862_v44 = vmul.f32 %v44817_v14, %v21860_v37  ;;  %v50987_v37 = vld [vmem:[#allocation12_spill] sm:$0xff]  ;;  %v50988_v14 = vld [vmem:[#allocation13_spill] sm:$0xff] }
0x13cc   :  { %v21863_v38 = vadd.f32 %v48886_v49, %v21862_v44  ;;  %v50989_v44 = vld [vmem:[#allocation9_spill] sm:$0xff] }
0x13ce   :  { %44818 = vtanh.f32 %v21863_v38 }
0x13d8   :  { %v44819_v61 = vpop.eup %44818 }
0x13d9   :  { %v21866_v19 = vmul.f32 %v44819_v61, %v21865_v63 }
0x13db   :  { %v49327_v59 = vadd.f32 %v21869_v47, %v21866_v19  ;;  %v50983_v47 = vld [vmem:[#allocation21_spill] sm:$0xff] }
0x13dd   :  { %v21872_v0 = vrot.slane %v49327_v59, 4 }
0x13df   :  { %v21873_v29 = vsel %vm1563_vm3, %v21872_v0, 0 }
0x13e0   :  { %v49331_v57 = vand.u32 4294901760, %v21873_v29 }
0x13e2   :  { %v49334_v53 = vsub.f32 %v21873_v29, %v49331_v57  ;;  %v50990_v29 = vld [vmem:[#allocation7_spill] sm:$0xff] }
0x13e4   :  { %v49337_v45 = vand.u32 4294901760, %v49334_v53 }
0x13e6   :  { %v21951_v9 = vsub.f32 %v49334_v53, %v49337_v45 }
0x13e8   :  { %v49341_v2 = vand.u32 4294901760, %v21951_v9 }
0x13ea   :  { %38296 = vmatmul.mubr.f32.vlgmr.msra.gmra.mrb[84].mxu1 %v49341_v2  ;;  %38410 = vmatmul.mubr.f32.vlgmr.msra.gmra.mrb[58].mxu0 %v49341_v2 }
0x13eb   :  { %43069 = vmatpush3.bf16.msra.mxu1 %v48247_v30  ;;  %43141 = vmatpush3.bf16.msra.mxu0 %v48519_v7 }
0x13ec   :  { %43070 = vmatprep.subr.bf16.mxu1 %v50908_v25  ;;  %43142 = vmatprep.subr.bf16.mxu0 %v50908_v25 }
0x13ed   :  { %38314 = vmatprep.mubr.msk.f32.mxu1 %vm44875_vm2, %v50909_v39  ;;  %38428 = vmatprep.mubr.msk.f32.mxu0 %vm44875_vm2, %v50909_v39 }
0x13ef   :  { %43072 = vmatpush3.bf16.msra.mxu1 %v48267_v33  ;;  %43144 = vmatpush3.bf16.msra.mxu0 %v48540_v13 }
0x13f0   :  { %43073 = vmatprep.subr.bf16.mxu1 %v50908_v25  ;;  %43145 = vmatprep.subr.bf16.mxu0 %v50908_v25 }
0x13f3   :  { %43075 = vmatpush3.bf16.msra.mxu1 %v48286_v35  ;;  %43147 = vmatpush3.bf16.msra.mxu0 %v48568_v62 }
0x13f4   :  { %43076 = vmatprep.subr.bf16.mxu1 %v50908_v25  ;;  %43148 = vmatprep.subr.bf16.mxu0 %v50908_v25 }
0x13f7   :  { %43078 = vmatpush3.bf16.msra.mxu1 %v48294_v41  ;;  %43150 = vmatpush3.bf16.msra.mxu0 %v48597_v4 }
0x13f8   :  { %43079 = vmatprep.subr.bf16.mxu1 %v50908_v25  ;;  %43151 = vmatprep.subr.bf16.mxu0 %v50908_v25 }
0x13fa   :  { %38315 = vmatmul.mubr.f32.vlgmr.msra.gmra.mrb[84].mxu1 %v49331_v57  ;;  %38429 = vmatmul.mubr.f32.vlgmr.msra.gmra.mrb[58].mxu0 %v49331_v57 }
0x13fb   :  { %43081 = vmatpush3.bf16.msra.mxu1 %v48302_v12  ;;  %43153 = vmatpush3.bf16.msra.mxu0 %v48619_v22 }
0x13fc   :  { %43082 = vmatprep.subr.bf16.mxu1 %v50908_v25  ;;  %43154 = vmatprep.subr.bf16.mxu0 %v50908_v25 }
0x13fd   :  { %38333 = vmatprep.mubr.msk.f32.mxu1 %vm44875_vm2, %v50909_v39  ;;  %38447 = vmatprep.mubr.msk.f32.mxu0 %vm44875_vm2, %v50909_v39 }
0x13ff   :  { %43084 = vmatpush3.bf16.msra.mxu1 %v48311_v50  ;;  %43156 = vmatpush3.bf16.msra.mxu0 %v48642_v48 }
0x1400   :  { %43085 = vmatprep.subr.bf16.mxu1 %v50908_v25  ;;  %43157 = vmatprep.subr.bf16.mxu0 %v50908_v25 }
0x1403   :  { %43087 = vmatpush3.bf16.msra.mxu1 %v48321_v21  ;;  %43159 = vmatpush3.bf16.msra.mxu0 %v48662_v46 }
0x1404   :  { %43088 = vmatprep.subr.bf16.mxu1 %v50908_v25  ;;  %43160 = vmatprep.subr.bf16.mxu0 %v50908_v25 }
0x1407   :  { %43090 = vmatpush3.bf16.msra.mxu1 %v48329_v40  ;;  %43162 = vmatpush3.bf16.msra.mxu0 %v48681_v17 }
0x1408   :  { %43091 = vmatprep.subr.bf16.mxu1 %v50908_v25  ;;  %43163 = vmatprep.subr.bf16.mxu0 %v50908_v25 }
0x140a   :  { %38334 = vmatmul.mubr.f32.vlgmr.msra.gmra.mrb[84].mxu1 %v49334_v53  ;;  %38448 = vmatmul.mubr.f32.vlgmr.msra.gmra.mrb[58].mxu0 %v49334_v53 }
0x140b   :  { %43093 = vmatpush3.bf16.msra.mxu1 %v48185_v55  ;;  %43165 = vmatpush3.bf16.msra.mxu0 %v48452_v10 }
0x140c   :  { %43094 = vmatprep.subr.bf16.mxu1 %v50908_v25  ;;  %43166 = vmatprep.subr.bf16.mxu0 %v50908_v25 }
0x140d   :  { %38352 = vmatprep.mubr.msk.f32.mxu1 %vm44875_vm2, %v50909_v39  ;;  %38466 = vmatprep.mubr.msk.f32.mxu0 %vm44875_vm2, %v50909_v39 }
0x140f   :  { %43096 = vmatpush3.bf16.msra.mxu1 %v48204_v23  ;;  %43168 = vmatpush3.bf16.msra.mxu0 %v48477_v20 }
0x1410   :  { %43097 = vmatprep.subr.bf16.mxu1 %v50908_v25  ;;  %43169 = vmatprep.subr.bf16.mxu0 %v50908_v25 }
0x1413   :  { %43099 = vmatpush3.bf16.msra.mxu1 %v48211_v36  ;;  %43171 = vmatpush3.bf16.msra.mxu0 %v48493_v56 }
0x1414   :  { %43100 = vmatprep.subr.bf16.mxu1 %v50908_v25  ;;  %43172 = vmatprep.subr.bf16.mxu0 %v50908_v25 }
0x1417   :  { %43102 = vmatpush3.bf16.msra.mxu1 %v48229_v18  ;;  %43174 = vmatpush3.bf16.msra.mxu0 %v48500_v51 }
0x1418   :  { %43103 = vmatprep.subr.bf16.mxu1 %v50908_v25  ;;  %43175 = vmatprep.subr.bf16.mxu0 %v50908_v25 }
0x141a   :  { %38353 = vmatmul.mubr.f32.vlgmr.msra.gmra.mrb[84].mxu1 %v49337_v45  ;;  %38467 = vmatmul.mubr.f32.vlgmr.msra.gmra.mrb[58].mxu0 %v49337_v45 }
0x141b   :  { %43105 = vmatpush3.bf16.msra.mxu1 %v48367_v31  ;;  %43177 = vmatpush3.bf16.msra.mxu0 %v48736_v26 }
0x141c   :  { %43106 = vmatprep.subr.bf16.mxu1 %v50908_v25  ;;  %43178 = vmatprep.subr.bf16.mxu0 %v50908_v25 }
0x141d   :  { %38371 = vmatprep.mubr.msk.f32.mxu1 %vm44875_vm2, %v50909_v39  ;;  %38485 = vmatprep.mubr.msk.f32.mxu0 %vm44875_vm2, %v50909_v39 }
0x141f   :  { %43108 = vmatpush3.bf16.msra.mxu1 %v48380_v52  ;;  %43180 = vmatpush3.bf16.msra.mxu0 %v48751_v32 }
0x1420   :  { %43109 = vmatprep.subr.bf16.mxu1 %v50908_v25  ;;  %43181 = vmatprep.subr.bf16.mxu0 %v50908_v25 }
0x1423   :  { %43111 = vmatpush3.bf16.msra.mxu1 %v50964_v1  ;;  %43183 = vmatpush3.bf16.msra.mxu0 %v48763_v54 }
0x1424   :  { %43112 = vmatprep.subr.bf16.mxu1 %v50908_v25  ;;  %43184 = vmatprep.subr.bf16.mxu0 %v50908_v25 }
0x1427   :  { %43114 = vmatpush3.bf16.msra.mxu1 %v50965_v34  ;;  %43186 = vmatpush3.bf16.msra.mxu0 %v48776_v3 }
0x1428   :  { %43115 = vmatprep.subr.bf16.mxu1 %v50908_v25  ;;  %43187 = vmatprep.subr.bf16.mxu0 %v50908_v25 }
0x142a   :  { %38372 = vmatmul.mubr.f32.vlgmr.msra.gmra.mrb[84].mxu1 %v49331_v57  ;;  %38486 = vmatmul.mubr.f32.vlgmr.msra.gmra.mrb[58].mxu0 %v49331_v57 }
0x142b   :  { %43117 = vmatpush3.bf16.msra.mxu1 %v48185_v55  ;;  %43189 = vmatpush3.bf16.msra.mxu0 %v48452_v10 }
0x142c   :  { %43118 = vmatprep.subr.bf16.mxu1 %v50908_v25  ;;  %43190 = vmatprep.subr.bf16.mxu0 %v50908_v25 }
0x142d   :  { %38390 = vmatprep.mubr.msk.f32.mxu1 %vm44875_vm2, %v50909_v39  ;;  %38504 = vmatprep.mubr.msk.f32.mxu0 %vm44875_vm2, %v50909_v39 }
0x142f   :  { %43120 = vmatpush3.bf16.msra.mxu1 %v48204_v23  ;;  %43192 = vmatpush3.bf16.msra.mxu0 %v48477_v20 }
0x1430   :  { %43121 = vmatprep.subr.bf16.mxu1 %v50908_v25  ;;  %43193 = vmatprep.subr.bf16.mxu0 %v50908_v25 }
0x1433   :  { %43123 = vmatpush3.bf16.msra.mxu1 %v48211_v36  ;;  %43195 = vmatpush3.bf16.msra.mxu0 %v48493_v56 }
0x1434   :  { %43124 = vmatprep.subr.bf16.mxu1 %v50908_v25  ;;  %43196 = vmatprep.subr.bf16.mxu0 %v50908_v25 }
0x1437   :  { %43126 = vmatpush3.bf16.msra.mxu1 %v48229_v18  ;;  %43198 = vmatpush3.bf16.msra.mxu0 %v48500_v51 }
0x1438   :  { %43199 = vmatprep.subr.bf16.mxu1 %v50908_v25  ;;  %43271 = vmatprep.subr.bf16.mxu0 %v50908_v25 }
0x143a   :  { %38391 = vmatmul.mubr.f32.vlgmr.msra.gmra.mrb[84].mxu1 %v49331_v57  ;;  %38505 = vmatmul.mubr.f32.vlgmr.msra.gmra.mrb[58].mxu0 %v49331_v57 }
0x143b   :  { %43201 = vmatpush3.bf16.msra.mxu1 %v48564_v11  ;;  %38523 = vmatprep.mubr.msk.f32.mxu1 %vm44875_vm2, %v50909_v39 }
0x143c   :  { %43202 = vmatprep.subr.bf16.mxu1 %v50908_v25  ;;  %43273 = vmatpush3.bf16.msra.mxu0 %v48185_v55 }
0x143d   :  { %43274 = vmatprep.subr.bf16.mxu0 %v50908_v25  ;;  %38637 = vmatprep.mubr.msk.f32.mxu0 %vm44875_vm2, %v50909_v39 }
0x143f   :  { %43204 = vmatpush3.bf16.msra.mxu1 %v48591_v27 }
0x1440   :  { %43205 = vmatprep.subr.bf16.mxu1 %v50908_v25  ;;  %43276 = vmatpush3.bf16.msra.mxu0 %v48204_v23 }
0x1441   :  { %43277 = vmatprep.subr.bf16.mxu0 %v50908_v25 }
0x1443   :  { %43207 = vmatpush3.bf16.msra.mxu1 %v48609_v16 }
0x1444   :  { %43208 = vmatprep.subr.bf16.mxu1 %v50908_v25  ;;  %43279 = vmatpush3.bf16.msra.mxu0 %v48211_v36 }
0x1445   :  { %43280 = vmatprep.subr.bf16.mxu0 %v50908_v25 }
0x1447   :  { %43210 = vmatpush3.bf16.msra.mxu1 %v48622_v60 }
0x1448   :  { %43211 = vmatprep.subr.bf16.mxu1 %v50908_v25  ;;  %43282 = vmatpush3.bf16.msra.mxu0 %v48229_v18 }
0x1449   :  { %43295 = vmatprep.subr.bf16.mxu0 %v50908_v25 }
0x144a   :  { %38524 = vmatmul.mubr.f32.vlgmr.msra.gmra.mrb[86].mxu1 %v49341_v2  ;;  %v23514_v2 = vrot.slane %v49327_v59, 6 }
0x144b   :  { %43213 = vmatpush3.bf16.msra.mxu1 %v50966_v15  ;;  %38542 = vmatprep.mubr.msk.f32.mxu1 %vm44875_vm2, %v50909_v39 }
0x144c   :  { %43214 = vmatprep.subr.bf16.mxu1 %v50908_v25 }
0x144f   :  { %43216 = vmatpush3.bf16.msra.mxu1 %v48666_v6 }
0x1450   :  { %43217 = vmatprep.subr.bf16.mxu1 %v50908_v25 }
0x1453   :  { %43219 = vmatpush3.bf16.msra.mxu1 %v48692_v5 }
0x1454   :  { %43220 = vmatprep.subr.bf16.mxu1 %v50908_v25 }
0x1457   :  { %43222 = vmatpush3.bf16.msra.mxu1 %v48699_v42 }
0x1458   :  { %43223 = vmatprep.subr.bf16.mxu1 %v50908_v25 }
0x145a   :  { %38543 = vmatmul.mubr.f32.vlgmr.msra.gmra.mrb[86].mxu1 %v49331_v57 }
0x145b   :  { %43225 = vmatpush3.bf16.msra.mxu1 %v50967_v28  ;;  %38561 = vmatprep.mubr.msk.f32.mxu1 %vm44875_vm2, %v50909_v39 }
0x145c   :  { %43226 = vmatprep.subr.bf16.mxu1 %v50908_v25 }
0x145f   :  { %43228 = vmatpush3.bf16.msra.mxu1 %v50983_v47 }
0x1460   :  { %43229 = vmatprep.subr.bf16.mxu1 %v50908_v25 }
0x1463   :  { %43231 = vmatpush3.bf16.msra.mxu1 %v50984_v43 }
0x1464   :  { %43232 = vmatprep.subr.bf16.mxu1 %v50908_v25 }
0x1467   :  { %43234 = vmatpush3.bf16.msra.mxu1 %v50985_v58 }
0x1468   :  { %43235 = vmatprep.subr.bf16.mxu1 %v50908_v25 }
0x146a   :  { %38562 = vmatmul.mubr.f32.vlgmr.msra.gmra.mrb[86].mxu1 %v49334_v53 }
0x146b   :  { %43237 = vmatpush3.bf16.msra.mxu1 %v48564_v11  ;;  %38580 = vmatprep.mubr.msk.f32.mxu1 %vm44875_vm2, %v50909_v39 }
0x146c   :  { %43238 = vmatprep.subr.bf16.mxu1 %v50908_v25 }
0x146f   :  { %43240 = vmatpush3.bf16.msra.mxu1 %v48591_v27 }
0x1470   :  { %43241 = vmatprep.subr.bf16.mxu1 %v50908_v25 }
0x1473   :  { %43243 = vmatpush3.bf16.msra.mxu1 %v48609_v16 }
0x1474   :  { %43244 = vmatprep.subr.bf16.mxu1 %v50908_v25 }
0x1477   :  { %43246 = vmatpush3.bf16.msra.mxu1 %v48622_v60 }
0x1478   :  { %43247 = vmatprep.subr.bf16.mxu1 %v50908_v25 }
0x147a   :  { %38581 = vmatmul.mubr.f32.vlgmr.msra.gmra.mrb[86].mxu1 %v49337_v45 }
0x147b   :  { %43249 = vmatpush3.bf16.msra.mxu1 %v50986_v24  ;;  %38599 = vmatprep.mubr.msk.f32.mxu1 %vm44875_vm2, %v50909_v39 }
0x147c   :  { %43250 = vmatprep.subr.bf16.mxu1 %v50908_v25 }
0x147f   :  { %43252 = vmatpush3.bf16.msra.mxu1 %v50987_v37 }
0x1480   :  { %43253 = vmatprep.subr.bf16.mxu1 %v50908_v25 }
0x1483   :  { %43255 = vmatpush3.bf16.msra.mxu1 %v50988_v14 }
0x1484   :  { %43256 = vmatprep.subr.bf16.mxu1 %v50908_v25 }
0x1487   :  { %43258 = vmatpush3.bf16.msra.mxu1 %v50989_v44 }
0x1488   :  { %43259 = vmatprep.subr.bf16.mxu1 %v50908_v25 }
0x148a   :  { %38600 = vmatmul.mubr.f32.vlgmr.msra.gmra.mrb[86].mxu1 %v49331_v57 }
0x148b   :  { %43261 = vmatpush3.bf16.msra.mxu1 %v48564_v11  ;;  %38618 = vmatprep.mubr.msk.f32.mxu1 %vm44875_vm2, %v50909_v39 }
0x148c   :  { %43262 = vmatprep.subr.bf16.mxu1 %v50908_v25 }
0x148f   :  { %43264 = vmatpush3.bf16.msra.mxu1 %v48591_v27 }
0x1490   :  { %43265 = vmatprep.subr.bf16.mxu1 %v50908_v25 }
0x1493   :  { %43267 = vmatpush3.bf16.msra.mxu1 %v48609_v16 }
0x1494   :  { %43268 = vmatprep.subr.bf16.mxu1 %v50908_v25 }
0x1497   :  { %43270 = vmatpush3.bf16.msra.mxu1 %v48622_v60 }
0x1498   :  { %43283 = vmatprep.subr.bf16.mxu1 %v50908_v25 }
0x149a   :  { %38619 = vmatmul.mubr.f32.vlgmr.msra.gmra.mrb[86].mxu1 %v49331_v57 }
0x149b   :  { %43285 = vmatpush3.bf16.msra.mxu1 %v48247_v30  ;;  %38656 = vmatprep.mubr.msk.f32.mxu1 %vm44875_vm2, %v50909_v39 }
0x149c   :  { %43286 = vmatprep.subr.bf16.mxu1 %v50908_v25 }
0x149f   :  { %43288 = vmatpush3.bf16.msra.mxu1 %v48267_v33 }
0x14a0   :  { %43289 = vmatprep.subr.bf16.mxu1 %v50908_v25 }
0x14a3   :  { %43291 = vmatpush3.bf16.msra.mxu1 %v48286_v35 }
0x14a4   :  { %43292 = vmatprep.subr.bf16.mxu1 %v50908_v25 }
0x14a7   :  { %43294 = vmatpush3.bf16.msra.mxu1 %v48294_v41 }
0x14a8   :  { %43307 = vmatprep.subr.bf16.mxu1 %v50908_v25 }
0x150d   :  { %v22408_v38 = vpop.f32.mrb[84].mxu1  ;;  %v22945_v63 = vpop.f32.mrb[58].mxu0 }
0x150e   :  { %v22960_v61 = vrot.slane %v22945_v63, 2  ;;  %v38392_v19 = vpop.f32.mrb[85].mxu1  ;;  %v38506_v0 = vpop.f32.mrb[59].mxu0  ;;  %v22950_v30 = vrot.slane %v22408_v38, 2 }
0x1510   :  { %v22962_v57 = vadd.f32 %v50990_v29, %v22960_v61  ;;  %v22952_v41 = vadd.f32 %v48689_v8, %v22950_v30  ;;  %v49547_v61 = vld [vmem:[%s50564_s8] ss:$0 sm:$0xff] }
0x1512   :  { %v30763_v53 = vmul.f32 -1.442695, %v22962_v57  ;;  %v30762_v44 = vmul.f32 -1.442695, %v22952_v41 }
0x1514   :  { %44820 = vpow2.f32 %v30763_v53 }
0x151e   :  { %v44821_v45 = vpop.eup %44820 }
0x151f   :  { %v22966_v9 = vadd.f32 1.0, %v44821_v45 }
0x1521   :  { %44822 = vrcp.f32 %v22966_v9 }
0x1522   :  { %44824 = vpow2.f32 %v30762_v44 }
0x152b   :  { %v44823_v35 = vpop.eup %44822 }
0x152c   :  { %v23516_v33 = vmul.f32 %v44823_v35, %v23514_v2  ;;  %v44825_v14 = vpop.eup %44824  ;;  %v23512_v30 = vsub.f32 1.0, %v44823_v35 }
0x152d   :  { %v22956_v63 = vadd.f32 1.0, %v44825_v14 }
0x152f   :  { %44826 = vrcp.f32 %v22956_v63  ;;  %v50991_v63 = vld [vmem:[#allocation13_spill] sm:$0xff] }
0x1539   :  { %v44827_v57 = vpop.eup %44826 }
0x156d   :  { %v23502_v19 = vpop.f32.mrb[86].mxu1 }
0x156e   :  { %v44234_v0 = vadd.f32 %v49547_v61, %v23502_v19  ;;  %v38620_v29 = vpop.f32.mrb[87].mxu1  ;;  %v50992_v19 = vld [vmem:[#allocation9_spill] sm:$0xff] }
0x1570   :  { %v23507_v59 = vrot.slane %v44234_v0, 2 }
0x1572   :  { %v23509_v53 = vmul.f32 %v44827_v57, %v23507_v59 }
0x1574   :  { %v23510_v38 = vadd.f32 %v48886_v49, %v23509_v53 }
0x1576   :  { %44828 = vtanh.f32 %v23510_v38 }
0x1580   :  { %v44829_v41 = vpop.eup %44828 }
0x1581   :  { %v23513_v8 = vmul.f32 %v44829_v41, %v23512_v30 }
0x1583   :  { %v49551_v14 = vadd.f32 %v23516_v33, %v23513_v8 }
0x1585   :  { %v50751_v44 = vrot.slane %v49551_v14, 6 }
0x1587   :  { %v23520_v45 = vsel %vm1563_vm3, %v50751_v44, 0 }
0x1588   :  { %v49557_v9 = vand.u32 4294901760, %v23520_v45 }
0x158a   :  { %38657 = vmatmul.mubr.f32.vlgmr.msra.gmra.mrb[88].mxu1 %v49557_v9  ;;  %v49561_v2 = vsub.f32 %v23520_v45, %v49557_v9 }
0x158b   :  { %43309 = vmatpush3.bf16.msra.mxu1 %v48185_v55  ;;  %38694 = vmatprep.mubr.msk.f32.mxu1 %vm44875_vm2, %v50909_v39 }
0x158c   :  { %43310 = vmatprep.subr.bf16.mxu1 %v50908_v25  ;;  %v49568_v33 = vand.u32 4294901760, %v49561_v2 }
0x158e   :  { %v23598_v35 = vsub.f32 %v49561_v2, %v49568_v33 }
0x158f   :  { %43312 = vmatpush3.bf16.msra.mxu1 %v48204_v23 }
0x1590   :  { %43313 = vmatprep.subr.bf16.mxu1 %v50908_v25  ;;  %v49574_v49 = vand.u32 4294901760, %v23598_v35 }
0x1592   :  { %38638 = vmatmul.mubr.f32.vlgmr.msra.gmra.mrb[60].mxu0 %v49574_v49 }
0x1593   :  { %43297 = vmatpush3.bf16.msra.mxu0 %v48302_v12  ;;  %43315 = vmatpush3.bf16.msra.mxu1 %v48211_v36 }
0x1594   :  { %43298 = vmatprep.subr.bf16.mxu0 %v50908_v25  ;;  %43316 = vmatprep.subr.bf16.mxu1 %v50908_v25 }
0x1595   :  { %38675 = vmatprep.mubr.msk.f32.mxu0 %vm44875_vm2, %v50909_v39 }
0x1597   :  { %43300 = vmatpush3.bf16.msra.mxu0 %v48311_v50  ;;  %43318 = vmatpush3.bf16.msra.mxu1 %v48229_v18 }
0x1598   :  { %43301 = vmatprep.subr.bf16.mxu0 %v50908_v25  ;;  %43331 = vmatprep.subr.bf16.mxu1 %v50908_v25 }
0x159a   :  { %38695 = vmatmul.mubr.f32.vlgmr.msra.gmra.mrb[90].mxu1 %v49568_v33 }
0x159b   :  { %43303 = vmatpush3.bf16.msra.mxu0 %v48321_v21  ;;  %43333 = vmatpush3.bf16.msra.mxu1 %v48185_v55 }
0x159c   :  { %43304 = vmatprep.subr.bf16.mxu0 %v50908_v25  ;;  %43334 = vmatprep.subr.bf16.mxu1 %v50908_v25 }
0x159d   :  { %38732 = vmatprep.mubr.msk.f32.mxu1 %vm44875_vm2, %v50909_v39 }
0x159f   :  { %43306 = vmatpush3.bf16.msra.mxu0 %v48329_v40  ;;  %43336 = vmatpush3.bf16.msra.mxu1 %v48204_v23 }
0x15a0   :  { %43319 = vmatprep.subr.bf16.mxu0 %v50908_v25  ;;  %43337 = vmatprep.subr.bf16.mxu1 %v50908_v25 }
0x15a2   :  { %38676 = vmatmul.mubr.f32.vlgmr.msra.gmra.mrb[62].mxu0 %v49561_v2 }
0x15a3   :  { %43321 = vmatpush3.bf16.msra.mxu0 %v48367_v31  ;;  %43339 = vmatpush3.bf16.msra.mxu1 %v48211_v36 }
0x15a4   :  { %43322 = vmatprep.subr.bf16.mxu0 %v50908_v25  ;;  %43340 = vmatprep.subr.bf16.mxu1 %v50908_v25 }
0x15a5   :  { %38713 = vmatprep.mubr.msk.f32.mxu0 %vm44875_vm2, %v50909_v39 }
0x15a7   :  { %43324 = vmatpush3.bf16.msra.mxu0 %v48380_v52  ;;  %43342 = vmatpush3.bf16.msra.mxu1 %v48229_v18 }
0x15a8   :  { %43325 = vmatprep.subr.bf16.mxu0 %v50908_v25  ;;  %43355 = vmatprep.subr.bf16.mxu1 %v50908_v25 }
0x15aa   :  { %38733 = vmatmul.mubr.f32.vlgmr.msra.gmra.mrb[92].mxu1 %v49557_v9 }
0x15ab   :  { %43327 = vmatpush3.bf16.msra.mxu0 %v50964_v1  ;;  %43357 = vmatpush3.bf16.msra.mxu1 %v48519_v7 }
0x15ac   :  { %43328 = vmatprep.subr.bf16.mxu0 %v50908_v25  ;;  %43358 = vmatprep.subr.bf16.mxu1 %v50908_v25 }
0x15ad   :  { %38770 = vmatprep.mubr.msk.f32.mxu1 %vm44875_vm2, %v50909_v39 }
0x15af   :  { %43330 = vmatpush3.bf16.msra.mxu0 %v50965_v34  ;;  %43360 = vmatpush3.bf16.msra.mxu1 %v48540_v13 }
0x15b0   :  { %43343 = vmatprep.subr.bf16.mxu0 %v50908_v25  ;;  %43361 = vmatprep.subr.bf16.mxu1 %v50908_v25 }
0x15b2   :  { %38714 = vmatmul.mubr.f32.vlgmr.msra.gmra.mrb[64].mxu0 %v49557_v9 }
0x15b3   :  { %43345 = vmatpush3.bf16.msra.mxu0 %v48452_v10  ;;  %43363 = vmatpush3.bf16.msra.mxu1 %v48568_v62 }
0x15b4   :  { %43346 = vmatprep.subr.bf16.mxu0 %v50908_v25  ;;  %43364 = vmatprep.subr.bf16.mxu1 %v50908_v25 }
0x15b5   :  { %38751 = vmatprep.mubr.msk.f32.mxu0 %vm44875_vm2, %v50909_v39 }
0x15b7   :  { %43348 = vmatpush3.bf16.msra.mxu0 %v48477_v20  ;;  %43366 = vmatpush3.bf16.msra.mxu1 %v48597_v4 }
0x15b8   :  { %43349 = vmatprep.subr.bf16.mxu0 %v50908_v25  ;;  %43379 = vmatprep.subr.bf16.mxu1 %v50908_v25 }
0x15ba   :  { %38771 = vmatmul.mubr.f32.vlgmr.msra.gmra.mrb[94].mxu1 %v49557_v9 }
0x15bb   :  { %43351 = vmatpush3.bf16.msra.mxu0 %v48493_v56  ;;  %43381 = vmatpush3.bf16.msra.mxu1 %v48452_v10 }
0x15bc   :  { %43352 = vmatprep.subr.bf16.mxu0 %v50908_v25  ;;  %43382 = vmatprep.subr.bf16.mxu1 %v50908_v25 }
0x15bd   :  { %38808 = vmatprep.mubr.msk.f32.mxu1 %vm44875_vm2, %v50909_v39 }
0x15bf   :  { %43354 = vmatpush3.bf16.msra.mxu0 %v48500_v51  ;;  %43384 = vmatpush3.bf16.msra.mxu1 %v48477_v20 }
0x15c0   :  { %43367 = vmatprep.subr.bf16.mxu0 %v50908_v25  ;;  %43385 = vmatprep.subr.bf16.mxu1 %v50908_v25 }
0x15c2   :  { %38752 = vmatmul.mubr.f32.vlgmr.msra.gmra.mrb[66].mxu0 %v49574_v49 }
0x15c3   :  { %43369 = vmatpush3.bf16.msra.mxu0 %v48619_v22  ;;  %43387 = vmatpush3.bf16.msra.mxu1 %v48493_v56 }
0x15c4   :  { %43370 = vmatprep.subr.bf16.mxu0 %v50908_v25  ;;  %43388 = vmatprep.subr.bf16.mxu1 %v50908_v25 }
0x15c5   :  { %38789 = vmatprep.mubr.msk.f32.mxu0 %vm44875_vm2, %v50909_v39 }
0x15c7   :  { %43372 = vmatpush3.bf16.msra.mxu0 %v48642_v48  ;;  %43390 = vmatpush3.bf16.msra.mxu1 %v48500_v51 }
0x15c8   :  { %43373 = vmatprep.subr.bf16.mxu0 %v50908_v25  ;;  %43403 = vmatprep.subr.bf16.mxu1 %v50908_v25 }
0x15ca   :  { %38809 = vmatmul.mubr.f32.vlgmr.msra.gmra.mrb[96].mxu1 %v49568_v33 }
0x15cb   :  { %43375 = vmatpush3.bf16.msra.mxu0 %v48662_v46  ;;  %43405 = vmatpush3.bf16.msra.mxu1 %v48452_v10 }
0x15cc   :  { %43376 = vmatprep.subr.bf16.mxu0 %v50908_v25  ;;  %43406 = vmatprep.subr.bf16.mxu1 %v50908_v25 }
0x15cd   :  { %38846 = vmatprep.mubr.msk.f32.mxu1 %vm44875_vm2, %v50909_v39 }
0x15cf   :  { %43378 = vmatpush3.bf16.msra.mxu0 %v48681_v17  ;;  %43408 = vmatpush3.bf16.msra.mxu1 %v48477_v20 }
0x15d0   :  { %43391 = vmatprep.subr.bf16.mxu0 %v50908_v25  ;;  %43409 = vmatprep.subr.bf16.mxu1 %v50908_v25 }
0x15d2   :  { %38790 = vmatmul.mubr.f32.vlgmr.msra.gmra.mrb[68].mxu0 %v49561_v2 }
0x15d3   :  { %43393 = vmatpush3.bf16.msra.mxu0 %v48736_v26  ;;  %43411 = vmatpush3.bf16.msra.mxu1 %v48493_v56 }
0x15d4   :  { %43394 = vmatprep.subr.bf16.mxu0 %v50908_v25  ;;  %43412 = vmatprep.subr.bf16.mxu1 %v50908_v25 }
0x15d5   :  { %38827 = vmatprep.mubr.msk.f32.mxu0 %vm44875_vm2, %v50909_v39 }
0x15d7   :  { %43396 = vmatpush3.bf16.msra.mxu0 %v48751_v32  ;;  %43414 = vmatpush3.bf16.msra.mxu1 %v48500_v51 }
0x15d8   :  { %43397 = vmatprep.subr.bf16.mxu0 %v50908_v25  ;;  %43487 = vmatprep.subr.bf16.mxu1 %v50908_v25 }
0x15da   :  { %38847 = vmatmul.mubr.f32.vlgmr.msra.gmra.mrb[98].mxu1 %v49557_v9 }
0x15db   :  { %43399 = vmatpush3.bf16.msra.mxu0 %v48763_v54  ;;  %43489 = vmatpush3.bf16.msra.mxu1 %v48185_v55 }
0x15dc   :  { %43400 = vmatprep.subr.bf16.mxu0 %v50908_v25  ;;  %43490 = vmatprep.subr.bf16.mxu1 %v50908_v25 }
0x15dd   :  { %38979 = vmatprep.mubr.msk.f32.mxu1 %vm44875_vm2, %v50909_v39 }
0x15df   :  { %43402 = vmatpush3.bf16.msra.mxu0 %v48776_v3  ;;  %43492 = vmatpush3.bf16.msra.mxu1 %v48204_v23 }
0x15e0   :  { %43415 = vmatprep.subr.bf16.mxu0 %v50908_v25  ;;  %43493 = vmatprep.subr.bf16.mxu1 %v50908_v25 }
0x15e2   :  { %38828 = vmatmul.mubr.f32.vlgmr.msra.gmra.mrb[70].mxu0 %v49557_v9 }
0x15e3   :  { %43417 = vmatpush3.bf16.msra.mxu0 %v48564_v11  ;;  %38865 = vmatprep.mubr.msk.f32.mxu0 %vm44875_vm2, %v50909_v39 }
0x15e4   :  { %43418 = vmatprep.subr.bf16.mxu0 %v50908_v25  ;;  %43495 = vmatpush3.bf16.msra.mxu1 %v48211_v36 }
0x15e5   :  { %43496 = vmatprep.subr.bf16.mxu1 %v50908_v25 }
0x15e7   :  { %43420 = vmatpush3.bf16.msra.mxu0 %v48591_v27 }
0x15e8   :  { %43421 = vmatprep.subr.bf16.mxu0 %v50908_v25  ;;  %43498 = vmatpush3.bf16.msra.mxu1 %v48229_v18 }
0x15e9   :  { %43499 = vmatprep.subr.bf16.mxu1 %v50908_v25 }
0x15eb   :  { %43423 = vmatpush3.bf16.msra.mxu0 %v48609_v16 }
0x15ec   :  { %43424 = vmatprep.subr.bf16.mxu0 %v50908_v25 }
0x15ef   :  { %43426 = vmatpush3.bf16.msra.mxu0 %v48622_v60 }
0x15f0   :  { %43427 = vmatprep.subr.bf16.mxu0 %v50908_v25 }
0x15f2   :  { %38866 = vmatmul.mubr.f32.vlgmr.msra.gmra.mrb[72].mxu0 %v49574_v49 }
0x15f3   :  { %43429 = vmatpush3.bf16.msra.mxu0 %v50966_v15  ;;  %38884 = vmatprep.mubr.msk.f32.mxu0 %vm44875_vm2, %v50909_v39 }
0x15f4   :  { %43430 = vmatprep.subr.bf16.mxu0 %v50908_v25 }
0x15f7   :  { %43432 = vmatpush3.bf16.msra.mxu0 %v48666_v6 }
0x15f8   :  { %43433 = vmatprep.subr.bf16.mxu0 %v50908_v25 }
0x15fb   :  { %43435 = vmatpush3.bf16.msra.mxu0 %v48692_v5 }
0x15fc   :  { %43436 = vmatprep.subr.bf16.mxu0 %v50908_v25 }
0x15ff   :  { %43438 = vmatpush3.bf16.msra.mxu0 %v48699_v42 }
0x1600   :  { %43439 = vmatprep.subr.bf16.mxu0 %v50908_v25 }
0x1602   :  { %38885 = vmatmul.mubr.f32.vlgmr.msra.gmra.mrb[72].mxu0 %v49557_v9 }
0x1603   :  { %43441 = vmatpush3.bf16.msra.mxu0 %v50967_v28  ;;  %38903 = vmatprep.mubr.msk.f32.mxu0 %vm44875_vm2, %v50909_v39 }
0x1604   :  { %43442 = vmatprep.subr.bf16.mxu0 %v50908_v25 }
0x1607   :  { %43444 = vmatpush3.bf16.msra.mxu0 %v50983_v47 }
0x1608   :  { %43445 = vmatprep.subr.bf16.mxu0 %v50908_v25 }
0x160b   :  { %43447 = vmatpush3.bf16.msra.mxu0 %v50984_v43 }
0x160c   :  { %43448 = vmatprep.subr.bf16.mxu0 %v50908_v25 }
0x160f   :  { %43450 = vmatpush3.bf16.msra.mxu0 %v50985_v58 }
0x1610   :  { %43451 = vmatprep.subr.bf16.mxu0 %v50908_v25 }
0x1612   :  { %38904 = vmatmul.mubr.f32.vlgmr.msra.gmra.mrb[72].mxu0 %v49561_v2 }
0x1613   :  { %43453 = vmatpush3.bf16.msra.mxu0 %v48564_v11  ;;  %38922 = vmatprep.mubr.msk.f32.mxu0 %vm44875_vm2, %v50909_v39 }
0x1614   :  { %43454 = vmatprep.subr.bf16.mxu0 %v50908_v25 }
0x1617   :  { %43456 = vmatpush3.bf16.msra.mxu0 %v48591_v27 }
0x1618   :  { %43457 = vmatprep.subr.bf16.mxu0 %v50908_v25 }
0x161b   :  { %43459 = vmatpush3.bf16.msra.mxu0 %v48609_v16 }
0x161c   :  { %43460 = vmatprep.subr.bf16.mxu0 %v50908_v25 }
0x161f   :  { %43462 = vmatpush3.bf16.msra.mxu0 %v48622_v60 }
0x1620   :  { %43463 = vmatprep.subr.bf16.mxu0 %v50908_v25 }
0x1622   :  { %38923 = vmatmul.mubr.f32.vlgmr.msra.gmra.mrb[72].mxu0 %v49568_v33 }
0x1623   :  { %43465 = vmatpush3.bf16.msra.mxu0 %v50986_v24  ;;  %38941 = vmatprep.mubr.msk.f32.mxu0 %vm44875_vm2, %v50909_v39 }
0x1624   :  { %43466 = vmatprep.subr.bf16.mxu0 %v50908_v25 }
0x1627   :  { %43468 = vmatpush3.bf16.msra.mxu0 %v50987_v37 }
0x1628   :  { %43469 = vmatprep.subr.bf16.mxu0 %v50908_v25 }
0x162b   :  { %43471 = vmatpush3.bf16.msra.mxu0 %v50991_v63 }
0x162c   :  { %43472 = vmatprep.subr.bf16.mxu0 %v50908_v25 }
0x162f   :  { %43474 = vmatpush3.bf16.msra.mxu0 %v50992_v19 }
0x1630   :  { %43475 = vmatprep.subr.bf16.mxu0 %v50908_v25 }
0x1632   :  { %38942 = vmatmul.mubr.f32.vlgmr.msra.gmra.mrb[72].mxu0 %v49557_v9 }
0x1633   :  { %43477 = vmatpush3.bf16.msra.mxu0 %v48564_v11  ;;  %38960 = vmatprep.mubr.msk.f32.mxu0 %vm44875_vm2, %v50909_v39 }
0x1634   :  { %43478 = vmatprep.subr.bf16.mxu0 %v50908_v25 }
0x1637   :  { %43480 = vmatpush3.bf16.msra.mxu0 %v48591_v27 }
0x1638   :  { %43481 = vmatprep.subr.bf16.mxu0 %v50908_v25 }
0x163b   :  { %43483 = vmatpush3.bf16.msra.mxu0 %v48609_v16 }
0x163c   :  { %43484 = vmatprep.subr.bf16.mxu0 %v50908_v25 }
0x163f   :  { %43486 = vmatpush3.bf16.msra.mxu0 %v48622_v60 }
0x1640   :  { %43559 = vmatprep.subr.bf16.mxu0 %v50908_v25 }
0x1642   :  { %38961 = vmatmul.mubr.f32.vlgmr.msra.gmra.mrb[72].mxu0 %v49557_v9 }
0x1643   :  { %43561 = vmatpush3.bf16.msra.mxu0 %v48452_v10  ;;  %39093 = vmatprep.mubr.msk.f32.mxu0 %vm44875_vm2, %v50909_v39 }
0x1644   :  { %43562 = vmatprep.subr.bf16.mxu0 %v50908_v25 }
0x1647   :  { %43564 = vmatpush3.bf16.msra.mxu0 %v48477_v20 }
0x1648   :  { %43565 = vmatprep.subr.bf16.mxu0 %v50908_v25 }
0x164b   :  { %43567 = vmatpush3.bf16.msra.mxu0 %v48493_v56 }
0x164c   :  { %43568 = vmatprep.subr.bf16.mxu0 %v50908_v25 }
0x164f   :  { %43570 = vmatpush3.bf16.msra.mxu0 %v48500_v51 }
0x1650   :  { %43571 = vmatprep.subr.bf16.mxu0 %v50908_v25 }
0x165d   :  { %v23712_v0 = vpop.f32.mrb[88].mxu1 }
0x165e   :  { %v38658_v29 = vpop.f32.mrb[89].mxu1 }
0x1665   :  { %v23601_v59 = vpop.f32.mrb[60].mxu0 }
0x1666   :  { %v23713_v57 = vadd.f32 %v23712_v0, %v23601_v59  ;;  %v38639_v53 = vpop.f32.mrb[61].mxu0 }
0x166d   :  { %v23881_v38 = vpop.f32.mrb[90].mxu1 }
0x166e   :  { %v38696_v30 = vpop.f32.mrb[91].mxu1 }
0x1675   :  { %v23800_v41 = vpop.f32.mrb[62].mxu0 }
0x1676   :  { %v23801_v8 = vadd.f32 %v23800_v41, %v23713_v57  ;;  %v38677_v45 = vpop.f32.mrb[63].mxu0 }
0x1678   :  { %v23882_v9 = vadd.f32 %v23881_v38, %v23801_v8 }
0x167d   :  { %v24055_v2 = vpop.f32.mrb[92].mxu1 }
0x167e   :  { %v38734_v33 = vpop.f32.mrb[93].mxu1 }
0x1685   :  { %v23976_v35 = vpop.f32.mrb[64].mxu0 }
0x1686   :  { %v23977_v49 = vadd.f32 %v23976_v35, %v23882_v9  ;;  %v38715_v44 = vpop.f32.mrb[65].mxu0  ;;  %v50993_v9 = vld [vmem:[#allocation22_spill] sm:$0xff] }
0x1688   :  { %v24056_v19 = vadd.f32 %v24055_v2, %v23977_v49 }
0x168a   :  { %v24596_v44 = vadd.f32 %v50993_v9, %v24056_v19 }
0x168c   :  { %v30764_v2 = vmul.f32 -1.442695, %v24596_v44 }
0x168d   :  { %v24249_v63 = vpop.f32.mrb[94].mxu1 }
0x168e   :  { %v38772_v37 = vpop.f32.mrb[95].mxu1  ;;  %44830 = vpow2.f32 %v30764_v2 }
0x168f   :  { %v50994_v37 = vld [vmem:[#allocation8_spill] sm:$0xff] }
0x1695   :  { %v24138_v24 = vpop.f32.mrb[66].mxu0 }
0x1696   :  { %v24250_v58 = vadd.f32 %v24249_v63, %v24138_v24  ;;  %v38753_v29 = vpop.f32.mrb[67].mxu0 }
0x1698   :  { %v44831_v63 = vpop.eup %44830 }
0x1699   :  { %v24600_v49 = vadd.f32 1.0, %v44831_v63 }
0x169d   :  { %v24418_v43 = vpop.f32.mrb[96].mxu1 }
0x169e   :  { %v38810_v0 = vpop.f32.mrb[97].mxu1 }
0x16a5   :  { %v24337_v59 = vpop.f32.mrb[68].mxu0 }
0x16a6   :  { %v24338_v53 = vadd.f32 %v24337_v59, %v24250_v58  ;;  %v38791_v30 = vpop.f32.mrb[69].mxu0 }
0x16a7   :  { %v50995_v30 = vld [vmem:[#allocation6_spill] sm:$0xff] }
0x16a8   :  { %v24419_v47 = vadd.f32 %v24418_v43, %v24338_v53 }
0x16ad   :  { %v24592_v57 = vpop.f32.mrb[98].mxu1 }
0x16ae   :  { %v38848_v41 = vpop.f32.mrb[99].mxu1 }
0x16b5   :  { %v24513_v38 = vpop.f32.mrb[70].mxu0 }
0x16b6   :  { %v24514_v8 = vadd.f32 %v24513_v38, %v24419_v47  ;;  %v38829_v45 = vpop.f32.mrb[71].mxu0 }
0x16b8   :  { %v24593_v33 = vadd.f32 %v24592_v57, %v24514_v8  ;;  %v50996_v8 = vrot.slane %v49551_v14, 6  ;;  %v50997_v14 = vld [vmem:[#allocation14_spill] sm:$0xff] }
0x16ba   :  { %v24603_v35 = vadd.f32 %v50994_v37, %v24593_v33 }
0x16bc   :  { %v30765_v24 = vmul.f32 -1.442695, %v24603_v35 }
0x16be   :  { %44832 = vpow2.f32 %v30765_v24 }
0x16bf   :  { %44834 = vrcp.f32 %v24600_v49 }
0x16c8   :  { %v44833_v58 = vpop.eup %44832 }
0x16c9   :  { %v24607_v29 = vadd.f32 1.0, %v44833_v58  ;;  %v44835_v47 = vpop.eup %44834 }
0x16cb   :  { %44836 = vrcp.f32 %v24607_v29  ;;  %v50998_v29 = vld [vmem:[#allocation15_spill] sm:$0xff] }
0x16d5   :  { %v44837_v57 = vpop.eup %44836 }
0x16d6   :  { %v25150_v41 = vsub.f32 1.0, %v44837_v57  ;;  %v25153_v45 = vmul.f32 %v44837_v57, %v50996_v8  ;;  %v51005_v57 = vld [vmem:[#allocation12_spill] sm:$0xff] }
0x1715   :  { %v25143_v43 = vpop.f32.mrb[72].mxu0 }
0x1716   :  { %v44235_v0 = vadd.f32 %v49547_v61, %v25143_v43  ;;  %v38962_v59 = vpop.f32.mrb[73].mxu0  ;;  %v50999_v43 = vld [vmem:[#allocation16_spill] sm:$0xff] }
0x1717   :  { %v51001_v59 = vld [vmem:[#allocation21_spill] sm:$0xff] }
0x1718   :  { %v25147_v53 = vmul.f32 %v44835_v47, %v44235_v0  ;;  %v51000_v0 = vld [vmem:[#allocation17_spill] sm:$0xff]  ;;  %v51002_v47 = vld [vmem:[#allocation4_spill] sm:$0xff] }
0x171a   :  { %v25148_v19 = vadd.f32 %v50995_v30, %v25147_v53  ;;  %v51003_v53 = vld [vmem:[#allocation5_spill] sm:$0xff] }
0x171c   :  { %44838 = vtanh.f32 %v25148_v19  ;;  %v51004_v19 = vld [vmem:[#allocation11_spill] sm:$0xff] }
0x1726   :  { %v44839_v38 = vpop.eup %44838 }
0x1727   :  { %v25151_v33 = vmul.f32 %v44839_v38, %v25150_v41  ;;  %v51006_v41 = vld [vmem:[#allocation13_spill] sm:$0xff] }
0x1728   :  { %v51007_v38 = vld [vmem:[#allocation9_spill] sm:$0xff] }
0x1729   :  { %v49773_v44 = vadd.f32 %v25153_v45, %v25151_v33 }
0x172b   :  { %v25156_v2 = vsel %vm1563_vm3, %v49773_v44, 0 }
0x172c   :  { %v49777_v35 = vand.u32 4294901760, %v25156_v2 }
0x172e   :  { %v49780_v24 = vsub.f32 %v25156_v2, %v49777_v35 }
0x1730   :  { %v49783_v63 = vand.u32 4294901760, %v49780_v24 }
0x1732   :  { %v25234_v49 = vsub.f32 %v49780_v24, %v49783_v63 }
0x1734   :  { %v49787_v58 = vand.u32 4294901760, %v25234_v49 }
0x1736   :  { %38980 = vmatmul.mubr.f32.vlgmr.msra.gmra.mrb[100].mxu1 %v49787_v58  ;;  %39094 = vmatmul.mubr.f32.vlgmr.msra.gmra.mrb[74].mxu0 %v49787_v58 }
0x1737   :  { %43501 = vmatpush3.bf16.msra.mxu1 %v50997_v14  ;;  %43573 = vmatpush3.bf16.msra.mxu0 %v48519_v7 }
0x1738   :  { %43502 = vmatprep.subr.bf16.mxu1 %v50908_v25  ;;  %43574 = vmatprep.subr.bf16.mxu0 %v50908_v25 }
0x1739   :  { %38998 = vmatprep.mubr.msk.f32.mxu1 %vm44875_vm2, %v50909_v39  ;;  %39112 = vmatprep.mubr.msk.f32.mxu0 %vm44875_vm2, %v50909_v39 }
0x173b   :  { %43504 = vmatpush3.bf16.msra.mxu1 %v50998_v29  ;;  %43576 = vmatpush3.bf16.msra.mxu0 %v48540_v13 }
0x173c   :  { %43505 = vmatprep.subr.bf16.mxu1 %v50908_v25  ;;  %43577 = vmatprep.subr.bf16.mxu0 %v50908_v25 }
0x173f   :  { %43507 = vmatpush3.bf16.msra.mxu1 %v50999_v43  ;;  %43579 = vmatpush3.bf16.msra.mxu0 %v48568_v62 }
0x1740   :  { %43508 = vmatprep.subr.bf16.mxu1 %v50908_v25  ;;  %43580 = vmatprep.subr.bf16.mxu0 %v50908_v25 }
0x1743   :  { %43510 = vmatpush3.bf16.msra.mxu1 %v51000_v0  ;;  %43582 = vmatpush3.bf16.msra.mxu0 %v48597_v4 }
0x1744   :  { %43511 = vmatprep.subr.bf16.mxu1 %v50908_v25  ;;  %43583 = vmatprep.subr.bf16.mxu0 %v50908_v25 }
0x1746   :  { %38999 = vmatmul.mubr.f32.vlgmr.msra.gmra.mrb[100].mxu1 %v49777_v35  ;;  %39113 = vmatmul.mubr.f32.vlgmr.msra.gmra.mrb[74].mxu0 %v49777_v35 }
0x1747   :  { %43513 = vmatpush3.bf16.msra.mxu1 %v48302_v12  ;;  %43585 = vmatpush3.bf16.msra.mxu0 %v48619_v22 }
0x1748   :  { %43514 = vmatprep.subr.bf16.mxu1 %v50908_v25  ;;  %43586 = vmatprep.subr.bf16.mxu0 %v50908_v25 }
0x1749   :  { %39017 = vmatprep.mubr.msk.f32.mxu1 %vm44875_vm2, %v50909_v39  ;;  %39131 = vmatprep.mubr.msk.f32.mxu0 %vm44875_vm2, %v50909_v39 }
0x174b   :  { %43516 = vmatpush3.bf16.msra.mxu1 %v48311_v50  ;;  %43588 = vmatpush3.bf16.msra.mxu0 %v48642_v48 }
0x174c   :  { %43517 = vmatprep.subr.bf16.mxu1 %v50908_v25  ;;  %43589 = vmatprep.subr.bf16.mxu0 %v50908_v25 }
0x174f   :  { %43519 = vmatpush3.bf16.msra.mxu1 %v48321_v21  ;;  %43591 = vmatpush3.bf16.msra.mxu0 %v48662_v46 }
0x1750   :  { %43520 = vmatprep.subr.bf16.mxu1 %v50908_v25  ;;  %43592 = vmatprep.subr.bf16.mxu0 %v50908_v25 }
0x1753   :  { %43522 = vmatpush3.bf16.msra.mxu1 %v48329_v40  ;;  %43594 = vmatpush3.bf16.msra.mxu0 %v48681_v17 }
0x1754   :  { %43523 = vmatprep.subr.bf16.mxu1 %v50908_v25  ;;  %43595 = vmatprep.subr.bf16.mxu0 %v50908_v25 }
0x1756   :  { %39018 = vmatmul.mubr.f32.vlgmr.msra.gmra.mrb[100].mxu1 %v49780_v24  ;;  %39132 = vmatmul.mubr.f32.vlgmr.msra.gmra.mrb[74].mxu0 %v49780_v24 }
0x1757   :  { %43525 = vmatpush3.bf16.msra.mxu1 %v48185_v55  ;;  %43597 = vmatpush3.bf16.msra.mxu0 %v48452_v10 }
0x1758   :  { %43526 = vmatprep.subr.bf16.mxu1 %v50908_v25  ;;  %43598 = vmatprep.subr.bf16.mxu0 %v50908_v25 }
0x1759   :  { %39036 = vmatprep.mubr.msk.f32.mxu1 %vm44875_vm2, %v50909_v39  ;;  %39150 = vmatprep.mubr.msk.f32.mxu0 %vm44875_vm2, %v50909_v39 }
0x175b   :  { %43528 = vmatpush3.bf16.msra.mxu1 %v48204_v23  ;;  %43600 = vmatpush3.bf16.msra.mxu0 %v48477_v20 }
0x175c   :  { %43529 = vmatprep.subr.bf16.mxu1 %v50908_v25  ;;  %43601 = vmatprep.subr.bf16.mxu0 %v50908_v25 }
0x175f   :  { %43531 = vmatpush3.bf16.msra.mxu1 %v48211_v36  ;;  %43603 = vmatpush3.bf16.msra.mxu0 %v48493_v56 }
0x1760   :  { %43532 = vmatprep.subr.bf16.mxu1 %v50908_v25  ;;  %43604 = vmatprep.subr.bf16.mxu0 %v50908_v25 }
0x1763   :  { %43534 = vmatpush3.bf16.msra.mxu1 %v48229_v18  ;;  %43606 = vmatpush3.bf16.msra.mxu0 %v48500_v51 }
0x1764   :  { %43535 = vmatprep.subr.bf16.mxu1 %v50908_v25  ;;  %43607 = vmatprep.subr.bf16.mxu0 %v50908_v25 }
0x1766   :  { %39037 = vmatmul.mubr.f32.vlgmr.msra.gmra.mrb[100].mxu1 %v49783_v63  ;;  %39151 = vmatmul.mubr.f32.vlgmr.msra.gmra.mrb[74].mxu0 %v49783_v63 }
0x1767   :  { %43537 = vmatpush3.bf16.msra.mxu1 %v48367_v31  ;;  %43609 = vmatpush3.bf16.msra.mxu0 %v48736_v26 }
0x1768   :  { %43538 = vmatprep.subr.bf16.mxu1 %v50908_v25  ;;  %43610 = vmatprep.subr.bf16.mxu0 %v50908_v25 }
0x1769   :  { %39055 = vmatprep.mubr.msk.f32.mxu1 %vm44875_vm2, %v50909_v39  ;;  %39169 = vmatprep.mubr.msk.f32.mxu0 %vm44875_vm2, %v50909_v39 }
0x176b   :  { %43540 = vmatpush3.bf16.msra.mxu1 %v48380_v52  ;;  %43612 = vmatpush3.bf16.msra.mxu0 %v48751_v32 }
0x176c   :  { %43541 = vmatprep.subr.bf16.mxu1 %v50908_v25  ;;  %43613 = vmatprep.subr.bf16.mxu0 %v50908_v25 }
0x176f   :  { %43543 = vmatpush3.bf16.msra.mxu1 %v50964_v1  ;;  %43615 = vmatpush3.bf16.msra.mxu0 %v48763_v54 }
0x1770   :  { %43544 = vmatprep.subr.bf16.mxu1 %v50908_v25  ;;  %43616 = vmatprep.subr.bf16.mxu0 %v50908_v25 }
0x1773   :  { %43546 = vmatpush3.bf16.msra.mxu1 %v50965_v34  ;;  %43618 = vmatpush3.bf16.msra.mxu0 %v48776_v3 }
0x1774   :  { %43547 = vmatprep.subr.bf16.mxu1 %v50908_v25  ;;  %43619 = vmatprep.subr.bf16.mxu0 %v50908_v25 }
0x1776   :  { %39056 = vmatmul.mubr.f32.vlgmr.msra.gmra.mrb[100].mxu1 %v49777_v35  ;;  %39170 = vmatmul.mubr.f32.vlgmr.msra.gmra.mrb[74].mxu0 %v49777_v35 }
0x1777   :  { %43549 = vmatpush3.bf16.msra.mxu1 %v48185_v55  ;;  %43621 = vmatpush3.bf16.msra.mxu0 %v48452_v10 }
0x1778   :  { %43550 = vmatprep.subr.bf16.mxu1 %v50908_v25  ;;  %43622 = vmatprep.subr.bf16.mxu0 %v50908_v25 }
0x1779   :  { %39074 = vmatprep.mubr.msk.f32.mxu1 %vm44875_vm2, %v50909_v39  ;;  %39188 = vmatprep.mubr.msk.f32.mxu0 %vm44875_vm2, %v50909_v39 }
0x177b   :  { %43552 = vmatpush3.bf16.msra.mxu1 %v48204_v23  ;;  %43624 = vmatpush3.bf16.msra.mxu0 %v48477_v20 }
0x177c   :  { %43553 = vmatprep.subr.bf16.mxu1 %v50908_v25  ;;  %43625 = vmatprep.subr.bf16.mxu0 %v50908_v25 }
0x177f   :  { %43555 = vmatpush3.bf16.msra.mxu1 %v48211_v36  ;;  %43627 = vmatpush3.bf16.msra.mxu0 %v48493_v56 }
0x1780   :  { %43556 = vmatprep.subr.bf16.mxu1 %v50908_v25  ;;  %43628 = vmatprep.subr.bf16.mxu0 %v50908_v25 }
0x1783   :  { %43558 = vmatpush3.bf16.msra.mxu1 %v48229_v18  ;;  %43630 = vmatpush3.bf16.msra.mxu0 %v48500_v51 }
0x1784   :  { %43631 = vmatprep.subr.bf16.mxu1 %v50908_v25  ;;  %43703 = vmatprep.subr.bf16.mxu0 %v50908_v25 }
0x1786   :  { %39075 = vmatmul.mubr.f32.vlgmr.msra.gmra.mrb[100].mxu1 %v49777_v35  ;;  %39189 = vmatmul.mubr.f32.vlgmr.msra.gmra.mrb[74].mxu0 %v49777_v35 }
0x1787   :  { %43633 = vmatpush3.bf16.msra.mxu1 %v48564_v11  ;;  %39207 = vmatprep.mubr.msk.f32.mxu1 %vm44875_vm2, %v50909_v39 }
0x1788   :  { %43634 = vmatprep.subr.bf16.mxu1 %v50908_v25  ;;  %43705 = vmatpush3.bf16.msra.mxu0 %v48185_v55 }
0x1789   :  { %43706 = vmatprep.subr.bf16.mxu0 %v50908_v25  ;;  %39321 = vmatprep.mubr.msk.f32.mxu0 %vm44875_vm2, %v50909_v39 }
0x178b   :  { %43636 = vmatpush3.bf16.msra.mxu1 %v48591_v27 }
0x178c   :  { %43637 = vmatprep.subr.bf16.mxu1 %v50908_v25  ;;  %43708 = vmatpush3.bf16.msra.mxu0 %v48204_v23 }
0x178d   :  { %43709 = vmatprep.subr.bf16.mxu0 %v50908_v25 }
0x178f   :  { %43639 = vmatpush3.bf16.msra.mxu1 %v48609_v16 }
0x1790   :  { %43640 = vmatprep.subr.bf16.mxu1 %v50908_v25  ;;  %43711 = vmatpush3.bf16.msra.mxu0 %v48211_v36 }
0x1791   :  { %43712 = vmatprep.subr.bf16.mxu0 %v50908_v25 }
0x1793   :  { %43642 = vmatpush3.bf16.msra.mxu1 %v48622_v60 }
0x1794   :  { %43643 = vmatprep.subr.bf16.mxu1 %v50908_v25  ;;  %43714 = vmatpush3.bf16.msra.mxu0 %v48229_v18 }
0x1795   :  { %43715 = vmatprep.subr.bf16.mxu0 %v50908_v25 }
0x1796   :  { %39208 = vmatmul.mubr.f32.vlgmr.msra.gmra.mrb[102].mxu1 %v49787_v58 }
0x1797   :  { %43645 = vmatpush3.bf16.msra.mxu1 %v50966_v15  ;;  %39226 = vmatprep.mubr.msk.f32.mxu1 %vm44875_vm2, %v50909_v39 }
0x1798   :  { %43646 = vmatprep.subr.bf16.mxu1 %v50908_v25 }
0x179b   :  { %43648 = vmatpush3.bf16.msra.mxu1 %v48666_v6 }
0x179c   :  { %43649 = vmatprep.subr.bf16.mxu1 %v50908_v25 }
0x179f   :  { %43651 = vmatpush3.bf16.msra.mxu1 %v48692_v5 }
0x17a0   :  { %43652 = vmatprep.subr.bf16.mxu1 %v50908_v25 }
0x17a3   :  { %43654 = vmatpush3.bf16.msra.mxu1 %v48699_v42 }
0x17a4   :  { %43655 = vmatprep.subr.bf16.mxu1 %v50908_v25 }
0x17a6   :  { %39227 = vmatmul.mubr.f32.vlgmr.msra.gmra.mrb[102].mxu1 %v49777_v35 }
0x17a7   :  { %43657 = vmatpush3.bf16.msra.mxu1 %v50967_v28  ;;  %39245 = vmatprep.mubr.msk.f32.mxu1 %vm44875_vm2, %v50909_v39 }
0x17a8   :  { %43658 = vmatprep.subr.bf16.mxu1 %v50908_v25 }
0x17ab   :  { %43660 = vmatpush3.bf16.msra.mxu1 %v51001_v59 }
0x17ac   :  { %43661 = vmatprep.subr.bf16.mxu1 %v50908_v25 }
0x17af   :  { %43663 = vmatpush3.bf16.msra.mxu1 %v51002_v47 }
0x17b0   :  { %43664 = vmatprep.subr.bf16.mxu1 %v50908_v25 }
0x17b3   :  { %43666 = vmatpush3.bf16.msra.mxu1 %v51003_v53 }
0x17b4   :  { %43667 = vmatprep.subr.bf16.mxu1 %v50908_v25 }
0x17b6   :  { %39246 = vmatmul.mubr.f32.vlgmr.msra.gmra.mrb[102].mxu1 %v49780_v24 }
0x17b7   :  { %43669 = vmatpush3.bf16.msra.mxu1 %v48564_v11  ;;  %39264 = vmatprep.mubr.msk.f32.mxu1 %vm44875_vm2, %v50909_v39 }
0x17b8   :  { %43670 = vmatprep.subr.bf16.mxu1 %v50908_v25 }
0x17bb   :  { %43672 = vmatpush3.bf16.msra.mxu1 %v48591_v27 }
0x17bc   :  { %43673 = vmatprep.subr.bf16.mxu1 %v50908_v25 }
0x17bf   :  { %43675 = vmatpush3.bf16.msra.mxu1 %v48609_v16 }
0x17c0   :  { %43676 = vmatprep.subr.bf16.mxu1 %v50908_v25 }
0x17c3   :  { %43678 = vmatpush3.bf16.msra.mxu1 %v48622_v60 }
0x17c4   :  { %43679 = vmatprep.subr.bf16.mxu1 %v50908_v25 }
0x17c6   :  { %39265 = vmatmul.mubr.f32.vlgmr.msra.gmra.mrb[102].mxu1 %v49783_v63 }
0x17c7   :  { %43681 = vmatpush3.bf16.msra.mxu1 %v51004_v19  ;;  %39283 = vmatprep.mubr.msk.f32.mxu1 %vm44875_vm2, %v50909_v39 }
0x17c8   :  { %43682 = vmatprep.subr.bf16.mxu1 %v50908_v25 }
0x17cb   :  { %43684 = vmatpush3.bf16.msra.mxu1 %v51005_v57 }
0x17cc   :  { %43685 = vmatprep.subr.bf16.mxu1 %v50908_v25 }
0x17cf   :  { %43687 = vmatpush3.bf16.msra.mxu1 %v51006_v41 }
0x17d0   :  { %43688 = vmatprep.subr.bf16.mxu1 %v50908_v25 }
0x17d3   :  { %43690 = vmatpush3.bf16.msra.mxu1 %v51007_v38  ;;  %v26797_v38 = vrot.slane %v49773_v44, 6 }
0x17d4   :  { %43691 = vmatprep.subr.bf16.mxu1 %v50908_v25 }
0x17d6   :  { %39284 = vmatmul.mubr.f32.vlgmr.msra.gmra.mrb[102].mxu1 %v49777_v35 }
0x17d7   :  { %43693 = vmatpush3.bf16.msra.mxu1 %v48564_v11  ;;  %39302 = vmatprep.mubr.msk.f32.mxu1 %vm44875_vm2, %v50909_v39 }
0x17d8   :  { %43694 = vmatprep.subr.bf16.mxu1 %v50908_v25 }
0x17db   :  { %43696 = vmatpush3.bf16.msra.mxu1 %v48591_v27 }
0x17dc   :  { %43697 = vmatprep.subr.bf16.mxu1 %v50908_v25 }
0x17df   :  { %43699 = vmatpush3.bf16.msra.mxu1 %v48609_v16 }
0x17e0   :  { %43700 = vmatprep.subr.bf16.mxu1 %v50908_v25 }
0x17e3   :  { %43702 = vmatpush3.bf16.msra.mxu1 %v48622_v60 }
0x17e4   :  { %43775 = vmatprep.subr.bf16.mxu1 %v50908_v25 }
0x17e6   :  { %39303 = vmatmul.mubr.f32.vlgmr.msra.gmra.mrb[102].mxu1 %v49777_v35 }
0x17e7   :  { %43777 = vmatpush3.bf16.msra.mxu1 %v48452_v10  ;;  %39435 = vmatprep.mubr.msk.f32.mxu1 %vm44875_vm2, %v50909_v39 }
0x17e8   :  { %43778 = vmatprep.subr.bf16.mxu1 %v50908_v25 }
0x17eb   :  { %43780 = vmatpush3.bf16.msra.mxu1 %v48477_v20 }
0x17ec   :  { %43781 = vmatprep.subr.bf16.mxu1 %v50908_v25 }
0x17ef   :  { %43783 = vmatpush3.bf16.msra.mxu1 %v48493_v56 }
0x17f0   :  { %43784 = vmatprep.subr.bf16.mxu1 %v50908_v25 }
0x17f3   :  { %43786 = vmatpush3.bf16.msra.mxu1 %v48500_v51 }
0x17f4   :  { %43787 = vmatprep.subr.bf16.mxu1 %v50908_v25 }
0x1859   :  { %v25691_v8 = vpop.f32.mrb[100].mxu1  ;;  %v26228_v45 = vpop.f32.mrb[74].mxu0 }
0x185a   :  { %v26243_v33 = vrot.slane %v26228_v45, 6  ;;  %v39076_v2 = vpop.f32.mrb[101].mxu1  ;;  %v39190_v35 = vpop.f32.mrb[75].mxu0  ;;  %v26233_v19 = vrot.slane %v25691_v8, 6 }
0x185c   :  { %v26245_v24 = vadd.f32 %v50994_v37, %v26243_v33  ;;  %v26235_v53 = vadd.f32 %v50993_v9, %v26233_v19 }
0x185e   :  { %v30767_v63 = vmul.f32 -1.442695, %v26245_v24  ;;  %v30766_v47 = vmul.f32 -1.442695, %v26235_v53 }
0x1860   :  { %44840 = vpow2.f32 %v30767_v63 }
0x186a   :  { %v44841_v49 = vpop.eup %44840 }
0x186b   :  { %v26249_v58 = vadd.f32 1.0, %v44841_v49 }
0x186d   :  { %44842 = vrcp.f32 %v26249_v58 }
0x186e   :  { %44844 = vpow2.f32 %v30766_v47 }
0x1877   :  { %v44843_v41 = vpop.eup %44842 }
0x1878   :  { %v26799_v57 = vmul.f32 %v44843_v41, %v26797_v38  ;;  %v44845_v59 = vpop.eup %44844  ;;  %v26795_v44 = vsub.f32 1.0, %v44843_v41 }
0x1879   :  { %v26239_v45 = vadd.f32 1.0, %v44845_v59 }
0x187b   :  { %44846 = vrcp.f32 %v26239_v45 }
0x1885   :  { %v44847_v63 = vpop.eup %44846 }
0x18b9   :  { %v26785_v2 = vpop.f32.mrb[102].mxu1 }
0x18ba   :  { %v44236_v33 = vadd.f32 %v49547_v61, %v26785_v2  ;;  %v39304_v35 = vpop.f32.mrb[103].mxu1  ;;  %v51009_v2 = vld [vmem:[#allocation4_spill] sm:$0xff] }
0x18bb   :  { %v51011_v35 = vld [vmem:[#allocation11_spill] sm:$0xff] }
0x18bc   :  { %v26790_v24 = vrot.slane %v44236_v33, 6  ;;  %v51010_v33 = vld [vmem:[#allocation5_spill] sm:$0xff] }
0x18be   :  { %v26792_v49 = vmul.f32 %v44847_v63, %v26790_v24  ;;  %v51012_v24 = vld [vmem:[#allocation12_spill] sm:$0xff]  ;;  %v51013_v63 = vld [vmem:[#allocation13_spill] sm:$0xff] }
0x18c0   :  { %v26793_v58 = vadd.f32 %v50995_v30, %v26792_v49  ;;  %v51014_v49 = vld [vmem:[#allocation9_spill] sm:$0xff] }
0x18c2   :  { %44848 = vtanh.f32 %v26793_v58 }
0x18cc   :  { %v44849_v38 = vpop.eup %44848 }
0x18cd   :  { %v26796_v8 = vmul.f32 %v44849_v38, %v26795_v44 }
0x18cf   :  { %v49992_v37 = vadd.f32 %v26799_v57, %v26796_v8  ;;  %v51008_v57 = vld [vmem:[#allocation21_spill] sm:$0xff] }
0x18d1   :  { %v26802_v47 = vrot.slane %v49992_v37, 2 }
0x18d3   :  { %v26803_v59 = vsel %vm1563_vm3, %v26802_v47, 0 }
0x18d4   :  { %v49996_v53 = vand.u32 4294901760, %v26803_v59 }
0x18d6   :  { %v49999_v61 = vsub.f32 %v26803_v59, %v49996_v53  ;;  %v51015_v59 = vld [vmem:[#allocation8_spill] sm:$0xff] }
0x18d8   :  { %v50002_v19 = vand.u32 4294901760, %v49999_v61 }
0x18da   :  { %v26881_v45 = vsub.f32 %v49999_v61, %v50002_v19 }
0x18dc   :  { %v50006_v41 = vand.u32 4294901760, %v26881_v45 }
0x18de   :  { %39322 = vmatmul.mubr.f32.vlgmr.msra.gmra.mrb[76].mxu0 %v50006_v41  ;;  %39436 = vmatmul.mubr.f32.vlgmr.msra.gmra.mrb[104].mxu1 %v50006_v41 }
0x18df   :  { %43717 = vmatpush3.bf16.msra.mxu0 %v50997_v14  ;;  %43789 = vmatpush3.bf16.msra.mxu1 %v48519_v7 }
0x18e0   :  { %43718 = vmatprep.subr.bf16.mxu0 %v50908_v25  ;;  %43790 = vmatprep.subr.bf16.mxu1 %v50908_v25 }
0x18e1   :  { %39340 = vmatprep.mubr.msk.f32.mxu0 %vm44875_vm2, %v50909_v39  ;;  %39454 = vmatprep.mubr.msk.f32.mxu1 %vm44875_vm2, %v50909_v39 }
0x18e3   :  { %43720 = vmatpush3.bf16.msra.mxu0 %v50998_v29  ;;  %43792 = vmatpush3.bf16.msra.mxu1 %v48540_v13 }
0x18e4   :  { %43721 = vmatprep.subr.bf16.mxu0 %v50908_v25  ;;  %43793 = vmatprep.subr.bf16.mxu1 %v50908_v25 }
0x18e7   :  { %43723 = vmatpush3.bf16.msra.mxu0 %v50999_v43  ;;  %43795 = vmatpush3.bf16.msra.mxu1 %v48568_v62 }
0x18e8   :  { %43724 = vmatprep.subr.bf16.mxu0 %v50908_v25  ;;  %43796 = vmatprep.subr.bf16.mxu1 %v50908_v25 }
0x18eb   :  { %43726 = vmatpush3.bf16.msra.mxu0 %v51000_v0  ;;  %43798 = vmatpush3.bf16.msra.mxu1 %v48597_v4 }
0x18ec   :  { %43727 = vmatprep.subr.bf16.mxu0 %v50908_v25  ;;  %43799 = vmatprep.subr.bf16.mxu1 %v50908_v25 }
0x18ee   :  { %39341 = vmatmul.mubr.f32.vlgmr.msra.gmra.mrb[76].mxu0 %v49996_v53  ;;  %39455 = vmatmul.mubr.f32.vlgmr.msra.gmra.mrb[104].mxu1 %v49996_v53 }
0x18ef   :  { %43729 = vmatpush3.bf16.msra.mxu0 %v48302_v12  ;;  %43801 = vmatpush3.bf16.msra.mxu1 %v48619_v22 }
0x18f0   :  { %43730 = vmatprep.subr.bf16.mxu0 %v50908_v25  ;;  %43802 = vmatprep.subr.bf16.mxu1 %v50908_v25 }
0x18f1   :  { %39359 = vmatprep.mubr.msk.f32.mxu0 %vm44875_vm2, %v50909_v39  ;;  %39473 = vmatprep.mubr.msk.f32.mxu1 %vm44875_vm2, %v50909_v39 }
0x18f3   :  { %43732 = vmatpush3.bf16.msra.mxu0 %v48311_v50  ;;  %43804 = vmatpush3.bf16.msra.mxu1 %v48642_v48 }
0x18f4   :  { %43733 = vmatprep.subr.bf16.mxu0 %v50908_v25  ;;  %43805 = vmatprep.subr.bf16.mxu1 %v50908_v25 }
0x18f7   :  { %43735 = vmatpush3.bf16.msra.mxu0 %v48321_v21  ;;  %43807 = vmatpush3.bf16.msra.mxu1 %v48662_v46 }
0x18f8   :  { %43736 = vmatprep.subr.bf16.mxu0 %v50908_v25  ;;  %43808 = vmatprep.subr.bf16.mxu1 %v50908_v25 }
0x18fb   :  { %43738 = vmatpush3.bf16.msra.mxu0 %v48329_v40  ;;  %43810 = vmatpush3.bf16.msra.mxu1 %v48681_v17 }
0x18fc   :  { %43739 = vmatprep.subr.bf16.mxu0 %v50908_v25  ;;  %43811 = vmatprep.subr.bf16.mxu1 %v50908_v25 }
0x18fe   :  { %39360 = vmatmul.mubr.f32.vlgmr.msra.gmra.mrb[76].mxu0 %v49999_v61  ;;  %39474 = vmatmul.mubr.f32.vlgmr.msra.gmra.mrb[104].mxu1 %v49999_v61 }
0x18ff   :  { %43741 = vmatpush3.bf16.msra.mxu0 %v48185_v55  ;;  %43813 = vmatpush3.bf16.msra.mxu1 %v48452_v10 }
0x1900   :  { %43742 = vmatprep.subr.bf16.mxu0 %v50908_v25  ;;  %43814 = vmatprep.subr.bf16.mxu1 %v50908_v25 }
0x1901   :  { %39378 = vmatprep.mubr.msk.f32.mxu0 %vm44875_vm2, %v50909_v39  ;;  %39492 = vmatprep.mubr.msk.f32.mxu1 %vm44875_vm2, %v50909_v39 }
0x1903   :  { %43744 = vmatpush3.bf16.msra.mxu0 %v48204_v23  ;;  %43816 = vmatpush3.bf16.msra.mxu1 %v48477_v20 }
0x1904   :  { %43745 = vmatprep.subr.bf16.mxu0 %v50908_v25  ;;  %43817 = vmatprep.subr.bf16.mxu1 %v50908_v25 }
0x1907   :  { %43747 = vmatpush3.bf16.msra.mxu0 %v48211_v36  ;;  %43819 = vmatpush3.bf16.msra.mxu1 %v48493_v56 }
0x1908   :  { %43748 = vmatprep.subr.bf16.mxu0 %v50908_v25  ;;  %43820 = vmatprep.subr.bf16.mxu1 %v50908_v25 }
0x190b   :  { %43750 = vmatpush3.bf16.msra.mxu0 %v48229_v18  ;;  %43822 = vmatpush3.bf16.msra.mxu1 %v48500_v51 }
0x190c   :  { %43751 = vmatprep.subr.bf16.mxu0 %v50908_v25  ;;  %43823 = vmatprep.subr.bf16.mxu1 %v50908_v25 }
0x190e   :  { %39379 = vmatmul.mubr.f32.vlgmr.msra.gmra.mrb[76].mxu0 %v50002_v19  ;;  %39493 = vmatmul.mubr.f32.vlgmr.msra.gmra.mrb[104].mxu1 %v50002_v19 }
0x190f   :  { %43753 = vmatpush3.bf16.msra.mxu0 %v48367_v31  ;;  %43825 = vmatpush3.bf16.msra.mxu1 %v48736_v26 }
0x1910   :  { %43754 = vmatprep.subr.bf16.mxu0 %v50908_v25  ;;  %43826 = vmatprep.subr.bf16.mxu1 %v50908_v25 }
0x1911   :  { %39397 = vmatprep.mubr.msk.f32.mxu0 %vm44875_vm2, %v50909_v39  ;;  %39511 = vmatprep.mubr.msk.f32.mxu1 %vm44875_vm2, %v50909_v39 }
0x1913   :  { %43756 = vmatpush3.bf16.msra.mxu0 %v48380_v52  ;;  %43828 = vmatpush3.bf16.msra.mxu1 %v48751_v32 }
0x1914   :  { %43757 = vmatprep.subr.bf16.mxu0 %v50908_v25  ;;  %43829 = vmatprep.subr.bf16.mxu1 %v50908_v25 }
0x1917   :  { %43759 = vmatpush3.bf16.msra.mxu0 %v50964_v1  ;;  %43831 = vmatpush3.bf16.msra.mxu1 %v48763_v54 }
0x1918   :  { %43760 = vmatprep.subr.bf16.mxu0 %v50908_v25  ;;  %43832 = vmatprep.subr.bf16.mxu1 %v50908_v25 }
0x191b   :  { %43762 = vmatpush3.bf16.msra.mxu0 %v50965_v34  ;;  %43834 = vmatpush3.bf16.msra.mxu1 %v48776_v3 }
0x191c   :  { %43763 = vmatprep.subr.bf16.mxu0 %v50908_v25  ;;  %43835 = vmatprep.subr.bf16.mxu1 %v50908_v25 }
0x191e   :  { %39398 = vmatmul.mubr.f32.vlgmr.msra.gmra.mrb[76].mxu0 %v49996_v53  ;;  %39512 = vmatmul.mubr.f32.vlgmr.msra.gmra.mrb[104].mxu1 %v49996_v53 }
0x191f   :  { %43765 = vmatpush3.bf16.msra.mxu0 %v48185_v55  ;;  %43837 = vmatpush3.bf16.msra.mxu1 %v48452_v10 }
0x1920   :  { %43766 = vmatprep.subr.bf16.mxu0 %v50908_v25  ;;  %43838 = vmatprep.subr.bf16.mxu1 %v50908_v25 }
0x1921   :  { %39416 = vmatprep.mubr.msk.f32.mxu0 %vm44875_vm2, %v50909_v39  ;;  %39530 = vmatprep.mubr.msk.f32.mxu1 %vm44875_vm2, %v50909_v39 }
0x1923   :  { %43768 = vmatpush3.bf16.msra.mxu0 %v48204_v23  ;;  %43840 = vmatpush3.bf16.msra.mxu1 %v48477_v20 }
0x1924   :  { %43769 = vmatprep.subr.bf16.mxu0 %v50908_v25  ;;  %43841 = vmatprep.subr.bf16.mxu1 %v50908_v25 }
0x1927   :  { %43771 = vmatpush3.bf16.msra.mxu0 %v48211_v36  ;;  %43843 = vmatpush3.bf16.msra.mxu1 %v48493_v56 }
0x1928   :  { %43772 = vmatprep.subr.bf16.mxu0 %v50908_v25  ;;  %43844 = vmatprep.subr.bf16.mxu1 %v50908_v25 }
0x192b   :  { %43774 = vmatpush3.bf16.msra.mxu0 %v48229_v18  ;;  %43846 = vmatpush3.bf16.msra.mxu1 %v48500_v51 }
0x192c   :  { %43847 = vmatprep.subr.bf16.mxu0 %v50908_v25  ;;  %43919 = vmatprep.subr.bf16.mxu1 %v50908_v25 }
0x192e   :  { %39417 = vmatmul.mubr.f32.vlgmr.msra.gmra.mrb[76].mxu0 %v49996_v53  ;;  %39531 = vmatmul.mubr.f32.vlgmr.msra.gmra.mrb[104].mxu1 %v49996_v53 }
0x192f   :  { %43849 = vmatpush3.bf16.msra.mxu0 %v48564_v11  ;;  %39549 = vmatprep.mubr.msk.f32.mxu0 %vm44875_vm2, %v50909_v39 }
0x1930   :  { %43850 = vmatprep.subr.bf16.mxu0 %v50908_v25  ;;  %43921 = vmatpush3.bf16.msra.mxu1 %v48185_v55 }
0x1931   :  { %43922 = vmatprep.subr.bf16.mxu1 %v50908_v25  ;;  %39663 = vmatprep.mubr.msk.f32.mxu1 %vm44875_vm2, %v50909_v39 }
0x1933   :  { %43852 = vmatpush3.bf16.msra.mxu0 %v48591_v27 }
0x1934   :  { %43853 = vmatprep.subr.bf16.mxu0 %v50908_v25  ;;  %43924 = vmatpush3.bf16.msra.mxu1 %v48204_v23 }
0x1935   :  { %43925 = vmatprep.subr.bf16.mxu1 %v50908_v25 }
0x1937   :  { %43855 = vmatpush3.bf16.msra.mxu0 %v48609_v16 }
0x1938   :  { %43856 = vmatprep.subr.bf16.mxu0 %v50908_v25  ;;  %43927 = vmatpush3.bf16.msra.mxu1 %v48211_v36 }
0x1939   :  { %43928 = vmatprep.subr.bf16.mxu1 %v50908_v25 }
0x193b   :  { %43858 = vmatpush3.bf16.msra.mxu0 %v48622_v60 }
0x193c   :  { %43859 = vmatprep.subr.bf16.mxu0 %v50908_v25  ;;  %43930 = vmatpush3.bf16.msra.mxu1 %v48229_v18 }
0x193d   :  { %43931 = vmatprep.subr.bf16.mxu1 %v50908_v25 }
0x193e   :  { %39550 = vmatmul.mubr.f32.vlgmr.msra.gmra.mrb[78].mxu0 %v50006_v41  ;;  %v28444_v41 = vrot.slane %v49992_v37, 6 }
0x193f   :  { %43861 = vmatpush3.bf16.msra.mxu0 %v50966_v15  ;;  %39568 = vmatprep.mubr.msk.f32.mxu0 %vm44875_vm2, %v50909_v39 }
0x1940   :  { %43862 = vmatprep.subr.bf16.mxu0 %v50908_v25 }
0x1943   :  { %43864 = vmatpush3.bf16.msra.mxu0 %v48666_v6 }
0x1944   :  { %43865 = vmatprep.subr.bf16.mxu0 %v50908_v25 }
0x1947   :  { %43867 = vmatpush3.bf16.msra.mxu0 %v48692_v5 }
0x1948   :  { %43868 = vmatprep.subr.bf16.mxu0 %v50908_v25 }
0x194b   :  { %43870 = vmatpush3.bf16.msra.mxu0 %v48699_v42 }
0x194c   :  { %43871 = vmatprep.subr.bf16.mxu0 %v50908_v25 }
0x194e   :  { %39569 = vmatmul.mubr.f32.vlgmr.msra.gmra.mrb[78].mxu0 %v49996_v53 }
0x194f   :  { %43873 = vmatpush3.bf16.msra.mxu0 %v50967_v28  ;;  %39587 = vmatprep.mubr.msk.f32.mxu0 %vm44875_vm2, %v50909_v39 }
0x1950   :  { %43874 = vmatprep.subr.bf16.mxu0 %v50908_v25 }
0x1953   :  { %43876 = vmatpush3.bf16.msra.mxu0 %v51008_v57 }
0x1954   :  { %43877 = vmatprep.subr.bf16.mxu0 %v50908_v25 }
0x1957   :  { %43879 = vmatpush3.bf16.msra.mxu0 %v51009_v2 }
0x1958   :  { %43880 = vmatprep.subr.bf16.mxu0 %v50908_v25 }
0x195b   :  { %43882 = vmatpush3.bf16.msra.mxu0 %v51010_v33 }
0x195c   :  { %43883 = vmatprep.subr.bf16.mxu0 %v50908_v25 }
0x195e   :  { %39588 = vmatmul.mubr.f32.vlgmr.msra.gmra.mrb[78].mxu0 %v49999_v61 }
0x195f   :  { %43885 = vmatpush3.bf16.msra.mxu0 %v48564_v11  ;;  %39606 = vmatprep.mubr.msk.f32.mxu0 %vm44875_vm2, %v50909_v39 }
0x1960   :  { %43886 = vmatprep.subr.bf16.mxu0 %v50908_v25 }
0x1963   :  { %43888 = vmatpush3.bf16.msra.mxu0 %v48591_v27 }
0x1964   :  { %43889 = vmatprep.subr.bf16.mxu0 %v50908_v25 }
0x1967   :  { %43891 = vmatpush3.bf16.msra.mxu0 %v48609_v16 }
0x1968   :  { %43892 = vmatprep.subr.bf16.mxu0 %v50908_v25 }
0x196b   :  { %43894 = vmatpush3.bf16.msra.mxu0 %v48622_v60 }
0x196c   :  { %43895 = vmatprep.subr.bf16.mxu0 %v50908_v25 }
0x196e   :  { %39607 = vmatmul.mubr.f32.vlgmr.msra.gmra.mrb[78].mxu0 %v50002_v19 }
0x196f   :  { %43897 = vmatpush3.bf16.msra.mxu0 %v51011_v35  ;;  %39625 = vmatprep.mubr.msk.f32.mxu0 %vm44875_vm2, %v50909_v39 }
0x1970   :  { %43898 = vmatprep.subr.bf16.mxu0 %v50908_v25 }
0x1973   :  { %43900 = vmatpush3.bf16.msra.mxu0 %v51012_v24 }
0x1974   :  { %43901 = vmatprep.subr.bf16.mxu0 %v50908_v25 }
0x1977   :  { %43903 = vmatpush3.bf16.msra.mxu0 %v51013_v63 }
0x1978   :  { %43904 = vmatprep.subr.bf16.mxu0 %v50908_v25 }
0x197b   :  { %43906 = vmatpush3.bf16.msra.mxu0 %v51014_v49 }
0x197c   :  { %43907 = vmatprep.subr.bf16.mxu0 %v50908_v25 }
0x197e   :  { %39626 = vmatmul.mubr.f32.vlgmr.msra.gmra.mrb[78].mxu0 %v49996_v53 }
0x197f   :  { %43909 = vmatpush3.bf16.msra.mxu0 %v48564_v11  ;;  %39644 = vmatprep.mubr.msk.f32.mxu0 %vm44875_vm2, %v50909_v39 }
0x1980   :  { %43910 = vmatprep.subr.bf16.mxu0 %v50908_v25 }
0x1983   :  { %43912 = vmatpush3.bf16.msra.mxu0 %v48591_v27 }
0x1984   :  { %43913 = vmatprep.subr.bf16.mxu0 %v50908_v25 }
0x1987   :  { %43915 = vmatpush3.bf16.msra.mxu0 %v48609_v16 }
0x1988   :  { %43916 = vmatprep.subr.bf16.mxu0 %v50908_v25 }
0x198b   :  { %43918 = vmatpush3.bf16.msra.mxu0 %v48622_v60 }
0x198c   :  { %43991 = vmatprep.subr.bf16.mxu0 %v50908_v25 }
0x198e   :  { %39645 = vmatmul.mubr.f32.vlgmr.msra.gmra.mrb[78].mxu0 %v49996_v53 }
0x198f   :  { %43993 = vmatpush3.bf16.msra.mxu0 %v48452_v10  ;;  %39777 = vmatprep.mubr.msk.f32.mxu0 %vm44875_vm2, %v50909_v39 }
0x1990   :  { %43994 = vmatprep.subr.bf16.mxu0 %v50908_v25 }
0x1993   :  { %43996 = vmatpush3.bf16.msra.mxu0 %v48477_v20 }
0x1994   :  { %43997 = vmatprep.subr.bf16.mxu0 %v50908_v25 }
0x1997   :  { %43999 = vmatpush3.bf16.msra.mxu0 %v48493_v56 }
0x1998   :  { %44000 = vmatprep.subr.bf16.mxu0 %v50908_v25 }
0x199b   :  { %44002 = vmatpush3.bf16.msra.mxu0 %v48500_v51 }
0x199c   :  { %44003 = vmatprep.subr.bf16.mxu0 %v50908_v25 }
0x1a01   :  { %v27338_v58 = vpop.f32.mrb[76].mxu0  ;;  %v27875_v44 = vpop.f32.mrb[104].mxu1 }
0x1a02   :  { %v27890_v38 = vrot.slane %v27875_v44, 4  ;;  %v39418_v8 = vpop.f32.mrb[77].mxu0  ;;  %v39532_v47 = vpop.f32.mrb[105].mxu1  ;;  %v27880_v24 = vrot.slane %v27338_v58, 4 }
0x1a04   :  { %v27892_v53 = vadd.f32 %v51015_v59, %v27890_v38  ;;  %v27882_v35 = vadd.f32 %v50993_v9, %v27880_v24  ;;  %v50212_v38 = vld [vmem:[%s50564_s8] ss:$0 sm:$0xff] }
0x1a06   :  { %v30769_v61 = vmul.f32 -1.442695, %v27892_v53  ;;  %v30768_v33 = vmul.f32 -1.442695, %v27882_v35 }
0x1a08   :  { %44850 = vpow2.f32 %v30769_v61 }
0x1a12   :  { %v44851_v19 = vpop.eup %44850 }
0x1a13   :  { %v27896_v45 = vadd.f32 1.0, %v44851_v19 }
0x1a15   :  { %44852 = vrcp.f32 %v27896_v45 }
0x1a16   :  { %44854 = vpow2.f32 %v30768_v33 }
0x1a1f   :  { %v44853_v49 = vpop.eup %44852 }
0x1a20   :  { %v28446_v63 = vmul.f32 %v44853_v49, %v28444_v41  ;;  %v44855_v2 = vpop.eup %44854  ;;  %v28442_v35 = vsub.f32 1.0, %v44853_v49 }
0x1a21   :  { %v27886_v44 = vadd.f32 1.0, %v44855_v2 }
0x1a23   :  { %44856 = vrcp.f32 %v27886_v44 }
0x1a2d   :  { %v44857_v61 = vpop.eup %44856 }
0x1a61   :  { %v28432_v8 = vpop.f32.mrb[78].mxu0 }
0x1a62   :  { %v44237_v47 = vadd.f32 %v50212_v38, %v28432_v8  ;;  %v39646_v53 = vpop.f32.mrb[79].mxu0 }
0x1a64   :  { %v28437_v37 = vrot.slane %v44237_v47, 4 }
0x1a66   :  { %v28439_v19 = vmul.f32 %v44857_v61, %v28437_v37 }
0x1a68   :  { %v28440_v58 = vadd.f32 %v50995_v30, %v28439_v19 }
0x1a6a   :  { %44858 = vtanh.f32 %v28440_v58 }
0x1a74   :  { %v44859_v33 = vpop.eup %44858 }
0x1a75   :  { %v28443_v24 = vmul.f32 %v44859_v33, %v28442_v35 }
0x1a77   :  { %v50216_v2 = vadd.f32 %v28446_v63, %v28443_v24 }
0x1a79   :  { %v28449_v45 = vrot.slane %v50216_v2, 4 }
0x1a7b   :  { %v28450_v41 = vsel %vm1563_vm3, %v28449_v45, 0 }
0x1a7c   :  { %v50220_v44 = vand.u32 4294901760, %v28450_v41 }
0x1a7e   :  { %v50223_v8 = vsub.f32 %v28450_v41, %v50220_v44 }
0x1a80   :  { %v50226_v47 = vand.u32 4294901760, %v50223_v8 }
0x1a82   :  { %v28528_v53 = vsub.f32 %v50223_v8, %v50226_v47 }
0x1a84   :  { %v50230_v49 = vand.u32 4294901760, %v28528_v53 }
0x1a86   :  { %39664 = vmatmul.mubr.f32.vlgmr.msra.gmra.mrb[106].mxu1 %v50230_v49  ;;  %39778 = vmatmul.mubr.f32.vlgmr.msra.gmra.mrb[80].mxu0 %v50230_v49 }
0x1a87   :  { %43933 = vmatpush3.bf16.msra.mxu1 %v50997_v14  ;;  %44005 = vmatpush3.bf16.msra.mxu0 %v48519_v7  ;;  %v30099_v7 = vld [vmem:[%s50565_s9 + $0x20] sm:$0xff] }
0x1a88   :  { %43934 = vmatprep.subr.bf16.mxu1 %v50908_v25  ;;  %44006 = vmatprep.subr.bf16.mxu0 %v50908_v25 }
0x1a89   :  { %39682 = vmatprep.mubr.msk.f32.mxu1 %vm44875_vm2, %v50909_v39  ;;  %39796 = vmatprep.mubr.msk.f32.mxu0 %vm44875_vm2, %v50909_v39 }
0x1a8b   :  { %43936 = vmatpush3.bf16.msra.mxu1 %v50998_v29  ;;  %44008 = vmatpush3.bf16.msra.mxu0 %v48540_v13 }
0x1a8c   :  { %43937 = vmatprep.subr.bf16.mxu1 %v50908_v25  ;;  %44009 = vmatprep.subr.bf16.mxu0 %v50908_v25 }
0x1a8f   :  { %43939 = vmatpush3.bf16.msra.mxu1 %v50999_v43  ;;  %44011 = vmatpush3.bf16.msra.mxu0 %v48568_v62  ;;  %v30131_v62 = vand.u32 4294901760, %v30099_v7 }
0x1a90   :  { %43940 = vmatprep.subr.bf16.mxu1 %v50908_v25  ;;  %44012 = vmatprep.subr.bf16.mxu0 %v50908_v25 }
0x1a93   :  { %43942 = vmatpush3.bf16.msra.mxu1 %v51000_v0  ;;  %44014 = vmatpush3.bf16.msra.mxu0 %v48597_v4 }
0x1a94   :  { %43943 = vmatprep.subr.bf16.mxu1 %v50908_v25  ;;  %44015 = vmatprep.subr.bf16.mxu0 %v50908_v25 }
0x1a96   :  { %39683 = vmatmul.mubr.f32.vlgmr.msra.gmra.mrb[106].mxu1 %v50220_v44  ;;  %39797 = vmatmul.mubr.f32.vlgmr.msra.gmra.mrb[80].mxu0 %v50220_v44 }
0x1a97   :  { %43945 = vmatpush3.bf16.msra.mxu1 %v48302_v12  ;;  %44017 = vmatpush3.bf16.msra.mxu0 %v48619_v22  ;;  %v51020_v12 = vld [vmem:[#allocation13_spill] sm:$0xff]  ;;  %v30101_v22 = vld [vmem:[%s50565_s9 + $0x30] sm:$0xff] }
0x1a98   :  { %43946 = vmatprep.subr.bf16.mxu1 %v50908_v25  ;;  %44018 = vmatprep.subr.bf16.mxu0 %v50908_v25 }
0x1a99   :  { %39701 = vmatprep.mubr.msk.f32.mxu1 %vm44875_vm2, %v50909_v39  ;;  %39815 = vmatprep.mubr.msk.f32.mxu0 %vm44875_vm2, %v50909_v39 }
0x1a9b   :  { %43948 = vmatpush3.bf16.msra.mxu1 %v48311_v50  ;;  %44020 = vmatpush3.bf16.msra.mxu0 %v48642_v48  ;;  %v51021_v50 = vld [vmem:[#allocation9_spill] sm:$0xff] }
0x1a9c   :  { %43949 = vmatprep.subr.bf16.mxu1 %v50908_v25  ;;  %44021 = vmatprep.subr.bf16.mxu0 %v50908_v25 }
0x1a9f   :  { %43951 = vmatpush3.bf16.msra.mxu1 %v48321_v21  ;;  %44023 = vmatpush3.bf16.msra.mxu0 %v48662_v46  ;;  %v30095_v21 = vld [vmem:[%s50565_s9] sm:$0xff] }
0x1aa0   :  { %43952 = vmatprep.subr.bf16.mxu1 %v50908_v25  ;;  %44024 = vmatprep.subr.bf16.mxu0 %v50908_v25 }
0x1aa3   :  { %43954 = vmatpush3.bf16.msra.mxu1 %v48329_v40  ;;  %44026 = vmatpush3.bf16.msra.mxu0 %v48681_v17  ;;  %v30096_v40 = vld [vmem:[%s50565_s9 + $0x8] sm:$0xff] }
0x1aa4   :  { %43955 = vmatprep.subr.bf16.mxu1 %v50908_v25  ;;  %44027 = vmatprep.subr.bf16.mxu0 %v50908_v25 }
0x1aa6   :  { %39702 = vmatmul.mubr.f32.vlgmr.msra.gmra.mrb[106].mxu1 %v50223_v8  ;;  %39816 = vmatmul.mubr.f32.vlgmr.msra.gmra.mrb[80].mxu0 %v50223_v8 }
0x1aa7   :  { %43957 = vmatpush3.bf16.msra.mxu1 %v48185_v55  ;;  %44029 = vmatpush3.bf16.msra.mxu0 %v48452_v10 }
0x1aa8   :  { %43958 = vmatprep.subr.bf16.mxu1 %v50908_v25  ;;  %44030 = vmatprep.subr.bf16.mxu0 %v50908_v25 }
0x1aa9   :  { %39720 = vmatprep.mubr.msk.f32.mxu1 %vm44875_vm2, %v50909_v39  ;;  %39834 = vmatprep.mubr.msk.f32.mxu0 %vm44875_vm2, %v50909_v39 }
0x1aab   :  { %43960 = vmatpush3.bf16.msra.mxu1 %v48204_v23  ;;  %44032 = vmatpush3.bf16.msra.mxu0 %v48477_v20 }
0x1aac   :  { %43961 = vmatprep.subr.bf16.mxu1 %v50908_v25  ;;  %44033 = vmatprep.subr.bf16.mxu0 %v50908_v25 }
0x1aaf   :  { %43963 = vmatpush3.bf16.msra.mxu1 %v48211_v36  ;;  %44035 = vmatpush3.bf16.msra.mxu0 %v48493_v56 }
0x1ab0   :  { %43964 = vmatprep.subr.bf16.mxu1 %v50908_v25  ;;  %44036 = vmatprep.subr.bf16.mxu0 %v50908_v25 }
0x1ab3   :  { %43966 = vmatpush3.bf16.msra.mxu1 %v48229_v18  ;;  %44038 = vmatpush3.bf16.msra.mxu0 %v48500_v51 }
0x1ab4   :  { %43967 = vmatprep.subr.bf16.mxu1 %v50908_v25  ;;  %44039 = vmatprep.subr.bf16.mxu0 %v50908_v25 }
0x1ab6   :  { %39721 = vmatmul.mubr.f32.vlgmr.msra.gmra.mrb[106].mxu1 %v50226_v47  ;;  %39835 = vmatmul.mubr.f32.vlgmr.msra.gmra.mrb[80].mxu0 %v50226_v47 }
0x1ab7   :  { %43969 = vmatpush3.bf16.msra.mxu1 %v48367_v31  ;;  %44041 = vmatpush3.bf16.msra.mxu0 %v48736_v26  ;;  %v30119_v31 = vand.u32 4294901760, %v30095_v21 }
0x1ab8   :  { %43970 = vmatprep.subr.bf16.mxu1 %v50908_v25  ;;  %44042 = vmatprep.subr.bf16.mxu0 %v50908_v25 }
0x1ab9   :  { %39739 = vmatprep.mubr.msk.f32.mxu1 %vm44875_vm2, %v50909_v39  ;;  %39853 = vmatprep.mubr.msk.f32.mxu0 %vm44875_vm2, %v50909_v39 }
0x1abb   :  { %43972 = vmatpush3.bf16.msra.mxu1 %v48380_v52  ;;  %44044 = vmatpush3.bf16.msra.mxu0 %v48751_v32  ;;  %v30122_v52 = vand.u32 4294901760, %v30096_v40 }
0x1abc   :  { %43973 = vmatprep.subr.bf16.mxu1 %v50908_v25  ;;  %44045 = vmatprep.subr.bf16.mxu0 %v50908_v25 }
0x1abf   :  { %43975 = vmatpush3.bf16.msra.mxu1 %v50964_v1  ;;  %44047 = vmatpush3.bf16.msra.mxu0 %v48763_v54 }
0x1ac0   :  { %43976 = vmatprep.subr.bf16.mxu1 %v50908_v25  ;;  %44048 = vmatprep.subr.bf16.mxu0 %v50908_v25 }
0x1ac3   :  { %43978 = vmatpush3.bf16.msra.mxu1 %v50965_v34  ;;  %44050 = vmatpush3.bf16.msra.mxu0 %v48776_v3 }
0x1ac4   :  { %43979 = vmatprep.subr.bf16.mxu1 %v50908_v25  ;;  %44051 = vmatprep.subr.bf16.mxu0 %v50908_v25 }
0x1ac6   :  { %39740 = vmatmul.mubr.f32.vlgmr.msra.gmra.mrb[106].mxu1 %v50220_v44  ;;  %39854 = vmatmul.mubr.f32.vlgmr.msra.gmra.mrb[80].mxu0 %v50220_v44 }
0x1ac7   :  { %43981 = vmatpush3.bf16.msra.mxu1 %v48185_v55  ;;  %44053 = vmatpush3.bf16.msra.mxu0 %v48452_v10  ;;  %v51017_v55 = vld [vmem:[#allocation5_spill] sm:$0xff]  ;;  %v50417_v10 = vpack.c.bf16 %v30122_v52, %v30119_v31 }
0x1ac8   :  { %43982 = vmatprep.subr.bf16.mxu1 %v50908_v25  ;;  %44054 = vmatprep.subr.bf16.mxu0 %v50908_v25 }
0x1ac9   :  { %39758 = vmatprep.mubr.msk.f32.mxu1 %vm44875_vm2, %v50909_v39  ;;  %39872 = vmatprep.mubr.msk.f32.mxu0 %vm44875_vm2, %v50909_v39 }
0x1acb   :  { %43984 = vmatpush3.bf16.msra.mxu1 %v48204_v23  ;;  %44056 = vmatpush3.bf16.msra.mxu0 %v48477_v20  ;;  %v51018_v23 = vld [vmem:[#allocation11_spill] sm:$0xff]  ;;  %v50419_v20 = vsub.f32 %v30095_v21, %v30119_v31 }
0x1acc   :  { %43985 = vmatprep.subr.bf16.mxu1 %v50908_v25  ;;  %44057 = vmatprep.subr.bf16.mxu0 %v50908_v25 }
0x1acd   :  { %v30204_v34 = vand.u32 4294901760, %v50419_v20 }
0x1acf   :  { %43987 = vmatpush3.bf16.msra.mxu1 %v48211_v36  ;;  %44059 = vmatpush3.bf16.msra.mxu0 %v48493_v56  ;;  %v51019_v36 = vld [vmem:[#allocation12_spill] sm:$0xff]  ;;  %v50421_v56 = vsub.f32 %v30096_v40, %v30122_v52 }
0x1ad0   :  { %43988 = vmatprep.subr.bf16.mxu1 %v50908_v25  ;;  %44060 = vmatprep.subr.bf16.mxu0 %v50908_v25 }
0x1ad3   :  { %43990 = vmatpush3.bf16.msra.mxu1 %v48229_v18  ;;  %44062 = vmatpush3.bf16.msra.mxu0 %v48500_v51  ;;  %v51016_v18 = vld [vmem:[#allocation4_spill] sm:$0xff] }
0x1ad4   :  { %44063 = vmatprep.subr.bf16.mxu1 %v50908_v25  ;;  %44135 = vmatprep.subr.bf16.mxu0 %v50908_v25  ;;  %v30097_v51 = vld [vmem:[%s50565_s9 + $0x10] sm:$0xff] }
0x1ad5   :  { %v30125_v4 = vand.u32 4294901760, %v30097_v51 }
0x1ad6   :  { %39759 = vmatmul.mubr.f32.vlgmr.msra.gmra.mrb[106].mxu1 %v50220_v44  ;;  %39873 = vmatmul.mubr.f32.vlgmr.msra.gmra.mrb[80].mxu0 %v50220_v44 }
0x1ad7   :  { %44065 = vmatpush3.bf16.msra.mxu1 %v48564_v11  ;;  %39891 = vmatprep.mubr.msk.f32.mxu1 %vm44875_vm2, %v50909_v39 }
0x1ad8   :  { %44066 = vmatprep.subr.bf16.mxu1 %v50908_v25  ;;  %40005 = vmatprep.mubr.msk.f32.mxu0 %vm44875_vm2, %v50909_v39 }
0x1ad9   :  { %44137 = vmatpush3.bf16.msra.mxu0 %v50417_v10 }
0x1ada   :  { %44138 = vmatprep.subr.bf16.mxu0 %v50908_v25 }
0x1adb   :  { %44068 = vmatpush3.bf16.msra.mxu1 %v48591_v27 }
0x1adc   :  { %44069 = vmatprep.subr.bf16.mxu1 %v50908_v25 }
0x1adf   :  { %44071 = vmatpush3.bf16.msra.mxu1 %v48609_v16 }
0x1ae0   :  { %44072 = vmatprep.subr.bf16.mxu1 %v50908_v25 }
0x1ae3   :  { %44074 = vmatpush3.bf16.msra.mxu1 %v48622_v60 }
0x1ae4   :  { %44075 = vmatprep.subr.bf16.mxu1 %v50908_v25 }
0x1ae6   :  { %39892 = vmatmul.mubr.f32.vlgmr.msra.gmra.mrb[108].mxu1 %v50230_v49 }
0x1ae7   :  { %44077 = vmatpush3.bf16.msra.mxu1 %v50966_v15  ;;  %39910 = vmatprep.mubr.msk.f32.mxu1 %vm44875_vm2, %v50909_v39  ;;  %v30211_v15 = vand.u32 4294901760, %v50421_v56 }
0x1ae8   :  { %44078 = vmatprep.subr.bf16.mxu1 %v50908_v25 }
0x1ae9   :  { %v30212_v63 = vsub.f32 %v50421_v56, %v30211_v15 }
0x1aeb   :  { %44080 = vmatpush3.bf16.msra.mxu1 %v48666_v6  ;;  %v50445_v6 = vsub.f32 %v30097_v51, %v30125_v4  ;;  %v30213_v19 = vand.u32 4294901760, %v30212_v63 }
0x1aec   :  { %44081 = vmatprep.subr.bf16.mxu1 %v50908_v25 }
0x1aed   :  { %v30218_v58 = vand.u32 4294901760, %v50445_v6 }
0x1aef   :  { %44083 = vmatpush3.bf16.msra.mxu1 %v48692_v5  ;;  %v30098_v5 = vld [vmem:[%s50565_s9 + $0x18] sm:$0xff]  ;;  %v30219_v45 = vsub.f32 %v50445_v6, %v30218_v58 }
0x1af0   :  { %44084 = vmatprep.subr.bf16.mxu1 %v50908_v25  ;;  %v30128_v13 = vand.u32 4294901760, %v30098_v5 }
0x1af2   :  { %v50443_v46 = vpack.c.bf16 %v30128_v13, %v30125_v4  ;;  %v50447_v17 = vsub.f32 %v30098_v5, %v30128_v13  ;;  %v44160_v4 = vpack.c.bf16 %v50421_v56, %v50419_v20 }
0x1af3   :  { %44086 = vmatpush3.bf16.msra.mxu1 %v48699_v42  ;;  %v50449_v42 = vsub.f32 %v30099_v7, %v30131_v62 }
0x1af4   :  { %44087 = vmatprep.subr.bf16.mxu1 %v50908_v25  ;;  %44140 = vmatpush3.bf16.msra.mxu0 %v50443_v46  ;;  %v30225_v35 = vand.u32 4294901760, %v50447_v17  ;;  %v44163_v13 = vpack.c.bf16 %v50447_v17, %v50445_v6 }
0x1af5   :  { %44141 = vmatprep.subr.bf16.mxu0 %v50908_v25 }
0x1af6   :  { %39911 = vmatmul.mubr.f32.vlgmr.msra.gmra.mrb[108].mxu1 %v50220_v44  ;;  %v30226_v41 = vsub.f32 %v50447_v17, %v30225_v35 }
0x1af7   :  { %44089 = vmatpush3.bf16.msra.mxu1 %v50967_v28  ;;  %39929 = vmatprep.mubr.msk.f32.mxu1 %vm44875_vm2, %v50909_v39 }
0x1af8   :  { %44090 = vmatprep.subr.bf16.mxu1 %v50908_v25 }
0x1afb   :  { %44092 = vmatpush3.bf16.msra.mxu1 %v51008_v57  ;;  %v30205_v57 = vsub.f32 %v50419_v20, %v30204_v34 }
0x1afc   :  { %44093 = vmatprep.subr.bf16.mxu1 %v50908_v25 }
0x1afd   :  { %v30206_v61 = vand.u32 4294901760, %v30205_v57 }
0x1aff   :  { %44095 = vmatpush3.bf16.msra.mxu1 %v51016_v18  ;;  %v50474_v24 = vpack.c.bf16 %v30213_v19, %v30206_v61 }
0x1b00   :  { %44096 = vmatprep.subr.bf16.mxu1 %v50908_v25 }
0x1b03   :  { %44098 = vmatpush3.bf16.msra.mxu1 %v51017_v55 }
0x1b04   :  { %44099 = vmatprep.subr.bf16.mxu1 %v50908_v25 }
0x1b06   :  { %39930 = vmatmul.mubr.f32.vlgmr.msra.gmra.mrb[108].mxu1 %v50223_v8  ;;  %v30220_v8 = vand.u32 4294901760, %v30219_v45 }
0x1b07   :  { %44101 = vmatpush3.bf16.msra.mxu1 %v48564_v11  ;;  %39948 = vmatprep.mubr.msk.f32.mxu1 %vm44875_vm2, %v50909_v39 }
0x1b08   :  { %44102 = vmatprep.subr.bf16.mxu1 %v50908_v25 }
0x1b0b   :  { %44104 = vmatpush3.bf16.msra.mxu1 %v48591_v27 }
0x1b0c   :  { %44105 = vmatprep.subr.bf16.mxu1 %v50908_v25 }
0x1b0f   :  { %44107 = vmatpush3.bf16.msra.mxu1 %v48609_v16 }
0x1b10   :  { %44108 = vmatprep.subr.bf16.mxu1 %v50908_v25 }
0x1b13   :  { %44110 = vmatpush3.bf16.msra.mxu1 %v48622_v60 }
0x1b14   :  { %44111 = vmatprep.subr.bf16.mxu1 %v50908_v25 }
0x1b16   :  { %39949 = vmatmul.mubr.f32.vlgmr.msra.gmra.mrb[108].mxu1 %v50226_v47  ;;  %v30227_v47 = vand.u32 4294901760, %v30226_v41 }
0x1b17   :  { %44113 = vmatpush3.bf16.msra.mxu1 %v51018_v23  ;;  %39967 = vmatprep.mubr.msk.f32.mxu1 %vm44875_vm2, %v50909_v39 }
0x1b18   :  { %44114 = vmatprep.subr.bf16.mxu1 %v50908_v25  ;;  %v44151_v18 = vpack.c.bf16 %v30227_v47, %v30220_v8 }
0x1b1b   :  { %44116 = vmatpush3.bf16.msra.mxu1 %v51019_v36 }
0x1b1c   :  { %44117 = vmatprep.subr.bf16.mxu1 %v50908_v25 }
0x1b1f   :  { %44119 = vmatpush3.bf16.msra.mxu1 %v51020_v12 }
0x1b20   :  { %44120 = vmatprep.subr.bf16.mxu1 %v50908_v25 }
0x1b23   :  { %44122 = vmatpush3.bf16.msra.mxu1 %v51021_v50 }
0x1b24   :  { %44123 = vmatprep.subr.bf16.mxu1 %v50908_v25 }
0x1b26   :  { %39968 = vmatmul.mubr.f32.vlgmr.msra.gmra.mrb[108].mxu1 %v50220_v44 }
0x1b27   :  { %44125 = vmatpush3.bf16.msra.mxu1 %v48564_v11  ;;  %39986 = vmatprep.mubr.msk.f32.mxu1 %vm44875_vm2, %v50909_v39  ;;  %v30100_v11 = vld [vmem:[%s50565_s9 + $0x28] sm:$0xff] }
0x1b28   :  { %44126 = vmatprep.subr.bf16.mxu1 %v50908_v25 }
0x1b2b   :  { %44128 = vmatpush3.bf16.msra.mxu1 %v48591_v27  ;;  %v30134_v27 = vand.u32 4294901760, %v30100_v11 }
0x1b2c   :  { %44129 = vmatprep.subr.bf16.mxu1 %v50908_v25 }
0x1b2d   :  { %v50451_v26 = vsub.f32 %v30100_v11, %v30134_v27  ;;  %v50456_v54 = vpack.c.bf16 %v30134_v27, %v30131_v62  ;;  %v30091_v62 = vrot.slane %v50216_v2, 6 }
0x1b2f   :  { %44131 = vmatpush3.bf16.msra.mxu1 %v48609_v16  ;;  %v30137_v16 = vand.u32 4294901760, %v30101_v22  ;;  %44143 = vmatpush3.bf16.msra.mxu0 %v50456_v54  ;;  %v44166_v11 = vpack.c.bf16 %v50451_v26, %v50449_v42 }
0x1b30   :  { %44132 = vmatprep.subr.bf16.mxu1 %v50908_v25  ;;  %44144 = vmatprep.subr.bf16.mxu0 %v50908_v25 }
0x1b31   :  { %v50453_v32 = vsub.f32 %v30101_v22, %v30137_v16 }
0x1b33   :  { %44134 = vmatpush3.bf16.msra.mxu1 %v48622_v60  ;;  %v30102_v60 = vld [vmem:[%s50565_s9 + $0x38] sm:$0xff]  ;;  %v30246_v36 = vand.u32 4294901760, %v50453_v32 }
0x1b34   :  { %v30140_v48 = vand.u32 4294901760, %v30102_v60 }
0x1b35   :  { %v30247_v21 = vsub.f32 %v50453_v32, %v30246_v36 }
0x1b36   :  { %39987 = vmatmul.mubr.f32.vlgmr.msra.gmra.mrb[108].mxu1 %v50220_v44  ;;  %v50458_v3 = vsub.f32 %v30102_v60, %v30140_v48  ;;  %v50462_v1 = vpack.c.bf16 %v30140_v48, %v30137_v16  ;;  %v30232_v44 = vand.u32 4294901760, %v50449_v42  ;;  %v50495_v16 = vpack.c.bf16 %v30211_v15, %v30204_v34 }
0x1b37   :  { %v30248_v31 = vand.u32 4294901760, %v30247_v21  ;;  %v50497_v48 = vpack.c.bf16 %v30225_v35, %v30218_v58 }
0x1b38   :  { %44146 = vmatpush3.bf16.msra.mxu0 %v50462_v1  ;;  %v30233_v53 = vsub.f32 %v50449_v42, %v30232_v44  ;;  %v30253_v12 = vand.u32 4294901760, %v50458_v3  ;;  %v44169_v27 = vpack.c.bf16 %v50458_v3, %v50453_v32 }
0x1b39   :  { %44147 = vmatprep.subr.bf16.mxu0 %v50908_v25 }
0x1b3a   :  { %v30234_v55 = vand.u32 4294901760, %v30233_v53  ;;  %v30254_v40 = vsub.f32 %v50458_v3, %v30253_v12  ;;  %v50501_v56 = vpack.c.bf16 %v30253_v12, %v30246_v36 }
0x1b3c   :  { %v30255_v52 = vand.u32 4294901760, %v30254_v40 }
0x1b3e   :  { %v44157_v51 = vpack.c.bf16 %v30255_v52, %v30248_v31 }
0x1ba9   :  { %v28985_v28 = vpop.f32.mrb[106].mxu1  ;;  %v29522_v14 = vpop.f32.mrb[80].mxu0 }
0x1baa   :  { %v29537_v29 = vrot.slane %v29522_v14, 2  ;;  %v39760_v43 = vpop.f32.mrb[107].mxu1  ;;  %v39874_v0 = vpop.f32.mrb[81].mxu0  ;;  %v29527_v20 = vrot.slane %v28985_v28, 2 }
0x1bac   :  { %v29539_v37 = vadd.f32 %v51015_v59, %v29537_v29  ;;  %v30239_v59 = vand.u32 4294901760, %v50451_v26  ;;  %v29529_v6 = vadd.f32 %v50993_v9, %v29527_v20 }
0x1bae   :  { %v30771_v33 = vmul.f32 -1.442695, %v29539_v37  ;;  %v30240_v49 = vsub.f32 %v50451_v26, %v30239_v59  ;;  %v50499_v14 = vpack.c.bf16 %v30239_v59, %v30232_v44  ;;  %v30770_v17 = vmul.f32 -1.442695, %v29529_v6  ;;  %v51022_v37 = vld [vmem:[#allocation23_spill] sm:$0xff] }
0x1baf   :  { %v16_v26 = vstv %s50566_s10  ;;  %v30104_v61 = vrot.slane %v51022_v37, 2 }
0x1bb0   :  { %44860 = vpow2.f32 %v30771_v33  ;;  %v30241_v23 = vand.u32 4294901760, %v30240_v49  ;;  %17 = vst [vmem:[#allocation3] sm:$0x1] %v16_v26 }
0x1bb2   :  { %v44154_v50 = vpack.c.bf16 %v30241_v23, %v30234_v55 }
0x1bba   :  { %v44861_v5 = vpop.eup %44860 }
0x1bbb   :  { %v29543_v7 = vadd.f32 1.0, %v44861_v5 }
0x1bbd   :  { %44862 = vrcp.f32 %v29543_v7 }
0x1bbe   :  { %44864 = vpow2.f32 %v30770_v17 }
0x1bc7   :  { %v44863_v22 = vpop.eup %44862 }
0x1bc8   :  { %v30093_v60 = vmul.f32 %v44863_v22, %v30091_v62  ;;  %v44865_v42 = vpop.eup %44864  ;;  %v30089_v9 = vsub.f32 1.0, %v44863_v22 }
0x1bc9   :  { %v29533_v2 = vadd.f32 1.0, %v44865_v42 }
0x1bcb   :  { %44866 = vrcp.f32 %v29533_v2 }
0x1bd5   :  { %v44867_v28 = vpop.eup %44866 }
0x1c09   :  { %v30079_v32 = vpop.f32.mrb[108].mxu1 }
0x1c0a   :  { %v44238_v3 = vadd.f32 %v50212_v38, %v30079_v32  ;;  %v39988_v34 = vpop.f32.mrb[109].mxu1 }
0x1c0c   :  { %v30084_v15 = vrot.slane %v44238_v3, 2 }
0x1c0e   :  { %v30086_v29 = vmul.f32 %v44867_v28, %v30084_v15 }
0x1c10   :  { %v30087_v43 = vadd.f32 %v50995_v30, %v30086_v29  ;;  %v30772_v30 = vld [vmem:[#allocation3] ss:$0 sm:$0xff] }
0x1c12   :  { %44868 = vtanh.f32 %v30087_v43 }
0x1c1c   :  { %v44869_v0 = vpop.eup %44868 }
0x1c1d   :  { %v30090_v57 = vmul.f32 %v44869_v0, %v30089_v9 }
0x1c1f   :  { %v30094_v63 = vadd.f32 %v30093_v60, %v30090_v57 }
0x1c21   :  { %v30107_v19 = vsel %vm30106_vm4, %v30094_v63, %v30104_v61 }
0x1c22   :  { %v30115_v58 = vrot.slane %v30107_v19, 6 }
0x1c24   :  { %v30116_v35 = vsel %vm1563_vm3, %v30115_v58, 0 }
0x1c25   :  { %v30191_v33 = vand.u32 4294901760, %v30116_v35 }
0x1c27   :  { %v30192_v38 = vsub.f32 %v30116_v35, %v30191_v33 }
0x1c29   :  { %v30193_v45 = vand.u32 4294901760, %v30192_v38 }
0x1c2b   :  { %v30194_v41 = vsub.f32 %v30192_v38, %v30193_v45 }
0x1c2d   :  { %v30195_v44 = vand.u32 4294901760, %v30194_v41 }
0x1c2f   :  { %40006 = vmatmul.mubr.f32.vlgmr.msra.gmra.mrb[82].mxu0 %v30195_v44 }
0x1c30   :  { %44149 = vmatpush3.bf16.msra.mxu0 %v50474_v24  ;;  %40024 = vmatprep.mubr.msk.f32.mxu0 %vm44875_vm2, %v50909_v39 }
0x1c31   :  { %44150 = vmatprep.subr.bf16.mxu0 %v50908_v25 }
0x1c34   :  { %44152 = vmatpush3.bf16.msra.mxu0 %v44151_v18 }
0x1c35   :  { %44153 = vmatprep.subr.bf16.mxu0 %v50908_v25 }
0x1c38   :  { %44155 = vmatpush3.bf16.msra.mxu0 %v44154_v50 }
0x1c39   :  { %44156 = vmatprep.subr.bf16.mxu0 %v50908_v25 }
0x1c3c   :  { %44158 = vmatpush3.bf16.msra.mxu0 %v44157_v51 }
0x1c3d   :  { %44159 = vmatprep.subr.bf16.mxu0 %v50908_v25 }
0x1c3f   :  { %40025 = vmatmul.mubr.f32.vlgmr.msra.gmra.mrb[82].mxu0 %v30191_v33 }
0x1c40   :  { %44161 = vmatpush3.bf16.msra.mxu0 %v44160_v4  ;;  %40043 = vmatprep.mubr.msk.f32.mxu0 %vm44875_vm2, %v50909_v39 }
0x1c41   :  { %44162 = vmatprep.subr.bf16.mxu0 %v50908_v25 }
0x1c44   :  { %44164 = vmatpush3.bf16.msra.mxu0 %v44163_v13 }
0x1c45   :  { %44165 = vmatprep.subr.bf16.mxu0 %v50908_v25 }
0x1c48   :  { %44167 = vmatpush3.bf16.msra.mxu0 %v44166_v11 }
0x1c49   :  { %44168 = vmatprep.subr.bf16.mxu0 %v50908_v25 }
0x1c4c   :  { %44170 = vmatpush3.bf16.msra.mxu0 %v44169_v27 }
0x1c4d   :  { %44171 = vmatprep.subr.bf16.mxu0 %v50908_v25 }
0x1c4f   :  { %40044 = vmatmul.mubr.f32.vlgmr.msra.gmra.mrb[82].mxu0 %v30192_v38 }
0x1c50   :  { %44173 = vmatpush3.bf16.msra.mxu0 %v50417_v10  ;;  %40062 = vmatprep.mubr.msk.f32.mxu0 %vm44875_vm2, %v50909_v39 }
0x1c51   :  { %44174 = vmatprep.subr.bf16.mxu0 %v50908_v25 }
0x1c54   :  { %44176 = vmatpush3.bf16.msra.mxu0 %v50443_v46 }
0x1c55   :  { %44177 = vmatprep.subr.bf16.mxu0 %v50908_v25 }
0x1c58   :  { %44179 = vmatpush3.bf16.msra.mxu0 %v50456_v54 }
0x1c59   :  { %44180 = vmatprep.subr.bf16.mxu0 %v50908_v25 }
0x1c5c   :  { %44182 = vmatpush3.bf16.msra.mxu0 %v50462_v1 }
0x1c5d   :  { %44183 = vmatprep.subr.bf16.mxu0 %v50908_v25 }
0x1c5f   :  { %40063 = vmatmul.mubr.f32.vlgmr.msra.gmra.mrb[82].mxu0 %v30193_v45 }
0x1c60   :  { %44185 = vmatpush3.bf16.msra.mxu0 %v50495_v16  ;;  %40081 = vmatprep.mubr.msk.f32.mxu0 %vm44875_vm2, %v50909_v39 }
0x1c61   :  { %44186 = vmatprep.subr.bf16.mxu0 %v50908_v25 }
0x1c64   :  { %44188 = vmatpush3.bf16.msra.mxu0 %v50497_v48 }
0x1c65   :  { %44189 = vmatprep.subr.bf16.mxu0 %v50908_v25 }
0x1c68   :  { %44191 = vmatpush3.bf16.msra.mxu0 %v50499_v14 }
0x1c69   :  { %44192 = vmatprep.subr.bf16.mxu0 %v50908_v25 }
0x1c6c   :  { %44194 = vmatpush3.bf16.msra.mxu0 %v50501_v56 }
0x1c6d   :  { %44195 = vmatprep.subr.bf16.mxu0 %v50908_v25 }
0x1c6f   :  { %40082 = vmatmul.mubr.f32.vlgmr.msra.gmra.mrb[82].mxu0 %v30191_v33 }
0x1c70   :  { %44197 = vmatpush3.bf16.msra.mxu0 %v50417_v10  ;;  %40100 = vmatprep.mubr.msk.f32.mxu0 %vm44875_vm2, %v50909_v39 }
0x1c71   :  { %44198 = vmatprep.subr.bf16.mxu0 %v50908_v25 }
0x1c74   :  { %44200 = vmatpush3.bf16.msra.mxu0 %v50443_v46 }
0x1c75   :  { %44201 = vmatprep.subr.bf16.mxu0 %v50908_v25 }
0x1c78   :  { %44203 = vmatpush3.bf16.msra.mxu0 %v50456_v54 }
0x1c79   :  { %44204 = vmatprep.subr.bf16.mxu0 %v50908_v25 }
0x1c7c   :  { %44206 = vmatpush3.bf16.msra.mxu0 %v50462_v1 }
0x1c7f   :  { %40101 = vmatmul.mubr.f32.vlgmr.msra.gmra.mrb[82].mxu0 %v30191_v33 }
0x1d52   :  { %v30651_v24 = vpop.f32.mrb[82].mxu0 }
0x1d53   :  { %v44239_v59 = vadd.f32 %v30772_v30, %v30651_v24  ;;  %v40102_v10 = vpop.f32.mrb[83].mxu0 }
0x1d55   :  { %v30655_v8 = vmax.f32 %v44239_v59, 0.0 }
0x1d57   :  { %30657 = vst.msk [vmem:[%s50567_s11] sm:$0x3] %vm30656_vm5, %v30655_v8 }

</bundles_post_ra>
